<compile_context>
chip_gen: v7x
topology: tpu7x:2x2x1
jax: 0.10.0
libtpu: 0.0.40
codegen_flags: <defaults>
</compile_context>

<pallas_src>
import functools

import jax
import jax.numpy as jnp
from jax.experimental import pallas as pl
from jax.experimental.pallas import tpu as pltpu

BN_EPS = 1e-5
PAD_D = 8      # pad point dim 3 -> 8
C_HID = 128    # layer-1 output channels padded 64 -> 128 (lane-dense)
C_CHUNK = 256  # layer-3 output-channel chunk size inside the kernel


# ---------------------------------------------------------------------------
# Pallas kernel: per-point MLP trunk + max over points
# grid = (split, B, n_tiles); the n axis accumulates a running channel-max.
# ---------------------------------------------------------------------------
def _trunk_kernel(pts_ref, w1_ref, b1_ref, w2_ref, b2_ref, w3_ref, b3_ref,
                  out_ref, acc_ref, *, relu_last, c_chunk):
    n = pl.program_id(2)

    @pl.when(n == 0)
    def _init():
        acc_ref[...] = jnp.full(acc_ref.shape, -jnp.inf, dtype=acc_ref.dtype)

    # Layer 1: f32 LHS (K=8 is tiny), lane-dense 128-wide (zero-padded) output.
    h = jnp.dot(pts_ref[0], w1_ref[0], preferred_element_type=jnp.float32)
    h = jnp.maximum(h + b1_ref[...], 0.0).astype(jnp.bfloat16)          # (TN, 128)
    # Layer 2 (padded rows of w2 are zero, so padded channels contribute 0).
    h = jnp.dot(h, w2_ref[...], preferred_element_type=jnp.float32)
    h = jnp.maximum(h + b2_ref[...], 0.0).astype(jnp.bfloat16)          # (TN, 128)

    # Layer 3, chunked over output channels: never materialize (TN, 1024) f32.
    # Bias add and final ReLU are deferred past the max (they commute with it).
    cout = acc_ref.shape[-1]
    for c0 in range(0, cout, c_chunk):
        hc = jnp.dot(h, w3_ref[:, c0:c0 + c_chunk],
                     preferred_element_type=jnp.float32)                # (TN, CC)
        acc_ref[:, c0:c0 + c_chunk] = jnp.maximum(
            acc_ref[:, c0:c0 + c_chunk], jnp.max(hc, axis=0, keepdims=True))

    @pl.when(n == pl.num_programs(2) - 1)
    def _finish():
        res = acc_ref[...] + b3_ref[...]
        if relu_last:
            res = jnp.maximum(res, 0.0)
        out_ref[0, 0] = res


def _trunk_call(pts, w1, b1, w2, b2, w3, b3, *, tn, split, nt,
                relu_last, per_batch_w1):
    """pts: (B, n_pad, 8) f32; w1 f32, w2/w3 bf16, biases f32. Returns (B, Cout) f32."""
    B, _, din = pts.shape
    cout = w3.shape[1]
    kernel = functools.partial(_trunk_kernel, relu_last=relu_last, c_chunk=C_CHUNK)

    pts_map = lambda s, b, n: (b, s * nt + n, 0)
    w1_map = (lambda s, b, n: (b, 0, 0)) if per_batch_w1 else (lambda s, b, n: (0, 0, 0))
    const2 = lambda s, b, n: (0, 0)

    out = pl.pallas_call(
        kernel,
        out_shape=jax.ShapeDtypeStruct((split, B, 1, cout), jnp.float32),
        grid=(split, B, nt),
        in_specs=[
            pl.BlockSpec((1, tn, din), pts_map),
            pl.BlockSpec((1,) + w1.shape[1:], w1_map),
            pl.BlockSpec(b1.shape, const2),
            pl.BlockSpec(w2.shape, const2),
            pl.BlockSpec(b2.shape, const2),
            pl.BlockSpec(w3.shape, const2),
            pl.BlockSpec(b3.shape, const2),
        ],
        out_specs=pl.BlockSpec((1, 1, 1, cout), lambda s, b, n: (s, b, 0, 0)),
        scratch_shapes=[pltpu.VMEM((1, cout), jnp.float32)],
        compiler_params=pltpu.CompilerParams(
            dimension_semantics=("parallel", "parallel", "arbitrary"),
            vmem_limit_bytes=32 * 1024 * 1024),
    )(pts, w1, b1, w2, b2, w3, b3)
    # Combine per-split partial maxima (split == 1 in the common case).
    return jnp.max(out, axis=0)[:, 0, :]                                 # (B, cout)


def _choose_tiling(n, batch, cap):
    """Pick (tn, split, n_tiles_per_split, n_pad). tn is a multiple of 16 (bf16/f32
    sublane friendly), as large as possible up to `cap`, rebalanced for minimal pad."""
    n16 = ((n + 15) // 16) * 16
    tn = min(n16, cap)
    n_tiles = -(-n16 // tn)
    tn = ((-(-n16 // n_tiles) + 15) // 16) * 16       # rebalance: minimal padding
    # Split the N axis into two parallel partial-max groups when B == 1 so both
    # v7x TensorCores stay busy (correct: max of partial maxima; bias/ReLU commute).
    split = 2 if (batch == 1 and n_tiles >= 2) else 1
    nt = -(-n_tiles // split)
    n_pad = split * nt * tn
    return tn, split, nt, n_pad


# ---------------------------------------------------------------------------
# Parameters (deterministic, synthetic) and BN folding / padding
# ---------------------------------------------------------------------------
def init_params(key):
    ki = iter(jax.random.split(key, 64))

    def dense(cin, cout, scale=0.1):
        w = scale * jax.random.normal(next(ki), (cin, cout), jnp.float32)
        b = 0.05 * jax.random.normal(next(ki), (cout,), jnp.float32)
        return (w, b)

    def bn(c):
        return {
            "gamma": 1.0 + 0.1 * jax.random.normal(next(ki), (c,), jnp.float32),
            "beta": 0.05 * jax.random.normal(next(ki), (c,), jnp.float32),
            "mean": 0.05 * jax.random.normal(next(ki), (c,), jnp.float32),
            "var": 0.5 + jax.random.uniform(next(ki), (c,), jnp.float32),
        }

    params = {
        "stn": {
            "conv1": dense(3, 64), "bn1": bn(64),
            "conv2": dense(64, 128), "bn2": bn(128),
            "conv3": dense(128, 1024), "bn3": bn(1024),
            "fc1": dense(1024, 512, 0.05), "bn4": bn(512),
            "fc2": dense(512, 256, 0.05), "bn5": bn(256),
            "fc3": dense(256, 9, 0.05),
        },
        "enc": {
            "conv1": dense(3, 64), "bn1": bn(64),
            "conv2": dense(64, 128), "bn2": bn(128),
            "conv3": dense(128, 1024), "bn3": bn(1024),
        },
    }
    return params


def fold_bn(dense, bn):
    """Fold eval-mode BatchNorm into the preceding matmul -> (Cin,Cout) W, (1,Cout) b."""
    w, b = dense
    scale = bn["gamma"] * jax.lax.rsqrt(bn["var"] + BN_EPS)
    return w * scale[None, :], (scale * (b - bn["mean"]) + bn["beta"]).reshape(1, -1)


def prepare_weights(params):
    """One-time BN folding / zero-padding / bf16 casting (outside the hot path)."""
    stn, enc = params["stn"], params["enc"]
    bf = lambda a: a.astype(jnp.bfloat16)

    def pad_cols(w, b):   # layer-1: channels 64 -> 128 (lane-dense), bias too
        w = jnp.pad(w, ((0, 0), (0, C_HID - w.shape[1])))
        b = jnp.pad(b, ((0, 0), (0, C_HID - b.shape[1])))
        return w, b

    def pad_rows(w):      # layer-2: input rows 64 -> 128 (zeros: padded ch contribute 0)
        return jnp.pad(w, ((0, C_HID - w.shape[0]), (0, 0)))

    # STN trunk (w1 also padded 3 -> 8 along the point dim; kept f32).
    w1, b1 = pad_cols(*fold_bn(stn["conv1"], stn["bn1"]))
    w1 = jnp.pad(w1, ((0, PAD_D - 3), (0, 0)))[None]          # (1, 8, 128) f32
    w2, b2 = fold_bn(stn["conv2"], stn["bn2"]); w2 = pad_rows(w2)
    w3, b3 = fold_bn(stn["conv3"], stn["bn3"])

    # STN FC head (left in XLA).
    f1, c1 = fold_bn(stn["fc1"], stn["bn4"])
    f2, c2 = fold_bn(stn["fc2"], stn["bn5"])
    f3w, f3b = stn["fc3"]
    f3b = (f3b + jnp.eye(3, dtype=jnp.float32).reshape(-1)).reshape(1, -1)

    # Encoder trunk (e1 stays (3, 128) f32: the per-batch 3x3 transform is folded
    # into it per call; rows are padded 3 -> 8 after that fold).
    e1, d1 = pad_cols(*fold_bn(enc["conv1"], enc["bn1"]))
    e2, d2 = fold_bn(enc["conv2"], enc["bn2"]); e2 = pad_rows(e2)
    e3, d3 = fold_bn(enc["conv3"], enc["bn3"])

    return {
        "stn_trunk": dict(w1=w1, b1=b1, w2=bf(w2), b2=b2, w3=bf(w3), b3=b3),
        "stn_head": dict(f1=f1, c1=c1, f2=f2, c2=c2, f3w=f3w, f3b=f3b),
        "enc_trunk": dict(e1=e1, d1=d1, e2=bf(e2), d2=d2, e3=bf(e3), d3=d3),
    }


# ---------------------------------------------------------------------------
# Full forward pass (hot path in Pallas, tiny glue in XLA)
# ---------------------------------------------------------------------------
@functools.partial(jax.jit, static_argnames=("tn_cap",))
def pointnet_encoder_forward(x_ncw, prep, tn_cap=2048):
    B, D, N = x_ncw.shape
    assert D == 3, "input_dim == point_dim == 3 in this configuration"
    tn, split, nt, n_pad = _choose_tiling(N, B, tn_cap)

    pts = jnp.transpose(x_ncw, (0, 2, 1)).astype(jnp.float32)           # (B, N, 3)
    if n_pad != N:
        # Pad by repeating the last point: duplicates never change a max.
        pts = jnp.pad(pts, ((0, 0), (0, n_pad - N), (0, 0)), mode="edge")
    pts_p = jnp.pad(pts, ((0, 0), (0, 0), (0, PAD_D - 3)))              # f32 (B, n_pad, 8)

    # ---- STN trunk: conv1/bn1/relu -> conv2/bn2/relu -> conv3/bn3/relu -> max_N
    st = prep["stn_trunk"]
    g = _trunk_call(pts_p, st["w1"], st["b1"], st["w2"], st["b2"], st["w3"], st["b3"],
                    tn=tn, split=split, nt=nt,
                    relu_last=True, per_batch_w1=False)                  # (B, 1024)

    # ---- STN FC head (fc1/bn4/relu, fc2/bn5/relu, fc3 + identity folded into bias)
    # TODO(synk): left to plain XLA per perf review — M=B rows and a 9-wide output
    # make a Pallas kernel pure launch/masked-store overhead.
    hd = prep["stn_head"]
    hp = jax.lax.Precision.HIGHEST
    h = jax.nn.relu(jnp.dot(g, hd["f1"], precision=hp) + hd["c1"])
    h = jax.nn.relu(jnp.dot(h, hd["f2"], precision=hp) + hd["c2"])
    trans = (jnp.dot(h, hd["f3w"], precision=hp) + hd["f3b"]).reshape(B, 3, 3)

    # ---- Encoder trunk: fold bmm(pts, trans) into conv1's weight, then conv1..3, max_N
    et = prep["enc_trunk"]
    w1_eff = jnp.einsum("bij,jk->bik", trans, et["e1"], precision=hp)    # (B, 3, 128) f32
    w1_eff = jnp.pad(w1_eff, ((0, 0), (0, PAD_D - 3), (0, 0)))           # (B, 8, 128) f32
    global_feat = _trunk_call(pts_p, w1_eff, et["d1"], et["e2"], et["d2"],
                              et["e3"], et["d3"],
                              tn=tn, split=split, nt=nt,
                              relu_last=False, per_batch_w1=True)        # (B, 1024)

    return global_feat, trans, None   # trans_feat is None (feature_transform=False)


# ---------------------------------------------------------------------------
# Pure-JAX reference (unfolded BN, eval mode, HIGHEST precision)
# ---------------------------------------------------------------------------
def _bn_eval(x, bn):
    return (x - bn["mean"]) / jnp.sqrt(bn["var"] + BN_EPS) * bn["gamma"] + bn["beta"]


def _lin(x, dense):
    return jnp.dot(x, dense[0], precision=jax.lax.Precision.HIGHEST) + dense[1]


def reference_forward(x_ncw, params):
    B, D, N = x_ncw.shape
    pts = jnp.transpose(x_ncw, (0, 2, 1)).astype(jnp.float32)
    stn = params["stn"]
    h = jax.nn.relu(_bn_eval(_lin(pts, stn["conv1"]), stn["bn1"]))
    h = jax.nn.relu(_bn_eval(_lin(h, stn["conv2"]), stn["bn2"]))
    h = jax.nn.relu(_bn_eval(_lin(h, stn["conv3"]), stn["bn3"]))
    g = jnp.max(h, axis=1)
    h = jax.nn.relu(_bn_eval(_lin(g, stn["fc1"]), stn["bn4"]))
    h = jax.nn.relu(_bn_eval(_lin(h, stn["fc2"]), stn["bn5"]))
    trans = _lin(h, stn["fc3"]).reshape(B, 3, 3) + jnp.eye(3, dtype=jnp.float32)

    x = jnp.einsum("bnd,bde->bne", pts, trans, precision=jax.lax.Precision.HIGHEST)
    enc = params["enc"]
    h = jax.nn.relu(_bn_eval(_lin(x, enc["conv1"]), enc["bn1"]))
    h = jax.nn.relu(_bn_eval(_lin(h, enc["conv2"]), enc["bn2"]))
    h = _bn_eval(_lin(h, enc["conv3"]), enc["bn3"])
    gf = jnp.max(h, axis=1)
    return gf, trans, None


# ---------------------------------------------------------------------------
if __name__ == "__main__":
    key = jax.random.PRNGKey(0)
    kx, kp = jax.random.split(key)
    params = init_params(kp)
    prep = prepare_weights(params)

    def rel_err(a, b):
        return float(jnp.max(jnp.abs(a - b)) / (jnp.max(jnp.abs(b)) + 1e-6))

    # Main demo shape: single large point tile per batch element.
    B, D, N = 2, 3, 512
    x = jax.random.normal(kx, (B, D, N), jnp.float32)
    gf, trans, trans_feat = pointnet_encoder_forward(x, prep)
    jax.block_until_ready((gf, trans))
    assert gf.shape == (B, 1024) and trans.shape == (B, 3, 3) and trans_feat is None
    gf_ref, trans_ref, _ = reference_forward(x, params)
    err_gf, err_tr = rel_err(gf, gf_ref), rel_err(trans, trans_ref)
    assert err_gf < 5e-2 and err_tr < 5e-2, (err_gf, err_tr)

    # Small-tile path: exercises multi-tile max accumulation and the B==1 N-split
    # (two parallel partial-max groups, combined with jnp.max in XLA).
    x1 = jax.random.normal(jax.random.fold_in(kx, 1), (1, 3, 512), jnp.float32)
    gf1, trans1, _ = pointnet_encoder_forward(x1, prep, tn_cap=128)
    jax.block_until_ready((gf1, trans1))
    gf1_ref, trans1_ref, _ = reference_forward(x1, params)
    err_gf1, err_tr1 = rel_err(gf1, gf1_ref), rel_err(trans1, trans1_ref)
    assert err_gf1 < 5e-2 and err_tr1 < 5e-2, (err_gf1, err_tr1)

    print("KERNEL_OK")
</pallas_src>

<mosaic_0001>
module attributes {stable_mosaic.version = 11 : i64} {
  func.func @_trunk_kernel(%arg0: i32, %arg1: i32, %arg2: i32, %arg3: memref<1x512x8xf32, #tpu.memory_space<vmem>>, %arg4: memref<1x8x128xf32, #tpu.memory_space<vmem>>, %arg5: memref<1x128xf32, #tpu.memory_space<vmem>>, %arg6: memref<128x128xbf16, #tpu.memory_space<vmem>>, %arg7: memref<1x128xf32, #tpu.memory_space<vmem>>, %arg8: memref<128x1024xbf16, #tpu.memory_space<vmem>>, %arg9: memref<1x1024xf32, #tpu.memory_space<vmem>>, %arg10: memref<1x1x1x1024xf32, #tpu.memory_space<vmem>>, %arg11: memref<1x1024xf32, #tpu.memory_space<vmem>>) attributes {dimension_semantics = [#tpu.dimension_semantics<parallel>, #tpu.dimension_semantics<parallel>, #tpu.dimension_semantics<arbitrary>], iteration_bounds = array<i64: 1, 2, 1>, scalar_prefetch = 0 : i64, scratch_operands = 1 : i64, tpu.core_type = #tpu.core_type<tc>, window_params = [{transform_indices = @transform_0, window_bounds = array<i64: 1, 512, 8>}, {pipeline_mode = #tpu.pipeline_mode<synchronous>, transform_indices = @transform_1, window_bounds = array<i64: 1, 8, 128>}, {pipeline_mode = #tpu.pipeline_mode<synchronous>, transform_indices = @transform_2, window_bounds = array<i64: 1, 128>}, {pipeline_mode = #tpu.pipeline_mode<synchronous>, transform_indices = @transform_3, window_bounds = array<i64: 128, 128>}, {pipeline_mode = #tpu.pipeline_mode<synchronous>, transform_indices = @transform_4, window_bounds = array<i64: 1, 128>}, {pipeline_mode = #tpu.pipeline_mode<synchronous>, transform_indices = @transform_5, window_bounds = array<i64: 128, 1024>}, {pipeline_mode = #tpu.pipeline_mode<synchronous>, transform_indices = @transform_6, window_bounds = array<i64: 1, 1024>}, {transform_indices = @transform_7, window_bounds = array<i64: 1, 1, 1, 1024>}]} {
    %c0_i32 = arith.constant 0 : i32
    %0 = arith.cmpi eq, %arg2, %c0_i32 : i32
    %1 = arith.extui %0 : i1 to i32
    %c0_i32_0 = arith.constant 0 : i32
    %2 = arith.cmpi ne, %1, %c0_i32_0 : i32
    scf.if %2 {
      %cst_46 = arith.constant 0xFF800000 : f32
      %53 = vector.broadcast %cst_46 : f32 to vector<1x1024xf32>
      %c0_47 = arith.constant 0 : index
      %c0_48 = arith.constant 0 : index
      %54 = vector.load %arg11[%c0_47, %c0_48] : memref<1x1024xf32, #tpu.memory_space<vmem>>, vector<1x1024xf32>
      tpu.vector_store %arg11[%c0_47, %c0_48], %53 {strides = array<i32>} : memref<1x1024xf32, #tpu.memory_space<vmem>>, vector<1x1024xf32>,
    } else {
    }
    %c0 = arith.constant 0 : index
    %c0_1 = arith.constant 0 : index
    %c0_2 = arith.constant 0 : index
    %3 = vector.load %arg3[%c0, %c0_1, %c0_2] : memref<1x512x8xf32, #tpu.memory_space<vmem>>, vector<1x512x8xf32>
    %4 = vector.shape_cast %3 : vector<1x512x8xf32> to vector<512x8xf32>
    %c0_3 = arith.constant 0 : index
    %c0_4 = arith.constant 0 : index
    %c0_5 = arith.constant 0 : index
    %5 = vector.load %arg4[%c0_3, %c0_4, %c0_5] : memref<1x8x128xf32, #tpu.memory_space<vmem>>, vector<1x8x128xf32>
    %6 = vector.shape_cast %5 : vector<1x8x128xf32> to vector<8x128xf32>
    %cst = arith.constant dense<0.000000e+00> : vector<512x128xf32>
    %7 = tpu.matmul %4, %6, %cst {dimension_numbers = #tpu.dot_dimension_numbers<[1], [0], [0], [1], [0, 0, 1, 1], [], []>} : vector<512x8xf32>, vector<8x128xf32>, vector<512x128xf32> -> vector<512x128xf32>
    %c0_6 = arith.constant 0 : index
    %c0_7 = arith.constant 0 : index
    %8 = vector.load %arg5[%c0_6, %c0_7] : memref<1x128xf32, #tpu.memory_space<vmem>>, vector<1x128xf32>
    %9 = vector.broadcast %8 : vector<1x128xf32> to vector<512x128xf32>
    %10 = arith.addf %7, %9 : vector<512x128xf32>
    %cst_8 = arith.constant 0.000000e+00 : f32
    %11 = vector.broadcast %cst_8 : f32 to vector<512x128xf32>
    %12 = arith.maximumf %10, %11 : vector<512x128xf32>
    %13 = arith.truncf %12 : vector<512x128xf32> to vector<512x128xbf16>
    %c0_9 = arith.constant 0 : index
    %c0_10 = arith.constant 0 : index
    %14 = vector.load %arg6[%c0_9, %c0_10] : memref<128x128xbf16, #tpu.memory_space<vmem>>, vector<128x128xbf16>
    %cst_11 = arith.constant dense<0.000000e+00> : vector<512x128xf32>
    %15 = tpu.matmul %13, %14, %cst_11 {dimension_numbers = #tpu.dot_dimension_numbers<[1], [0], [0], [1], [0, 0, 1, 1], [], []>} : vector<512x128xbf16>, vector<128x128xbf16>, vector<512x128xf32> -> vector<512x128xf32>
    %c0_12 = arith.constant 0 : index
    %c0_13 = arith.constant 0 : index
    %16 = vector.load %arg7[%c0_12, %c0_13] : memref<1x128xf32, #tpu.memory_space<vmem>>, vector<1x128xf32>
    %17 = vector.broadcast %16 : vector<1x128xf32> to vector<512x128xf32>
    %18 = arith.addf %15, %17 : vector<512x128xf32>
    %cst_14 = arith.constant 0.000000e+00 : f32
    %19 = vector.broadcast %cst_14 : f32 to vector<512x128xf32>
    %20 = arith.maximumf %18, %19 : vector<512x128xf32>
    %21 = arith.truncf %20 : vector<512x128xf32> to vector<512x128xbf16>
    %c0_15 = arith.constant 0 : index
    %c0_16 = arith.constant 0 : index
    %22 = vector.load %arg8[%c0_15, %c0_16] : memref<128x1024xbf16, #tpu.memory_space<vmem>>, vector<128x256xbf16>
    %cst_17 = arith.constant dense<0.000000e+00> : vector<512x256xf32>
    %23 = tpu.matmul %21, %22, %cst_17 {dimension_numbers = #tpu.dot_dimension_numbers<[1], [0], [0], [1], [0, 0, 1, 1], [], []>} : vector<512x128xbf16>, vector<128x256xbf16>, vector<512x256xf32> -> vector<512x256xf32>
    %c0_18 = arith.constant 0 : index
    %c0_19 = arith.constant 0 : index
    %24 = vector.load %arg11[%c0_18, %c0_19] : memref<1x1024xf32, #tpu.memory_space<vmem>>, vector<1x256xf32>
    %cst_20 = arith.constant dense<0xFF800000> : vector<256xf32>
    %25 = vector.multi_reduction <maximumf>, %23, %cst_20 [0] : vector<512x256xf32> to vector<256xf32>
    %26 = vector.shape_cast %25 : vector<256xf32> to vector<1x256xf32>
    %27 = arith.maximumf %24, %26 : vector<1x256xf32>
    %c0_21 = arith.constant 0 : index
    %c0_22 = arith.constant 0 : index
    %28 = vector.load %arg11[%c0_21, %c0_22] : memref<1x1024xf32, #tpu.memory_space<vmem>>, vector<1x256xf32>
    tpu.vector_store %arg11[%c0_21, %c0_22], %27 {strides = array<i32>} : memref<1x1024xf32, #tpu.memory_space<vmem>>, vector<1x256xf32>,
    %c0_23 = arith.constant 0 : index
    %c256 = arith.constant 256 : index
    %29 = vector.load %arg8[%c0_23, %c256] : memref<128x1024xbf16, #tpu.memory_space<vmem>>, vector<128x256xbf16>
    %cst_24 = arith.constant dense<0.000000e+00> : vector<512x256xf32>
    %30 = tpu.matmul %21, %29, %cst_24 {dimension_numbers = #tpu.dot_dimension_numbers<[1], [0], [0], [1], [0, 0, 1, 1], [], []>} : vector<512x128xbf16>, vector<128x256xbf16>, vector<512x256xf32> -> vector<512x256xf32>
    %c0_25 = arith.constant 0 : index
    %c256_26 = arith.constant 256 : index
    %31 = vector.load %arg11[%c0_25, %c256_26] : memref<1x1024xf32, #tpu.memory_space<vmem>>, vector<1x256xf32>
    %cst_27 = arith.constant dense<0xFF800000> : vector<256xf32>
    %32 = vector.multi_reduction <maximumf>, %30, %cst_27 [0] : vector<512x256xf32> to vector<256xf32>
    %33 = vector.shape_cast %32 : vector<256xf32> to vector<1x256xf32>
    %34 = arith.maximumf %31, %33 : vector<1x256xf32>
    %c0_28 = arith.constant 0 : index
    %c256_29 = arith.constant 256 : index
    %35 = vector.load %arg11[%c0_28, %c256_29] : memref<1x1024xf32, #tpu.memory_space<vmem>>, vector<1x256xf32>
    tpu.vector_store %arg11[%c0_28, %c256_29], %34 {strides = array<i32>} : memref<1x1024xf32, #tpu.memory_space<vmem>>, vector<1x256xf32>,
    %c0_30 = arith.constant 0 : index
    %c512 = arith.constant 512 : index
    %36 = vector.load %arg8[%c0_30, %c512] : memref<128x1024xbf16, #tpu.memory_space<vmem>>, vector<128x256xbf16>
    %cst_31 = arith.constant dense<0.000000e+00> : vector<512x256xf32>
    %37 = tpu.matmul %21, %36, %cst_31 {dimension_numbers = #tpu.dot_dimension_numbers<[1], [0], [0], [1], [0, 0, 1, 1], [], []>} : vector<512x128xbf16>, vector<128x256xbf16>, vector<512x256xf32> -> vector<512x256xf32>
    %c0_32 = arith.constant 0 : index
    %c512_33 = arith.constant 512 : index
    %38 = vector.load %arg11[%c0_32, %c512_33] : memref<1x1024xf32, #tpu.memory_space<vmem>>, vector<1x256xf32>
    %cst_34 = arith.constant dense<0xFF800000> : vector<256xf32>
    %39 = vector.multi_reduction <maximumf>, %37, %cst_34 [0] : vector<512x256xf32> to vector<256xf32>
    %40 = vector.shape_cast %39 : vector<256xf32> to vector<1x256xf32>
    %41 = arith.maximumf %38, %40 : vector<1x256xf32>
    %c0_35 = arith.constant 0 : index
    %c512_36 = arith.constant 512 : index
    %42 = vector.load %arg11[%c0_35, %c512_36] : memref<1x1024xf32, #tpu.memory_space<vmem>>, vector<1x256xf32>
    tpu.vector_store %arg11[%c0_35, %c512_36], %41 {strides = array<i32>} : memref<1x1024xf32, #tpu.memory_space<vmem>>, vector<1x256xf32>,
    %c0_37 = arith.constant 0 : index
    %c768 = arith.constant 768 : index
    %43 = vector.load %arg8[%c0_37, %c768] : memref<128x1024xbf16, #tpu.memory_space<vmem>>, vector<128x256xbf16>
    %cst_38 = arith.constant dense<0.000000e+00> : vector<512x256xf32>
    %44 = tpu.matmul %21, %43, %cst_38 {dimension_numbers = #tpu.dot_dimension_numbers<[1], [0], [0], [1], [0, 0, 1, 1], [], []>} : vector<512x128xbf16>, vector<128x256xbf16>, vector<512x256xf32> -> vector<512x256xf32>
    %c0_39 = arith.constant 0 : index
    %c768_40 = arith.constant 768 : index
    %45 = vector.load %arg11[%c0_39, %c768_40] : memref<1x1024xf32, #tpu.memory_space<vmem>>, vector<1x256xf32>
    %cst_41 = arith.constant dense<0xFF800000> : vector<256xf32>
    %46 = vector.multi_reduction <maximumf>, %44, %cst_41 [0] : vector<512x256xf32> to vector<256xf32>
    %47 = vector.shape_cast %46 : vector<256xf32> to vector<1x256xf32>
    %48 = arith.maximumf %45, %47 : vector<1x256xf32>
    %c0_42 = arith.constant 0 : index
    %c768_43 = arith.constant 768 : index
    %49 = vector.load %arg11[%c0_42, %c768_43] : memref<1x1024xf32, #tpu.memory_space<vmem>>, vector<1x256xf32>
    tpu.vector_store %arg11[%c0_42, %c768_43], %48 {strides = array<i32>} : memref<1x1024xf32, #tpu.memory_space<vmem>>, vector<1x256xf32>,
    %c0_i32_44 = arith.constant 0 : i32
    %50 = arith.cmpi eq, %arg2, %c0_i32_44 : i32
    %51 = arith.extui %50 : i1 to i32
    %c0_i32_45 = arith.constant 0 : i32
    %52 = arith.cmpi ne, %51, %c0_i32_45 : i32
    scf.if %52 {
      %c0_46 = arith.constant 0 : index
      %c0_47 = arith.constant 0 : index
      %53 = vector.load %arg11[%c0_46, %c0_47] : memref<1x1024xf32, #tpu.memory_space<vmem>>, vector<1x1024xf32>
      %c0_48 = arith.constant 0 : index
      %c0_49 = arith.constant 0 : index
      %54 = vector.load %arg9[%c0_48, %c0_49] : memref<1x1024xf32, #tpu.memory_space<vmem>>, vector<1x1024xf32>
      %55 = arith.addf %53, %54 : vector<1x1024xf32>
      %cst_50 = arith.constant 0.000000e+00 : f32
      %56 = vector.broadcast %cst_50 : f32 to vector<1x1024xf32>
      %57 = arith.maximumf %55, %56 : vector<1x1024xf32>
      %c0_51 = arith.constant 0 : index
      %c0_52 = arith.constant 0 : index
      %c0_53 = arith.constant 0 : index
      %c0_54 = arith.constant 0 : index
      %58 = vector.load %arg10[%c0_51, %c0_52, %c0_53, %c0_54] : memref<1x1x1x1024xf32, #tpu.memory_space<vmem>>, vector<1x1x1x1024xf32>
      %59 = vector.shape_cast %58 : vector<1x1x1x1024xf32> to vector<1x1024xf32>
      %60 = vector.shape_cast %57 : vector<1x1024xf32> to vector<1x1x1x1024xf32>
      tpu.vector_store %arg10[%c0_51, %c0_52, %c0_53, %c0_54], %60 {strides = array<i32>} : memref<1x1x1x1024xf32, #tpu.memory_space<vmem>>, vector<1x1x1x1024xf32>,
    } else {
    }
    return
  }
  func.func @transform_0(%arg0: i32, %arg1: i32, %arg2: i32) -> (i32, i32, i32) {
    %c1_i32 = arith.constant 1 : i32
    %0 = arith.muli %arg0, %c1_i32 : i32
    %1 = arith.addi %0, %arg2 : i32
    %c0_i32 = arith.constant 0 : i32
    %c0_i32_0 = arith.constant 0 : i32
    return %arg1, %1, %c0_i32 : i32, i32, i32
  }
  func.func @transform_1(%arg0: i32, %arg1: i32, %arg2: i32) -> (i32, i32, i32) {
    %c0_i32 = arith.constant 0 : i32
    %c0_i32_0 = arith.constant 0 : i32
    %c0_i32_1 = arith.constant 0 : i32
    %c0_i32_2 = arith.constant 0 : i32
    return %c0_i32, %c0_i32_0, %c0_i32_1 : i32, i32, i32
  }
  func.func @transform_2(%arg0: i32, %arg1: i32, %arg2: i32) -> (i32, i32) {
    %c0_i32 = arith.constant 0 : i32
    %c0_i32_0 = arith.constant 0 : i32
    %c0_i32_1 = arith.constant 0 : i32
    return %c0_i32, %c0_i32_0 : i32, i32
  }
  func.func @transform_3(%arg0: i32, %arg1: i32, %arg2: i32) -> (i32, i32) {
    %c0_i32 = arith.constant 0 : i32
    %c0_i32_0 = arith.constant 0 : i32
    %c0_i32_1 = arith.constant 0 : i32
    return %c0_i32, %c0_i32_0 : i32, i32
  }
  func.func @transform_4(%arg0: i32, %arg1: i32, %arg2: i32) -> (i32, i32) {
    %c0_i32 = arith.constant 0 : i32
    %c0_i32_0 = arith.constant 0 : i32
    %c0_i32_1 = arith.constant 0 : i32
    return %c0_i32, %c0_i32_0 : i32, i32
  }
  func.func @transform_5(%arg0: i32, %arg1: i32, %arg2: i32) -> (i32, i32) {
    %c0_i32 = arith.constant 0 : i32
    %c0_i32_0 = arith.constant 0 : i32
    %c0_i32_1 = arith.constant 0 : i32
    return %c0_i32, %c0_i32_0 : i32, i32
  }
  func.func @transform_6(%arg0: i32, %arg1: i32, %arg2: i32) -> (i32, i32) {
    %c0_i32 = arith.constant 0 : i32
    %c0_i32_0 = arith.constant 0 : i32
    %c0_i32_1 = arith.constant 0 : i32
    return %c0_i32, %c0_i32_0 : i32, i32
  }
  func.func @transform_7(%arg0: i32, %arg1: i32, %arg2: i32) -> (i32, i32, i32, i32) {
    %c0_i32 = arith.constant 0 : i32
    %c0_i32_0 = arith.constant 0 : i32
    %c0_i32_1 = arith.constant 0 : i32
    return %arg0, %arg1, %c0_i32, %c0_i32_0 : i32, i32, i32, i32
  }
}

module attributes {stable_mosaic.version = 11 : i64} {
  func.func @_trunk_kernel(%arg0: i32, %arg1: i32, %arg2: i32, %arg3: memref<1x512x8xf32, #tpu.memory_space<vmem>>, %arg4: memref<1x8x128xf32, #tpu.memory_space<vmem>>, %arg5: memref<1x128xf32, #tpu.memory_space<vmem>>, %arg6: memref<128x128xbf16, #tpu.memory_space<vmem>>, %arg7: memref<1x128xf32, #tpu.memory_space<vmem>>, %arg8: memref<128x1024xbf16, #tpu.memory_space<vmem>>, %arg9: memref<1x1024xf32, #tpu.memory_space<vmem>>, %arg10: memref<1x1x1x1024xf32, #tpu.memory_space<vmem>>, %arg11: memref<1x1024xf32, #tpu.memory_space<vmem>>) attributes {dimension_semantics = [#tpu.dimension_semantics<parallel>, #tpu.dimension_semantics<parallel>, #tpu.dimension_semantics<arbitrary>], iteration_bounds = array<i64: 1, 2, 1>, scalar_prefetch = 0 : i64, scratch_operands = 1 : i64, tpu.core_type = #tpu.core_type<tc>, window_params = [{transform_indices = @transform_0, window_bounds = array<i64: 1, 512, 8>}, {transform_indices = @transform_1, window_bounds = array<i64: 1, 8, 128>}, {pipeline_mode = #tpu.pipeline_mode<synchronous>, transform_indices = @transform_2, window_bounds = array<i64: 1, 128>}, {pipeline_mode = #tpu.pipeline_mode<synchronous>, transform_indices = @transform_3, window_bounds = array<i64: 128, 128>}, {pipeline_mode = #tpu.pipeline_mode<synchronous>, transform_indices = @transform_4, window_bounds = array<i64: 1, 128>}, {pipeline_mode = #tpu.pipeline_mode<synchronous>, transform_indices = @transform_5, window_bounds = array<i64: 128, 1024>}, {pipeline_mode = #tpu.pipeline_mode<synchronous>, transform_indices = @transform_6, window_bounds = array<i64: 1, 1024>}, {transform_indices = @transform_7, window_bounds = array<i64: 1, 1, 1, 1024>}]} {
    %c0_i32 = arith.constant 0 : i32
    %0 = arith.cmpi eq, %arg2, %c0_i32 : i32
    %1 = arith.extui %0 : i1 to i32
    %c0_i32_0 = arith.constant 0 : i32
    %2 = arith.cmpi ne, %1, %c0_i32_0 : i32
    scf.if %2 {
      %cst_46 = arith.constant 0xFF800000 : f32
      %53 = vector.broadcast %cst_46 : f32 to vector<1x1024xf32>
      %c0_47 = arith.constant 0 : index
      %c0_48 = arith.constant 0 : index
      %54 = vector.load %arg11[%c0_47, %c0_48] : memref<1x1024xf32, #tpu.memory_space<vmem>>, vector<1x1024xf32>
      tpu.vector_store %arg11[%c0_47, %c0_48], %53 {strides = array<i32>} : memref<1x1024xf32, #tpu.memory_space<vmem>>, vector<1x1024xf32>,
    } else {
    }
    %c0 = arith.constant 0 : index
    %c0_1 = arith.constant 0 : index
    %c0_2 = arith.constant 0 : index
    %3 = vector.load %arg3[%c0, %c0_1, %c0_2] : memref<1x512x8xf32, #tpu.memory_space<vmem>>, vector<1x512x8xf32>
    %4 = vector.shape_cast %3 : vector<1x512x8xf32> to vector<512x8xf32>
    %c0_3 = arith.constant 0 : index
    %c0_4 = arith.constant 0 : index
    %c0_5 = arith.constant 0 : index
    %5 = vector.load %arg4[%c0_3, %c0_4, %c0_5] : memref<1x8x128xf32, #tpu.memory_space<vmem>>, vector<1x8x128xf32>
    %6 = vector.shape_cast %5 : vector<1x8x128xf32> to vector<8x128xf32>
    %cst = arith.constant dense<0.000000e+00> : vector<512x128xf32>
    %7 = tpu.matmul %4, %6, %cst {dimension_numbers = #tpu.dot_dimension_numbers<[1], [0], [0], [1], [0, 0, 1, 1], [], []>} : vector<512x8xf32>, vector<8x128xf32>, vector<512x128xf32> -> vector<512x128xf32>
    %c0_6 = arith.constant 0 : index
    %c0_7 = arith.constant 0 : index
    %8 = vector.load %arg5[%c0_6, %c0_7] : memref<1x128xf32, #tpu.memory_space<vmem>>, vector<1x128xf32>
    %9 = vector.broadcast %8 : vector<1x128xf32> to vector<512x128xf32>
    %10 = arith.addf %7, %9 : vector<512x128xf32>
    %cst_8 = arith.constant 0.000000e+00 : f32
    %11 = vector.broadcast %cst_8 : f32 to vector<512x128xf32>
    %12 = arith.maximumf %10, %11 : vector<512x128xf32>
    %13 = arith.truncf %12 : vector<512x128xf32> to vector<512x128xbf16>
    %c0_9 = arith.constant 0 : index
    %c0_10 = arith.constant 0 : index
    %14 = vector.load %arg6[%c0_9, %c0_10] : memref<128x128xbf16, #tpu.memory_space<vmem>>, vector<128x128xbf16>
    %cst_11 = arith.constant dense<0.000000e+00> : vector<512x128xf32>
    %15 = tpu.matmul %13, %14, %cst_11 {dimension_numbers = #tpu.dot_dimension_numbers<[1], [0], [0], [1], [0, 0, 1, 1], [], []>} : vector<512x128xbf16>, vector<128x128xbf16>, vector<512x128xf32> -> vector<512x128xf32>
    %c0_12 = arith.constant 0 : index
    %c0_13 = arith.constant 0 : index
    %16 = vector.load %arg7[%c0_12, %c0_13] : memref<1x128xf32, #tpu.memory_space<vmem>>, vector<1x128xf32>
    %17 = vector.broadcast %16 : vector<1x128xf32> to vector<512x128xf32>
    %18 = arith.addf %15, %17 : vector<512x128xf32>
    %cst_14 = arith.constant 0.000000e+00 : f32
    %19 = vector.broadcast %cst_14 : f32 to vector<512x128xf32>
    %20 = arith.maximumf %18, %19 : vector<512x128xf32>
    %21 = arith.truncf %20 : vector<512x128xf32> to vector<512x128xbf16>
    %c0_15 = arith.constant 0 : index
    %c0_16 = arith.constant 0 : index
    %22 = vector.load %arg8[%c0_15, %c0_16] : memref<128x1024xbf16, #tpu.memory_space<vmem>>, vector<128x256xbf16>
    %cst_17 = arith.constant dense<0.000000e+00> : vector<512x256xf32>
    %23 = tpu.matmul %21, %22, %cst_17 {dimension_numbers = #tpu.dot_dimension_numbers<[1], [0], [0], [1], [0, 0, 1, 1], [], []>} : vector<512x128xbf16>, vector<128x256xbf16>, vector<512x256xf32> -> vector<512x256xf32>
    %c0_18 = arith.constant 0 : index
    %c0_19 = arith.constant 0 : index
    %24 = vector.load %arg11[%c0_18, %c0_19] : memref<1x1024xf32, #tpu.memory_space<vmem>>, vector<1x256xf32>
    %cst_20 = arith.constant dense<0xFF800000> : vector<256xf32>
    %25 = vector.multi_reduction <maximumf>, %23, %cst_20 [0] : vector<512x256xf32> to vector<256xf32>
    %26 = vector.shape_cast %25 : vector<256xf32> to vector<1x256xf32>
    %27 = arith.maximumf %24, %26 : vector<1x256xf32>
    %c0_21 = arith.constant 0 : index
    %c0_22 = arith.constant 0 : index
    %28 = vector.load %arg11[%c0_21, %c0_22] : memref<1x1024xf32, #tpu.memory_space<vmem>>, vector<1x256xf32>
    tpu.vector_store %arg11[%c0_21, %c0_22], %27 {strides = array<i32>} : memref<1x1024xf32, #tpu.memory_space<vmem>>, vector<1x256xf32>,
    %c0_23 = arith.constant 0 : index
    %c256 = arith.constant 256 : index
    %29 = vector.load %arg8[%c0_23, %c256] : memref<128x1024xbf16, #tpu.memory_space<vmem>>, vector<128x256xbf16>
    %cst_24 = arith.constant dense<0.000000e+00> : vector<512x256xf32>
    %30 = tpu.matmul %21, %29, %cst_24 {dimension_numbers = #tpu.dot_dimension_numbers<[1], [0], [0], [1], [0, 0, 1, 1], [], []>} : vector<512x128xbf16>, vector<128x256xbf16>, vector<512x256xf32> -> vector<512x256xf32>
    %c0_25 = arith.constant 0 : index
    %c256_26 = arith.constant 256 : index
    %31 = vector.load %arg11[%c0_25, %c256_26] : memref<1x1024xf32, #tpu.memory_space<vmem>>, vector<1x256xf32>
    %cst_27 = arith.constant dense<0xFF800000> : vector<256xf32>
    %32 = vector.multi_reduction <maximumf>, %30, %cst_27 [0] : vector<512x256xf32> to vector<256xf32>
    %33 = vector.shape_cast %32 : vector<256xf32> to vector<1x256xf32>
    %34 = arith.maximumf %31, %33 : vector<1x256xf32>
    %c0_28 = arith.constant 0 : index
    %c256_29 = arith.constant 256 : index
    %35 = vector.load %arg11[%c0_28, %c256_29] : memref<1x1024xf32, #tpu.memory_space<vmem>>, vector<1x256xf32>
    tpu.vector_store %arg11[%c0_28, %c256_29], %34 {strides = array<i32>} : memref<1x1024xf32, #tpu.memory_space<vmem>>, vector<1x256xf32>,
    %c0_30 = arith.constant 0 : index
    %c512 = arith.constant 512 : index
    %36 = vector.load %arg8[%c0_30, %c512] : memref<128x1024xbf16, #tpu.memory_space<vmem>>, vector<128x256xbf16>
    %cst_31 = arith.constant dense<0.000000e+00> : vector<512x256xf32>
    %37 = tpu.matmul %21, %36, %cst_31 {dimension_numbers = #tpu.dot_dimension_numbers<[1], [0], [0], [1], [0, 0, 1, 1], [], []>} : vector<512x128xbf16>, vector<128x256xbf16>, vector<512x256xf32> -> vector<512x256xf32>
    %c0_32 = arith.constant 0 : index
    %c512_33 = arith.constant 512 : index
    %38 = vector.load %arg11[%c0_32, %c512_33] : memref<1x1024xf32, #tpu.memory_space<vmem>>, vector<1x256xf32>
    %cst_34 = arith.constant dense<0xFF800000> : vector<256xf32>
    %39 = vector.multi_reduction <maximumf>, %37, %cst_34 [0] : vector<512x256xf32> to vector<256xf32>
    %40 = vector.shape_cast %39 : vector<256xf32> to vector<1x256xf32>
    %41 = arith.maximumf %38, %40 : vector<1x256xf32>
    %c0_35 = arith.constant 0 : index
    %c512_36 = arith.constant 512 : index
    %42 = vector.load %arg11[%c0_35, %c512_36] : memref<1x1024xf32, #tpu.memory_space<vmem>>, vector<1x256xf32>
    tpu.vector_store %arg11[%c0_35, %c512_36], %41 {strides = array<i32>} : memref<1x1024xf32, #tpu.memory_space<vmem>>, vector<1x256xf32>,
    %c0_37 = arith.constant 0 : index
    %c768 = arith.constant 768 : index
    %43 = vector.load %arg8[%c0_37, %c768] : memref<128x1024xbf16, #tpu.memory_space<vmem>>, vector<128x256xbf16>
    %cst_38 = arith.constant dense<0.000000e+00> : vector<512x256xf32>
    %44 = tpu.matmul %21, %43, %cst_38 {dimension_numbers = #tpu.dot_dimension_numbers<[1], [0], [0], [1], [0, 0, 1, 1], [], []>} : vector<512x128xbf16>, vector<128x256xbf16>, vector<512x256xf32> -> vector<512x256xf32>
    %c0_39 = arith.constant 0 : index
    %c768_40 = arith.constant 768 : index
    %45 = vector.load %arg11[%c0_39, %c768_40] : memref<1x1024xf32, #tpu.memory_space<vmem>>, vector<1x256xf32>
    %cst_41 = arith.constant dense<0xFF800000> : vector<256xf32>
    %46 = vector.multi_reduction <maximumf>, %44, %cst_41 [0] : vector<512x256xf32> to vector<256xf32>
    %47 = vector.shape_cast %46 : vector<256xf32> to vector<1x256xf32>
    %48 = arith.maximumf %45, %47 : vector<1x256xf32>
    %c0_42 = arith.constant 0 : index
    %c768_43 = arith.constant 768 : index
    %49 = vector.load %arg11[%c0_42, %c768_43] : memref<1x1024xf32, #tpu.memory_space<vmem>>, vector<1x256xf32>
    tpu.vector_store %arg11[%c0_42, %c768_43], %48 {strides = array<i32>} : memref<1x1024xf32, #tpu.memory_space<vmem>>, vector<1x256xf32>,
    %c0_i32_44 = arith.constant 0 : i32
    %50 = arith.cmpi eq, %arg2, %c0_i32_44 : i32
    %51 = arith.extui %50 : i1 to i32
    %c0_i32_45 = arith.constant 0 : i32
    %52 = arith.cmpi ne, %51, %c0_i32_45 : i32
    scf.if %52 {
      %c0_46 = arith.constant 0 : index
      %c0_47 = arith.constant 0 : index
      %53 = vector.load %arg11[%c0_46, %c0_47] : memref<1x1024xf32, #tpu.memory_space<vmem>>, vector<1x1024xf32>
      %c0_48 = arith.constant 0 : index
      %c0_49 = arith.constant 0 : index
      %54 = vector.load %arg9[%c0_48, %c0_49] : memref<1x1024xf32, #tpu.memory_space<vmem>>, vector<1x1024xf32>
      %55 = arith.addf %53, %54 : vector<1x1024xf32>
      %c0_50 = arith.constant 0 : index
      %c0_51 = arith.constant 0 : index
      %c0_52 = arith.constant 0 : index
      %c0_53 = arith.constant 0 : index
      %56 = vector.load %arg10[%c0_50, %c0_51, %c0_52, %c0_53] : memref<1x1x1x1024xf32, #tpu.memory_space<vmem>>, vector<1x1x1x1024xf32>
      %57 = vector.shape_cast %56 : vector<1x1x1x1024xf32> to vector<1x1024xf32>
      %58 = vector.shape_cast %55 : vector<1x1024xf32> to vector<1x1x1x1024xf32>
      tpu.vector_store %arg10[%c0_50, %c0_51, %c0_52, %c0_53], %58 {strides = array<i32>} : memref<1x1x1x1024xf32, #tpu.memory_space<vmem>>, vector<1x1x1x1024xf32>,
    } else {
    }
    return
  }
  func.func @transform_0(%arg0: i32, %arg1: i32, %arg2: i32) -> (i32, i32, i32) {
    %c1_i32 = arith.constant 1 : i32
    %0 = arith.muli %arg0, %c1_i32 : i32
    %1 = arith.addi %0, %arg2 : i32
    %c0_i32 = arith.constant 0 : i32
    %c0_i32_0 = arith.constant 0 : i32
    return %arg1, %1, %c0_i32 : i32, i32, i32
  }
  func.func @transform_1(%arg0: i32, %arg1: i32, %arg2: i32) -> (i32, i32, i32) {
    %c0_i32 = arith.constant 0 : i32
    %c0_i32_0 = arith.constant 0 : i32
    %c0_i32_1 = arith.constant 0 : i32
    return %arg1, %c0_i32, %c0_i32_0 : i32, i32, i32
  }
  func.func @transform_2(%arg0: i32, %arg1: i32, %arg2: i32) -> (i32, i32) {
    %c0_i32 = arith.constant 0 : i32
    %c0_i32_0 = arith.constant 0 : i32
    %c0_i32_1 = arith.constant 0 : i32
    return %c0_i32, %c0_i32_0 : i32, i32
  }
  func.func @transform_3(%arg0: i32, %arg1: i32, %arg2: i32) -> (i32, i32) {
    %c0_i32 = arith.constant 0 : i32
    %c0_i32_0 = arith.constant 0 : i32
    %c0_i32_1 = arith.constant 0 : i32
    return %c0_i32, %c0_i32_0 : i32, i32
  }
  func.func @transform_4(%arg0: i32, %arg1: i32, %arg2: i32) -> (i32, i32) {
    %c0_i32 = arith.constant 0 : i32
    %c0_i32_0 = arith.constant 0 : i32
    %c0_i32_1 = arith.constant 0 : i32
    return %c0_i32, %c0_i32_0 : i32, i32
  }
  func.func @transform_5(%arg0: i32, %arg1: i32, %arg2: i32) -> (i32, i32) {
    %c0_i32 = arith.constant 0 : i32
    %c0_i32_0 = arith.constant 0 : i32
    %c0_i32_1 = arith.constant 0 : i32
    return %c0_i32, %c0_i32_0 : i32, i32
  }
  func.func @transform_6(%arg0: i32, %arg1: i32, %arg2: i32) -> (i32, i32) {
    %c0_i32 = arith.constant 0 : i32
    %c0_i32_0 = arith.constant 0 : i32
    %c0_i32_1 = arith.constant 0 : i32
    return %c0_i32, %c0_i32_0 : i32, i32
  }
  func.func @transform_7(%arg0: i32, %arg1: i32, %arg2: i32) -> (i32, i32, i32, i32) {
    %c0_i32 = arith.constant 0 : i32
    %c0_i32_0 = arith.constant 0 : i32
    %c0_i32_1 = arith.constant 0 : i32
    return %arg0, %arg1, %c0_i32, %c0_i32_0 : i32, i32, i32, i32
  }
}

</mosaic_0001>

<bundles_post_ra>
// kernel: pointnet_encoder_forward.2
= control target key start
LH: loop header
LB: loop body
LE: loop exit
PB: predicated region body
PF: predicated region fallthrough
CT: control target
= control target key end

     0   :  { %12 = vsyncpa [#allocation4], 0  ;;  %s5930_s0 = inlined_call_operand.vmem [shape: f32[2,512,8], index: 0, kind: input, shape index: {}]   ;;  %s5931_s1 = inlined_call_operand.hbm [shape: f32[1,8,128], index: 1, kind: input, shape index: {}]   ;;  %s5932_s2 = inlined_call_operand.hbm [shape: f32[1,128], index: 2, kind: input, shape index: {}]   ;;  %s5933_s3 = inlined_call_operand.hbm [shape: bf16[128,128], index: 3, kind: input, shape index: {}]   ;;  %s5934_s4 = inlined_call_operand.hbm [shape: f32[1,128], index: 4, kind: input, shape index: {}]   ;;  %s5935_s5 = inlined_call_operand.hbm [shape: bf16[128,1024], index: 5, kind: input, shape index: {}]   ;;  %s5936_s6 = inlined_call_operand.hbm [shape: f32[1,1024], index: 6, kind: input, shape index: {}]   ;;  %s5937_s7 = inlined_call_operand.vmem [shape: f32[1,2,1,1024], index: 7, kind: output, shape index: {}]  }
   0x1   :  { %13 = vsyncpa [#allocation6], 0 }
   0x2   :  { %14 = vsyncpa [#allocation9], 0 }
   0x3   :  { %15 = vsyncpa [#allocation12], 0  ;;  %s5029_s24 = smov 0   ;;  %s5031_s25 = smov 0  }
   0x4   :  { %s5033_s26 = smov 0  }
   0x5 LB: > { %s4976_s27 = smov [#allocation5]   ;;  %s4208_s29 = sadd.s32 4294967295, %s4974_s26   ;;  %s4974_s26 = sphi %s5033_s26, %s21_s26   ;;  %s4970_s25 = sphi %s5031_s25, %s5984_s25   ;;  %s4966_s24 = sphi %s5029_s24, %s5983_s24  }
   0x6   : > { %s253_s28 = sshll.u32 %s4976_s27, 4  ;;  %p4210_p0 = scmp.ge.s32.totalorder %s4974_s26, 1  ;;  %s254_s28 = int_to_ptr.vmem [resolvable:$true] %s253_s28 }
   0x7   : > { %p229_p1 = scmp.lt.s32.totalorder %s4974_s26, 3  ;;  %p5047_p2 = scmp.eq.s32.totalorder %s4208_s29, 0 }
   0x8   : > { %s4977_s9 = smov [#allocation8]   ;;  %s36_s12 = sadd.s32 1, %s4970_s25 }
   0x9   : > { %s5957_s30 = scalar_select %p5047_p2, 1, 0 }
   0xa   : > { %p5051_p3 = pnand %p4210_p0, %p229_p1  ;;  %s277_s10 = sshll.u32 %s4977_s9, 4  ;;  %s5057_s10 = int_to_ptr.vmem [resolvable:$true] %s277_s10 }
   0xb   : > { %p5068_p6 = scmp.ge.s32.totalorder %s36_s12, 2  ;;  %s4768_s16 = scalar_lea.hbm %s5932_s2, 16 }
   0xc   : > { %s5958_s8 = scalar_select %p5051_p3, 1, 0 }
   0xd   : > { %p4692_p4 = pneg %p5051_p3  ;;  %p4769_p7 = scmp.ne.s32.totalorder %s5932_s2, %s4768_s16 }
   0xe   : > { %s5960_s13 = scalar_select %p5068_p6, 1, 0 }
   0xf   : > { %p5061_p5 = pnand %p5047_p2, %p4692_p4  ;;  %p4775_p11 = scmp.lt.u32.totalorder %s4768_s16, %s5932_s2 }
  0x11   : > { %p5080_p8 = pneg %p5061_p5 }
  0x13   : > { %p4771_p9 = pnand %p5080_p8, %p4769_p7 }
  0x15   : > { %p4772_p10 = pneg %p4771_p9 }
  0x17   : > { %p4777_p12 = pnand %p4775_p11, %p4772_p10 }
  0x19   : > { %4780 = shalt.err (!%p4777_p12)
}
  0x1a   : > { %s4781_s22 = scalar_lea.vmem %s254_s28, 16  ;;  %s4788_s23 = scalar_lea.vmem %s254_s28, 32 }
  0x1b   : > { %p4782_p13 = scmp.ne.s32.totalorder %s254_s28, %s4781_s22  ;;  %p4789_p4 = scmp.lt.s32.totalorder %s254_s28, %s254_s28 }
  0x1c   : > { %p4790_p2 = scmp.lt.s32.totalorder %s4788_s23, %s4781_s22 }
  0x1d   : > { %p4784_p0 = pnand %p4782_p13, %p5080_p8 }
  0x1e   : > { %p4791_p3 = por %p4790_p2, %p4789_p4 }
  0x1f   : > { %p4785_p1 = pneg %p4784_p0 }
  0x21   : > { %p4792_p6 = pnand %p4791_p3, %p4785_p1 }
  0x23   : > { %4795 = shalt.err (!%p4792_p6)
}
  0x24   : > { %4698 = dma.hbm_to_vmem [thread:$0]  (!%p5061_p5), %s5932_s2, 16, %s254_s28, [#allocation6]  }
  0x25   : > { %s4796_s15 = scalar_lea.hbm %s5934_s4, 16 }
  0x26   : > { %p4797_p7 = scmp.ne.s32.totalorder %s5934_s4, %s4796_s15  ;;  %p4803_p3 = scmp.lt.u32.totalorder %s4796_s15, %s5934_s4 }
  0x28   : > { %p4799_p9 = pnand %p4797_p7, %p5080_p8 }
  0x2a   : > { %p4800_p2 = pneg %p4799_p9 }
  0x2c   : > { %p4805_p6 = pnand %p4803_p3, %p4800_p2 }
  0x2e   : > { %4808 = shalt.err (!%p4805_p6)
}
  0x2f   : > { %s4809_s28 = scalar_lea.vmem %s5057_s10, 16  ;;  %s4816_s21 = scalar_lea.vmem %s5057_s10, 32 }
  0x30   : > { %p4810_p10 = scmp.ne.s32.totalorder %s5057_s10, %s4809_s28  ;;  %p4817_p13 = scmp.lt.s32.totalorder %s5057_s10, %s5057_s10 }
  0x31   : > { %p4818_p0 = scmp.lt.s32.totalorder %s4816_s21, %s4809_s28 }
  0x32   : > { %p4812_p11 = pnand %p4810_p10, %p5080_p8 }
  0x33   : > { %p4819_p1 = por %p4818_p0, %p4817_p13 }
  0x34   : > { %p4813_p12 = pneg %p4812_p11 }
  0x36   : > { %p4820_p4 = pnand %p4819_p1, %p4813_p12 }
  0x38   : > { %4823 = shalt.err (!%p4820_p4)
}
  0x39   : > { %4704 = dma.hbm_to_vmem [thread:$0]  (!%p5061_p5), %s5934_s4, 16, %s5057_s10, [#allocation9]  }
  0x3a   : > { %p5962_p7 = scmp.ne.s32.totalorder %s5960_s13, 0  ;;  %s4978_s27 = smov [#allocation3]  }
  0x3b   : > { %s242_s29 = sshll.u32 %s4978_s27, 4  ;;  %s4979_s9 = smov [#allocation7]   ;;  %s243_s29 = int_to_ptr.vmem [resolvable:$true] %s242_s29 }
  0x3c   : > { %s5986_s12 = smov (%p5962_p7, %s36_s12), 0  ;;  %s263_s14 = sshll.u32 %s4979_s9, 4  ;;  %s264_s14 = int_to_ptr.vmem [resolvable:$true] %s263_s14 }
  0x3d   : > { %s4824_s17 = scalar_lea.hbm %s5931_s1, 128 }
  0x3e   : > { %p4825_p9 = scmp.ne.s32.totalorder %s5931_s1, %s4824_s17  ;;  %p4831_p6 = scmp.lt.u32.totalorder %s4824_s17, %s5931_s1 }
  0x40   : > { %p4827_p2 = pnand %p4825_p9, %p5080_p8 }
  0x42   : > { %p4828_p3 = pneg %p4827_p2 }
  0x44   : > { %p4833_p10 = pnand %p4831_p6, %p4828_p3 }
  0x46   : > { %4836 = shalt.err (!%p4833_p10)
}
  0x47   : > { %s4837_s28 = scalar_lea.vmem %s243_s29, 128  ;;  %p4845_p0 = scmp.lt.s32.totalorder %s243_s29, %s243_s29 }
  0x48   : > { %p4838_p11 = scmp.ne.s32.totalorder %s243_s29, %s4837_s28  ;;  %p4846_p1 = scmp.lt.s32.totalorder %s4837_s28, %s4837_s28 }
  0x4a   : > { %p4840_p12 = pnand %p4838_p11, %p5080_p8  ;;  %p4847_p4 = por %p4846_p1, %p4845_p0 }
  0x4c   : > { %p4841_p13 = pneg %p4840_p12 }
  0x4e   : > { %p4848_p7 = pnand %p4847_p4, %p4841_p13 }
  0x50   : > { %4851 = shalt.err (!%p4848_p7)
}
  0x51   : > { %4695 = dma.hbm_to_vmem [thread:$0]  (!%p5061_p5), %s5931_s1, 128, %s243_s29, [#allocation4]  }
  0x52   : > { %s4852_s9 = scalar_lea.hbm %s5933_s3, 1024 }
  0x53   : > { %p4853_p9 = scmp.ne.s32.totalorder %s5933_s3, %s4852_s9  ;;  %p4859_p6 = scmp.lt.u32.totalorder %s4852_s9, %s5933_s3 }
  0x55   : > { %p4855_p2 = pnand %p4853_p9, %p5080_p8 }
  0x57   : > { %p4856_p3 = pneg %p4855_p2 }
  0x59   : > { %p4861_p10 = pnand %p4859_p6, %p4856_p3 }
  0x5b   : > { %4864 = shalt.err (!%p4861_p10)
}
  0x5c   : > { %s4865_s20 = scalar_lea.vmem %s264_s14, 1024  ;;  %p4873_p0 = scmp.lt.s32.totalorder %s264_s14, %s264_s14 }
  0x5d   : > { %p4866_p11 = scmp.ne.s32.totalorder %s264_s14, %s4865_s20  ;;  %p4874_p1 = scmp.lt.s32.totalorder %s4865_s20, %s4865_s20 }
  0x5f   : > { %p4868_p12 = pnand %p4866_p11, %p5080_p8  ;;  %p4875_p4 = por %p4874_p1, %p4873_p0 }
  0x61   : > { %p4869_p13 = pneg %p4868_p12 }
  0x63   : > { %p4876_p7 = pnand %p4875_p4, %p4869_p13 }
  0x65   : > { %4879 = shalt.err (!%p4876_p7)
}
  0x66   : > { %s4980_s29 = smov 64   ;;  %s4981_s10 = smov 4  }
  0x67   : > { %4701 = dma.hbm_to_vmem [thread:$0]  (!%p5061_p5), %s5933_s3, 1024, %s264_s14, [#allocation6], %s4980_s29, %s4980_s29, %s4981_s10  }
  0x68   : > { %s4982_s21 = smov [#allocation10]   ;;  %s4880_s9 = scalar_lea.hbm %s5935_s5, 8192 }
  0x69   : > { %s287_s22 = sshll.u32 %s4982_s21, 4  ;;  %p4881_p9 = scmp.ne.s32.totalorder %s5935_s5, %s4880_s9  ;;  %s288_s22 = int_to_ptr.vmem [resolvable:$true] %s287_s22 }
  0x6a   : > { %p4887_p6 = scmp.lt.u32.totalorder %s4880_s9, %s5935_s5 }
  0x6b   : > { %p4883_p2 = pnand %p4881_p9, %p5080_p8 }
  0x6d   : > { %p4884_p3 = pneg %p4883_p2 }
  0x6f   : > { %p4889_p10 = pnand %p4887_p6, %p4884_p3 }
  0x71   : > { %4892 = shalt.err (!%p4889_p10)
}
  0x72   : > { %s4893_s14 = scalar_lea.vmem %s288_s22, 8192  ;;  %p4901_p0 = scmp.lt.s32.totalorder %s288_s22, %s288_s22 }
  0x73   : > { %p4894_p11 = scmp.ne.s32.totalorder %s288_s22, %s4893_s14  ;;  %p4902_p1 = scmp.lt.s32.totalorder %s4893_s14, %s4893_s14 }
  0x75   : > { %p4896_p12 = pnand %p4894_p11, %p5080_p8  ;;  %p4903_p4 = por %p4902_p1, %p4901_p0 }
  0x77   : > { %p4897_p13 = pneg %p4896_p12 }
  0x79   : > { %p4904_p7 = pnand %p4903_p4, %p4897_p13 }
  0x7b   : > { %4907 = shalt.err (!%p4904_p7)
}
  0x7c   : > { %s4983_s20 = smov 512   ;;  %s4984_s29 = smov 32  }
  0x7d   : > { %4707 = dma.hbm_to_vmem [thread:$0]  (!%p5061_p5), %s5935_s5, 8192, %s288_s22, [#allocation9], %s4983_s20, %s4983_s20, %s4984_s29  }
  0x7e   : > { %s4985_s28 = smov [#allocation11]   ;;  %s4908_s9 = scalar_lea.hbm %s5936_s6, 128 }
  0x7f   : > { %s301_s21 = sshll.u32 %s4985_s28, 4  ;;  %p4909_p9 = scmp.ne.s32.totalorder %s5936_s6, %s4908_s9  ;;  %s302_s21 = int_to_ptr.vmem [resolvable:$true] %s301_s21 }
  0x80   : > { %p4915_p6 = scmp.lt.u32.totalorder %s4908_s9, %s5936_s6 }
  0x81   : > { %p4911_p2 = pnand %p4909_p9, %p5080_p8 }
  0x83   : > { %p4912_p3 = pneg %p4911_p2 }
  0x85   : > { %p4917_p10 = pnand %p4915_p6, %p4912_p3 }
  0x87   : > { %4920 = shalt.err (!%p4917_p10)
}
  0x88   : > { %s4921_s22 = scalar_lea.vmem %s302_s21, 128  ;;  %p4929_p0 = scmp.lt.s32.totalorder %s302_s21, %s302_s21 }
  0x89   : > { %p4922_p11 = scmp.ne.s32.totalorder %s302_s21, %s4921_s22  ;;  %p4930_p1 = scmp.lt.s32.totalorder %s4921_s22, %s4921_s22 }
  0x8b   : > { %p4924_p12 = pnand %p4922_p11, %p5080_p8  ;;  %p4931_p4 = por %p4930_p1, %p4929_p0 }
  0x8d   : > { %p4925_p13 = pneg %p4924_p12 }
  0x8f   : > { %p4932_p7 = pnand %p4931_p4, %p4925_p13 }
  0x91   : > { %4935 = shalt.err (!%p4932_p7)
}
  0x92   : > { %4710 = dma.hbm_to_vmem [thread:$0]  (!%p5061_p5), %s5936_s6, 128, %s302_s21, [#allocation12]  }
  0x93   : > { %p5963_p9 = scmp.ne.s32.totalorder %s5958_s8, 0 }
  0x95   : > { %329 = sbr.rel (%p5963_p9) target bundleno = 1378 (0x562), region = 48 }
  0x9c   : > { %p5964_p2 = scmp.ne.s32.totalorder %s5957_s30, 0 }
  0x9e   : > { %4949 = dma.done.wait (%p5964_p2), [#allocation4], 128  }
  0x9f   : > { %4951 = vsyncadd (%p5964_p2), [#allocation4], 4294967168 }
  0xa0   : > { %4953 = dma.done.wait (%p5964_p2), [#allocation6], 1040  }
  0xa1   : > { %4955 = vsyncadd (%p5964_p2), [#allocation6], 4294966256 }
  0xa2   : > { %4957 = dma.done.wait (%p5964_p2), [#allocation9], 8208  }
  0xa3   : > { %4959 = vsyncadd (%p5964_p2), [#allocation9], 4294959088 }
  0xa4   : > { %4961 = dma.done.wait (%p5964_p2), [#allocation12], 128  }
  0xa5   : > { %4963 = vsyncadd (%p5964_p2), [#allocation12], 4294967168  ;;  %p391_p5 = scmp.lt.s32.totalorder %s4966_s24, 1  ;;  %vm487_vm0 = vcmask 64512   ;;  %v479_v0 = vld [vmem:[#allocation3] sm:$0xff]  ;;  %v4760_v12 = vld [vmem:[#allocation7] sm:$0xff]  }
  0xa6   : > { %4474 = vmatprep.subr.mxu0 %v479_v0  ;;  %v4761_v13 = vld [vmem:[#allocation7 + $0x8] sm:$0xff]   ;;  %4572 = vmatprep.subr.bf16.mxu1 %v4760_v12  ;;  %v4762_v16 = vld [vmem:[#allocation7 + $0x10] sm:$0xff]   ;;  %v4763_v19 = vld [vmem:[#allocation7 + $0x18] sm:$0xff]  }
  0xa7   : > { %s5988_s24 = smov (!%p391_p5, %s4966_s24), 1  ;;  %4475 = vmatpush3.msra.mxu0 %v479_v0  ;;  %4573 = vmatpush3.bf16.msra.mxu1 %v4760_v12  ;;  %v4764_v22 = vld [vmem:[#allocation7 + $0x20] sm:$0xff]   ;;  %v4765_v50 = vld [vmem:[#allocation7 + $0x28] sm:$0xff]   ;;  %v4766_v53 = vld [vmem:[#allocation7 + $0x30] sm:$0xff]  }
  0xa8   : > { %s4368_s8 = sshll.u32 %s5988_s24, 9  ;;  %4574 = vmatprep.subr.bf16.mxu1 %v4761_v13  ;;  %v4767_v56 = vld [vmem:[#allocation7 + $0x38] sm:$0xff]   ;;  %s4227_s30 = sshll.u32 %s5988_s24, 3 }
  0xa9   : > { %s5224_s29 = scalar_lea.vmem %s5930_s0, %s4368_s8  ;;  %s408_s28 = scalar_lea.vmem %s5937_s7, %s4227_s30 }
  0xaa   : > { %v415_v1 = vld [vmem:[%s5224_s29] sm:$0xff]  ;;  %v416_v2 = vld [vmem:[%s5224_s29 + $0x8] sm:$0xff]  ;;  %v417_v3 = vld [vmem:[%s5224_s29 + $0x10] sm:$0xff] }
  0xab   : > { %4476 = vmatprep.mubr.msk.f32.mxu0 %vm487_vm0, %v415_v1  ;;  %v418_v4 = vld [vmem:[%s5224_s29 + $0x18] sm:$0xff]  ;;  %v419_v5 = vld [vmem:[%s5224_s29 + $0x20] sm:$0xff]  ;;  %v420_v6 = vld [vmem:[%s5224_s29 + $0x28] sm:$0xff]  ;;  %4575 = vmatpush3.bf16.msra.mxu1 %v4761_v13 }
  0xac   : > { %4477 = vmatmul.mubr.msk.f32.vlgmr.msra.gmra.mrb[0].mxu0 %vm487_vm0, %v416_v2  ;;  %v421_v7 = vld [vmem:[%s5224_s29 + $0x30] sm:$0xff]  ;;  %v422_v8 = vld [vmem:[%s5224_s29 + $0x38] sm:$0xff]  ;;  %v423_v9 = vld [vmem:[%s5224_s29 + $0x40] sm:$0xff]  ;;  %4576 = vmatprep.subr.bf16.mxu1 %v4762_v16 }
  0xad   : > { %4479 = vmatprep.mubr.msk.f32.mxu0 %vm487_vm0, %v417_v3  ;;  %v424_v10 = vld [vmem:[%s5224_s29 + $0x48] sm:$0xff]  ;;  %v425_v11 = vld [vmem:[%s5224_s29 + $0x50] sm:$0xff]  ;;  %v426_v14 = vld [vmem:[%s5224_s29 + $0x58] sm:$0xff] }
  0xae   : > { %v427_v15 = vld [vmem:[%s5224_s29 + $0x60] sm:$0xff]  ;;  %v428_v17 = vld [vmem:[%s5224_s29 + $0x68] sm:$0xff]  ;;  %v429_v18 = vld [vmem:[%s5224_s29 + $0x70] sm:$0xff] }
  0xaf   : > { %v430_v20 = vld [vmem:[%s5224_s29 + $0x78] sm:$0xff]  ;;  %v431_v21 = vld [vmem:[%s5224_s29 + $0x80] sm:$0xff]  ;;  %4577 = vmatpush3.bf16.msra.mxu1 %v4762_v16  ;;  %v432_v23 = vld [vmem:[%s5224_s29 + $0x88] sm:$0xff] }
  0xb0   : > { %4480 = vmatmul.mubr.msk.f32.gmra.mrb[2].mxu0 %vm487_vm0, %v418_v4  ;;  %4578 = vmatprep.subr.bf16.mxu1 %v4763_v19  ;;  %v433_v24 = vld [vmem:[%s5224_s29 + $0x90] sm:$0xff]  ;;  %v434_v25 = vld [vmem:[%s5224_s29 + $0x98] sm:$0xff]  ;;  %v435_v26 = vld [vmem:[%s5224_s29 + $0xa0] sm:$0xff] }
  0xb1   : > { %4482 = vmatprep.mubr.msk.f32.mxu0 %vm487_vm0, %v419_v5  ;;  %v436_v27 = vld [vmem:[%s5224_s29 + $0xa8] sm:$0xff]  ;;  %v437_v28 = vld [vmem:[%s5224_s29 + $0xb0] sm:$0xff]  ;;  %v438_v29 = vld [vmem:[%s5224_s29 + $0xb8] sm:$0xff] }
  0xb2   : > { %v439_v30 = vld [vmem:[%s5224_s29 + $0xc0] sm:$0xff]  ;;  %v440_v31 = vld [vmem:[%s5224_s29 + $0xc8] sm:$0xff]  ;;  %v441_v32 = vld [vmem:[%s5224_s29 + $0xd0] sm:$0xff] }
  0xb3   : > { %4579 = vmatpush3.bf16.msra.mxu1 %v4763_v19  ;;  %v442_v33 = vld [vmem:[%s5224_s29 + $0xd8] sm:$0xff]  ;;  %v443_v34 = vld [vmem:[%s5224_s29 + $0xe0] sm:$0xff]  ;;  %v444_v35 = vld [vmem:[%s5224_s29 + $0xe8] sm:$0xff] }
  0xb4   : > { %4483 = vmatmul.mubr.msk.f32.gmra.mrb[4].mxu0 %vm487_vm0, %v420_v6  ;;  %4580 = vmatprep.subr.bf16.mxu1 %v4764_v22  ;;  %v445_v36 = vld [vmem:[%s5224_s29 + $0xf0] sm:$0xff]  ;;  %v446_v37 = vld [vmem:[%s5224_s29 + $0xf8] sm:$0xff]  ;;  %v447_v38 = vld [vmem:[%s5224_s29 + $0x100] sm:$0xff] }
  0xb5   : > { %4485 = vmatprep.mubr.msk.f32.mxu0 %vm487_vm0, %v421_v7  ;;  %v448_v39 = vld [vmem:[%s5224_s29 + $0x108] sm:$0xff]  ;;  %v449_v40 = vld [vmem:[%s5224_s29 + $0x110] sm:$0xff]  ;;  %v450_v41 = vld [vmem:[%s5224_s29 + $0x118] sm:$0xff] }
  0xb6   : > { %v451_v42 = vld [vmem:[%s5224_s29 + $0x120] sm:$0xff]  ;;  %v452_v43 = vld [vmem:[%s5224_s29 + $0x128] sm:$0xff]  ;;  %v453_v44 = vld [vmem:[%s5224_s29 + $0x130] sm:$0xff] }
  0xb7   : > { %4581 = vmatpush3.bf16.msra.mxu1 %v4764_v22  ;;  %v454_v45 = vld [vmem:[%s5224_s29 + $0x138] sm:$0xff]  ;;  %v455_v46 = vld [vmem:[%s5224_s29 + $0x140] sm:$0xff]  ;;  %v456_v47 = vld [vmem:[%s5224_s29 + $0x148] sm:$0xff] }
  0xb8   : > { %4486 = vmatmul.mubr.msk.f32.gmra.mrb[6].mxu0 %vm487_vm0, %v422_v8  ;;  %v457_v48 = vld [vmem:[%s5224_s29 + $0x150] sm:$0xff]  ;;  %v458_v49 = vld [vmem:[%s5224_s29 + $0x158] sm:$0xff]  ;;  %v459_v51 = vld [vmem:[%s5224_s29 + $0x160] sm:$0xff]  ;;  %4582 = vmatprep.subr.bf16.mxu1 %v4765_v50 }
  0xb9   : > { %4488 = vmatprep.mubr.msk.f32.mxu0 %vm487_vm0, %v423_v9  ;;  %v460_v52 = vld [vmem:[%s5224_s29 + $0x168] sm:$0xff]  ;;  %v461_v54 = vld [vmem:[%s5224_s29 + $0x170] sm:$0xff]  ;;  %v462_v55 = vld [vmem:[%s5224_s29 + $0x178] sm:$0xff] }
  0xba   : > { %v463_v57 = vld [vmem:[%s5224_s29 + $0x180] sm:$0xff]  ;;  %v464_v58 = vld [vmem:[%s5224_s29 + $0x188] sm:$0xff]  ;;  %v465_v59 = vld [vmem:[%s5224_s29 + $0x190] sm:$0xff] }
  0xbb   : > { %4583 = vmatpush3.bf16.msra.mxu1 %v4765_v50  ;;  %v466_v60 = vld [vmem:[%s5224_s29 + $0x198] sm:$0xff]  ;;  %v467_v61 = vld [vmem:[%s5224_s29 + $0x1a0] sm:$0xff]  ;;  %v468_v62 = vld [vmem:[%s5224_s29 + $0x1a8] sm:$0xff] }
  0xbc   : > { %4489 = vmatmul.mubr.msk.f32.gmra.mrb[8].mxu0 %vm487_vm0, %v424_v10  ;;  %4584 = vmatprep.subr.bf16.mxu1 %v4766_v53  ;;  %v469_v63 = vld [vmem:[%s5224_s29 + $0x1b0] sm:$0xff]  ;;  %v470_v0 = vld [vmem:[%s5224_s29 + $0x1b8] sm:$0xff]  ;;  %v471_v1 = vld [vmem:[%s5224_s29 + $0x1c0] sm:$0xff] }
  0xbd   : > { %4491 = vmatprep.mubr.msk.f32.mxu0 %vm487_vm0, %v425_v11  ;;  %v472_v2 = vld [vmem:[%s5224_s29 + $0x1c8] sm:$0xff]  ;;  %v473_v3 = vld [vmem:[%s5224_s29 + $0x1d0] sm:$0xff]  ;;  %v474_v4 = vld [vmem:[%s5224_s29 + $0x1d8] sm:$0xff] }
  0xbe   : > { %v475_v5 = vld [vmem:[%s5224_s29 + $0x1e0] sm:$0xff]  ;;  %v476_v6 = vld [vmem:[%s5224_s29 + $0x1e8] sm:$0xff]  ;;  %v477_v7 = vld [vmem:[%s5224_s29 + $0x1f0] sm:$0xff] }
  0xbf   : > { %4585 = vmatpush3.bf16.msra.mxu1 %v4766_v53  ;;  %v478_v8 = vld [vmem:[%s5224_s29 + $0x1f8] sm:$0xff] }
  0xc0   : > { %4492 = vmatmul.mubr.msk.f32.gmra.mrb[10].mxu0 %vm487_vm0, %v426_v14  ;;  %4586 = vmatprep.subr.bf16.mxu1 %v4767_v56  ;;  %v1617_v9 = vld [vmem:[#allocation10] sm:$0xff] }
  0xc1   : > { %4494 = vmatprep.mubr.msk.f32.mxu0 %vm487_vm0, %v427_v15  ;;  %v1618_v10 = vld [vmem:[#allocation10 + $0x20] sm:$0xff] }
  0xc2   : > { %v4302_v11 = vcombine.low %v1617_v9, %v1618_v10  ;;  %v4303_v12 = vcombine.high %v1617_v9, %v1618_v10  ;;  %v1619_v13 = vld [vmem:[#allocation10 + $0x40] sm:$0xff] }
  0xc3   : > { %4587 = vmatpush3.bf16.msra.mxu1 %v4767_v56  ;;  %v1620_v14 = vld [vmem:[#allocation10 + $0x60] sm:$0xff] }
  0xc4   : > { %4495 = vmatmul.mubr.msk.f32.gmra.mrb[12].mxu0 %vm487_vm0, %v428_v17  ;;  %1713 = vmatprep.subr.bf16.mxu0 %v4303_v12  ;;  %v4304_v15 = vcombine.low %v1619_v13, %v1620_v14  ;;  %v4305_v16 = vcombine.high %v1619_v13, %v1620_v14  ;;  %v1621_v17 = vld [vmem:[#allocation10 + $0x80] sm:$0xff] }
  0xc5   : > { %4497 = vmatprep.mubr.msk.f32.mxu0 %vm487_vm0, %v429_v18  ;;  %1714 = vmatpush1.bf16.msra.mxu0 %v4302_v11  ;;  %v1622_v18 = vld [vmem:[#allocation10 + $0xa0] sm:$0xff] }
  0xc6   : > { %1715 = vmatprep.subr.bf16.mxu0 %v4305_v16  ;;  %v4306_v19 = vcombine.low %v1621_v17, %v1622_v18  ;;  %v1624_v22 = vld [vmem:[#allocation10 + $0xe0] sm:$0xff]  ;;  %v2236_v16 = vld [vmem:[#allocation10 + $0xe8] sm:$0xff] }
  0xc8   : > { %4498 = vmatmul.mubr.msk.f32.gmra.mrb[14].mxu0 %vm487_vm0, %v430_v20  ;;  %v4307_v20 = vcombine.high %v1621_v17, %v1622_v18 }
  0xc9   : > { %4500 = vmatprep.mubr.msk.f32.mxu0 %vm487_vm0, %v431_v21  ;;  %1716 = vmatpush1.bf16.msra.mxu0 %v4304_v15  ;;  %v1623_v21 = vld [vmem:[#allocation10 + $0xc0] sm:$0xff]  ;;  %v2235_v15 = vld [vmem:[#allocation10 + $0xc8] sm:$0xff] }
  0xca   : > { %1717 = vmatprep.subr.bf16.mxu0 %v4307_v20 }
  0xcc   : > { %4501 = vmatmul.mubr.msk.f32.gmra.mrb[16].mxu0 %vm487_vm0, %v432_v23  ;;  %v4308_v23 = vcombine.low %v1623_v21, %v1624_v22 }
  0xcd   : > { %4503 = vmatprep.mubr.msk.f32.mxu0 %vm487_vm0, %v433_v24  ;;  %1718 = vmatpush1.bf16.msra.mxu0 %v4306_v19  ;;  %v4309_v24 = vcombine.high %v1623_v21, %v1624_v22 }
  0xcf   : > { %1719 = vmatprep.subr.bf16.mxu0 %v4309_v24  ;;  %v4325_v24 = vcombine.high %v2235_v15, %v2236_v16 }
  0xd0   : > { %4504 = vmatmul.mubr.msk.f32.gmra.mrb[18].mxu0 %vm487_vm0, %v434_v25  ;;  %v1625_v25 = vld [vmem:[#allocation10 + $0x100] sm:$0xff] }
  0xd1   : > { %4506 = vmatprep.mubr.msk.f32.mxu0 %vm487_vm0, %v435_v26  ;;  %1720 = vmatpush1.bf16.msra.mxu0 %v4308_v23  ;;  %v1626_v26 = vld [vmem:[#allocation10 + $0x120] sm:$0xff] }
  0xd4   : > { %4507 = vmatmul.mubr.msk.f32.gmra.mrb[20].mxu0 %vm487_vm0, %v436_v27  ;;  %v4310_v27 = vcombine.low %v1625_v25, %v1626_v26 }
  0xd5   : > { %4509 = vmatprep.mubr.msk.f32.mxu0 %vm487_vm0, %v437_v28  ;;  %v4311_v28 = vcombine.high %v1625_v25, %v1626_v26  ;;  %v2237_v26 = vld [vmem:[#allocation10 + $0x108] sm:$0xff] }
  0xd7   : > { %1721 = vmatprep.subr.bf16.mxu0 %v4311_v28 }
  0xd8   : > { %4510 = vmatmul.mubr.msk.f32.gmra.mrb[22].mxu0 %vm487_vm0, %v438_v29  ;;  %v2229_v29 = vld [vmem:[#allocation10 + $0x8] sm:$0xff] }
  0xd9   : > { %4512 = vmatprep.mubr.msk.f32.mxu0 %vm487_vm0, %v439_v30  ;;  %1722 = vmatpush1.bf16.msra.mxu0 %v4310_v27  ;;  %v2230_v30 = vld [vmem:[#allocation10 + $0x28] sm:$0xff] }
  0xda   : > { %v2238_v27 = vld [vmem:[#allocation10 + $0x128] sm:$0xff] }
  0xdc   : > { %4513 = vmatmul.mubr.msk.f32.gmra.mrb[24].mxu0 %vm487_vm0, %v440_v31  ;;  %v4319_v31 = vcombine.high %v2229_v29, %v2230_v30 }
  0xdd   : > { %4515 = vmatprep.mubr.msk.f32.mxu0 %vm487_vm0, %v441_v32  ;;  %v1627_v32 = vld [vmem:[#allocation10 + $0x140] sm:$0xff] }
  0xde   : > { %2325 = vmatprep.subr.bf16.mxu1 %v4319_v31 }
  0xe0   : > { %4516 = vmatmul.mubr.msk.f32.gmra.mrb[26].mxu0 %vm487_vm0, %v442_v33  ;;  %v1628_v33 = vld [vmem:[#allocation10 + $0x160] sm:$0xff] }
  0xe1   : > { %4518 = vmatprep.mubr.msk.f32.mxu0 %vm487_vm0, %v443_v34  ;;  %v4312_v34 = vcombine.low %v1627_v32, %v1628_v33 }
  0xe4   : > { %4519 = vmatmul.mubr.msk.f32.gmra.mrb[28].mxu0 %vm487_vm0, %v444_v35  ;;  %v4313_v35 = vcombine.high %v1627_v32, %v1628_v33  ;;  %v4324_v32 = vcombine.low %v2235_v15, %v2236_v16 }
  0xe5   : > { %4521 = vmatprep.mubr.msk.f32.mxu0 %vm487_vm0, %v445_v36  ;;  %v1629_v36 = vld [vmem:[#allocation10 + $0x180] sm:$0xff] }
  0xe6   : > { %1723 = vmatprep.subr.bf16.mxu0 %v4313_v35  ;;  %v4327_v35 = vcombine.high %v2237_v26, %v2238_v27 }
  0xe7   : > { %1724 = vmatpush1.bf16.msra.mxu0 %v4312_v34 }
  0xe8   : > { %4522 = vmatmul.mubr.msk.f32.gmra.mrb[30].mxu0 %vm487_vm0, %v446_v37  ;;  %v1630_v37 = vld [vmem:[#allocation10 + $0x1a0] sm:$0xff] }
  0xe9   : > { %4524 = vmatprep.mubr.msk.f32.mxu0 %vm487_vm0, %v447_v38  ;;  %v4314_v38 = vcombine.low %v1629_v36, %v1630_v37 }
  0xec   : > { %4525 = vmatmul.mubr.msk.f32.gmra.mrb[32].mxu0 %vm487_vm0, %v448_v39  ;;  %v4315_v39 = vcombine.high %v1629_v36, %v1630_v37  ;;  %v2239_v37 = vld [vmem:[#allocation10 + $0x148] sm:$0xff] }
  0xed   : > { %4527 = vmatprep.mubr.msk.f32.mxu0 %vm487_vm0, %v449_v40  ;;  %v1631_v40 = vld [vmem:[#allocation10 + $0x1c0] sm:$0xff] }
  0xee   : > { %1725 = vmatprep.subr.bf16.mxu0 %v4315_v39 }
  0xef   : > { %1726 = vmatpush1.bf16.msra.mxu0 %v4314_v38  ;;  %v2240_v38 = vld [vmem:[#allocation10 + $0x168] sm:$0xff] }
  0xf0   : > { %4528 = vmatmul.mubr.msk.f32.gmra.mrb[34].mxu0 %vm487_vm0, %v450_v41  ;;  %v1632_v41 = vld [vmem:[#allocation10 + $0x1e0] sm:$0xff] }
  0xf1   : > { %4530 = vmatprep.mubr.msk.f32.mxu0 %vm487_vm0, %v451_v42  ;;  %v4316_v42 = vcombine.low %v1631_v40, %v1632_v41 }
  0xf4   : > { %4531 = vmatmul.mubr.msk.f32.gmra.mrb[36].mxu0 %vm487_vm0, %v452_v43  ;;  %v4317_v43 = vcombine.high %v1631_v40, %v1632_v41 }
  0xf5   : > { %4533 = vmatprep.mubr.msk.f32.mxu0 %vm487_vm0, %v453_v44  ;;  %v5354_v44 = vld [vmem:[#allocation5] ss:$0 sm:$0xff] }
  0xf6   : > { %1727 = vmatprep.subr.bf16.mxu0 %v4317_v43  ;;  %v4326_v43 = vcombine.low %v2237_v26, %v2238_v27 }
  0xf7   : > { %1728 = vmatpush1.bf16.msra.mxu0 %v4316_v42 }
  0xf8   : > { %4534 = vmatmul.mubr.msk.f32.gmra.mrb[38].mxu0 %vm487_vm0, %v454_v45 }
  0xf9   : > { %4536 = vmatprep.mubr.msk.f32.mxu0 %vm487_vm0, %v455_v46 }
  0xfc   : > { %4537 = vmatmul.mubr.msk.f32.gmra.mrb[40].mxu0 %vm487_vm0, %v456_v47 }
  0xfd   : > { %4539 = vmatprep.mubr.msk.f32.mxu0 %vm487_vm0, %v457_v48 }
 0x100   : > { %4540 = vmatmul.mubr.msk.f32.gmra.mrb[42].mxu0 %vm487_vm0, %v458_v49 }
 0x101   : > { %4542 = vmatprep.mubr.msk.f32.mxu0 %vm487_vm0, %v459_v51 }
 0x104   : > { %4543 = vmatmul.mubr.msk.f32.gmra.mrb[44].mxu0 %vm487_vm0, %v460_v52 }
 0x105   : > { %4545 = vmatprep.mubr.msk.f32.mxu0 %vm487_vm0, %v461_v54 }
 0x108   : > { %4546 = vmatmul.mubr.msk.f32.gmra.mrb[46].mxu0 %vm487_vm0, %v462_v55 }
 0x109   : > { %4548 = vmatprep.mubr.msk.f32.mxu0 %vm487_vm0, %v463_v57  ;;  %v2231_v57 = vld [vmem:[#allocation10 + $0x48] sm:$0xff] }
 0x10c   : > { %4549 = vmatmul.mubr.msk.f32.gmra.mrb[48].mxu0 %vm487_vm0, %v464_v58  ;;  %v2232_v58 = vld [vmem:[#allocation10 + $0x68] sm:$0xff] }
 0x10d   : > { %4551 = vmatprep.mubr.msk.f32.mxu0 %vm487_vm0, %v465_v59  ;;  %v4320_v10 = vcombine.low %v2231_v57, %v2232_v58 }
 0x110   : > { %4552 = vmatmul.mubr.msk.f32.gmra.mrb[50].mxu0 %vm487_vm0, %v466_v60 }
 0x111   : > { %4554 = vmatprep.mubr.msk.f32.mxu0 %vm487_vm0, %v467_v61 }
 0x114   : > { %4555 = vmatmul.mubr.msk.f32.gmra.mrb[52].mxu0 %vm487_vm0, %v468_v62 }
 0x115   : > { %4557 = vmatprep.mubr.msk.f32.mxu0 %vm487_vm0, %v469_v63  ;;  %v4318_v63 = vcombine.low %v2229_v29, %v2230_v30 }
 0x118   : > { %4558 = vmatmul.mubr.msk.f32.gmra.mrb[54].mxu0 %vm487_vm0, %v470_v0 }
 0x119   : > { %4560 = vmatprep.mubr.msk.f32.mxu0 %vm487_vm0, %v471_v1 }
 0x11c   : > { %4561 = vmatmul.mubr.msk.f32.gmra.mrb[56].mxu0 %vm487_vm0, %v472_v2  ;;  %v4321_v2 = vcombine.high %v2231_v57, %v2232_v58 }
 0x11d   : > { %4563 = vmatprep.mubr.msk.f32.mxu0 %vm487_vm0, %v473_v3 }
 0x120   : > { %4564 = vmatmul.mubr.msk.f32.gmra.mrb[58].mxu0 %vm487_vm0, %v474_v4  ;;  %v2233_v4 = vld [vmem:[#allocation10 + $0x88] sm:$0xff] }
 0x121   : > { %4566 = vmatprep.mubr.msk.f32.mxu0 %vm487_vm0, %v475_v5  ;;  %v2234_v5 = vld [vmem:[#allocation10 + $0xa8] sm:$0xff] }
 0x122   : > { %v4323_v13 = vcombine.high %v2233_v4, %v2234_v5  ;;  %v4322_v21 = vcombine.low %v2233_v4, %v2234_v5 }
 0x124   : > { %4567 = vmatmul.mubr.msk.f32.gmra.mrb[60].mxu0 %vm487_vm0, %v476_v6 }
 0x125   : > { %4569 = vmatprep.mubr.msk.f32.mxu0 %vm487_vm0, %v477_v7 }
 0x128   : > { %4570 = vmatmul.mubr.msk.f32.gmra.mrb[62].mxu0 %vm487_vm0, %v478_v8 }
 0x17f   : > { %v4478_v45 = vpop.f32.mrb[0].mxu0 }
 0x180   : > { %v746_v46 = vpop.f32.mrb[1].mxu0  ;;  %v752_v47 = vadd.f32 %v4478_v45, %v5354_v44 }
 0x181   : > { %v747_v48 = vadd.f32 %v5354_v44, %v746_v46 }
 0x182   : > { %v1066_v49 = vmax.f32 %v752_v47, 0.0  ;;  %v4329_v47 = vcombine.high %v2239_v37, %v2240_v38 }
 0x183   : > { %v4481_v50 = vpop.f32.mrb[2].mxu0  ;;  %v1065_v51 = vmax.f32 %v747_v48, 0.0 }
 0x184   : > { %v762_v52 = vadd.f32 %v4481_v50, %v5354_v44  ;;  %v756_v53 = vpop.f32.mrb[3].mxu0 }
 0x185   : > { %v757_v54 = vadd.f32 %v5354_v44, %v756_v53  ;;  %v1129_v55 = vpack.c.bf16 %v1066_v49, %v1065_v51  ;;  %v4328_v53 = vcombine.low %v2239_v37, %v2240_v38 }
 0x186   : > { %v1068_v56 = vmax.f32 %v762_v52, 0.0 }
 0x187   : > { %v1067_v59 = vmax.f32 %v757_v54, 0.0  ;;  %4588 = vmatprep.mubr.bf16.mxu1 %v1129_v55  ;;  %v4484_v60 = vpop.f32.mrb[4].mxu0 }
 0x188   : > { %v772_v61 = vadd.f32 %v4484_v60, %v5354_v44  ;;  %v766_v62 = vpop.f32.mrb[5].mxu0 }
 0x189   : > { %v1130_v0 = vpack.c.bf16 %v1068_v56, %v1067_v59  ;;  %v767_v1 = vadd.f32 %v5354_v44, %v766_v62 }
 0x18a   : > { %v1070_v3 = vmax.f32 %v772_v61, 0.0 }
 0x18b   : > { %4589 = vmatmul.mubr.bf16.vlgmr.msra.gmra.mrb[0].mxu1 %v1130_v0  ;;  %v1069_v6 = vmax.f32 %v767_v1, 0.0  ;;  %v4487_v7 = vpop.f32.mrb[6].mxu0 }
 0x18c   : > { %v782_v8 = vadd.f32 %v4487_v7, %v5354_v44  ;;  %v776_v9 = vpop.f32.mrb[7].mxu0  ;;  %2326 = vmatpush1.bf16.msra.mxu1 %v4318_v63 }
 0x18d   : > { %v777_v11 = vadd.f32 %v5354_v44, %v776_v9  ;;  %v1131_v12 = vpack.c.bf16 %v1070_v3, %v1069_v6  ;;  %2327 = vmatprep.subr.bf16.mxu1 %v4321_v2 }
 0x18e   : > { %v1072_v14 = vmax.f32 %v782_v8, 0.0 }
 0x18f   : > { %v1071_v17 = vmax.f32 %v777_v11, 0.0  ;;  %4592 = vmatprep.mubr.bf16.mxu1 %v1131_v12  ;;  %v4490_v18 = vpop.f32.mrb[8].mxu0 }
 0x190   : > { %v792_v19 = vadd.f32 %v4490_v18, %v5354_v44  ;;  %v786_v20 = vpop.f32.mrb[9].mxu0  ;;  %2328 = vmatpush1.bf16.msra.mxu1 %v4320_v10 }
 0x191   : > { %v1132_v22 = vpack.c.bf16 %v1072_v14, %v1071_v17  ;;  %v787_v23 = vadd.f32 %v5354_v44, %v786_v20  ;;  %2329 = vmatprep.subr.bf16.mxu1 %v4323_v13 }
 0x192   : > { %v1074_v25 = vmax.f32 %v792_v19, 0.0 }
 0x193   : > { %4593 = vmatmul.mubr.bf16.gmra.mrb[4].mxu1 %v1132_v22  ;;  %v1073_v28 = vmax.f32 %v787_v23, 0.0  ;;  %v4493_v29 = vpop.f32.mrb[10].mxu0 }
 0x194   : > { %v802_v30 = vadd.f32 %v4493_v29, %v5354_v44  ;;  %v796_v31 = vpop.f32.mrb[11].mxu0  ;;  %2330 = vmatpush1.bf16.msra.mxu1 %v4322_v21 }
 0x195   : > { %v797_v33 = vadd.f32 %v5354_v44, %v796_v31  ;;  %v1133_v34 = vpack.c.bf16 %v1074_v25, %v1073_v28  ;;  %2331 = vmatprep.subr.bf16.mxu1 %v4325_v24 }
 0x196   : > { %v1076_v36 = vmax.f32 %v802_v30, 0.0 }
 0x197   : > { %v1075_v39 = vmax.f32 %v797_v33, 0.0  ;;  %4596 = vmatprep.mubr.bf16.mxu1 %v1133_v34  ;;  %v4496_v40 = vpop.f32.mrb[12].mxu0 }
 0x198   : > { %v812_v41 = vadd.f32 %v4496_v40, %v5354_v44  ;;  %v806_v42 = vpop.f32.mrb[13].mxu0  ;;  %2332 = vmatpush1.bf16.msra.mxu1 %v4324_v32 }
 0x199   : > { %v1134_v45 = vpack.c.bf16 %v1076_v36, %v1075_v39  ;;  %v807_v46 = vadd.f32 %v5354_v44, %v806_v42  ;;  %2333 = vmatprep.subr.bf16.mxu1 %v4327_v35 }
 0x19a   : > { %v1078_v48 = vmax.f32 %v812_v41, 0.0 }
 0x19b   : > { %4597 = vmatmul.mubr.bf16.gmra.mrb[8].mxu1 %v1134_v45  ;;  %v1077_v49 = vmax.f32 %v807_v46, 0.0  ;;  %v4499_v50 = vpop.f32.mrb[14].mxu0 }
 0x19c   : > { %v822_v51 = vadd.f32 %v4499_v50, %v5354_v44  ;;  %v816_v52 = vpop.f32.mrb[15].mxu0  ;;  %2334 = vmatpush1.bf16.msra.mxu1 %v4326_v43 }
 0x19d   : > { %v817_v54 = vadd.f32 %v5354_v44, %v816_v52  ;;  %v1135_v55 = vpack.c.bf16 %v1078_v48, %v1077_v49  ;;  %2335 = vmatprep.subr.bf16.mxu1 %v4329_v47 }
 0x19e   : > { %v1080_v56 = vmax.f32 %v822_v51, 0.0 }
 0x19f   : > { %v1079_v57 = vmax.f32 %v817_v54, 0.0  ;;  %4600 = vmatprep.mubr.bf16.mxu1 %v1135_v55  ;;  %v4502_v58 = vpop.f32.mrb[16].mxu0 }
 0x1a0   : > { %v832_v59 = vadd.f32 %v4502_v58, %v5354_v44  ;;  %v826_v60 = vpop.f32.mrb[17].mxu0  ;;  %2336 = vmatpush1.bf16.msra.mxu1 %v4328_v53 }
 0x1a1   : > { %v1136_v61 = vpack.c.bf16 %v1080_v56, %v1079_v57  ;;  %v827_v62 = vadd.f32 %v5354_v44, %v826_v60 }
 0x1a2   : > { %v1082_v63 = vmax.f32 %v832_v59, 0.0 }
 0x1a3   : > { %4601 = vmatmul.mubr.bf16.gmra.mrb[12].mxu1 %v1136_v61  ;;  %v1081_v0 = vmax.f32 %v827_v62, 0.0  ;;  %v4505_v1 = vpop.f32.mrb[18].mxu0 }
 0x1a4   : > { %v842_v2 = vadd.f32 %v4505_v1, %v5354_v44  ;;  %v836_v3 = vpop.f32.mrb[19].mxu0 }
 0x1a5   : > { %v837_v4 = vadd.f32 %v5354_v44, %v836_v3  ;;  %v1137_v5 = vpack.c.bf16 %v1082_v63, %v1081_v0 }
 0x1a6   : > { %v1084_v6 = vmax.f32 %v842_v2, 0.0 }
 0x1a7   : > { %v1083_v7 = vmax.f32 %v837_v4, 0.0  ;;  %4604 = vmatprep.mubr.bf16.mxu1 %v1137_v5  ;;  %v4508_v8 = vpop.f32.mrb[20].mxu0 }
 0x1a8   : > { %v852_v9 = vadd.f32 %v4508_v8, %v5354_v44  ;;  %v846_v10 = vpop.f32.mrb[21].mxu0 }
 0x1a9   : > { %v1138_v11 = vpack.c.bf16 %v1084_v6, %v1083_v7  ;;  %v847_v12 = vadd.f32 %v5354_v44, %v846_v10 }
 0x1aa   : > { %v1086_v13 = vmax.f32 %v852_v9, 0.0 }
 0x1ab   : > { %4605 = vmatmul.mubr.bf16.gmra.mrb[16].mxu1 %v1138_v11  ;;  %v1085_v14 = vmax.f32 %v847_v12, 0.0  ;;  %v4511_v15 = vpop.f32.mrb[22].mxu0 }
 0x1ac   : > { %v862_v16 = vadd.f32 %v4511_v15, %v5354_v44  ;;  %v856_v17 = vpop.f32.mrb[23].mxu0 }
 0x1ad   : > { %v857_v18 = vadd.f32 %v5354_v44, %v856_v17  ;;  %v1139_v19 = vpack.c.bf16 %v1086_v13, %v1085_v14 }
 0x1ae   : > { %v1088_v20 = vmax.f32 %v862_v16, 0.0 }
 0x1af   : > { %v1087_v21 = vmax.f32 %v857_v18, 0.0  ;;  %4608 = vmatprep.mubr.bf16.mxu1 %v1139_v19  ;;  %v4514_v22 = vpop.f32.mrb[24].mxu0 }
 0x1b0   : > { %v872_v23 = vadd.f32 %v4514_v22, %v5354_v44  ;;  %v866_v24 = vpop.f32.mrb[25].mxu0 }
 0x1b1   : > { %v1140_v25 = vpack.c.bf16 %v1088_v20, %v1087_v21  ;;  %v867_v26 = vadd.f32 %v5354_v44, %v866_v24 }
 0x1b2   : > { %v1090_v27 = vmax.f32 %v872_v23, 0.0 }
 0x1b3   : > { %4609 = vmatmul.mubr.bf16.gmra.mrb[20].mxu1 %v1140_v25  ;;  %v1089_v28 = vmax.f32 %v867_v26, 0.0  ;;  %v4517_v29 = vpop.f32.mrb[26].mxu0 }
 0x1b4   : > { %v882_v30 = vadd.f32 %v4517_v29, %v5354_v44  ;;  %v876_v31 = vpop.f32.mrb[27].mxu0 }
 0x1b5   : > { %v877_v32 = vadd.f32 %v5354_v44, %v876_v31  ;;  %v1141_v33 = vpack.c.bf16 %v1090_v27, %v1089_v28 }
 0x1b6   : > { %v1092_v34 = vmax.f32 %v882_v30, 0.0 }
 0x1b7   : > { %v1091_v35 = vmax.f32 %v877_v32, 0.0  ;;  %4612 = vmatprep.mubr.bf16.mxu1 %v1141_v33  ;;  %v4520_v36 = vpop.f32.mrb[28].mxu0 }
 0x1b8   : > { %v892_v37 = vadd.f32 %v4520_v36, %v5354_v44  ;;  %v886_v38 = vpop.f32.mrb[29].mxu0 }
 0x1b9   : > { %v1142_v39 = vpack.c.bf16 %v1092_v34, %v1091_v35  ;;  %v887_v40 = vadd.f32 %v5354_v44, %v886_v38 }
 0x1ba   : > { %v1094_v41 = vmax.f32 %v892_v37, 0.0 }
 0x1bb   : > { %4613 = vmatmul.mubr.bf16.gmra.mrb[24].mxu1 %v1142_v39  ;;  %v1093_v42 = vmax.f32 %v887_v40, 0.0  ;;  %v4523_v43 = vpop.f32.mrb[30].mxu0 }
 0x1bc   : > { %v902_v45 = vadd.f32 %v4523_v43, %v5354_v44  ;;  %v896_v46 = vpop.f32.mrb[31].mxu0 }
 0x1bd   : > { %v897_v47 = vadd.f32 %v5354_v44, %v896_v46  ;;  %v1143_v48 = vpack.c.bf16 %v1094_v41, %v1093_v42  ;;  %v2241_v41 = vld [vmem:[#allocation10 + $0x188] sm:$0xff] }
 0x1be   : > { %v1096_v49 = vmax.f32 %v902_v45, 0.0  ;;  %v2242_v42 = vld [vmem:[#allocation10 + $0x1a8] sm:$0xff] }
 0x1bf   : > { %v1095_v50 = vmax.f32 %v897_v47, 0.0  ;;  %4616 = vmatprep.mubr.bf16.mxu1 %v1143_v48  ;;  %v4526_v51 = vpop.f32.mrb[32].mxu0  ;;  %v4331_v45 = vcombine.high %v2241_v41, %v2242_v42  ;;  %v4330_v48 = vcombine.low %v2241_v41, %v2242_v42 }
 0x1c0   : > { %v912_v52 = vadd.f32 %v4526_v51, %v5354_v44  ;;  %v906_v53 = vpop.f32.mrb[33].mxu0 }
 0x1c1   : > { %v1144_v54 = vpack.c.bf16 %v1096_v49, %v1095_v50  ;;  %v907_v55 = vadd.f32 %v5354_v44, %v906_v53  ;;  %2337 = vmatprep.subr.bf16.mxu1 %v4331_v45  ;;  %v2243_v53 = vld [vmem:[#allocation10 + $0x1c8] sm:$0xff] }
 0x1c2   : > { %v1098_v56 = vmax.f32 %v912_v52, 0.0  ;;  %2338 = vmatpush1.bf16.msra.mxu1 %v4330_v48 }
 0x1c3   : > { %4617 = vmatmul.mubr.bf16.gmra.mrb[28].mxu1 %v1144_v54  ;;  %v1097_v57 = vmax.f32 %v907_v55, 0.0  ;;  %v4529_v58 = vpop.f32.mrb[34].mxu0  ;;  %v2244_v54 = vld [vmem:[#allocation10 + $0x1e8] sm:$0xff] }
 0x1c4   : > { %v922_v59 = vadd.f32 %v4529_v58, %v5354_v44  ;;  %v916_v60 = vpop.f32.mrb[35].mxu0 }
 0x1c5   : > { %v917_v61 = vadd.f32 %v5354_v44, %v916_v60  ;;  %v1145_v62 = vpack.c.bf16 %v1098_v56, %v1097_v57  ;;  %v4333_v56 = vcombine.high %v2243_v53, %v2244_v54 }
 0x1c6   : > { %v1100_v63 = vmax.f32 %v922_v59, 0.0  ;;  %v4332_v59 = vcombine.low %v2243_v53, %v2244_v54  ;;  %v5433_v54 = vld [vmem:[#allocation8] ss:$0 sm:$0xff] }
 0x1c7   : > { %v1099_v0 = vmax.f32 %v917_v61, 0.0  ;;  %4620 = vmatprep.mubr.bf16.mxu1 %v1145_v62  ;;  %v4532_v1 = vpop.f32.mrb[36].mxu0  ;;  %2339 = vmatprep.subr.bf16.mxu1 %v4333_v56 }
 0x1c8   : > { %v932_v2 = vadd.f32 %v4532_v1, %v5354_v44  ;;  %v926_v3 = vpop.f32.mrb[37].mxu0  ;;  %2340 = vmatpush1.bf16.msra.mxu1 %v4332_v59  ;;  %v5408_v1 = vld [vmem:[#allocation10 + $0x10] sm:$0xff] }
 0x1c9   : > { %v1146_v4 = vpack.c.bf16 %v1100_v63, %v1099_v0  ;;  %v927_v5 = vadd.f32 %v5354_v44, %v926_v3 }
 0x1ca   : > { %v1102_v6 = vmax.f32 %v932_v2, 0.0  ;;  %v5410_v2 = vld [vmem:[#allocation10 + $0x30] sm:$0xff] }
 0x1cb   : > { %4621 = vmatmul.mubr.bf16.gmra.mrb[32].mxu1 %v1146_v4  ;;  %v1101_v7 = vmax.f32 %v927_v5, 0.0  ;;  %v4535_v8 = vpop.f32.mrb[38].mxu0  ;;  %v4986_v5 = vmov 0  }
 0x1cc   : > { %v942_v9 = vadd.f32 %v4535_v8, %v5354_v44  ;;  %v936_v10 = vpop.f32.mrb[39].mxu0  ;;  %1745 = vmatprep.mubr.bf16.mxu0 %v4986_v5 }
 0x1cd   : > { %v937_v11 = vadd.f32 %v5354_v44, %v936_v10  ;;  %v1147_v12 = vpack.c.bf16 %v1102_v6, %v1101_v7  ;;  %v4334_v6 = vcombine.low %v5408_v1, %v5410_v2  ;;  %v4335_v7 = vcombine.high %v5408_v1, %v5410_v2  ;;  %v2843_v2 = vld [vmem:[#allocation10 + $0xd0] sm:$0xff] }
 0x1ce   : > { %v1104_v13 = vmax.f32 %v942_v9, 0.0 }
 0x1cf   : > { %v1103_v14 = vmax.f32 %v937_v11, 0.0  ;;  %4624 = vmatprep.mubr.bf16.mxu1 %v1147_v12  ;;  %v4538_v15 = vpop.f32.mrb[40].mxu0  ;;  %2933 = vmatprep.subr.bf16.mxu0 %v4335_v7 }
 0x1d0   : > { %v952_v16 = vadd.f32 %v4538_v15, %v5354_v44  ;;  %v946_v17 = vpop.f32.mrb[41].mxu0 }
 0x1d1   : > { %v1148_v18 = vpack.c.bf16 %v1104_v13, %v1103_v14  ;;  %v947_v19 = vadd.f32 %v5354_v44, %v946_v17 }
 0x1d2   : > { %v1106_v20 = vmax.f32 %v952_v16, 0.0 }
 0x1d3   : > { %4625 = vmatmul.mubr.bf16.gmra.mrb[36].mxu1 %v1148_v18  ;;  %v1105_v21 = vmax.f32 %v947_v19, 0.0  ;;  %v4541_v22 = vpop.f32.mrb[42].mxu0 }
 0x1d4   : > { %v962_v23 = vadd.f32 %v4541_v22, %v5354_v44  ;;  %v956_v24 = vpop.f32.mrb[43].mxu0 }
 0x1d5   : > { %v957_v25 = vadd.f32 %v5354_v44, %v956_v24  ;;  %v1149_v26 = vpack.c.bf16 %v1106_v20, %v1105_v21 }
 0x1d6   : > { %v1108_v27 = vmax.f32 %v962_v23, 0.0 }
 0x1d7   : > { %v1107_v28 = vmax.f32 %v957_v25, 0.0  ;;  %4628 = vmatprep.mubr.bf16.mxu1 %v1149_v26  ;;  %v4544_v29 = vpop.f32.mrb[44].mxu0 }
 0x1d8   : > { %v972_v30 = vadd.f32 %v4544_v29, %v5354_v44  ;;  %v966_v31 = vpop.f32.mrb[45].mxu0 }
 0x1d9   : > { %v1150_v32 = vpack.c.bf16 %v1108_v27, %v1107_v28  ;;  %v967_v33 = vadd.f32 %v5354_v44, %v966_v31 }
 0x1da   : > { %v1110_v34 = vmax.f32 %v972_v30, 0.0 }
 0x1db   : > { %4629 = vmatmul.mubr.bf16.gmra.mrb[40].mxu1 %v1150_v32  ;;  %v1109_v35 = vmax.f32 %v967_v33, 0.0  ;;  %v4547_v36 = vpop.f32.mrb[46].mxu0 }
 0x1dc   : > { %v982_v37 = vadd.f32 %v4547_v36, %v5354_v44  ;;  %v976_v38 = vpop.f32.mrb[47].mxu0 }
 0x1dd   : > { %v977_v39 = vadd.f32 %v5354_v44, %v976_v38  ;;  %v1151_v40 = vpack.c.bf16 %v1110_v34, %v1109_v35 }
 0x1de   : > { %v1112_v43 = vmax.f32 %v982_v37, 0.0 }
 0x1df   : > { %v1111_v46 = vmax.f32 %v977_v39, 0.0  ;;  %4632 = vmatprep.mubr.bf16.mxu1 %v1151_v40  ;;  %v4550_v47 = vpop.f32.mrb[48].mxu0 }
 0x1e0   : > { %v992_v49 = vadd.f32 %v4550_v47, %v5354_v44  ;;  %v986_v50 = vpop.f32.mrb[49].mxu0 }
 0x1e1   : > { %v1152_v51 = vpack.c.bf16 %v1112_v43, %v1111_v46  ;;  %v987_v52 = vadd.f32 %v5354_v44, %v986_v50 }
 0x1e2   : > { %v1114_v55 = vmax.f32 %v992_v49, 0.0 }
 0x1e3   : > { %4633 = vmatmul.mubr.bf16.gmra.mrb[44].mxu1 %v1152_v51  ;;  %v1113_v57 = vmax.f32 %v987_v52, 0.0  ;;  %v4553_v58 = vpop.f32.mrb[50].mxu0  ;;  %v3445_v51 = vld [vmem:[#allocation10 + $0x18] sm:$0xff] }
 0x1e4   : > { %v1002_v60 = vadd.f32 %v4553_v58, %v5354_v44  ;;  %v996_v61 = vpop.f32.mrb[51].mxu0  ;;  %v3446_v52 = vld [vmem:[#allocation10 + $0x38] sm:$0xff] }
 0x1e5   : > { %v997_v62 = vadd.f32 %v5354_v44, %v996_v61  ;;  %v1153_v63 = vpack.c.bf16 %v1114_v55, %v1113_v57  ;;  %v5430_v53 = vcombine.high %v3445_v51, %v3446_v52 }
 0x1e6   : > { %v1116_v0 = vmax.f32 %v1002_v60, 0.0 }
 0x1e7   : > { %v1115_v3 = vmax.f32 %v997_v62, 0.0  ;;  %v4556_v4 = vpop.f32.mrb[52].mxu0  ;;  %4636 = vmatprep.mubr.bf16.mxu1 %v1153_v63  ;;  %4652 = vmatprep.subr.bf16.mxu1 %v5430_v53 }
 0x1e8   : > { %v1012_v8 = vadd.f32 %v4556_v4, %v5354_v44  ;;  %v1006_v9 = vpop.f32.mrb[53].mxu0 }
 0x1e9   : > { %v1007_v10 = vadd.f32 %v5354_v44, %v1006_v9  ;;  %v1154_v11 = vpack.c.bf16 %v1116_v0, %v1115_v3  ;;  %v2839_v0 = vld [vmem:[#allocation10 + $0x50] sm:$0xff]  ;;  %v3447_v9 = vld [vmem:[#allocation10 + $0x58] sm:$0xff] }
 0x1ea   : > { %v1118_v12 = vmax.f32 %v1012_v8, 0.0  ;;  %v2840_v3 = vld [vmem:[#allocation10 + $0x70] sm:$0xff] }
 0x1eb   : > { %v1117_v13 = vmax.f32 %v1007_v10, 0.0  ;;  %4637 = vmatmul.mubr.bf16.gmra.mrb[48].mxu1 %v1154_v11  ;;  %v4559_v14 = vpop.f32.mrb[54].mxu0  ;;  %v3448_v10 = vld [vmem:[#allocation10 + $0x78] sm:$0xff] }
 0x1ec   : > { %v1022_v15 = vadd.f32 %v4559_v14, %v5354_v44  ;;  %v1016_v16 = vpop.f32.mrb[55].mxu0 }
 0x1ed   : > { %v1017_v17 = vadd.f32 %v5354_v44, %v1016_v16  ;;  %v1155_v18 = vpack.c.bf16 %v1118_v12, %v1117_v13  ;;  %v4337_v13 = vcombine.high %v2839_v0, %v2840_v3  ;;  %v2841_v16 = vld [vmem:[#allocation10 + $0x90] sm:$0xff] }
 0x1ee   : > { %v1120_v19 = vmax.f32 %v1022_v15, 0.0 }
 0x1ef   : > { %v1119_v20 = vmax.f32 %v1017_v17, 0.0  ;;  %v4562_v21 = vpop.f32.mrb[56].mxu0  ;;  %4640 = vmatprep.mubr.bf16.mxu1 %v1155_v18  ;;  %v2842_v17 = vld [vmem:[#allocation10 + $0xb0] sm:$0xff]  ;;  %v5444_v18 = vcombine.low %v3445_v51, %v3446_v52 }
 0x1f0   : > { %v1032_v22 = vadd.f32 %v4562_v21, %v5354_v44  ;;  %v1026_v23 = vpop.f32.mrb[57].mxu0  ;;  %v5449_v21 = vcombine.high %v3447_v9, %v3448_v10 }
 0x1f1   : > { %v1027_v24 = vadd.f32 %v5354_v44, %v1026_v23  ;;  %v1156_v25 = vpack.c.bf16 %v1120_v19, %v1119_v20 }
 0x1f2   : > { %v1122_v26 = vmax.f32 %v1032_v22, 0.0 }
 0x1f3   : > { %v1121_v27 = vmax.f32 %v1027_v24, 0.0  ;;  %v4565_v28 = vpop.f32.mrb[58].mxu0  ;;  %4641 = vmatmul.mubr.bf16.gmra.mrb[52].mxu1 %v1156_v25  ;;  %v4336_v25 = vcombine.low %v2839_v0, %v2840_v3 }
 0x1f4   : > { %v1042_v29 = vadd.f32 %v4565_v28, %v5354_v44  ;;  %v1036_v30 = vpop.f32.mrb[59].mxu0  ;;  %v4339_v28 = vcombine.high %v2841_v16, %v2842_v17 }
 0x1f5   : > { %v1037_v31 = vadd.f32 %v5354_v44, %v1036_v30  ;;  %v1157_v32 = vpack.c.bf16 %v1122_v26, %v1121_v27  ;;  %v5459_v30 = vcombine.low %v3447_v9, %v3448_v10 }
 0x1f6   : > { %v1124_v33 = vmax.f32 %v1042_v29, 0.0 }
 0x1f7   : > { %v1123_v34 = vmax.f32 %v1037_v31, 0.0  ;;  %v4568_v35 = vpop.f32.mrb[60].mxu0  ;;  %4644 = vmatprep.mubr.bf16.mxu1 %v1157_v32 }
 0x1f8   : > { %v1052_v36 = vadd.f32 %v4568_v35, %v5354_v44  ;;  %v1046_v37 = vpop.f32.mrb[61].mxu0 }
 0x1f9   : > { %v1047_v38 = vadd.f32 %v5354_v44, %v1046_v37  ;;  %v1158_v39 = vpack.c.bf16 %v1124_v33, %v1123_v34  ;;  %v4338_v34 = vcombine.low %v2841_v16, %v2842_v17 }
 0x1fa   : > { %v1126_v40 = vmax.f32 %v1052_v36, 0.0 }
 0x1fb   : > { %v1125_v41 = vmax.f32 %v1047_v38, 0.0  ;;  %v4571_v42 = vpop.f32.mrb[62].mxu0  ;;  %4645 = vmatmul.mubr.bf16.gmra.mrb[56].mxu1 %v1158_v39  ;;  %v2845_v38 = vld [vmem:[#allocation10 + $0x110] sm:$0xff] }
 0x1fc   : > { %v1062_v43 = vadd.f32 %v4571_v42, %v5354_v44  ;;  %v1056_v45 = vpop.f32.mrb[63].mxu0  ;;  %v3449_v42 = vld [vmem:[#allocation10 + $0x98] sm:$0xff] }
 0x1fd   : > { %v1057_v46 = vadd.f32 %v5354_v44, %v1056_v45  ;;  %v1159_v47 = vpack.c.bf16 %v1126_v40, %v1125_v41  ;;  %v2846_v41 = vld [vmem:[#allocation10 + $0x130] sm:$0xff] }
 0x1fe   : > { %v1128_v48 = vmax.f32 %v1062_v43, 0.0  ;;  %v3450_v43 = vld [vmem:[#allocation10 + $0xb8] sm:$0xff] }
 0x1ff   : > { %v1127_v49 = vmax.f32 %v1057_v46, 0.0  ;;  %4648 = vmatprep.mubr.bf16.mxu1 %v1159_v47 }
 0x201   : > { %v1160_v50 = vpack.c.bf16 %v1128_v48, %v1127_v49  ;;  %v5474_v48 = vcombine.low %v3449_v42, %v3450_v43  ;;  %v5476_v49 = vcombine.high %v3449_v42, %v3450_v43 }
 0x203   : > { %4649 = vmatmul.mubr.bf16.gmra.mrb[60].mxu1 %v1160_v50 }
 0x204   : > { %2357 = vmatprep.mubr.bf16.mxu1 %v4986_v5 }
 0x25e   : > { %v4590_v55 = vpop.f32.mrb[0].mxu1 }
 0x25f   : > { %v1275_v56 = vadd.f32 %v4590_v55, %v5433_v54  ;;  %v1266_v44 = vpop.f32.mrb[1].mxu1 }
 0x260   : > { %v1267_v57 = vadd.f32 %v5433_v54, %v1266_v44  ;;  %v4591_v58 = vpop.f32.mrb[2].mxu1 }
 0x261   : > { %v1278_v59 = vadd.f32 %v4591_v58, %v5433_v54  ;;  %v1269_v60 = vpop.f32.mrb[3].mxu1  ;;  %v1523_v62 = vmax.f32 %v1275_v56, 0.0  ;;  %v4343_v56 = vcombine.high %v2845_v38, %v2846_v41 }
 0x262   : > { %v1270_v61 = vadd.f32 %v5433_v54, %v1269_v60  ;;  %v1521_v4 = vmax.f32 %v1267_v57, 0.0  ;;  %v4342_v60 = vcombine.low %v2845_v38, %v2846_v41 }
 0x263   : > { %v1524_v63 = vmax.f32 %v1278_v59, 0.0 }
 0x264   : > { %v1522_v7 = vmax.f32 %v1270_v61, 0.0 }
 0x265   : > { %v5439_v8 = vpack.c.bf16 %v1524_v63, %v1523_v62 }
 0x266   : > { %v5441_v11 = vpack.c.bf16 %v1522_v7, %v1521_v4  ;;  %v4594_v12 = vpop.f32.mrb[4].mxu1 }
 0x267   : > { %v1291_v14 = vadd.f32 %v4594_v12, %v5433_v54  ;;  %v1282_v15 = vpop.f32.mrb[5].mxu1 }
 0x268   : > { %1746 = vmatmul.mubr.bf16.vlgmr.msra.gmra.mrb[64].mxu0 %v5441_v11  ;;  %2358 = vmatmul.mubr.bf16.vlgmr.msra.gmra.mrb[64].mxu1 %v5441_v11  ;;  %v1283_v19 = vadd.f32 %v5433_v54, %v1282_v15  ;;  %v4595_v20 = vpop.f32.mrb[6].mxu1 }
 0x269   : > { %2934 = vmatpush1.bf16.msra.mxu0 %v4334_v6  ;;  %v1527_v22 = vmax.f32 %v1291_v14, 0.0  ;;  %v1294_v23 = vadd.f32 %v4595_v20, %v5433_v54  ;;  %v1285_v24 = vpop.f32.mrb[7].mxu1  ;;  %1755 = vmatprep.mubr.bf16.mxu0 %v4986_v5  ;;  %v2844_v6 = vld [vmem:[#allocation10 + $0xf0] sm:$0xff] }
 0x26a   : > { %v1525_v26 = vmax.f32 %v1283_v19, 0.0  ;;  %v1286_v27 = vadd.f32 %v5433_v54, %v1285_v24  ;;  %2367 = vmatprep.mubr.bf16.mxu1 %v4986_v5  ;;  %2935 = vmatprep.subr.bf16.mxu0 %v4337_v13  ;;  %v4341_v37 = vcombine.high %v2843_v2, %v2844_v6  ;;  %v4340_v52 = vcombine.low %v2843_v2, %v2844_v6 }
 0x26b   : > { %v1528_v29 = vmax.f32 %v1294_v23, 0.0  ;;  %4660 = vmatpush1.bf16.msra.mxu1 %v5444_v18 }
 0x26c   : > { %v1526_v1 = vmax.f32 %v1286_v27, 0.0  ;;  %4653 = vmatprep.subr.bf16.mxu1 %v5449_v21  ;;  %v2848_v27 = vld [vmem:[#allocation10 + $0x170] sm:$0xff] }
 0x26d   : > { %v5462_v31 = vpack.c.bf16 %v1528_v29, %v1527_v22  ;;  %2936 = vmatpush1.bf16.msra.mxu0 %v4336_v25 }
 0x26e   : > { %v5464_v32 = vpack.c.bf16 %v1526_v1, %v1525_v26  ;;  %v4598_v33 = vpop.f32.mrb[8].mxu1  ;;  %2937 = vmatprep.subr.bf16.mxu0 %v4339_v28  ;;  %v2847_v26 = vld [vmem:[#allocation10 + $0x150] sm:$0xff] }
 0x26f   : > { %v1307_v35 = vadd.f32 %v4598_v33, %v5433_v54  ;;  %v1298_v36 = vpop.f32.mrb[9].mxu1  ;;  %4661 = vmatpush1.bf16.msra.mxu1 %v5459_v30  ;;  %v4344_v1 = vcombine.low %v2847_v26, %v2848_v27  ;;  %v4345_v2 = vcombine.high %v2847_v26, %v2848_v27 }
 0x270   : > { %1756 = vmatmul.mubr.bf16.gmra.mrb[68].mxu0 %v5439_v8  ;;  %2368 = vmatmul.mubr.bf16.gmra.mrb[68].mxu1 %v5439_v8  ;;  %v1299_v39 = vadd.f32 %v5433_v54, %v1298_v36  ;;  %v4599_v40 = vpop.f32.mrb[10].mxu1 }
 0x271   : > { %1765 = vmatprep.mubr.bf16.mxu0 %v4986_v5  ;;  %2377 = vmatprep.mubr.bf16.mxu1 %v4986_v5  ;;  %v1531_v45 = vmax.f32 %v1307_v35, 0.0  ;;  %v1310_v46 = vadd.f32 %v4599_v40, %v5433_v54  ;;  %v1301_v47 = vpop.f32.mrb[11].mxu1 }
 0x272   : > { %v1529_v50 = vmax.f32 %v1299_v39, 0.0  ;;  %v1302_v51 = vadd.f32 %v5433_v54, %v1301_v47  ;;  %2938 = vmatpush1.bf16.msra.mxu0 %v4338_v34  ;;  %4654 = vmatprep.subr.bf16.mxu1 %v5476_v49 }
 0x273   : > { %v1532_v55 = vmax.f32 %v1310_v46, 0.0  ;;  %2939 = vmatprep.subr.bf16.mxu0 %v4341_v37  ;;  %4662 = vmatpush1.bf16.msra.mxu1 %v5474_v48 }
 0x274   : > { %v1530_v44 = vmax.f32 %v1302_v51, 0.0 }
 0x275   : > { %v5481_v57 = vpack.c.bf16 %v1532_v55, %v1531_v45 }
 0x276   : > { %v5483_v58 = vpack.c.bf16 %v1530_v44, %v1529_v50  ;;  %v4602_v59 = vpop.f32.mrb[12].mxu1  ;;  %2940 = vmatpush1.bf16.msra.mxu0 %v4340_v52 }
 0x277   : > { %v1323_v61 = vadd.f32 %v4602_v59, %v5433_v54  ;;  %v1314_v62 = vpop.f32.mrb[13].mxu1  ;;  %2941 = vmatprep.subr.bf16.mxu0 %v4343_v56 }
 0x278   : > { %1766 = vmatmul.mubr.bf16.gmra.mrb[72].mxu0 %v5464_v32  ;;  %2378 = vmatmul.mubr.bf16.gmra.mrb[72].mxu1 %v5464_v32  ;;  %v1315_v63 = vadd.f32 %v5433_v54, %v1314_v62  ;;  %v4603_v0 = vpop.f32.mrb[14].mxu1  ;;  %v3452_v62 = vld [vmem:[#allocation10 + $0xf8] sm:$0xff] }
 0x279   : > { %1775 = vmatprep.mubr.bf16.mxu0 %v4986_v5  ;;  %2387 = vmatprep.mubr.bf16.mxu1 %v4986_v5  ;;  %v1535_v3 = vmax.f32 %v1323_v61, 0.0  ;;  %v1326_v4 = vadd.f32 %v4603_v0, %v5433_v54  ;;  %v1317_v7 = vpop.f32.mrb[15].mxu1  ;;  %v3451_v61 = vld [vmem:[#allocation10 + $0xd8] sm:$0xff] }
 0x27a   : > { %v1533_v9 = vmax.f32 %v1315_v63, 0.0  ;;  %v1318_v10 = vadd.f32 %v5433_v54, %v1317_v7  ;;  %2942 = vmatpush1.bf16.msra.mxu0 %v4342_v60  ;;  %v5530_v7 = vcombine.high %v3451_v61, %v3452_v62 }
 0x27b   : > { %v1536_v12 = vmax.f32 %v1326_v4, 0.0  ;;  %2943 = vmatprep.subr.bf16.mxu0 %v4345_v2  ;;  %v5528_v4 = vcombine.low %v3451_v61, %v3452_v62 }
 0x27c   : > { %v1534_v13 = vmax.f32 %v1318_v10, 0.0  ;;  %4655 = vmatprep.subr.bf16.mxu1 %v5530_v7 }
 0x27d   : > { %v5493_v14 = vpack.c.bf16 %v1536_v12, %v1535_v3  ;;  %4663 = vmatpush1.bf16.msra.mxu1 %v5528_v4 }
 0x27e   : > { %v5495_v15 = vpack.c.bf16 %v1534_v13, %v1533_v9  ;;  %v4606_v16 = vpop.f32.mrb[16].mxu1  ;;  %2944 = vmatpush1.bf16.msra.mxu0 %v4344_v1 }
 0x27f   : > { %v1339_v17 = vadd.f32 %v4606_v16, %v5433_v54  ;;  %v1330_v19 = vpop.f32.mrb[17].mxu1 }
 0x280   : > { %1776 = vmatmul.mubr.bf16.gmra.mrb[76].mxu0 %v5462_v31  ;;  %2388 = vmatmul.mubr.bf16.gmra.mrb[76].mxu1 %v5462_v31  ;;  %v1331_v20 = vadd.f32 %v5433_v54, %v1330_v19  ;;  %v4607_v22 = vpop.f32.mrb[18].mxu1 }
 0x281   : > { %1785 = vmatprep.mubr.bf16.mxu0 %v4986_v5  ;;  %2397 = vmatprep.mubr.bf16.mxu1 %v4986_v5  ;;  %v1539_v23 = vmax.f32 %v1339_v17, 0.0  ;;  %v1342_v24 = vadd.f32 %v4607_v22, %v5433_v54  ;;  %v1333_v25 = vpop.f32.mrb[19].mxu1 }
 0x282   : > { %v1537_v28 = vmax.f32 %v1331_v20, 0.0  ;;  %v1334_v29 = vadd.f32 %v5433_v54, %v1333_v25 }
 0x283   : > { %v1540_v6 = vmax.f32 %v1342_v24, 0.0 }
 0x284   : > { %v1538_v33 = vmax.f32 %v1334_v29, 0.0 }
 0x285   : > { %v5505_v34 = vpack.c.bf16 %v1540_v6, %v1539_v23 }
 0x286   : > { %v5507_v35 = vpack.c.bf16 %v1538_v33, %v1537_v28  ;;  %v4610_v36 = vpop.f32.mrb[20].mxu1 }
 0x287   : > { %v1355_v37 = vadd.f32 %v4610_v36, %v5433_v54  ;;  %v1346_v38 = vpop.f32.mrb[21].mxu1 }
 0x288   : > { %1786 = vmatmul.mubr.bf16.gmra.mrb[80].mxu0 %v5483_v58  ;;  %2398 = vmatmul.mubr.bf16.gmra.mrb[80].mxu1 %v5483_v58  ;;  %v1347_v39 = vadd.f32 %v5433_v54, %v1346_v38  ;;  %v4611_v40 = vpop.f32.mrb[22].mxu1 }
 0x289   : > { %1795 = vmatprep.mubr.bf16.mxu0 %v4986_v5  ;;  %2407 = vmatprep.mubr.bf16.mxu1 %v4986_v5  ;;  %v1543_v41 = vmax.f32 %v1355_v37, 0.0  ;;  %v1358_v42 = vadd.f32 %v4611_v40, %v5433_v54  ;;  %v1349_v43 = vpop.f32.mrb[23].mxu1 }
 0x28a   : > { %v1541_v45 = vmax.f32 %v1347_v39, 0.0  ;;  %v1350_v46 = vadd.f32 %v5433_v54, %v1349_v43 }
 0x28b   : > { %v1544_v47 = vmax.f32 %v1358_v42, 0.0 }
 0x28c   : > { %v1542_v50 = vmax.f32 %v1350_v46, 0.0  ;;  %v2850_v46 = vld [vmem:[#allocation10 + $0x1b0] sm:$0xff] }
 0x28d   : > { %v5517_v51 = vpack.c.bf16 %v1544_v47, %v1543_v41 }
 0x28e   : > { %v5519_v52 = vpack.c.bf16 %v1542_v50, %v1541_v45  ;;  %v4614_v55 = vpop.f32.mrb[24].mxu1  ;;  %v2849_v45 = vld [vmem:[#allocation10 + $0x190] sm:$0xff] }
 0x28f   : > { %v1371_v56 = vadd.f32 %v4614_v55, %v5433_v54  ;;  %v1362_v44 = vpop.f32.mrb[25].mxu1  ;;  %v4346_v55 = vcombine.low %v2849_v45, %v2850_v46 }
 0x290   : > { %1796 = vmatmul.mubr.bf16.gmra.mrb[84].mxu0 %v5481_v57  ;;  %2408 = vmatmul.mubr.bf16.gmra.mrb[84].mxu1 %v5481_v57  ;;  %v1363_v59 = vadd.f32 %v5433_v54, %v1362_v44  ;;  %v4615_v60 = vpop.f32.mrb[26].mxu1 }
 0x291   : > { %1805 = vmatprep.mubr.bf16.mxu0 %v4986_v5  ;;  %2417 = vmatprep.mubr.bf16.mxu1 %v4986_v5  ;;  %v1547_v63 = vmax.f32 %v1371_v56, 0.0  ;;  %v1374_v0 = vadd.f32 %v4615_v60, %v5433_v54  ;;  %v1365_v3 = vpop.f32.mrb[27].mxu1  ;;  %v4347_v56 = vcombine.high %v2849_v45, %v2850_v46 }
 0x292   : > { %v1545_v9 = vmax.f32 %v1363_v59, 0.0  ;;  %v1366_v10 = vadd.f32 %v5433_v54, %v1365_v3 }
 0x293   : > { %v1548_v12 = vmax.f32 %v1374_v0, 0.0  ;;  %2945 = vmatprep.subr.bf16.mxu0 %v4347_v56 }
 0x294   : > { %v1546_v13 = vmax.f32 %v1366_v10, 0.0  ;;  %2946 = vmatpush1.bf16.msra.mxu0 %v4346_v55 }
 0x295   : > { %v5535_v16 = vpack.c.bf16 %v1548_v12, %v1547_v63 }
 0x296   : > { %v5537_v17 = vpack.c.bf16 %v1546_v13, %v1545_v9  ;;  %v4618_v19 = vpop.f32.mrb[28].mxu1 }
 0x297   : > { %v1387_v20 = vadd.f32 %v4618_v19, %v5433_v54  ;;  %v1378_v22 = vpop.f32.mrb[29].mxu1 }
 0x298   : > { %1806 = vmatmul.mubr.bf16.gmra.mrb[88].mxu0 %v5495_v15  ;;  %2418 = vmatmul.mubr.bf16.gmra.mrb[88].mxu1 %v5495_v15  ;;  %v1379_v23 = vadd.f32 %v5433_v54, %v1378_v22  ;;  %v4619_v24 = vpop.f32.mrb[30].mxu1 }
 0x299   : > { %1815 = vmatprep.mubr.bf16.mxu0 %v4986_v5  ;;  %2427 = vmatprep.mubr.bf16.mxu1 %v4986_v5  ;;  %v1551_v25 = vmax.f32 %v1387_v20, 0.0  ;;  %v1390_v26 = vadd.f32 %v4619_v24, %v5433_v54  ;;  %v1381_v27 = vpop.f32.mrb[31].mxu1 }
 0x29a   : > { %v1549_v28 = vmax.f32 %v1379_v23, 0.0  ;;  %v1382_v29 = vadd.f32 %v5433_v54, %v1381_v27 }
 0x29b   : > { %v1552_v1 = vmax.f32 %v1390_v26, 0.0 }
 0x29c   : > { %v1550_v2 = vmax.f32 %v1382_v29, 0.0 }
 0x29d   : > { %v5547_v6 = vpack.c.bf16 %v1552_v1, %v1551_v25 }
 0x29e   : > { %v5549_v33 = vpack.c.bf16 %v1550_v2, %v1549_v28  ;;  %v4622_v36 = vpop.f32.mrb[32].mxu1  ;;  %v3453_v2 = vld [vmem:[#allocation10 + $0x118] sm:$0xff] }
 0x29f   : > { %v1403_v37 = vadd.f32 %v4622_v36, %v5433_v54  ;;  %v1394_v38 = vpop.f32.mrb[33].mxu1  ;;  %v3454_v36 = vld [vmem:[#allocation10 + $0x138] sm:$0xff] }
 0x2a0   : > { %1816 = vmatmul.mubr.bf16.gmra.mrb[92].mxu0 %v5493_v14  ;;  %2428 = vmatmul.mubr.bf16.gmra.mrb[92].mxu1 %v5493_v14  ;;  %v1395_v39 = vadd.f32 %v5433_v54, %v1394_v38  ;;  %v4623_v40 = vpop.f32.mrb[34].mxu1 }
 0x2a1   : > { %1825 = vmatprep.mubr.bf16.mxu0 %v4986_v5  ;;  %2437 = vmatprep.mubr.bf16.mxu1 %v4986_v5  ;;  %v1555_v41 = vmax.f32 %v1403_v37, 0.0  ;;  %v1406_v42 = vadd.f32 %v4623_v40, %v5433_v54  ;;  %v1397_v43 = vpop.f32.mrb[35].mxu1  ;;  %v5582_v40 = vcombine.low %v3453_v2, %v3454_v36 }
 0x2a2   : > { %v1553_v47 = vmax.f32 %v1395_v39, 0.0  ;;  %v1398_v50 = vadd.f32 %v5433_v54, %v1397_v43 }
 0x2a3   : > { %v1556_v44 = vmax.f32 %v1406_v42, 0.0 }
 0x2a4   : > { %v1554_v59 = vmax.f32 %v1398_v50, 0.0 }
 0x2a5   : > { %v5559_v60 = vpack.c.bf16 %v1556_v44, %v1555_v41  ;;  %v5584_v41 = vcombine.high %v3453_v2, %v3454_v36 }
 0x2a6   : > { %v5561_v61 = vpack.c.bf16 %v1554_v59, %v1553_v47  ;;  %v4626_v62 = vpop.f32.mrb[36].mxu1 }
 0x2a7   : > { %v1419_v63 = vadd.f32 %v4626_v62, %v5433_v54  ;;  %v1410_v0 = vpop.f32.mrb[37].mxu1  ;;  %4656 = vmatprep.subr.bf16.mxu1 %v5584_v41 }
 0x2a8   : > { %1826 = vmatmul.mubr.bf16.gmra.mrb[96].mxu0 %v5507_v35  ;;  %2438 = vmatmul.mubr.bf16.gmra.mrb[96].mxu1 %v5507_v35  ;;  %v1411_v3 = vadd.f32 %v5433_v54, %v1410_v0  ;;  %v4627_v9 = vpop.f32.mrb[38].mxu1 }
 0x2a9   : > { %1835 = vmatprep.mubr.bf16.mxu0 %v4986_v5  ;;  %2447 = vmatprep.mubr.bf16.mxu1 %v4986_v5  ;;  %v1559_v10 = vmax.f32 %v1419_v63, 0.0  ;;  %v1422_v12 = vadd.f32 %v4627_v9, %v5433_v54  ;;  %v1413_v13 = vpop.f32.mrb[39].mxu1 }
 0x2aa   : > { %v1557_v19 = vmax.f32 %v1411_v3, 0.0  ;;  %v1414_v20 = vadd.f32 %v5433_v54, %v1413_v13  ;;  %4664 = vmatpush1.bf16.msra.mxu1 %v5582_v40 }
 0x2ab   : > { %v1560_v22 = vmax.f32 %v1422_v12, 0.0 }
 0x2ac   : > { %v1558_v23 = vmax.f32 %v1414_v20, 0.0 }
 0x2ad   : > { %v5571_v24 = vpack.c.bf16 %v1560_v22, %v1559_v10 }
 0x2ae   : > { %v5573_v25 = vpack.c.bf16 %v1558_v23, %v1557_v19  ;;  %v4630_v26 = vpop.f32.mrb[40].mxu1 }
 0x2af   : > { %v1435_v27 = vadd.f32 %v4630_v26, %v5433_v54  ;;  %v1426_v28 = vpop.f32.mrb[41].mxu1 }
 0x2b0   : > { %1836 = vmatmul.mubr.bf16.gmra.mrb[100].mxu0 %v5505_v34  ;;  %2448 = vmatmul.mubr.bf16.gmra.mrb[100].mxu1 %v5505_v34  ;;  %v1427_v29 = vadd.f32 %v5433_v54, %v1426_v28  ;;  %v4631_v1 = vpop.f32.mrb[42].mxu1 }
 0x2b1   : > { %1845 = vmatprep.mubr.bf16.mxu0 %v4986_v5  ;;  %2457 = vmatprep.mubr.bf16.mxu1 %v4986_v5  ;;  %v1563_v37 = vmax.f32 %v1435_v27, 0.0  ;;  %v1438_v38 = vadd.f32 %v4631_v1, %v5433_v54  ;;  %v1429_v39 = vpop.f32.mrb[43].mxu1 }
 0x2b2   : > { %v1561_v42 = vmax.f32 %v1427_v29, 0.0  ;;  %v1430_v43 = vadd.f32 %v5433_v54, %v1429_v39 }
 0x2b3   : > { %v1564_v45 = vmax.f32 %v1438_v38, 0.0 }
 0x2b4   : > { %v1562_v46 = vmax.f32 %v1430_v43, 0.0 }
 0x2b5   : > { %v5589_v47 = vpack.c.bf16 %v1564_v45, %v1563_v37 }
 0x2b6   : > { %v5591_v50 = vpack.c.bf16 %v1562_v46, %v1561_v42  ;;  %v4634_v55 = vpop.f32.mrb[44].mxu1 }
 0x2b7   : > { %5965 = vst [vmem:[#allocation17_spill] sm:$0xff] %v5589_v47  ;;  %v1451_v56 = vadd.f32 %v4634_v55, %v5433_v54  ;;  %v1442_v44 = vpop.f32.mrb[45].mxu1 }
 0x2b8   : > { %5966 = vst [vmem:[#allocation18_spill] sm:$0xff] %v5591_v50  ;;  %1846 = vmatmul.mubr.bf16.gmra.mrb[104].mxu0 %v5519_v52  ;;  %2458 = vmatmul.mubr.bf16.gmra.mrb[104].mxu1 %v5519_v52  ;;  %v1443_v59 = vadd.f32 %v5433_v54, %v1442_v44  ;;  %v4635_v62 = vpop.f32.mrb[46].mxu1  ;;  %v2852_v44 = vld [vmem:[#allocation10 + $0x1f0] sm:$0xff] }
 0x2b9   : > { %1855 = vmatprep.mubr.bf16.mxu0 %v4986_v5  ;;  %2467 = vmatprep.mubr.bf16.mxu1 %v4986_v5  ;;  %v1567_v63 = vmax.f32 %v1451_v56, 0.0  ;;  %v1454_v0 = vadd.f32 %v4635_v62, %v5433_v54  ;;  %v1445_v3 = vpop.f32.mrb[47].mxu1  ;;  %v2851_v56 = vld [vmem:[#allocation10 + $0x1d0] sm:$0xff] }
 0x2ba   : > { %v1565_v9 = vmax.f32 %v1443_v59, 0.0  ;;  %v1446_v10 = vadd.f32 %v5433_v54, %v1445_v3 }
 0x2bb   : > { %v1568_v12 = vmax.f32 %v1454_v0, 0.0  ;;  %v4349_v0 = vcombine.high %v2851_v56, %v2852_v44 }
 0x2bc   : > { %v1566_v13 = vmax.f32 %v1446_v10, 0.0 }
 0x2bd   : > { %v5601_v19 = vpack.c.bf16 %v1568_v12, %v1567_v63  ;;  %v4348_v63 = vcombine.low %v2851_v56, %v2852_v44  ;;  %2947 = vmatprep.subr.bf16.mxu0 %v4349_v0  ;;  %v3455_v56 = vld [vmem:[#allocation10 + $0x158] sm:$0xff] }
 0x2be   : > { %v5603_v20 = vpack.c.bf16 %v1566_v13, %v1565_v9  ;;  %v4638_v22 = vpop.f32.mrb[48].mxu1  ;;  %v3456_v44 = vld [vmem:[#allocation10 + $0x178] sm:$0xff] }
 0x2bf   : > { %5967 = vst [vmem:[#allocation19_spill] sm:$0xff] %v5601_v19  ;;  %v1467_v23 = vadd.f32 %v4638_v22, %v5433_v54  ;;  %v1458_v26 = vpop.f32.mrb[49].mxu1  ;;  %2948 = vmatpush1.bf16.msra.mxu0 %v4348_v63 }
 0x2c0   : > { %5968 = vst [vmem:[#allocation20_spill] sm:$0xff] %v5603_v20  ;;  %1856 = vmatmul.mubr.bf16.gmra.mrb[108].mxu0 %v5517_v51  ;;  %2468 = vmatmul.mubr.bf16.gmra.mrb[108].mxu1 %v5517_v51  ;;  %v1459_v27 = vadd.f32 %v5433_v54, %v1458_v26  ;;  %v4639_v28 = vpop.f32.mrb[50].mxu1 }
 0x2c1   : > { %1865 = vmatprep.mubr.bf16.mxu0 %v4986_v5  ;;  %2477 = vmatprep.mubr.bf16.mxu1 %v4986_v5  ;;  %v1571_v29 = vmax.f32 %v1467_v23, 0.0  ;;  %v1470_v1 = vadd.f32 %v4639_v28, %v5433_v54  ;;  %v1461_v2 = vpop.f32.mrb[51].mxu1 }
 0x2c2   : > { %v1569_v36 = vmax.f32 %v1459_v27, 0.0  ;;  %v1462_v37 = vadd.f32 %v5433_v54, %v1461_v2  ;;  %3541 = vmatprep.subr.bf16.mxu0 %v5430_v53 }
 0x2c3   : > { %v1572_v38 = vmax.f32 %v1470_v1, 0.0 }
 0x2c4   : > { %v1570_v39 = vmax.f32 %v1462_v37, 0.0 }
 0x2c5   : > { %v5613_v42 = vpack.c.bf16 %v1572_v38, %v1571_v29 }
 0x2c6   : > { %v5615_v43 = vpack.c.bf16 %v1570_v39, %v1569_v36  ;;  %v4642_v45 = vpop.f32.mrb[52].mxu1 }
 0x2c7   : > { %5969 = vst [vmem:[#allocation21_spill] sm:$0xff] %v5613_v42  ;;  %v1483_v46 = vadd.f32 %v4642_v45, %v5433_v54  ;;  %v1474_v55 = vpop.f32.mrb[53].mxu1 }
 0x2c8   : > { %5970 = vst [vmem:[#allocation22_spill] sm:$0xff] %v5615_v43  ;;  %1866 = vmatmul.mubr.bf16.gmra.mrb[112].mxu0 %v5537_v17  ;;  %2478 = vmatmul.mubr.bf16.gmra.mrb[112].mxu1 %v5537_v17  ;;  %v1475_v59 = vadd.f32 %v5433_v54, %v1474_v55  ;;  %v4643_v62 = vpop.f32.mrb[54].mxu1 }
 0x2c9   : > { %1875 = vmatprep.mubr.bf16.mxu0 %v4986_v5  ;;  %2487 = vmatprep.mubr.bf16.mxu1 %v4986_v5  ;;  %v1575_v3 = vmax.f32 %v1483_v46, 0.0  ;;  %v1486_v9 = vadd.f32 %v4643_v62, %v5433_v54  ;;  %v1477_v10 = vpop.f32.mrb[55].mxu1  ;;  %v5640_v62 = vcombine.high %v3455_v56, %v3456_v44 }
 0x2ca   : > { %v1573_v12 = vmax.f32 %v1475_v59, 0.0  ;;  %v1478_v13 = vadd.f32 %v5433_v54, %v1477_v10 }
 0x2cb   : > { %v1576_v22 = vmax.f32 %v1486_v9, 0.0  ;;  %4657 = vmatprep.subr.bf16.mxu1 %v5640_v62 }
 0x2cc   : > { %v1574_v23 = vmax.f32 %v1478_v13, 0.0 }
 0x2cd   : > { %v5626_v26 = vpack.c.bf16 %v1576_v22, %v1575_v3  ;;  %v5644_v3 = vcombine.low %v3455_v56, %v3456_v44 }
 0x2ce   : > { %v5628_v27 = vpack.c.bf16 %v1574_v23, %v1573_v12  ;;  %v4646_v28 = vpop.f32.mrb[56].mxu1 }
 0x2cf   : > { %5971 = vst [vmem:[#allocation23_spill] sm:$0xff] %v5626_v26  ;;  %v1499_v29 = vadd.f32 %v4646_v28, %v5433_v54  ;;  %v1490_v1 = vpop.f32.mrb[57].mxu1  ;;  %4665 = vmatpush1.bf16.msra.mxu1 %v5644_v3 }
 0x2d0   : > { %5972 = vst [vmem:[#allocation24_spill] sm:$0xff] %v5628_v27  ;;  %1876 = vmatmul.mubr.bf16.gmra.mrb[116].mxu0 %v5535_v16  ;;  %2488 = vmatmul.mubr.bf16.gmra.mrb[116].mxu1 %v5535_v16  ;;  %v1491_v2 = vadd.f32 %v5433_v54, %v1490_v1  ;;  %v4647_v36 = vpop.f32.mrb[58].mxu1 }
 0x2d1   : > { %1885 = vmatprep.mubr.bf16.mxu0 %v4986_v5  ;;  %2497 = vmatprep.mubr.bf16.mxu1 %v4986_v5  ;;  %v1579_v53 = vmax.f32 %v1499_v29, 0.0  ;;  %v1502_v37 = vadd.f32 %v4647_v36, %v5433_v54  ;;  %v1493_v38 = vpop.f32.mrb[59].mxu1 }
 0x2d2   : > { %v1577_v39 = vmax.f32 %v1491_v2, 0.0  ;;  %v1494_v45 = vadd.f32 %v5433_v54, %v1493_v38  ;;  %v3458_v38 = vld [vmem:[#allocation10 + $0x1b8] sm:$0xff] }
 0x2d3   : > { %v1580_v46 = vmax.f32 %v1502_v37, 0.0  ;;  %v3457_v37 = vld [vmem:[#allocation10 + $0x198] sm:$0xff] }
 0x2d4   : > { %v1578_v55 = vmax.f32 %v1494_v45, 0.0  ;;  %v5660_v45 = vcombine.high %v3457_v37, %v3458_v38 }
 0x2d5   : > { %v5638_v59 = vpack.c.bf16 %v1580_v46, %v1579_v53  ;;  %v5662_v46 = vcombine.low %v3457_v37, %v3458_v38 }
 0x2d6   : > { %v5642_v63 = vpack.c.bf16 %v1578_v55, %v1577_v39  ;;  %v4650_v0 = vpop.f32.mrb[60].mxu1  ;;  %v3460_v55 = vld [vmem:[#allocation10 + $0x1f8] sm:$0xff]  ;;  %4658 = vmatprep.subr.bf16.mxu1 %v5660_v45 }
 0x2d7   : > { %v1515_v9 = vadd.f32 %v4650_v0, %v5433_v54  ;;  %v1506_v10 = vpop.f32.mrb[61].mxu1  ;;  %4666 = vmatpush1.bf16.msra.mxu1 %v5662_v46 }
 0x2d8   : > { %1886 = vmatmul.mubr.bf16.gmra.mrb[120].mxu0 %v5549_v33  ;;  %2498 = vmatmul.mubr.bf16.gmra.mrb[120].mxu1 %v5549_v33  ;;  %v1507_v12 = vadd.f32 %v5433_v54, %v1506_v10  ;;  %v4651_v13 = vpop.f32.mrb[62].mxu1 }
 0x2d9   : > { %1895 = vmatprep.mubr.bf16.mxu0 %v4986_v5  ;;  %2507 = vmatprep.mubr.bf16.mxu1 %v4986_v5  ;;  %v1583_v22 = vmax.f32 %v1515_v9, 0.0  ;;  %v1518_v23 = vadd.f32 %v4651_v13, %v5433_v54  ;;  %v1509_v28 = vpop.f32.mrb[63].mxu1 }
 0x2da   : > { %v1581_v29 = vmax.f32 %v1507_v12, 0.0  ;;  %v1510_v1 = vadd.f32 %v5433_v54, %v1509_v28  ;;  %v3459_v54 = vld [vmem:[#allocation10 + $0x1d8] sm:$0xff] }
 0x2db   : > { %v1584_v2 = vmax.f32 %v1518_v23, 0.0  ;;  %v5669_v56 = vcombine.high %v3459_v54, %v3460_v55  ;;  %v5672_v44 = vcombine.low %v3459_v54, %v3460_v55 }
 0x2dc   : > { %v1582_v36 = vmax.f32 %v1510_v1, 0.0 }
 0x2dd   : > { %v5656_v53 = vpack.c.bf16 %v1584_v2, %v1583_v22  ;;  %4659 = vmatprep.subr.bf16.mxu1 %v5669_v56 }
 0x2de   : > { %v5658_v39 = vpack.c.bf16 %v1582_v36, %v1581_v29  ;;  %4667 = vmatpush1.bf16.msra.mxu1 %v5672_v44 }
 0x2e0   : > { %1896 = vmatmul.mubr.bf16.gmra.mrb[124].mxu0 %v5547_v6  ;;  %2508 = vmatmul.mubr.bf16.gmra.mrb[124].mxu1 %v5547_v6 }
 0x2e1   : > { %1905 = vmatprep.mubr.bf16.mxu0 %v4986_v5  ;;  %2517 = vmatprep.mubr.bf16.mxu1 %v4986_v5 }
 0x2e8   : > { %1906 = vmatmul.mubr.bf16.gmra.mrb[128].mxu0 %v5561_v61  ;;  %2518 = vmatmul.mubr.bf16.gmra.mrb[128].mxu1 %v5561_v61 }
 0x2e9   : > { %1915 = vmatprep.mubr.bf16.mxu0 %v4986_v5  ;;  %2527 = vmatprep.mubr.bf16.mxu1 %v4986_v5 }
 0x2f0   : > { %1916 = vmatmul.mubr.bf16.gmra.mrb[132].mxu0 %v5559_v60  ;;  %2528 = vmatmul.mubr.bf16.gmra.mrb[132].mxu1 %v5559_v60 }
 0x2f1   : > { %1925 = vmatprep.mubr.bf16.mxu0 %v4986_v5  ;;  %2537 = vmatprep.mubr.bf16.mxu1 %v4986_v5 }
 0x2f8   : > { %1926 = vmatmul.mubr.bf16.gmra.mrb[136].mxu0 %v5573_v25  ;;  %2538 = vmatmul.mubr.bf16.gmra.mrb[136].mxu1 %v5573_v25 }
 0x2f9   : > { %1935 = vmatprep.mubr.bf16.mxu0 %v4986_v5  ;;  %2547 = vmatprep.mubr.bf16.mxu1 %v4986_v5 }
 0x300   : > { %1936 = vmatmul.mubr.bf16.gmra.mrb[140].mxu0 %v5571_v24  ;;  %2548 = vmatmul.mubr.bf16.gmra.mrb[140].mxu1 %v5571_v24 }
 0x301   : > { %1945 = vmatprep.mubr.bf16.mxu0 %v4986_v5  ;;  %2557 = vmatprep.mubr.bf16.mxu1 %v4986_v5 }
 0x308   : > { %1946 = vmatmul.mubr.bf16.gmra.mrb[144].mxu0 %v5591_v50  ;;  %2558 = vmatmul.mubr.bf16.gmra.mrb[144].mxu1 %v5591_v50 }
 0x309   : > { %1955 = vmatprep.mubr.bf16.mxu0 %v4986_v5  ;;  %2567 = vmatprep.mubr.bf16.mxu1 %v4986_v5 }
 0x310   : > { %1956 = vmatmul.mubr.bf16.gmra.mrb[148].mxu0 %v5589_v47  ;;  %2568 = vmatmul.mubr.bf16.gmra.mrb[148].mxu1 %v5589_v47 }
 0x311   : > { %1965 = vmatprep.mubr.bf16.mxu0 %v4986_v5  ;;  %2577 = vmatprep.mubr.bf16.mxu1 %v4986_v5 }
 0x318   : > { %1966 = vmatmul.mubr.bf16.gmra.mrb[152].mxu0 %v5603_v20  ;;  %2578 = vmatmul.mubr.bf16.gmra.mrb[152].mxu1 %v5603_v20 }
 0x319   : > { %1975 = vmatprep.mubr.bf16.mxu0 %v4986_v5  ;;  %2587 = vmatprep.mubr.bf16.mxu1 %v4986_v5 }
 0x320   : > { %1976 = vmatmul.mubr.bf16.gmra.mrb[156].mxu0 %v5601_v19  ;;  %2588 = vmatmul.mubr.bf16.gmra.mrb[156].mxu1 %v5601_v19 }
 0x321   : > { %1985 = vmatprep.mubr.bf16.mxu0 %v4986_v5  ;;  %2597 = vmatprep.mubr.bf16.mxu1 %v4986_v5 }
 0x328   : > { %1986 = vmatmul.mubr.bf16.gmra.mrb[160].mxu0 %v5615_v43  ;;  %2598 = vmatmul.mubr.bf16.gmra.mrb[160].mxu1 %v5615_v43 }
 0x329   : > { %1995 = vmatprep.mubr.bf16.mxu0 %v4986_v5  ;;  %2607 = vmatprep.mubr.bf16.mxu1 %v4986_v5 }
 0x330   : > { %1996 = vmatmul.mubr.bf16.gmra.mrb[164].mxu0 %v5613_v42  ;;  %2608 = vmatmul.mubr.bf16.gmra.mrb[164].mxu1 %v5613_v42 }
 0x331   : > { %2005 = vmatprep.mubr.bf16.mxu0 %v4986_v5  ;;  %2617 = vmatprep.mubr.bf16.mxu1 %v4986_v5 }
 0x338   : > { %2006 = vmatmul.mubr.bf16.gmra.mrb[168].mxu0 %v5628_v27  ;;  %2618 = vmatmul.mubr.bf16.gmra.mrb[168].mxu1 %v5628_v27 }
 0x339   : > { %2015 = vmatprep.mubr.bf16.mxu0 %v4986_v5  ;;  %2627 = vmatprep.mubr.bf16.mxu1 %v4986_v5 }
 0x33b   : > { %v1747_v0 = vpop.f32.mrb[64].mxu0  ;;  %v2359_v9 = vpop.f32.mrb[64].mxu1 }
 0x33c   : > { %v1749_v10 = vpop.f32.mrb[65].mxu0  ;;  %v2361_v12 = vpop.f32.mrb[65].mxu1 }
 0x33d   : > { %v1751_v13 = vpop.f32.mrb[66].mxu0  ;;  %v2363_v22 = vpop.f32.mrb[66].mxu1 }
 0x33e   : > { %v1753_v23 = vpop.f32.mrb[67].mxu0  ;;  %v2365_v28 = vpop.f32.mrb[67].mxu1 }
 0x340   : > { %2016 = vmatmul.mubr.bf16.gmra.mrb[172].mxu0 %v5626_v26  ;;  %2628 = vmatmul.mubr.bf16.gmra.mrb[172].mxu1 %v5626_v26 }
 0x341   : > { %2025 = vmatprep.mubr.bf16.mxu0 %v4986_v5  ;;  %2637 = vmatprep.mubr.bf16.mxu1 %v4986_v5 }
 0x343   : > { %v1757_v29 = vpop.f32.mrb[68].mxu0  ;;  %v2369_v1 = vpop.f32.mrb[68].mxu1 }
 0x344   : > { %v2067_v2 = vmax.f32 %v1747_v0, %v1757_v29  ;;  %v2679_v36 = vmax.f32 %v2359_v9, %v2369_v1  ;;  %v1759_v37 = vpop.f32.mrb[69].mxu0  ;;  %v2371_v38 = vpop.f32.mrb[69].mxu1 }
 0x345   : > { %v2136_v54 = vmax.f32 %v1749_v10, %v1759_v37  ;;  %v2748_v55 = vmax.f32 %v2361_v12, %v2371_v38  ;;  %v1761_v27 = vpop.f32.mrb[70].mxu0  ;;  %v2373_v42 = vpop.f32.mrb[70].mxu1 }
 0x346   : > { %v2068_v43 = vmax.f32 %v1751_v13, %v1761_v27  ;;  %v2680_v19 = vmax.f32 %v2363_v22, %v2373_v42  ;;  %v1763_v20 = vpop.f32.mrb[71].mxu0  ;;  %v2375_v47 = vpop.f32.mrb[71].mxu1 }
 0x347   : > { %v2137_v50 = vmax.f32 %v1753_v23, %v1763_v20  ;;  %v2749_v26 = vmax.f32 %v2365_v28, %v2375_v47 }
 0x348   : > { %2026 = vmatmul.mubr.bf16.gmra.mrb[176].mxu0 %v5642_v63  ;;  %2638 = vmatmul.mubr.bf16.gmra.mrb[176].mxu1 %v5642_v63 }
 0x349   : > { %2035 = vmatprep.mubr.bf16.mxu0 %v4986_v5  ;;  %2647 = vmatprep.mubr.bf16.mxu1 %v4986_v5 }
 0x34b   : > { %v1767_v0 = vpop.f32.mrb[72].mxu0  ;;  %v2379_v9 = vpop.f32.mrb[72].mxu1 }
 0x34c   : > { %v2069_v10 = vmax.f32 %v2067_v2, %v1767_v0  ;;  %v2681_v12 = vmax.f32 %v2679_v36, %v2379_v9  ;;  %v1769_v29 = vpop.f32.mrb[73].mxu0  ;;  %v2381_v1 = vpop.f32.mrb[73].mxu1 }
 0x34d   : > { %v2138_v27 = vmax.f32 %v2136_v54, %v1769_v29  ;;  %v2750_v42 = vmax.f32 %v2748_v55, %v2381_v1  ;;  %v1771_v13 = vpop.f32.mrb[74].mxu0  ;;  %v2383_v22 = vpop.f32.mrb[74].mxu1 }
 0x34e   : > { %v2070_v20 = vmax.f32 %v2068_v43, %v1771_v13  ;;  %v2682_v47 = vmax.f32 %v2680_v19, %v2383_v22  ;;  %v1773_v23 = vpop.f32.mrb[75].mxu0  ;;  %v2385_v28 = vpop.f32.mrb[75].mxu1 }
 0x34f   : > { %v2139_v37 = vmax.f32 %v2137_v50, %v1773_v23  ;;  %v2751_v38 = vmax.f32 %v2749_v26, %v2385_v28 }
 0x350   : > { %2036 = vmatmul.mubr.bf16.gmra.mrb[180].mxu0 %v5638_v59  ;;  %2648 = vmatmul.mubr.bf16.gmra.mrb[180].mxu1 %v5638_v59 }
 0x351   : > { %2045 = vmatprep.mubr.bf16.mxu0 %v4986_v5  ;;  %2657 = vmatprep.mubr.bf16.mxu1 %v4986_v5 }
 0x353   : > { %v1777_v2 = vpop.f32.mrb[76].mxu0  ;;  %v2389_v36 = vpop.f32.mrb[76].mxu1 }
 0x354   : > { %v2071_v54 = vmax.f32 %v2069_v10, %v1777_v2  ;;  %v2683_v55 = vmax.f32 %v2681_v12, %v2389_v36  ;;  %v1779_v0 = vpop.f32.mrb[77].mxu0  ;;  %v2391_v9 = vpop.f32.mrb[77].mxu1 }
 0x355   : > { %v2140_v43 = vmax.f32 %v2138_v27, %v1779_v0  ;;  %v2752_v19 = vmax.f32 %v2750_v42, %v2391_v9  ;;  %v1781_v29 = vpop.f32.mrb[78].mxu0  ;;  %v2393_v1 = vpop.f32.mrb[78].mxu1 }
 0x356   : > { %v2072_v50 = vmax.f32 %v2070_v20, %v1781_v29  ;;  %v2684_v26 = vmax.f32 %v2682_v47, %v2393_v1  ;;  %v1783_v13 = vpop.f32.mrb[79].mxu0  ;;  %v2395_v22 = vpop.f32.mrb[79].mxu1 }
 0x357   : > { %v2141_v23 = vmax.f32 %v2139_v37, %v1783_v13  ;;  %v2753_v28 = vmax.f32 %v2751_v38, %v2395_v22 }
 0x358   : > { %2046 = vmatmul.mubr.bf16.gmra.mrb[184].mxu0 %v5658_v39  ;;  %2658 = vmatmul.mubr.bf16.gmra.mrb[184].mxu1 %v5658_v39 }
 0x359   : > { %2055 = vmatprep.mubr.bf16.mxu0 %v4986_v5  ;;  %2667 = vmatprep.mubr.bf16.mxu1 %v4986_v5 }
 0x35b   : > { %v1787_v10 = vpop.f32.mrb[80].mxu0  ;;  %v2399_v12 = vpop.f32.mrb[80].mxu1 }
 0x35c   : > { %v2073_v27 = vmax.f32 %v2071_v54, %v1787_v10  ;;  %v2685_v42 = vmax.f32 %v2683_v55, %v2399_v12  ;;  %v1789_v2 = vpop.f32.mrb[81].mxu0  ;;  %v2401_v36 = vpop.f32.mrb[81].mxu1 }
 0x35d   : > { %v2142_v20 = vmax.f32 %v2140_v43, %v1789_v2  ;;  %v2754_v47 = vmax.f32 %v2752_v19, %v2401_v36  ;;  %v1791_v0 = vpop.f32.mrb[82].mxu0  ;;  %v2403_v9 = vpop.f32.mrb[82].mxu1 }
 0x35e   : > { %v2074_v37 = vmax.f32 %v2072_v50, %v1791_v0  ;;  %v2686_v38 = vmax.f32 %v2684_v26, %v2403_v9  ;;  %v1793_v29 = vpop.f32.mrb[83].mxu0  ;;  %v2405_v1 = vpop.f32.mrb[83].mxu1 }
 0x35f   : > { %v2143_v13 = vmax.f32 %v2141_v23, %v1793_v29  ;;  %v2755_v22 = vmax.f32 %v2753_v28, %v2405_v1 }
 0x360   : > { %2056 = vmatmul.mubr.bf16.gmra.mrb[188].mxu0 %v5656_v53  ;;  %2668 = vmatmul.mubr.bf16.gmra.mrb[188].mxu1 %v5656_v53 }
 0x361   : > { %2965 = vmatprep.mubr.bf16.mxu0 %v4986_v5  ;;  %3583 = vmatprep.mubr.bf16.mxu1 %v4986_v5 }
 0x363   : > { %v1797_v54 = vpop.f32.mrb[84].mxu0  ;;  %v2409_v55 = vpop.f32.mrb[84].mxu1 }
 0x364   : > { %v2075_v43 = vmax.f32 %v2073_v27, %v1797_v54  ;;  %v2687_v19 = vmax.f32 %v2685_v42, %v2409_v55  ;;  %v1799_v10 = vpop.f32.mrb[85].mxu0  ;;  %v2411_v12 = vpop.f32.mrb[85].mxu1 }
 0x365   : > { %v2144_v50 = vmax.f32 %v2142_v20, %v1799_v10  ;;  %v2756_v26 = vmax.f32 %v2754_v47, %v2411_v12  ;;  %v1801_v2 = vpop.f32.mrb[86].mxu0  ;;  %v2413_v36 = vpop.f32.mrb[86].mxu1 }
 0x366   : > { %v2076_v23 = vmax.f32 %v2074_v37, %v1801_v2  ;;  %v2688_v28 = vmax.f32 %v2686_v38, %v2413_v36  ;;  %v1803_v0 = vpop.f32.mrb[87].mxu0  ;;  %v2415_v9 = vpop.f32.mrb[87].mxu1 }
 0x367   : > { %v2145_v29 = vmax.f32 %v2143_v13, %v1803_v0  ;;  %v2757_v1 = vmax.f32 %v2755_v22, %v2415_v9 }
 0x368   : > { %2966 = vmatmul.mubr.bf16.vlgmr.msra.gmra.mrb[192].mxu0 %v5441_v11  ;;  %3584 = vmatmul.mubr.bf16.vlgmr.msra.gmra.mrb[192].mxu1 %v5439_v8 }
 0x369   : > { %3542 = vmatpush1.bf16.msra.mxu0 %v5444_v18  ;;  %2975 = vmatprep.mubr.bf16.mxu0 %v4986_v5 }
 0x36a   : > { %3593 = vmatprep.mubr.bf16.mxu1 %v4986_v5  ;;  %3543 = vmatprep.subr.bf16.mxu0 %v5449_v21 }
 0x36b   : > { %v1807_v27 = vpop.f32.mrb[88].mxu0  ;;  %v2419_v42 = vpop.f32.mrb[88].mxu1 }
 0x36c   : > { %v2077_v20 = vmax.f32 %v2075_v43, %v1807_v27  ;;  %v2689_v47 = vmax.f32 %v2687_v19, %v2419_v42  ;;  %v1809_v37 = vpop.f32.mrb[89].mxu0  ;;  %v2421_v38 = vpop.f32.mrb[89].mxu1 }
 0x36d   : > { %v2146_v13 = vmax.f32 %v2144_v50, %v1809_v37  ;;  %v2758_v22 = vmax.f32 %v2756_v26, %v2421_v38  ;;  %v1811_v54 = vpop.f32.mrb[90].mxu0  ;;  %v2423_v55 = vpop.f32.mrb[90].mxu1  ;;  %3544 = vmatpush1.bf16.msra.mxu0 %v5459_v30 }
 0x36e   : > { %v2078_v10 = vmax.f32 %v2076_v23, %v1811_v54  ;;  %v2690_v18 = vmax.f32 %v2688_v28, %v2423_v55  ;;  %v1813_v12 = vpop.f32.mrb[91].mxu0  ;;  %v2425_v2 = vpop.f32.mrb[91].mxu1  ;;  %3545 = vmatprep.subr.bf16.mxu0 %v5476_v49 }
 0x36f   : > { %v2147_v36 = vmax.f32 %v2145_v29, %v1813_v12  ;;  %v2759_v21 = vmax.f32 %v2757_v1, %v2425_v2 }
 0x370   : > { %2976 = vmatmul.mubr.bf16.gmra.mrb[196].mxu0 %v5439_v8  ;;  %3594 = vmatmul.mubr.bf16.gmra.mrb[196].mxu1 %v5464_v32 }
 0x371   : > { %2985 = vmatprep.mubr.bf16.mxu0 %v4986_v5  ;;  %3603 = vmatprep.mubr.bf16.mxu1 %v4986_v5 }
 0x372   : > { %3546 = vmatpush1.bf16.msra.mxu0 %v5474_v48 }
 0x373   : > { %v1817_v43 = vpop.f32.mrb[92].mxu0  ;;  %v2429_v30 = vpop.f32.mrb[92].mxu1  ;;  %3547 = vmatprep.subr.bf16.mxu0 %v5530_v7 }
 0x374   : > { %v2079_v19 = vmax.f32 %v2077_v20, %v1817_v43  ;;  %v2691_v50 = vmax.f32 %v2689_v47, %v2429_v30  ;;  %v1819_v26 = vpop.f32.mrb[93].mxu0  ;;  %v2431_v49 = vpop.f32.mrb[93].mxu1 }
 0x375   : > { %v2148_v23 = vmax.f32 %v2146_v13, %v1819_v26  ;;  %v2760_v28 = vmax.f32 %v2758_v22, %v2431_v49  ;;  %v1821_v0 = vpop.f32.mrb[94].mxu0  ;;  %v2433_v8 = vpop.f32.mrb[94].mxu1 }
 0x376   : > { %v2080_v9 = vmax.f32 %v2078_v10, %v1821_v0  ;;  %v2692_v29 = vmax.f32 %v2690_v18, %v2433_v8  ;;  %v1823_v1 = vpop.f32.mrb[95].mxu0  ;;  %v2435_v27 = vpop.f32.mrb[95].mxu1  ;;  %3548 = vmatpush1.bf16.msra.mxu0 %v5528_v4 }
 0x377   : > { %v2149_v42 = vmax.f32 %v2147_v36, %v1823_v1  ;;  %v2761_v48 = vmax.f32 %v2759_v21, %v2435_v27  ;;  %3549 = vmatprep.subr.bf16.mxu0 %v5584_v41 }
 0x378   : > { %2986 = vmatmul.mubr.bf16.gmra.mrb[200].mxu0 %v5464_v32  ;;  %3604 = vmatmul.mubr.bf16.gmra.mrb[200].mxu1 %v5462_v31 }
 0x379   : > { %2995 = vmatprep.mubr.bf16.mxu0 %v4986_v5  ;;  %3613 = vmatprep.mubr.bf16.mxu1 %v4986_v5 }
 0x37a   : > { %3550 = vmatpush1.bf16.msra.mxu0 %v5582_v40 }
 0x37b   : > { %v1827_v7 = vpop.f32.mrb[96].mxu0  ;;  %v2439_v20 = vpop.f32.mrb[96].mxu1  ;;  %3551 = vmatprep.subr.bf16.mxu0 %v5640_v62 }
 0x37c   : > { %v2081_v47 = vmax.f32 %v2079_v19, %v1827_v7  ;;  %v2693_v4 = vmax.f32 %v2691_v50, %v2439_v20  ;;  %v1829_v37 = vpop.f32.mrb[97].mxu0  ;;  %v2441_v38 = vpop.f32.mrb[97].mxu1 }
 0x37d   : > { %v2150_v13 = vmax.f32 %v2148_v23, %v1829_v37  ;;  %v2762_v41 = vmax.f32 %v2760_v28, %v2441_v38  ;;  %v1831_v22 = vpop.f32.mrb[98].mxu0  ;;  %v2443_v32 = vpop.f32.mrb[98].mxu1 }
 0x37e   : > { %v2082_v54 = vmax.f32 %v2080_v9, %v1831_v22  ;;  %v2694_v55 = vmax.f32 %v2692_v29, %v2443_v32  ;;  %v1833_v10 = vpop.f32.mrb[99].mxu0  ;;  %v2445_v18 = vpop.f32.mrb[99].mxu1  ;;  %3552 = vmatpush1.bf16.msra.mxu0 %v5644_v3 }
 0x37f   : > { %v2151_v12 = vmax.f32 %v2149_v42, %v1833_v10  ;;  %v2763_v40 = vmax.f32 %v2761_v48, %v2445_v18  ;;  %3553 = vmatprep.subr.bf16.mxu0 %v5660_v45 }
 0x380   : > { %2996 = vmatmul.mubr.bf16.gmra.mrb[204].mxu0 %v5462_v31  ;;  %3614 = vmatmul.mubr.bf16.gmra.mrb[204].mxu1 %v5483_v58 }
 0x381   : > { %3005 = vmatprep.mubr.bf16.mxu0 %v4986_v5  ;;  %3623 = vmatprep.mubr.bf16.mxu1 %v4986_v5 }
 0x382   : > { %3554 = vmatpush1.bf16.msra.mxu0 %v5662_v46 }
 0x383   : > { %v1837_v62 = vpop.f32.mrb[100].mxu0  ;;  %v2449_v2 = vpop.f32.mrb[100].mxu1  ;;  %3555 = vmatprep.subr.bf16.mxu0 %v5669_v56 }
 0x384   : > { %v2083_v36 = vmax.f32 %v2081_v47, %v1837_v62  ;;  %v2695_v3 = vmax.f32 %v2693_v4, %v2449_v2  ;;  %v1839_v21 = vpop.f32.mrb[101].mxu0  ;;  %v2451_v43 = vpop.f32.mrb[101].mxu1 }
 0x385   : > { %v2152_v30 = vmax.f32 %v2150_v13, %v1839_v21  ;;  %v2764_v45 = vmax.f32 %v2762_v41, %v2451_v43  ;;  %v1841_v19 = vpop.f32.mrb[102].mxu0  ;;  %v2453_v31 = vpop.f32.mrb[102].mxu1 }
 0x386   : > { %v2084_v50 = vmax.f32 %v2082_v54, %v1841_v19  ;;  %v2696_v26 = vmax.f32 %v2694_v55, %v2453_v31  ;;  %v1843_v49 = vpop.f32.mrb[103].mxu0  ;;  %v2455_v23 = vpop.f32.mrb[103].mxu1  ;;  %3556 = vmatpush1.bf16.msra.mxu0 %v5672_v44 }
 0x387   : > { %v2153_v28 = vmax.f32 %v2151_v12, %v1843_v49  ;;  %v2765_v46 = vmax.f32 %v2763_v40, %v2455_v23 }
 0x388   : > { %3006 = vmatmul.mubr.bf16.gmra.mrb[208].mxu0 %v5483_v58  ;;  %3624 = vmatmul.mubr.bf16.gmra.mrb[208].mxu1 %v5481_v57 }
 0x389   : > { %3015 = vmatprep.mubr.bf16.mxu0 %v4986_v5  ;;  %3633 = vmatprep.mubr.bf16.mxu1 %v4986_v5 }
 0x38b   : > { %v1847_v56 = vpop.f32.mrb[104].mxu0  ;;  %v2459_v0 = vpop.f32.mrb[104].mxu1 }
 0x38c   : > { %v2085_v8 = vmax.f32 %v2083_v36, %v1847_v56  ;;  %v2697_v9 = vmax.f32 %v2695_v3, %v2459_v0  ;;  %v1849_v29 = vpop.f32.mrb[105].mxu0  ;;  %v2461_v1 = vpop.f32.mrb[105].mxu1 }
 0x38d   : > { %v2154_v27 = vmax.f32 %v2152_v30, %v1849_v29  ;;  %v2766_v42 = vmax.f32 %v2764_v45, %v2461_v1  ;;  %v1851_v48 = vpop.f32.mrb[106].mxu0  ;;  %v2463_v44 = vpop.f32.mrb[106].mxu1 }
 0x38e   : > { %v2086_v7 = vmax.f32 %v2084_v50, %v1851_v48  ;;  %v2698_v20 = vmax.f32 %v2696_v26, %v2463_v44  ;;  %v1853_v47 = vpop.f32.mrb[107].mxu0  ;;  %v2465_v58 = vpop.f32.mrb[107].mxu1 }
 0x38f   : > { %v2155_v4 = vmax.f32 %v2153_v28, %v1853_v47  ;;  %v2767_v37 = vmax.f32 %v2765_v46, %v2465_v58 }
 0x390   : > { %3016 = vmatmul.mubr.bf16.gmra.mrb[212].mxu0 %v5481_v57  ;;  %3634 = vmatmul.mubr.bf16.gmra.mrb[212].mxu1 %v5495_v15 }
 0x391   : > { %3025 = vmatprep.mubr.bf16.mxu0 %v4986_v5  ;;  %3643 = vmatprep.mubr.bf16.mxu1 %v4986_v5 }
 0x393   : > { %v1857_v38 = vpop.f32.mrb[108].mxu0  ;;  %v2469_v13 = vpop.f32.mrb[108].mxu1 }
 0x394   : > { %v2087_v41 = vmax.f32 %v2085_v8, %v1857_v38  ;;  %v2699_v22 = vmax.f32 %v2697_v9, %v2469_v13  ;;  %v1859_v32 = vpop.f32.mrb[109].mxu0  ;;  %v2471_v54 = vpop.f32.mrb[109].mxu1 }
 0x395   : > { %v2156_v55 = vmax.f32 %v2154_v27, %v1859_v32  ;;  %v2768_v10 = vmax.f32 %v2766_v42, %v2471_v54  ;;  %v1861_v18 = vpop.f32.mrb[110].mxu0  ;;  %v2473_v12 = vpop.f32.mrb[110].mxu1 }
 0x396   : > { %v2088_v40 = vmax.f32 %v2086_v7, %v1861_v18  ;;  %v2700_v62 = vmax.f32 %v2698_v20, %v2473_v12  ;;  %v1863_v2 = vpop.f32.mrb[111].mxu0  ;;  %v2475_v57 = vpop.f32.mrb[111].mxu1 }
 0x397   : > { %v2157_v36 = vmax.f32 %v2155_v4, %v1863_v2  ;;  %v2769_v3 = vmax.f32 %v2767_v37, %v2475_v57 }
 0x398   : > { %3026 = vmatmul.mubr.bf16.gmra.mrb[216].mxu0 %v5495_v15  ;;  %3644 = vmatmul.mubr.bf16.gmra.mrb[216].mxu1 %v5493_v14 }
 0x399   : > { %3035 = vmatprep.mubr.bf16.mxu0 %v4986_v5  ;;  %3653 = vmatprep.mubr.bf16.mxu1 %v4986_v5 }
 0x39b   : > { %v1867_v21 = vpop.f32.mrb[112].mxu0  ;;  %v2479_v43 = vpop.f32.mrb[112].mxu1 }
 0x39c   : > { %v2089_v30 = vmax.f32 %v2087_v41, %v1867_v21  ;;  %v2701_v45 = vmax.f32 %v2699_v22, %v2479_v43  ;;  %v1869_v19 = vpop.f32.mrb[113].mxu0  ;;  %v2481_v31 = vpop.f32.mrb[113].mxu1 }
 0x39d   : > { %v2158_v50 = vmax.f32 %v2156_v55, %v1869_v19  ;;  %v2770_v26 = vmax.f32 %v2768_v10, %v2481_v31  ;;  %v1871_v49 = vpop.f32.mrb[114].mxu0  ;;  %v2483_v23 = vpop.f32.mrb[114].mxu1 }
 0x39e   : > { %v2090_v28 = vmax.f32 %v2088_v40, %v1871_v49  ;;  %v2702_v46 = vmax.f32 %v2700_v62, %v2483_v23  ;;  %v1873_v56 = vpop.f32.mrb[115].mxu0  ;;  %v2485_v15 = vpop.f32.mrb[115].mxu1 }
 0x39f   : > { %v2159_v0 = vmax.f32 %v2157_v36, %v1873_v56  ;;  %v2771_v8 = vmax.f32 %v2769_v3, %v2485_v15 }
 0x3a0   : > { %3036 = vmatmul.mubr.bf16.gmra.mrb[220].mxu0 %v5493_v14  ;;  %3654 = vmatmul.mubr.bf16.gmra.mrb[220].mxu1 %v5507_v35 }
 0x3a1   : > { %3045 = vmatprep.mubr.bf16.mxu0 %v4986_v5  ;;  %3663 = vmatprep.mubr.bf16.mxu1 %v4986_v5 }
 0x3a3   : > { %v1877_v9 = vpop.f32.mrb[116].mxu0  ;;  %v2489_v29 = vpop.f32.mrb[116].mxu1 }
 0x3a4   : > { %v2091_v1 = vmax.f32 %v2089_v30, %v1877_v9  ;;  %v2703_v27 = vmax.f32 %v2701_v45, %v2489_v29  ;;  %v1879_v42 = vpop.f32.mrb[117].mxu0  ;;  %v2491_v48 = vpop.f32.mrb[117].mxu1 }
 0x3a5   : > { %v2160_v44 = vmax.f32 %v2158_v50, %v1879_v42  ;;  %v2772_v7 = vmax.f32 %v2770_v26, %v2491_v48  ;;  %v1881_v20 = vpop.f32.mrb[118].mxu0  ;;  %v2493_v47 = vpop.f32.mrb[118].mxu1 }
 0x3a6   : > { %v2092_v58 = vmax.f32 %v2090_v28, %v1881_v20  ;;  %v2704_v4 = vmax.f32 %v2702_v46, %v2493_v47  ;;  %v1883_v37 = vpop.f32.mrb[119].mxu0  ;;  %v2495_v14 = vpop.f32.mrb[119].mxu1 }
 0x3a7   : > { %v2161_v38 = vmax.f32 %v2159_v0, %v1883_v37  ;;  %v2773_v13 = vmax.f32 %v2771_v8, %v2495_v14 }
 0x3a8   : > { %3046 = vmatmul.mubr.bf16.gmra.mrb[224].mxu0 %v5507_v35  ;;  %3664 = vmatmul.mubr.bf16.gmra.mrb[224].mxu1 %v5505_v34 }
 0x3a9   : > { %3055 = vmatprep.mubr.bf16.mxu0 %v4986_v5  ;;  %3673 = vmatprep.mubr.bf16.mxu1 %v4986_v5 }
 0x3ab   : > { %v1887_v41 = vpop.f32.mrb[120].mxu0  ;;  %v2499_v22 = vpop.f32.mrb[120].mxu1 }
 0x3ac   : > { %v2093_v32 = vmax.f32 %v2091_v1, %v1887_v41  ;;  %v2705_v54 = vmax.f32 %v2703_v27, %v2499_v22  ;;  %v1889_v55 = vpop.f32.mrb[121].mxu0  ;;  %v2501_v10 = vpop.f32.mrb[121].mxu1 }
 0x3ad   : > { %v2162_v18 = vmax.f32 %v2160_v44, %v1889_v55  ;;  %v2774_v12 = vmax.f32 %v2772_v7, %v2501_v10  ;;  %v1891_v40 = vpop.f32.mrb[122].mxu0  ;;  %v2503_v62 = vpop.f32.mrb[122].mxu1 }
 0x3ae   : > { %v2094_v2 = vmax.f32 %v2092_v58, %v1891_v40  ;;  %v2706_v57 = vmax.f32 %v2704_v4, %v2503_v62  ;;  %v1893_v36 = vpop.f32.mrb[123].mxu0  ;;  %v2505_v35 = vpop.f32.mrb[123].mxu1  ;;  %v4987_v62 = vmov -inf  }
 0x3af   : > { %v2163_v3 = vmax.f32 %v2161_v38, %v1893_v36  ;;  %v2775_v21 = vmax.f32 %v2773_v13, %v2505_v35  ;;  %414 = vst [vmem:[#allocation2] sm:$0xff] %v4987_v62 }
 0x3b0   : > { %3056 = vmatmul.mubr.bf16.gmra.mrb[228].mxu0 %v5505_v34  ;;  %3674 = vmatmul.mubr.bf16.gmra.mrb[228].mxu1 %v5519_v52 }
 0x3b1   : > { %3065 = vmatprep.mubr.bf16.mxu0 %v4986_v5  ;;  %3683 = vmatprep.mubr.bf16.mxu1 %v4986_v5 }
 0x3b3   : > { %v1897_v43 = vpop.f32.mrb[124].mxu0  ;;  %v2509_v30 = vpop.f32.mrb[124].mxu1 }
 0x3b4   : > { %v2095_v45 = vmax.f32 %v2093_v32, %v1897_v43  ;;  %v2707_v19 = vmax.f32 %v2705_v54, %v2509_v30  ;;  %v1899_v31 = vpop.f32.mrb[125].mxu0  ;;  %v2511_v50 = vpop.f32.mrb[125].mxu1 }
 0x3b5   : > { %v2164_v26 = vmax.f32 %v2162_v18, %v1899_v31  ;;  %v2776_v49 = vmax.f32 %v2774_v12, %v2511_v50  ;;  %v1901_v23 = vpop.f32.mrb[126].mxu0  ;;  %v2513_v28 = vpop.f32.mrb[126].mxu1 }
 0x3b6   : > { %v2096_v46 = vmax.f32 %v2094_v2, %v1901_v23  ;;  %v2708_v56 = vmax.f32 %v2706_v57, %v2513_v28  ;;  %v1903_v15 = vpop.f32.mrb[127].mxu0  ;;  %v2515_v34 = vpop.f32.mrb[127].mxu1 }
 0x3b7   : > { %v2165_v0 = vmax.f32 %v2163_v3, %v1903_v15  ;;  %v2777_v8 = vmax.f32 %v2775_v21, %v2515_v34 }
 0x3b8   : > { %3066 = vmatmul.mubr.bf16.gmra.mrb[232].mxu0 %v5519_v52  ;;  %3684 = vmatmul.mubr.bf16.gmra.mrb[232].mxu1 %v5517_v51 }
 0x3b9   : > { %3075 = vmatprep.mubr.bf16.mxu0 %v4986_v5  ;;  %3693 = vmatprep.mubr.bf16.mxu1 %v4986_v5 }
 0x3bb   : > { %v1907_v9 = vpop.f32.mrb[128].mxu0  ;;  %v2519_v29 = vpop.f32.mrb[128].mxu1 }
 0x3bc   : > { %v2097_v1 = vmax.f32 %v2095_v45, %v1907_v9  ;;  %v2709_v27 = vmax.f32 %v2707_v19, %v2519_v29  ;;  %v1909_v42 = vpop.f32.mrb[129].mxu0  ;;  %v2521_v48 = vpop.f32.mrb[129].mxu1 }
 0x3bd   : > { %v2166_v44 = vmax.f32 %v2164_v26, %v1909_v42  ;;  %v2778_v7 = vmax.f32 %v2776_v49, %v2521_v48  ;;  %v1911_v20 = vpop.f32.mrb[130].mxu0  ;;  %v2523_v47 = vpop.f32.mrb[130].mxu1 }
 0x3be   : > { %v2098_v58 = vmax.f32 %v2096_v46, %v1911_v20  ;;  %v2710_v4 = vmax.f32 %v2708_v56, %v2523_v47  ;;  %v1913_v37 = vpop.f32.mrb[131].mxu0  ;;  %v2525_v52 = vpop.f32.mrb[131].mxu1 }
 0x3bf   : > { %v2167_v14 = vmax.f32 %v2165_v0, %v1913_v37  ;;  %v2779_v38 = vmax.f32 %v2777_v8, %v2525_v52 }
 0x3c0   : > { %3076 = vmatmul.mubr.bf16.gmra.mrb[236].mxu0 %v5517_v51  ;;  %3694 = vmatmul.mubr.bf16.gmra.mrb[236].mxu1 %v5537_v17 }
 0x3c1   : > { %3085 = vmatprep.mubr.bf16.mxu0 %v4986_v5  ;;  %3703 = vmatprep.mubr.bf16.mxu1 %v4986_v5 }
 0x3c3   : > { %v1917_v13 = vpop.f32.mrb[132].mxu0  ;;  %v2529_v41 = vpop.f32.mrb[132].mxu1 }
 0x3c4   : > { %v2099_v22 = vmax.f32 %v2097_v1, %v1917_v13  ;;  %v2711_v32 = vmax.f32 %v2709_v27, %v2529_v41  ;;  %v1919_v54 = vpop.f32.mrb[133].mxu0  ;;  %v2531_v55 = vpop.f32.mrb[133].mxu1 }
 0x3c5   : > { %v2168_v10 = vmax.f32 %v2166_v44, %v1919_v54  ;;  %v2780_v18 = vmax.f32 %v2778_v7, %v2531_v55  ;;  %v1921_v12 = vpop.f32.mrb[134].mxu0  ;;  %v2533_v40 = vpop.f32.mrb[134].mxu1 }
 0x3c6   : > { %v2100_v2 = vmax.f32 %v2098_v58, %v1921_v12  ;;  %v2712_v51 = vmax.f32 %v2710_v4, %v2533_v40  ;;  %v1923_v57 = vpop.f32.mrb[135].mxu0  ;;  %v2535_v36 = vpop.f32.mrb[135].mxu1 }
 0x3c7   : > { %v2169_v35 = vmax.f32 %v2167_v14, %v1923_v57  ;;  %v2781_v3 = vmax.f32 %v2779_v38, %v2535_v36 }
 0x3c8   : > { %3086 = vmatmul.mubr.bf16.gmra.mrb[240].mxu0 %v5537_v17  ;;  %3704 = vmatmul.mubr.bf16.gmra.mrb[240].mxu1 %v5535_v16 }
 0x3c9   : > { %3095 = vmatprep.mubr.bf16.mxu0 %v4986_v5  ;;  %3713 = vmatprep.mubr.bf16.mxu1 %v4986_v5 }
 0x3cb   : > { %v1927_v21 = vpop.f32.mrb[136].mxu0  ;;  %v2539_v43 = vpop.f32.mrb[136].mxu1 }
 0x3cc   : > { %v2101_v30 = vmax.f32 %v2099_v22, %v1927_v21  ;;  %v2713_v45 = vmax.f32 %v2711_v32, %v2539_v43  ;;  %v1929_v19 = vpop.f32.mrb[137].mxu0  ;;  %v2541_v31 = vpop.f32.mrb[137].mxu1 }
 0x3cd   : > { %v2170_v50 = vmax.f32 %v2168_v10, %v1929_v19  ;;  %v2782_v26 = vmax.f32 %v2780_v18, %v2541_v31  ;;  %v1931_v49 = vpop.f32.mrb[138].mxu0  ;;  %v2543_v23 = vpop.f32.mrb[138].mxu1 }
 0x3ce   : > { %v2102_v28 = vmax.f32 %v2100_v2, %v1931_v49  ;;  %v2714_v46 = vmax.f32 %v2712_v51, %v2543_v23  ;;  %v1933_v56 = vpop.f32.mrb[139].mxu0  ;;  %v2545_v17 = vpop.f32.mrb[139].mxu1 }
 0x3cf   : > { %v2171_v15 = vmax.f32 %v2169_v35, %v1933_v56  ;;  %v2783_v34 = vmax.f32 %v2781_v3, %v2545_v17 }
 0x3d0   : > { %3096 = vmatmul.mubr.bf16.gmra.mrb[244].mxu0 %v5535_v16  ;;  %3714 = vmatmul.mubr.bf16.gmra.mrb[244].mxu1 %v5549_v33 }
 0x3d1   : > { %3105 = vmatprep.mubr.bf16.mxu0 %v4986_v5  ;;  %3723 = vmatprep.mubr.bf16.mxu1 %v4986_v5 }
 0x3d3   : > { %v1937_v0 = vpop.f32.mrb[140].mxu0  ;;  %v2549_v8 = vpop.f32.mrb[140].mxu1 }
 0x3d4   : > { %v2103_v9 = vmax.f32 %v2101_v30, %v1937_v0  ;;  %v2715_v29 = vmax.f32 %v2713_v45, %v2549_v8  ;;  %v1939_v1 = vpop.f32.mrb[141].mxu0  ;;  %v2551_v27 = vpop.f32.mrb[141].mxu1 }
 0x3d5   : > { %v2172_v42 = vmax.f32 %v2170_v50, %v1939_v1  ;;  %v2784_v48 = vmax.f32 %v2782_v26, %v2551_v27  ;;  %v1941_v44 = vpop.f32.mrb[142].mxu0  ;;  %v2553_v7 = vpop.f32.mrb[142].mxu1 }
 0x3d6   : > { %v2104_v20 = vmax.f32 %v2102_v28, %v1941_v44  ;;  %v2716_v47 = vmax.f32 %v2714_v46, %v2553_v7  ;;  %v1943_v58 = vpop.f32.mrb[143].mxu0  ;;  %v2555_v16 = vpop.f32.mrb[143].mxu1 }
 0x3d7   : > { %v2173_v4 = vmax.f32 %v2171_v15, %v1943_v58  ;;  %v2785_v37 = vmax.f32 %v2783_v34, %v2555_v16 }
 0x3d8   : > { %3106 = vmatmul.mubr.bf16.gmra.mrb[248].mxu0 %v5549_v33  ;;  %3724 = vmatmul.mubr.bf16.gmra.mrb[248].mxu1 %v5547_v6 }
 0x3d9   : > { %3115 = vmatprep.mubr.bf16.mxu0 %v4986_v5  ;;  %3733 = vmatprep.mubr.bf16.mxu1 %v4986_v5 }
 0x3db   : > { %v1947_v52 = vpop.f32.mrb[144].mxu0  ;;  %v2559_v14 = vpop.f32.mrb[144].mxu1 }
 0x3dc   : > { %v2105_v38 = vmax.f32 %v2103_v9, %v1947_v52  ;;  %v2717_v13 = vmax.f32 %v2715_v29, %v2559_v14  ;;  %v1949_v41 = vpop.f32.mrb[145].mxu0  ;;  %v2561_v22 = vpop.f32.mrb[145].mxu1 }
 0x3dd   : > { %v2174_v32 = vmax.f32 %v2172_v42, %v1949_v41  ;;  %v2786_v54 = vmax.f32 %v2784_v48, %v2561_v22  ;;  %v1951_v55 = vpop.f32.mrb[146].mxu0  ;;  %v2563_v10 = vpop.f32.mrb[146].mxu1 }
 0x3de   : > { %v2106_v18 = vmax.f32 %v2104_v20, %v1951_v55  ;;  %v2718_v12 = vmax.f32 %v2716_v47, %v2563_v10  ;;  %v1953_v40 = vpop.f32.mrb[147].mxu0  ;;  %v2565_v33 = vpop.f32.mrb[147].mxu1 }
 0x3df   : > { %v2175_v62 = vmax.f32 %v2173_v4, %v1953_v40  ;;  %v2787_v2 = vmax.f32 %v2785_v37, %v2565_v33 }
 0x3e0   : > { %3116 = vmatmul.mubr.bf16.gmra.mrb[252].mxu0 %v5547_v6  ;;  %3734 = vmatmul.mubr.bf16.gmra.mrb[252].mxu1 %v5561_v61 }
 0x3e1   : > { %3125 = vmatprep.mubr.bf16.mxu0 %v4986_v5  ;;  %3743 = vmatprep.mubr.bf16.mxu1 %v4986_v5 }
 0x3e3   : > { %v1957_v51 = vpop.f32.mrb[148].mxu0  ;;  %v2569_v57 = vpop.f32.mrb[148].mxu1 }
 0x3e4   : > { %v2107_v36 = vmax.f32 %v2105_v38, %v1957_v51  ;;  %v2719_v35 = vmax.f32 %v2717_v13, %v2569_v57  ;;  %v1959_v3 = vpop.f32.mrb[149].mxu0  ;;  %v2571_v21 = vpop.f32.mrb[149].mxu1 }
 0x3e5   : > { %v2176_v43 = vmax.f32 %v2174_v32, %v1959_v3  ;;  %v2788_v30 = vmax.f32 %v2786_v54, %v2571_v21  ;;  %v1961_v45 = vpop.f32.mrb[150].mxu0  ;;  %v2573_v19 = vpop.f32.mrb[150].mxu1 }
 0x3e6   : > { %v2108_v31 = vmax.f32 %v2106_v18, %v1961_v45  ;;  %v2720_v50 = vmax.f32 %v2718_v12, %v2573_v19  ;;  %v1963_v26 = vpop.f32.mrb[151].mxu0  ;;  %v2575_v6 = vpop.f32.mrb[151].mxu1 }
 0x3e7   : > { %v2177_v49 = vmax.f32 %v2175_v62, %v1963_v26  ;;  %v2789_v23 = vmax.f32 %v2787_v2, %v2575_v6 }
 0x3e8   : > { %3126 = vmatmul.mubr.bf16.gmra.mrb[0].mxu0 %v5561_v61  ;;  %3744 = vmatmul.mubr.bf16.gmra.mrb[0].mxu1 %v5559_v60 }
 0x3e9   : > { %3135 = vmatprep.mubr.bf16.mxu0 %v4986_v5  ;;  %3753 = vmatprep.mubr.bf16.mxu1 %v4986_v5 }
 0x3eb   : > { %v1967_v28 = vpop.f32.mrb[152].mxu0  ;;  %v2579_v46 = vpop.f32.mrb[152].mxu1 }
 0x3ec   : > { %v2109_v56 = vmax.f32 %v2107_v36, %v1967_v28  ;;  %v2721_v17 = vmax.f32 %v2719_v35, %v2579_v46  ;;  %v1969_v15 = vpop.f32.mrb[153].mxu0  ;;  %v2581_v34 = vpop.f32.mrb[153].mxu1 }
 0x3ed   : > { %v2178_v0 = vmax.f32 %v2176_v43, %v1969_v15  ;;  %v2790_v8 = vmax.f32 %v2788_v30, %v2581_v34  ;;  %v1971_v9 = vpop.f32.mrb[154].mxu0  ;;  %v2583_v29 = vpop.f32.mrb[154].mxu1  ;;  %v5973_v30 = vld [vmem:[#allocation18_spill] sm:$0xff] }
 0x3ee   : > { %v2110_v1 = vmax.f32 %v2108_v31, %v1971_v9  ;;  %v2722_v27 = vmax.f32 %v2720_v50, %v2583_v29  ;;  %v1973_v42 = vpop.f32.mrb[155].mxu0  ;;  %v2585_v61 = vpop.f32.mrb[155].mxu1 }
 0x3ef   : > { %v2179_v48 = vmax.f32 %v2177_v49, %v1973_v42  ;;  %v2791_v44 = vmax.f32 %v2789_v23, %v2585_v61 }
 0x3f0   : > { %3136 = vmatmul.mubr.bf16.gmra.mrb[4].mxu0 %v5559_v60  ;;  %3754 = vmatmul.mubr.bf16.gmra.mrb[4].mxu1 %v5573_v25 }
 0x3f1   : > { %3145 = vmatprep.mubr.bf16.mxu0 %v4986_v5  ;;  %3763 = vmatprep.mubr.bf16.mxu1 %v4986_v5 }
 0x3f3   : > { %v1977_v7 = vpop.f32.mrb[156].mxu0  ;;  %v2589_v20 = vpop.f32.mrb[156].mxu1 }
 0x3f4   : > { %v2111_v47 = vmax.f32 %v2109_v56, %v1977_v7  ;;  %v2723_v58 = vmax.f32 %v2721_v17, %v2589_v20  ;;  %v1979_v16 = vpop.f32.mrb[157].mxu0  ;;  %v2591_v4 = vpop.f32.mrb[157].mxu1 }
 0x3f5   : > { %v2180_v37 = vmax.f32 %v2178_v0, %v1979_v16  ;;  %v2792_v52 = vmax.f32 %v2790_v8, %v2591_v4  ;;  %v1981_v14 = vpop.f32.mrb[158].mxu0  ;;  %v2593_v38 = vpop.f32.mrb[158].mxu1  ;;  %v5974_v8 = vld [vmem:[#allocation17_spill] sm:$0xff] }
 0x3f6   : > { %v2112_v13 = vmax.f32 %v2110_v1, %v1981_v14  ;;  %v2724_v41 = vmax.f32 %v2722_v27, %v2593_v38  ;;  %v1983_v22 = vpop.f32.mrb[159].mxu0  ;;  %v2595_v60 = vpop.f32.mrb[159].mxu1  ;;  %v5975_v14 = vld [vmem:[#allocation20_spill] sm:$0xff] }
 0x3f7   : > { %v2181_v32 = vmax.f32 %v2179_v48, %v1983_v22  ;;  %v2793_v54 = vmax.f32 %v2791_v44, %v2595_v60 }
 0x3f8   : > { %3146 = vmatmul.mubr.bf16.gmra.mrb[8].mxu0 %v5573_v25  ;;  %3764 = vmatmul.mubr.bf16.gmra.mrb[8].mxu1 %v5571_v24 }
 0x3f9   : > { %3155 = vmatprep.mubr.bf16.mxu0 %v4986_v5  ;;  %3773 = vmatprep.mubr.bf16.mxu1 %v4986_v5 }
 0x3fb   : > { %v1987_v55 = vpop.f32.mrb[160].mxu0  ;;  %v2599_v10 = vpop.f32.mrb[160].mxu1 }
 0x3fc   : > { %v2113_v18 = vmax.f32 %v2111_v47, %v1987_v55  ;;  %v2725_v12 = vmax.f32 %v2723_v58, %v2599_v10  ;;  %v1989_v40 = vpop.f32.mrb[161].mxu0  ;;  %v2601_v33 = vpop.f32.mrb[161].mxu1 }
 0x3fd   : > { %v2182_v62 = vmax.f32 %v2180_v37, %v1989_v40  ;;  %v2794_v2 = vmax.f32 %v2792_v52, %v2601_v33  ;;  %v1991_v51 = vpop.f32.mrb[162].mxu0  ;;  %v2603_v57 = vpop.f32.mrb[162].mxu1 }
 0x3fe   : > { %v2114_v36 = vmax.f32 %v2112_v13, %v1991_v51  ;;  %v2726_v35 = vmax.f32 %v2724_v41, %v2603_v57  ;;  %v1993_v3 = vpop.f32.mrb[163].mxu0  ;;  %v2605_v25 = vpop.f32.mrb[163].mxu1  ;;  %v5976_v57 = vld [vmem:[#allocation19_spill] sm:$0xff] }
 0x3ff   : > { %v2183_v21 = vmax.f32 %v2181_v32, %v1993_v3  ;;  %v2795_v43 = vmax.f32 %v2793_v54, %v2605_v25 }
 0x400   : > { %3156 = vmatmul.mubr.bf16.gmra.mrb[12].mxu0 %v5571_v24  ;;  %3774 = vmatmul.mubr.bf16.gmra.mrb[12].mxu1 %v5973_v30 }
 0x401   : > { %3165 = vmatprep.mubr.bf16.mxu0 %v4986_v5  ;;  %3783 = vmatprep.mubr.bf16.mxu1 %v4986_v5 }
 0x403   : > { %v1997_v45 = vpop.f32.mrb[164].mxu0  ;;  %v2609_v19 = vpop.f32.mrb[164].mxu1 }
 0x404   : > { %v2115_v31 = vmax.f32 %v2113_v18, %v1997_v45  ;;  %v2727_v50 = vmax.f32 %v2725_v12, %v2609_v19  ;;  %v1999_v26 = vpop.f32.mrb[165].mxu0  ;;  %v2611_v6 = vpop.f32.mrb[165].mxu1 }
 0x405   : > { %v2184_v49 = vmax.f32 %v2182_v62, %v1999_v26  ;;  %v2796_v23 = vmax.f32 %v2794_v2, %v2611_v6  ;;  %v2001_v28 = vpop.f32.mrb[166].mxu0  ;;  %v2613_v46 = vpop.f32.mrb[166].mxu1 }
 0x406   : > { %v2116_v56 = vmax.f32 %v2114_v36, %v2001_v28  ;;  %v2728_v17 = vmax.f32 %v2726_v35, %v2613_v46  ;;  %v2003_v15 = vpop.f32.mrb[167].mxu0  ;;  %v2615_v24 = vpop.f32.mrb[167].mxu1  ;;  %v5977_v46 = vld [vmem:[#allocation22_spill] sm:$0xff] }
 0x407   : > { %v2185_v34 = vmax.f32 %v2183_v21, %v2003_v15  ;;  %v2797_v0 = vmax.f32 %v2795_v43, %v2615_v24 }
 0x408   : > { %3166 = vmatmul.mubr.bf16.gmra.mrb[16].mxu0 %v5973_v30  ;;  %3784 = vmatmul.mubr.bf16.gmra.mrb[16].mxu1 %v5974_v8 }
 0x409   : > { %3175 = vmatprep.mubr.bf16.mxu0 %v4986_v5  ;;  %3793 = vmatprep.mubr.bf16.mxu1 %v4986_v5 }
 0x40b   : > { %v2007_v9 = vpop.f32.mrb[168].mxu0  ;;  %v2619_v29 = vpop.f32.mrb[168].mxu1 }
 0x40c   : > { %v2117_v1 = vmax.f32 %v2115_v31, %v2007_v9  ;;  %v2729_v27 = vmax.f32 %v2727_v50, %v2619_v29  ;;  %v2009_v42 = vpop.f32.mrb[169].mxu0  ;;  %v2621_v61 = vpop.f32.mrb[169].mxu1 }
 0x40d   : > { %v2186_v48 = vmax.f32 %v2184_v49, %v2009_v42  ;;  %v2798_v44 = vmax.f32 %v2796_v23, %v2621_v61  ;;  %v2011_v7 = vpop.f32.mrb[170].mxu0  ;;  %v2623_v20 = vpop.f32.mrb[170].mxu1 }
 0x40e   : > { %v2118_v47 = vmax.f32 %v2116_v56, %v2011_v7  ;;  %v2730_v58 = vmax.f32 %v2728_v17, %v2623_v20  ;;  %v2013_v16 = vpop.f32.mrb[171].mxu0  ;;  %v2625_v4 = vpop.f32.mrb[171].mxu1  ;;  %v5978_v20 = vld [vmem:[#allocation21_spill] sm:$0xff] }
 0x40f   : > { %v2187_v37 = vmax.f32 %v2185_v34, %v2013_v16  ;;  %v2799_v52 = vmax.f32 %v2797_v0, %v2625_v4 }
 0x410   : > { %3176 = vmatmul.mubr.bf16.gmra.mrb[20].mxu0 %v5974_v8  ;;  %3794 = vmatmul.mubr.bf16.gmra.mrb[20].mxu1 %v5975_v14 }
 0x411   : > { %3185 = vmatprep.mubr.bf16.mxu0 %v4986_v5  ;;  %3803 = vmatprep.mubr.bf16.mxu1 %v4986_v5 }
 0x413   : > { %v2017_v38 = vpop.f32.mrb[172].mxu0  ;;  %v2629_v13 = vpop.f32.mrb[172].mxu1 }
 0x414   : > { %v2119_v41 = vmax.f32 %v2117_v1, %v2017_v38  ;;  %v2731_v22 = vmax.f32 %v2729_v27, %v2629_v13  ;;  %v2019_v60 = vpop.f32.mrb[173].mxu0  ;;  %v2631_v32 = vpop.f32.mrb[173].mxu1 }
 0x415   : > { %v2188_v54 = vmax.f32 %v2186_v48, %v2019_v60  ;;  %v2800_v55 = vmax.f32 %v2798_v44, %v2631_v32  ;;  %v2021_v10 = vpop.f32.mrb[174].mxu0  ;;  %v2633_v18 = vpop.f32.mrb[174].mxu1 }
 0x416   : > { %v2120_v12 = vmax.f32 %v2118_v47, %v2021_v10  ;;  %v2732_v40 = vmax.f32 %v2730_v58, %v2633_v18  ;;  %v2023_v33 = vpop.f32.mrb[175].mxu0  ;;  %v2635_v62 = vpop.f32.mrb[175].mxu1  ;;  %v5979_v18 = vld [vmem:[#allocation24_spill] sm:$0xff] }
 0x417   : > { %v2189_v2 = vmax.f32 %v2187_v37, %v2023_v33  ;;  %v2801_v51 = vmax.f32 %v2799_v52, %v2635_v62 }
 0x418   : > { %3186 = vmatmul.mubr.bf16.gmra.mrb[24].mxu0 %v5975_v14  ;;  %3804 = vmatmul.mubr.bf16.gmra.mrb[24].mxu1 %v5976_v57 }
 0x419   : > { %3195 = vmatprep.mubr.bf16.mxu0 %v4986_v5  ;;  %3813 = vmatprep.mubr.bf16.mxu1 %v4986_v5 }
 0x41b   : > { %v2027_v36 = vpop.f32.mrb[176].mxu0  ;;  %v2639_v35 = vpop.f32.mrb[176].mxu1 }
 0x41c   : > { %v2121_v3 = vmax.f32 %v2119_v41, %v2027_v36  ;;  %v2733_v25 = vmax.f32 %v2731_v22, %v2639_v35  ;;  %v2029_v21 = vpop.f32.mrb[177].mxu0  ;;  %v2641_v43 = vpop.f32.mrb[177].mxu1 }
 0x41d   : > { %v2190_v30 = vmax.f32 %v2188_v54, %v2029_v21  ;;  %v2802_v45 = vmax.f32 %v2800_v55, %v2641_v43  ;;  %v2031_v19 = vpop.f32.mrb[178].mxu0  ;;  %v2643_v31 = vpop.f32.mrb[178].mxu1 }
 0x41e   : > { %v2122_v50 = vmax.f32 %v2120_v12, %v2031_v19  ;;  %v2734_v26 = vmax.f32 %v2732_v40, %v2643_v31  ;;  %v2033_v6 = vpop.f32.mrb[179].mxu0  ;;  %v2645_v49 = vpop.f32.mrb[179].mxu1 }
 0x41f   : > { %v2191_v23 = vmax.f32 %v2189_v2, %v2033_v6  ;;  %v2803_v28 = vmax.f32 %v2801_v51, %v2645_v49 }
 0x420   : > { %3196 = vmatmul.mubr.bf16.gmra.mrb[28].mxu0 %v5976_v57  ;;  %3814 = vmatmul.mubr.bf16.gmra.mrb[28].mxu1 %v5977_v46 }
 0x421   : > { %3205 = vmatprep.mubr.bf16.mxu0 %v4986_v5  ;;  %3823 = vmatprep.mubr.bf16.mxu1 %v4986_v5 }
 0x423   : > { %v2037_v56 = vpop.f32.mrb[180].mxu0  ;;  %v2649_v17 = vpop.f32.mrb[180].mxu1 }
 0x424   : > { %v2123_v15 = vmax.f32 %v2121_v3, %v2037_v56  ;;  %v2735_v24 = vmax.f32 %v2733_v25, %v2649_v17  ;;  %v2039_v34 = vpop.f32.mrb[181].mxu0  ;;  %v2651_v0 = vpop.f32.mrb[181].mxu1 }
 0x425   : > { %v2192_v8 = vmax.f32 %v2190_v30, %v2039_v34  ;;  %v2804_v9 = vmax.f32 %v2802_v45, %v2651_v0  ;;  %v2041_v29 = vpop.f32.mrb[182].mxu0  ;;  %v2653_v1 = vpop.f32.mrb[182].mxu1 }
 0x426   : > { %v2124_v27 = vmax.f32 %v2122_v50, %v2041_v29  ;;  %v2736_v42 = vmax.f32 %v2734_v26, %v2653_v1  ;;  %v2043_v61 = vpop.f32.mrb[183].mxu0  ;;  %v2655_v48 = vpop.f32.mrb[183].mxu1  ;;  %v5980_v26 = vld [vmem:[#allocation23_spill] sm:$0xff] }
 0x427   : > { %v2193_v44 = vmax.f32 %v2191_v23, %v2043_v61  ;;  %v2805_v7 = vmax.f32 %v2803_v28, %v2655_v48 }
 0x428   : > { %3206 = vmatmul.mubr.bf16.gmra.mrb[32].mxu0 %v5977_v46  ;;  %3824 = vmatmul.mubr.bf16.gmra.mrb[32].mxu1 %v5978_v20  ;;  %v4988_v46 = vmov 1966171168  }
 0x429   : > { %3215 = vmatprep.mubr.bf16.mxu0 %v4986_v5  ;;  %3833 = vmatprep.mubr.bf16.mxu1 %v4986_v5  ;;  %v2209_v56 = vunpack.c.l.s4 %v4988_v46  ;;  %v2066_v46 = vld [vmem:[#allocation2] sm:$0x3] }
 0x42b   : > { %v2047_v47 = vpop.f32.mrb[184].mxu0  ;;  %v2659_v58 = vpop.f32.mrb[184].mxu1 }
 0x42c   : > { %v2125_v16 = vmax.f32 %v2123_v15, %v2047_v47  ;;  %v2737_v4 = vmax.f32 %v2735_v24, %v2659_v58  ;;  %v2049_v37 = vpop.f32.mrb[185].mxu0  ;;  %v2661_v52 = vpop.f32.mrb[185].mxu1  ;;  %v2211_v15 = vlaneseq }
 0x42d   : > { %v2194_v14 = vmax.f32 %v2192_v8, %v2049_v37  ;;  %v2806_v38 = vmax.f32 %v2804_v9, %v2661_v52  ;;  %v2051_v13 = vpop.f32.mrb[186].mxu0  ;;  %v2663_v41 = vpop.f32.mrb[186].mxu1 }
 0x42e   : > { %v2126_v22 = vmax.f32 %v2124_v27, %v2051_v13  ;;  %v2738_v60 = vmax.f32 %v2736_v42, %v2663_v41  ;;  %v2053_v32 = vpop.f32.mrb[187].mxu0  ;;  %v2665_v54 = vpop.f32.mrb[187].mxu1  ;;  %v2212_v37 = vshrl.u32 %v2211_v15, 7  ;;  %vm5891_vm1 = vcmp.lt.s32.totalorder %v2211_v15, 256 }
 0x42f   : > { %v2195_v55 = vmax.f32 %v2193_v44, %v2053_v32  ;;  %v2807_v10 = vmax.f32 %v2805_v7, %v2665_v54 }
 0x430   : > { %3216 = vmatmul.mubr.bf16.gmra.mrb[36].mxu0 %v5978_v20  ;;  %3834 = vmatmul.mubr.bf16.gmra.mrb[36].mxu1 %v5979_v18  ;;  %v2210_v20 = vunpack.c.0.s8 %v2209_v56  ;;  %v2678_v56 = vld [vmem:[#allocation2 + $0x2] sm:$0x3] }
 0x431   : > { %3225 = vmatprep.mubr.bf16.mxu0 %v4986_v5  ;;  %3843 = vmatprep.mubr.bf16.mxu1 %v4986_v5 }
 0x433   : > { %v2057_v12 = vpop.f32.mrb[188].mxu0  ;;  %v2669_v40 = vpop.f32.mrb[188].mxu1 }
 0x434   : > { %v2127_v33 = vmax.f32 %v2125_v16, %v2057_v12  ;;  %v2739_v62 = vmax.f32 %v2737_v4, %v2669_v40  ;;  %v2059_v2 = vpop.f32.mrb[189].mxu0  ;;  %v2671_v51 = vpop.f32.mrb[189].mxu1 }
 0x435   : > { %v2196_v57 = vmax.f32 %v2194_v14, %v2059_v2  ;;  %v2808_v36 = vmax.f32 %v2806_v38, %v2671_v51  ;;  %v2061_v35 = vpop.f32.mrb[190].mxu0  ;;  %v2673_v3 = vpop.f32.mrb[190].mxu1 }
 0x436   : > { %v2128_v25 = vmax.f32 %v2126_v22, %v2061_v35  ;;  %v2740_v21 = vmax.f32 %v2738_v60, %v2673_v3  ;;  %v2063_v43 = vpop.f32.mrb[191].mxu0  ;;  %v2675_v30 = vpop.f32.mrb[191].mxu1 }
 0x437   : > { %v2197_v45 = vmax.f32 %v2195_v55, %v2063_v43  ;;  %v2809_v19 = vmax.f32 %v2807_v10, %v2675_v30  ;;  %v5876_v55 = vsub.s32 %v2210_v20, %v2212_v37 }
 0x438   : > { %v2129_v31 = vmax.f32 %v2127_v33, %v2128_v25  ;;  %v2741_v50 = vmax.f32 %v2739_v62, %v2740_v21  ;;  %3226 = vmatmul.mubr.bf16.gmra.mrb[40].mxu0 %v5979_v18  ;;  %3844 = vmatmul.mubr.bf16.gmra.mrb[40].mxu1 %v5980_v26 }
 0x439   : > { %v2198_v6 = vmax.f32 %v2196_v57, %v2197_v45  ;;  %v2810_v49 = vmax.f32 %v2808_v36, %v2809_v19  ;;  %3235 = vmatprep.mubr.bf16.mxu0 %v4986_v5  ;;  %3853 = vmatprep.mubr.bf16.mxu1 %v4986_v5 }
 0x43a   : > { %v2130_v23 = vrot.slane %v2129_v31, 4  ;;  %v2742_v28 = vrot.slane %v2741_v50, 4 }
 0x43b   : > { %v2199_v17 = vrot.slane %v2198_v6, 4  ;;  %v2811_v24 = vrot.slane %v2810_v49, 4  ;;  %v5863_v34 = vpop.f32.mrb[192].mxu0  ;;  %v3585_v0 = vpop.f32.mrb[192].mxu1 }
 0x43c   : > { %v2131_v8 = vmax.f32 %v2129_v31, %v2130_v23  ;;  %v2743_v9 = vmax.f32 %v2741_v50, %v2742_v28  ;;  %v5865_v29 = vpop.f32.mrb[193].mxu0  ;;  %v3587_v1 = vpop.f32.mrb[193].mxu1 }
 0x43d   : > { %v2200_v27 = vmax.f32 %v2198_v6, %v2199_v17  ;;  %v2812_v42 = vmax.f32 %v2810_v49, %v2811_v24  ;;  %v5867_v61 = vpop.f32.mrb[194].mxu0  ;;  %v3589_v48 = vpop.f32.mrb[194].mxu1 }
 0x43e   : > { %v2132_v44 = vrot.slane %v2131_v8, 2  ;;  %v2744_v7 = vrot.slane %v2743_v9, 2  ;;  %v3895_v47 = vmax.f32 %v3589_v48, %v3585_v0  ;;  %v5869_v58 = vpop.f32.mrb[195].mxu0  ;;  %v3591_v16 = vpop.f32.mrb[195].mxu1 }
 0x43f   : > { %v2201_v4 = vrot.slane %v2200_v27, 2  ;;  %v2813_v52 = vrot.slane %v2812_v42, 2  ;;  %v3964_v14 = vmax.f32 %v3591_v16, %v3587_v1 }
 0x440   : > { %v2133_v38 = vmax.f32 %v2131_v8, %v2132_v44  ;;  %v2745_v13 = vmax.f32 %v2743_v9, %v2744_v7  ;;  %3236 = vmatmul.mubr.bf16.gmra.mrb[44].mxu0 %v5980_v26  ;;  %3854 = vmatmul.mubr.bf16.gmra.mrb[44].mxu1 %v5642_v63 }
 0x441   : > { %v2202_v41 = vmax.f32 %v2200_v27, %v2201_v4  ;;  %v2814_v22 = vmax.f32 %v2812_v42, %v2813_v52  ;;  %3245 = vmatprep.mubr.bf16.mxu0 %v4986_v5  ;;  %3863 = vmatprep.mubr.bf16.mxu1 %v4986_v5 }
 0x442   : > { %v2134_v60 = vrot.slane %v2133_v38, 1  ;;  %v2746_v32 = vrot.slane %v2745_v13, 1 }
 0x443   : > { %v2203_v54 = vrot.slane %v2202_v41, 1  ;;  %v2815_v10 = vrot.slane %v2814_v22, 1  ;;  %v2977_v18 = vpop.f32.mrb[196].mxu0  ;;  %v3595_v12 = vpop.f32.mrb[196].mxu1 }
 0x444   : > { %v2135_v40 = vmax.f32 %v2133_v38, %v2134_v60  ;;  %v2747_v33 = vmax.f32 %v2745_v13, %v2746_v32  ;;  %v3287_v62 = vmax.f32 %v5863_v34, %v2977_v18  ;;  %v3897_v2 = vmax.f32 %v3895_v47, %v3595_v12  ;;  %v2979_v51 = vpop.f32.mrb[197].mxu0  ;;  %v3597_v57 = vpop.f32.mrb[197].mxu1 }
 0x445   : > { %v2204_v36 = vmax.f32 %v2202_v41, %v2203_v54  ;;  %v2816_v35 = vmax.f32 %v2814_v22, %v2815_v10  ;;  %v3356_v3 = vmax.f32 %v5865_v29, %v2979_v51  ;;  %v3966_v25 = vmax.f32 %v3964_v14, %v3597_v57  ;;  %v2981_v21 = vpop.f32.mrb[198].mxu0  ;;  %v3599_v43 = vpop.f32.mrb[198].mxu1 }
 0x446   : > { %v3288_v30 = vmax.f32 %v5867_v61, %v2981_v21  ;;  %v3899_v45 = vmax.f32 %v3897_v2, %v3599_v43  ;;  %v2983_v19 = vpop.f32.mrb[199].mxu0  ;;  %v3601_v31 = vpop.f32.mrb[199].mxu1 }
 0x447   : > { %v2207_v50 = vcombine.low %v2135_v40, %v2204_v36  ;;  %v2819_v26 = vcombine.low %v2747_v33, %v2816_v35  ;;  %v3357_v6 = vmax.f32 %v5869_v58, %v2983_v19  ;;  %v3968_v49 = vmax.f32 %v3966_v25, %v3601_v31 }
 0x448   : > { %3246 = vmatmul.mubr.bf16.gmra.mrb[48].mxu0 %v5642_v63  ;;  %3864 = vmatmul.mubr.bf16.gmra.mrb[48].mxu1 %v5638_v59 }
 0x449   : > { %v2214_v23 = vrot.slane %v2207_v50, %v5876_v55  ;;  %v2826_v28 = vrot.slane %v2819_v26, %v5876_v55  ;;  %3255 = vmatprep.mubr.bf16.mxu0 %v4986_v5  ;;  %3873 = vmatprep.mubr.bf16.mxu1 %v4986_v5 }
 0x44b   : > { %v2221_v17 = vrot.slane %v2214_v23, %v5876_v55  ;;  %v2833_v24 = vrot.slane %v2826_v28, %v5876_v55  ;;  %v2987_v34 = vpop.f32.mrb[200].mxu0  ;;  %v3605_v0 = vpop.f32.mrb[200].mxu1 }
 0x44c   : > { %v3289_v8 = vmax.f32 %v3287_v62, %v2987_v34  ;;  %v3901_v9 = vmax.f32 %v3899_v45, %v3605_v0  ;;  %v2989_v29 = vpop.f32.mrb[201].mxu0  ;;  %v3607_v1 = vpop.f32.mrb[201].mxu1 }
 0x44d   : > { %v2223_v27 = vmax.f32 %v2066_v46, %v2221_v17  ;;  %v2835_v42 = vmax.f32 %v2678_v56, %v2833_v24  ;;  %v3358_v61 = vmax.f32 %v3356_v3, %v2989_v29  ;;  %v3970_v48 = vmax.f32 %v3968_v49, %v3607_v1  ;;  %v2991_v44 = vpop.f32.mrb[202].mxu0  ;;  %v3609_v7 = vpop.f32.mrb[202].mxu1 }
 0x44e   : > { %v3290_v20 = vmax.f32 %v3288_v30, %v2991_v44  ;;  %v3903_v47 = vmax.f32 %v3901_v9, %v3609_v7  ;;  %v2993_v58 = vpop.f32.mrb[203].mxu0  ;;  %v3611_v16 = vpop.f32.mrb[203].mxu1 }
 0x44f   : > { %2228 = vst.msk [vmem:[#allocation2] sm:$0x3] %vm5891_vm1, %v2223_v27  ;;  %2836 = vst.msk [vmem:[#allocation2 + $0x2] sm:$0x3] %vm5891_vm1, %v2835_v42  ;;  %v3359_v15 = vmax.f32 %v3357_v6, %v2993_v58  ;;  %v3972_v4 = vmax.f32 %v3970_v48, %v3611_v16 }
 0x450   : > { %3256 = vmatmul.mubr.bf16.gmra.mrb[52].mxu0 %v5638_v59  ;;  %3874 = vmatmul.mubr.bf16.gmra.mrb[52].mxu1 %v5658_v39 }
 0x451   : > { %3265 = vmatprep.mubr.bf16.mxu0 %v4986_v5  ;;  %3883 = vmatprep.mubr.bf16.mxu1 %v4986_v5 }
 0x453   : > { %v2997_v37 = vpop.f32.mrb[204].mxu0  ;;  %v3615_v52 = vpop.f32.mrb[204].mxu1 }
 0x454   : > { %v3291_v14 = vmax.f32 %v3289_v8, %v2997_v37  ;;  %v3905_v38 = vmax.f32 %v3903_v47, %v3615_v52  ;;  %v2999_v13 = vpop.f32.mrb[205].mxu0  ;;  %v3617_v41 = vpop.f32.mrb[205].mxu1 }
 0x455   : > { %v3360_v22 = vmax.f32 %v3358_v61, %v2999_v13  ;;  %v3974_v60 = vmax.f32 %v3972_v4, %v3617_v41  ;;  %v3001_v32 = vpop.f32.mrb[206].mxu0  ;;  %v3619_v54 = vpop.f32.mrb[206].mxu1 }
 0x456   : > { %v3292_v10 = vmax.f32 %v3290_v20, %v3001_v32  ;;  %v3907_v18 = vmax.f32 %v3905_v38, %v3619_v54  ;;  %v3003_v12 = vpop.f32.mrb[207].mxu0  ;;  %v3621_v59 = vpop.f32.mrb[207].mxu1 }
 0x457   : > { %v3361_v40 = vmax.f32 %v3359_v15, %v3003_v12  ;;  %v3976_v33 = vmax.f32 %v3974_v60, %v3621_v59 }
 0x458   : > { %3266 = vmatmul.mubr.bf16.gmra.mrb[56].mxu0 %v5658_v39  ;;  %3884 = vmatmul.mubr.bf16.gmra.mrb[56].mxu1 %v5656_v53 }
 0x459   : > { %3275 = vmatprep.mubr.bf16.mxu0 %v4986_v5 }
 0x45b   : > { %v3007_v62 = vpop.f32.mrb[208].mxu0  ;;  %v3625_v2 = vpop.f32.mrb[208].mxu1 }
 0x45c   : > { %v3293_v51 = vmax.f32 %v3291_v14, %v3007_v62  ;;  %v3909_v57 = vmax.f32 %v3907_v18, %v3625_v2  ;;  %v3009_v36 = vpop.f32.mrb[209].mxu0  ;;  %v3627_v35 = vpop.f32.mrb[209].mxu1 }
 0x45d   : > { %v3362_v3 = vmax.f32 %v3360_v22, %v3009_v36  ;;  %v3978_v25 = vmax.f32 %v3976_v33, %v3627_v35  ;;  %v3011_v21 = vpop.f32.mrb[210].mxu0  ;;  %v3629_v43 = vpop.f32.mrb[210].mxu1 }
 0x45e   : > { %v3294_v30 = vmax.f32 %v3292_v10, %v3011_v21  ;;  %v3911_v45 = vmax.f32 %v3909_v57, %v3629_v43  ;;  %v3013_v19 = vpop.f32.mrb[211].mxu0  ;;  %v3631_v31 = vpop.f32.mrb[211].mxu1 }
 0x45f   : > { %v3363_v50 = vmax.f32 %v3361_v40, %v3013_v19  ;;  %v3980_v39 = vmax.f32 %v3978_v25, %v3631_v31 }
 0x460   : > { %3276 = vmatmul.mubr.bf16.gmra.mrb[60].mxu0 %v5656_v53 }
 0x461   : > { %3573 = vmatprep.mubr.bf16.mxu0 %v4986_v5 }
 0x463   : > { %v3017_v26 = vpop.f32.mrb[212].mxu0  ;;  %v3635_v6 = vpop.f32.mrb[212].mxu1 }
 0x464   : > { %v3295_v49 = vmax.f32 %v3293_v51, %v3017_v26  ;;  %v3913_v23 = vmax.f32 %v3911_v45, %v3635_v6  ;;  %v3019_v28 = vpop.f32.mrb[213].mxu0  ;;  %v3637_v46 = vpop.f32.mrb[213].mxu1 }
 0x465   : > { %v3364_v56 = vmax.f32 %v3362_v3, %v3019_v28  ;;  %v3982_v17 = vmax.f32 %v3980_v39, %v3637_v46  ;;  %v3021_v24 = vpop.f32.mrb[214].mxu0  ;;  %v3639_v34 = vpop.f32.mrb[214].mxu1 }
 0x466   : > { %v3296_v0 = vmax.f32 %v3294_v30, %v3021_v24  ;;  %v3915_v8 = vmax.f32 %v3913_v23, %v3639_v34  ;;  %v3023_v9 = vpop.f32.mrb[215].mxu0  ;;  %v3641_v29 = vpop.f32.mrb[215].mxu1 }
 0x467   : > { %v3365_v1 = vmax.f32 %v3363_v50, %v3023_v9  ;;  %v3984_v27 = vmax.f32 %v3982_v17, %v3641_v29 }
 0x468   : > { %3574 = vmatmul.mubr.bf16.vlgmr.msra.gmra.mrb[64].mxu0 %v5441_v11 }
 0x46b   : > { %v3027_v53 = vpop.f32.mrb[216].mxu0  ;;  %v3645_v5 = vpop.f32.mrb[216].mxu1 }
 0x46c   : > { %v3297_v42 = vmax.f32 %v3295_v49, %v3027_v53  ;;  %v3917_v61 = vmax.f32 %v3915_v8, %v3645_v5  ;;  %v3029_v48 = vpop.f32.mrb[217].mxu0  ;;  %v3647_v44 = vpop.f32.mrb[217].mxu1 }
 0x46d   : > { %v3366_v7 = vmax.f32 %v3364_v56, %v3029_v48  ;;  %v3986_v20 = vmax.f32 %v3984_v27, %v3647_v44  ;;  %v3031_v47 = vpop.f32.mrb[218].mxu0  ;;  %v3649_v58 = vpop.f32.mrb[218].mxu1 }
 0x46e   : > { %v3298_v16 = vmax.f32 %v3296_v0, %v3031_v47  ;;  %v3919_v15 = vmax.f32 %v3917_v61, %v3649_v58  ;;  %v3033_v4 = vpop.f32.mrb[219].mxu0  ;;  %v3651_v37 = vpop.f32.mrb[219].mxu1 }
 0x46f   : > { %v3367_v52 = vmax.f32 %v3365_v1, %v3033_v4  ;;  %v3988_v14 = vmax.f32 %v3986_v20, %v3651_v37 }
 0x473   : > { %v3037_v38 = vpop.f32.mrb[220].mxu0  ;;  %v3655_v13 = vpop.f32.mrb[220].mxu1 }
 0x474   : > { %v3299_v41 = vmax.f32 %v3297_v42, %v3037_v38  ;;  %v3921_v11 = vmax.f32 %v3919_v15, %v3655_v13  ;;  %v3039_v22 = vpop.f32.mrb[221].mxu0  ;;  %v3657_v60 = vpop.f32.mrb[221].mxu1 }
 0x475   : > { %v3368_v32 = vmax.f32 %v3366_v7, %v3039_v22  ;;  %v3990_v54 = vmax.f32 %v3988_v14, %v3657_v60  ;;  %v3041_v10 = vpop.f32.mrb[222].mxu0  ;;  %v3659_v18 = vpop.f32.mrb[222].mxu1 }
 0x476   : > { %v3300_v12 = vmax.f32 %v3298_v16, %v3041_v10  ;;  %v3923_v59 = vmax.f32 %v3921_v11, %v3659_v18  ;;  %v3043_v40 = vpop.f32.mrb[223].mxu0  ;;  %v3661_v33 = vpop.f32.mrb[223].mxu1 }
 0x477   : > { %v3369_v62 = vmax.f32 %v3367_v52, %v3043_v40  ;;  %v3992_v2 = vmax.f32 %v3990_v54, %v3661_v33 }
 0x47b   : > { %v3047_v51 = vpop.f32.mrb[224].mxu0  ;;  %v3665_v57 = vpop.f32.mrb[224].mxu1 }
 0x47c   : > { %v3301_v36 = vmax.f32 %v3299_v41, %v3047_v51  ;;  %v3925_v35 = vmax.f32 %v3923_v59, %v3665_v57  ;;  %v3049_v3 = vpop.f32.mrb[225].mxu0  ;;  %v3667_v25 = vpop.f32.mrb[225].mxu1 }
 0x47d   : > { %v3370_v21 = vmax.f32 %v3368_v32, %v3049_v3  ;;  %v3994_v43 = vmax.f32 %v3992_v2, %v3667_v25  ;;  %v3051_v30 = vpop.f32.mrb[226].mxu0  ;;  %v3669_v45 = vpop.f32.mrb[226].mxu1 }
 0x47e   : > { %v3302_v19 = vmax.f32 %v3300_v12, %v3051_v30  ;;  %v3927_v31 = vmax.f32 %v3925_v35, %v3669_v45  ;;  %v3053_v50 = vpop.f32.mrb[227].mxu0  ;;  %v3671_v39 = vpop.f32.mrb[227].mxu1 }
 0x47f   : > { %v3371_v26 = vmax.f32 %v3369_v62, %v3053_v50  ;;  %v3996_v6 = vmax.f32 %v3994_v43, %v3671_v39 }
 0x483   : > { %v3057_v49 = vpop.f32.mrb[228].mxu0  ;;  %v3675_v23 = vpop.f32.mrb[228].mxu1 }
 0x484   : > { %v3303_v28 = vmax.f32 %v3301_v36, %v3057_v49  ;;  %v3929_v46 = vmax.f32 %v3927_v31, %v3675_v23  ;;  %v3059_v56 = vpop.f32.mrb[229].mxu0  ;;  %v3677_v17 = vpop.f32.mrb[229].mxu1 }
 0x485   : > { %v3372_v24 = vmax.f32 %v3370_v21, %v3059_v56  ;;  %v3998_v34 = vmax.f32 %v3996_v6, %v3677_v17  ;;  %v3061_v0 = vpop.f32.mrb[230].mxu0  ;;  %v3679_v8 = vpop.f32.mrb[230].mxu1 }
 0x486   : > { %v3304_v9 = vmax.f32 %v3302_v19, %v3061_v0  ;;  %v3931_v29 = vmax.f32 %v3929_v46, %v3679_v8  ;;  %v3063_v1 = vpop.f32.mrb[231].mxu0  ;;  %v3681_v27 = vpop.f32.mrb[231].mxu1 }
 0x487   : > { %v3373_v53 = vmax.f32 %v3371_v26, %v3063_v1  ;;  %v4000_v5 = vmax.f32 %v3998_v34, %v3681_v27 }
 0x48b   : > { %v3067_v42 = vpop.f32.mrb[232].mxu0  ;;  %v3685_v61 = vpop.f32.mrb[232].mxu1 }
 0x48c   : > { %v3305_v48 = vmax.f32 %v3303_v28, %v3067_v42  ;;  %v3933_v44 = vmax.f32 %v3931_v29, %v3685_v61  ;;  %v3069_v7 = vpop.f32.mrb[233].mxu0  ;;  %v3687_v20 = vpop.f32.mrb[233].mxu1 }
 0x48d   : > { %v3374_v47 = vmax.f32 %v3372_v24, %v3069_v7  ;;  %v4002_v58 = vmax.f32 %v4000_v5, %v3687_v20  ;;  %v3071_v16 = vpop.f32.mrb[234].mxu0  ;;  %v3689_v15 = vpop.f32.mrb[234].mxu1 }
 0x48e   : > { %v3306_v4 = vmax.f32 %v3304_v9, %v3071_v16  ;;  %v3935_v37 = vmax.f32 %v3933_v44, %v3689_v15  ;;  %v3073_v52 = vpop.f32.mrb[235].mxu0  ;;  %v3691_v14 = vpop.f32.mrb[235].mxu1 }
 0x48f   : > { %v3375_v38 = vmax.f32 %v3373_v53, %v3073_v52  ;;  %v4004_v13 = vmax.f32 %v4002_v58, %v3691_v14 }
 0x493   : > { %v3077_v41 = vpop.f32.mrb[236].mxu0  ;;  %v3695_v11 = vpop.f32.mrb[236].mxu1 }
 0x494   : > { %v3307_v22 = vmax.f32 %v3305_v48, %v3077_v41  ;;  %v3937_v60 = vmax.f32 %v3935_v37, %v3695_v11  ;;  %v3079_v32 = vpop.f32.mrb[237].mxu0  ;;  %v3697_v54 = vpop.f32.mrb[237].mxu1 }
 0x495   : > { %v3376_v10 = vmax.f32 %v3374_v47, %v3079_v32  ;;  %v4006_v18 = vmax.f32 %v4004_v13, %v3697_v54  ;;  %v3081_v12 = vpop.f32.mrb[238].mxu0  ;;  %v3699_v59 = vpop.f32.mrb[238].mxu1 }
 0x496   : > { %v3308_v40 = vmax.f32 %v3306_v4, %v3081_v12  ;;  %v3939_v33 = vmax.f32 %v3937_v60, %v3699_v59  ;;  %v3083_v62 = vpop.f32.mrb[239].mxu0  ;;  %v3701_v2 = vpop.f32.mrb[239].mxu1 }
 0x497   : > { %v3377_v51 = vmax.f32 %v3375_v38, %v3083_v62  ;;  %v4008_v57 = vmax.f32 %v4006_v18, %v3701_v2 }
 0x49b   : > { %v3087_v36 = vpop.f32.mrb[240].mxu0  ;;  %v3705_v35 = vpop.f32.mrb[240].mxu1 }
 0x49c   : > { %v3309_v3 = vmax.f32 %v3307_v22, %v3087_v36  ;;  %v3941_v25 = vmax.f32 %v3939_v33, %v3705_v35  ;;  %v3089_v21 = vpop.f32.mrb[241].mxu0  ;;  %v3707_v43 = vpop.f32.mrb[241].mxu1 }
 0x49d   : > { %v3378_v30 = vmax.f32 %v3376_v10, %v3089_v21  ;;  %v4010_v45 = vmax.f32 %v4008_v57, %v3707_v43  ;;  %v3091_v19 = vpop.f32.mrb[242].mxu0  ;;  %v3709_v31 = vpop.f32.mrb[242].mxu1 }
 0x49e   : > { %v3310_v50 = vmax.f32 %v3308_v40, %v3091_v19  ;;  %v3943_v39 = vmax.f32 %v3941_v25, %v3709_v31  ;;  %v3093_v26 = vpop.f32.mrb[243].mxu0  ;;  %v3711_v6 = vpop.f32.mrb[243].mxu1 }
 0x49f   : > { %v3379_v49 = vmax.f32 %v3377_v51, %v3093_v26  ;;  %v4012_v23 = vmax.f32 %v4010_v45, %v3711_v6 }
 0x4a3   : > { %v3097_v28 = vpop.f32.mrb[244].mxu0  ;;  %v3715_v46 = vpop.f32.mrb[244].mxu1 }
 0x4a4   : > { %v3311_v56 = vmax.f32 %v3309_v3, %v3097_v28  ;;  %v3945_v17 = vmax.f32 %v3943_v39, %v3715_v46  ;;  %v3099_v24 = vpop.f32.mrb[245].mxu0  ;;  %v3717_v34 = vpop.f32.mrb[245].mxu1 }
 0x4a5   : > { %v3380_v0 = vmax.f32 %v3378_v30, %v3099_v24  ;;  %v4014_v8 = vmax.f32 %v4012_v23, %v3717_v34  ;;  %v3101_v9 = vpop.f32.mrb[246].mxu0  ;;  %v3719_v29 = vpop.f32.mrb[246].mxu1 }
 0x4a6   : > { %v3312_v1 = vmax.f32 %v3310_v50, %v3101_v9  ;;  %v3947_v27 = vmax.f32 %v3945_v17, %v3719_v29  ;;  %v3103_v53 = vpop.f32.mrb[247].mxu0  ;;  %v3721_v5 = vpop.f32.mrb[247].mxu1 }
 0x4a7   : > { %v3381_v42 = vmax.f32 %v3379_v49, %v3103_v53  ;;  %v4016_v61 = vmax.f32 %v4014_v8, %v3721_v5 }
 0x4ab   : > { %v3107_v48 = vpop.f32.mrb[248].mxu0  ;;  %v3725_v44 = vpop.f32.mrb[248].mxu1 }
 0x4ac   : > { %v3313_v7 = vmax.f32 %v3311_v56, %v3107_v48  ;;  %v3949_v20 = vmax.f32 %v3947_v27, %v3725_v44  ;;  %v3109_v47 = vpop.f32.mrb[249].mxu0  ;;  %v3727_v58 = vpop.f32.mrb[249].mxu1 }
 0x4ad   : > { %v3382_v16 = vmax.f32 %v3380_v0, %v3109_v47  ;;  %v4018_v15 = vmax.f32 %v4016_v61, %v3727_v58  ;;  %v3111_v4 = vpop.f32.mrb[250].mxu0  ;;  %v3729_v37 = vpop.f32.mrb[250].mxu1 }
 0x4ae   : > { %v3314_v52 = vmax.f32 %v3312_v1, %v3111_v4  ;;  %v3951_v14 = vmax.f32 %v3949_v20, %v3729_v37  ;;  %v3113_v38 = vpop.f32.mrb[251].mxu0  ;;  %v3731_v13 = vpop.f32.mrb[251].mxu1 }
 0x4af   : > { %v3383_v41 = vmax.f32 %v3381_v42, %v3113_v38  ;;  %v4020_v11 = vmax.f32 %v4018_v15, %v3731_v13 }
 0x4b3   : > { %v3117_v22 = vpop.f32.mrb[252].mxu0  ;;  %v3735_v60 = vpop.f32.mrb[252].mxu1 }
 0x4b4   : > { %v3315_v32 = vmax.f32 %v3313_v7, %v3117_v22  ;;  %v3953_v54 = vmax.f32 %v3951_v14, %v3735_v60  ;;  %v3119_v10 = vpop.f32.mrb[253].mxu0  ;;  %v3737_v18 = vpop.f32.mrb[253].mxu1 }
 0x4b5   : > { %v3384_v12 = vmax.f32 %v3382_v16, %v3119_v10  ;;  %v4022_v59 = vmax.f32 %v4020_v11, %v3737_v18  ;;  %v3121_v40 = vpop.f32.mrb[254].mxu0  ;;  %v3739_v33 = vpop.f32.mrb[254].mxu1 }
 0x4b6   : > { %v3316_v62 = vmax.f32 %v3314_v52, %v3121_v40  ;;  %v3955_v2 = vmax.f32 %v3953_v54, %v3739_v33  ;;  %v3123_v51 = vpop.f32.mrb[255].mxu0  ;;  %v3741_v57 = vpop.f32.mrb[255].mxu1 }
 0x4b7   : > { %v3385_v36 = vmax.f32 %v3383_v41, %v3123_v51  ;;  %v4024_v35 = vmax.f32 %v4022_v59, %v3741_v57 }
 0x4bb   : > { %v3127_v3 = vpop.f32.mrb[0].mxu0  ;;  %v3745_v25 = vpop.f32.mrb[0].mxu1 }
 0x4bc   : > { %v3317_v21 = vmax.f32 %v3315_v32, %v3127_v3  ;;  %v3896_v43 = vmax.f32 %v3745_v25, %v3955_v2  ;;  %v3129_v30 = vpop.f32.mrb[1].mxu0  ;;  %v3747_v45 = vpop.f32.mrb[1].mxu1 }
 0x4bd   : > { %v3386_v19 = vmax.f32 %v3384_v12, %v3129_v30  ;;  %v3965_v31 = vmax.f32 %v3747_v45, %v4024_v35  ;;  %v3131_v50 = vpop.f32.mrb[2].mxu0  ;;  %v3749_v39 = vpop.f32.mrb[2].mxu1 }
 0x4be   : > { %v3318_v26 = vmax.f32 %v3316_v62, %v3131_v50  ;;  %v3898_v6 = vmax.f32 %v3896_v43, %v3749_v39  ;;  %v3133_v49 = vpop.f32.mrb[3].mxu0  ;;  %v3751_v23 = vpop.f32.mrb[3].mxu1 }
 0x4bf   : > { %v3387_v28 = vmax.f32 %v3385_v36, %v3133_v49  ;;  %v3967_v46 = vmax.f32 %v3965_v31, %v3751_v23 }
 0x4c3   : > { %v3137_v56 = vpop.f32.mrb[4].mxu0  ;;  %v3755_v17 = vpop.f32.mrb[4].mxu1 }
 0x4c4   : > { %v3319_v24 = vmax.f32 %v3317_v21, %v3137_v56  ;;  %v3900_v34 = vmax.f32 %v3898_v6, %v3755_v17  ;;  %v3139_v0 = vpop.f32.mrb[5].mxu0  ;;  %v3757_v8 = vpop.f32.mrb[5].mxu1 }
 0x4c5   : > { %v3388_v9 = vmax.f32 %v3386_v19, %v3139_v0  ;;  %v3969_v29 = vmax.f32 %v3967_v46, %v3757_v8  ;;  %v3141_v1 = vpop.f32.mrb[6].mxu0  ;;  %v3759_v27 = vpop.f32.mrb[6].mxu1 }
 0x4c6   : > { %v3320_v53 = vmax.f32 %v3318_v26, %v3141_v1  ;;  %v3902_v5 = vmax.f32 %v3900_v34, %v3759_v27  ;;  %v3143_v42 = vpop.f32.mrb[7].mxu0  ;;  %v3761_v61 = vpop.f32.mrb[7].mxu1 }
 0x4c7   : > { %v3389_v48 = vmax.f32 %v3387_v28, %v3143_v42  ;;  %v3971_v44 = vmax.f32 %v3969_v29, %v3761_v61 }
 0x4cb   : > { %v3147_v7 = vpop.f32.mrb[8].mxu0  ;;  %v3765_v20 = vpop.f32.mrb[8].mxu1 }
 0x4cc   : > { %v3321_v47 = vmax.f32 %v3319_v24, %v3147_v7  ;;  %v3904_v58 = vmax.f32 %v3902_v5, %v3765_v20  ;;  %v3149_v16 = vpop.f32.mrb[9].mxu0  ;;  %v3767_v15 = vpop.f32.mrb[9].mxu1 }
 0x4cd   : > { %v3390_v4 = vmax.f32 %v3388_v9, %v3149_v16  ;;  %v3973_v37 = vmax.f32 %v3971_v44, %v3767_v15  ;;  %v3151_v52 = vpop.f32.mrb[10].mxu0  ;;  %v3769_v14 = vpop.f32.mrb[10].mxu1 }
 0x4ce   : > { %v3322_v38 = vmax.f32 %v3320_v53, %v3151_v52  ;;  %v3906_v13 = vmax.f32 %v3904_v58, %v3769_v14  ;;  %v3153_v41 = vpop.f32.mrb[11].mxu0  ;;  %v3771_v11 = vpop.f32.mrb[11].mxu1 }
 0x4cf   : > { %v3391_v22 = vmax.f32 %v3389_v48, %v3153_v41  ;;  %v3975_v60 = vmax.f32 %v3973_v37, %v3771_v11 }
 0x4d3   : > { %v3157_v32 = vpop.f32.mrb[12].mxu0  ;;  %v3775_v54 = vpop.f32.mrb[12].mxu1 }
 0x4d4   : > { %v3323_v10 = vmax.f32 %v3321_v47, %v3157_v32  ;;  %v3908_v18 = vmax.f32 %v3906_v13, %v3775_v54  ;;  %v3159_v12 = vpop.f32.mrb[13].mxu0  ;;  %v3777_v59 = vpop.f32.mrb[13].mxu1 }
 0x4d5   : > { %v3392_v40 = vmax.f32 %v3390_v4, %v3159_v12  ;;  %v3977_v33 = vmax.f32 %v3975_v60, %v3777_v59  ;;  %v3161_v62 = vpop.f32.mrb[14].mxu0  ;;  %v3779_v2 = vpop.f32.mrb[14].mxu1 }
 0x4d6   : > { %v3324_v51 = vmax.f32 %v3322_v38, %v3161_v62  ;;  %v3910_v57 = vmax.f32 %v3908_v18, %v3779_v2  ;;  %v3163_v36 = vpop.f32.mrb[15].mxu0  ;;  %v3781_v35 = vpop.f32.mrb[15].mxu1 }
 0x4d7   : > { %v3393_v3 = vmax.f32 %v3391_v22, %v3163_v36  ;;  %v3979_v25 = vmax.f32 %v3977_v33, %v3781_v35 }
 0x4db   : > { %v3167_v21 = vpop.f32.mrb[16].mxu0  ;;  %v3785_v43 = vpop.f32.mrb[16].mxu1 }
 0x4dc   : > { %v3325_v30 = vmax.f32 %v3323_v10, %v3167_v21  ;;  %v3912_v45 = vmax.f32 %v3910_v57, %v3785_v43  ;;  %v3169_v19 = vpop.f32.mrb[17].mxu0  ;;  %v3787_v31 = vpop.f32.mrb[17].mxu1 }
 0x4dd   : > { %v3394_v50 = vmax.f32 %v3392_v40, %v3169_v19  ;;  %v3981_v39 = vmax.f32 %v3979_v25, %v3787_v31  ;;  %v3171_v26 = vpop.f32.mrb[18].mxu0  ;;  %v3789_v6 = vpop.f32.mrb[18].mxu1 }
 0x4de   : > { %v3326_v49 = vmax.f32 %v3324_v51, %v3171_v26  ;;  %v3914_v23 = vmax.f32 %v3912_v45, %v3789_v6  ;;  %v3173_v28 = vpop.f32.mrb[19].mxu0  ;;  %v3791_v46 = vpop.f32.mrb[19].mxu1 }
 0x4df   : > { %v3395_v56 = vmax.f32 %v3393_v3, %v3173_v28  ;;  %v3983_v17 = vmax.f32 %v3981_v39, %v3791_v46 }
 0x4e3   : > { %v3177_v24 = vpop.f32.mrb[20].mxu0  ;;  %v3795_v34 = vpop.f32.mrb[20].mxu1 }
 0x4e4   : > { %v3327_v0 = vmax.f32 %v3325_v30, %v3177_v24  ;;  %v3916_v8 = vmax.f32 %v3914_v23, %v3795_v34  ;;  %v3179_v9 = vpop.f32.mrb[21].mxu0  ;;  %v3797_v29 = vpop.f32.mrb[21].mxu1 }
 0x4e5   : > { %v3396_v1 = vmax.f32 %v3394_v50, %v3179_v9  ;;  %v3985_v27 = vmax.f32 %v3983_v17, %v3797_v29  ;;  %v3181_v53 = vpop.f32.mrb[22].mxu0  ;;  %v3799_v5 = vpop.f32.mrb[22].mxu1 }
 0x4e6   : > { %v3328_v42 = vmax.f32 %v3326_v49, %v3181_v53  ;;  %v3918_v61 = vmax.f32 %v3916_v8, %v3799_v5  ;;  %v3183_v48 = vpop.f32.mrb[23].mxu0  ;;  %v3801_v44 = vpop.f32.mrb[23].mxu1 }
 0x4e7   : > { %v3397_v7 = vmax.f32 %v3395_v56, %v3183_v48  ;;  %v3987_v20 = vmax.f32 %v3985_v27, %v3801_v44 }
 0x4eb   : > { %v3187_v47 = vpop.f32.mrb[24].mxu0  ;;  %v3805_v58 = vpop.f32.mrb[24].mxu1 }
 0x4ec   : > { %v3329_v16 = vmax.f32 %v3327_v0, %v3187_v47  ;;  %v3920_v15 = vmax.f32 %v3918_v61, %v3805_v58  ;;  %v3189_v4 = vpop.f32.mrb[25].mxu0  ;;  %v3807_v37 = vpop.f32.mrb[25].mxu1 }
 0x4ed   : > { %v3398_v52 = vmax.f32 %v3396_v1, %v3189_v4  ;;  %v3989_v14 = vmax.f32 %v3987_v20, %v3807_v37  ;;  %v3191_v38 = vpop.f32.mrb[26].mxu0  ;;  %v3809_v13 = vpop.f32.mrb[26].mxu1 }
 0x4ee   : > { %v3330_v41 = vmax.f32 %v3328_v42, %v3191_v38  ;;  %v3922_v11 = vmax.f32 %v3920_v15, %v3809_v13  ;;  %v3193_v22 = vpop.f32.mrb[27].mxu0  ;;  %v3811_v60 = vpop.f32.mrb[27].mxu1 }
 0x4ef   : > { %v3399_v32 = vmax.f32 %v3397_v7, %v3193_v22  ;;  %v3991_v54 = vmax.f32 %v3989_v14, %v3811_v60 }
 0x4f3   : > { %v3197_v10 = vpop.f32.mrb[28].mxu0  ;;  %v3815_v18 = vpop.f32.mrb[28].mxu1 }
 0x4f4   : > { %v3331_v12 = vmax.f32 %v3329_v16, %v3197_v10  ;;  %v3924_v59 = vmax.f32 %v3922_v11, %v3815_v18  ;;  %v3199_v40 = vpop.f32.mrb[29].mxu0  ;;  %v3817_v33 = vpop.f32.mrb[29].mxu1 }
 0x4f5   : > { %v3400_v62 = vmax.f32 %v3398_v52, %v3199_v40  ;;  %v3993_v2 = vmax.f32 %v3991_v54, %v3817_v33  ;;  %v3201_v51 = vpop.f32.mrb[30].mxu0  ;;  %v3819_v57 = vpop.f32.mrb[30].mxu1 }
 0x4f6   : > { %v3332_v36 = vmax.f32 %v3330_v41, %v3201_v51  ;;  %v3926_v35 = vmax.f32 %v3924_v59, %v3819_v57  ;;  %v3203_v3 = vpop.f32.mrb[31].mxu0  ;;  %v3821_v25 = vpop.f32.mrb[31].mxu1 }
 0x4f7   : > { %v3401_v21 = vmax.f32 %v3399_v32, %v3203_v3  ;;  %v3995_v43 = vmax.f32 %v3993_v2, %v3821_v25 }
 0x4fb   : > { %v3207_v30 = vpop.f32.mrb[32].mxu0  ;;  %v3825_v45 = vpop.f32.mrb[32].mxu1 }
 0x4fc   : > { %v3333_v19 = vmax.f32 %v3331_v12, %v3207_v30  ;;  %v3928_v31 = vmax.f32 %v3926_v35, %v3825_v45  ;;  %v3209_v50 = vpop.f32.mrb[33].mxu0  ;;  %v3827_v39 = vpop.f32.mrb[33].mxu1 }
 0x4fd   : > { %v3402_v26 = vmax.f32 %v3400_v62, %v3209_v50  ;;  %v3997_v6 = vmax.f32 %v3995_v43, %v3827_v39  ;;  %v3211_v49 = vpop.f32.mrb[34].mxu0  ;;  %v3829_v23 = vpop.f32.mrb[34].mxu1 }
 0x4fe   : > { %v3334_v28 = vmax.f32 %v3332_v36, %v3211_v49  ;;  %v3930_v46 = vmax.f32 %v3928_v31, %v3829_v23  ;;  %v3213_v56 = vpop.f32.mrb[35].mxu0  ;;  %v3831_v17 = vpop.f32.mrb[35].mxu1 }
 0x4ff   : > { %v3403_v24 = vmax.f32 %v3401_v21, %v3213_v56  ;;  %v3999_v34 = vmax.f32 %v3997_v6, %v3831_v17 }
 0x503   : > { %v3217_v0 = vpop.f32.mrb[36].mxu0  ;;  %v3835_v8 = vpop.f32.mrb[36].mxu1 }
 0x504   : > { %v3335_v9 = vmax.f32 %v3333_v19, %v3217_v0  ;;  %v3932_v29 = vmax.f32 %v3930_v46, %v3835_v8  ;;  %v3219_v1 = vpop.f32.mrb[37].mxu0  ;;  %v3837_v27 = vpop.f32.mrb[37].mxu1 }
 0x505   : > { %v3404_v53 = vmax.f32 %v3402_v26, %v3219_v1  ;;  %v4001_v5 = vmax.f32 %v3999_v34, %v3837_v27  ;;  %v3221_v42 = vpop.f32.mrb[38].mxu0  ;;  %v3839_v61 = vpop.f32.mrb[38].mxu1 }
 0x506   : > { %v3336_v48 = vmax.f32 %v3334_v28, %v3221_v42  ;;  %v3934_v44 = vmax.f32 %v3932_v29, %v3839_v61  ;;  %v3223_v7 = vpop.f32.mrb[39].mxu0  ;;  %v3841_v20 = vpop.f32.mrb[39].mxu1 }
 0x507   : > { %v3405_v47 = vmax.f32 %v3403_v24, %v3223_v7  ;;  %v4003_v58 = vmax.f32 %v4001_v5, %v3841_v20 }
 0x50b   : > { %v3227_v16 = vpop.f32.mrb[40].mxu0  ;;  %v3845_v15 = vpop.f32.mrb[40].mxu1 }
 0x50c   : > { %v3337_v4 = vmax.f32 %v3335_v9, %v3227_v16  ;;  %v3936_v37 = vmax.f32 %v3934_v44, %v3845_v15  ;;  %v3229_v52 = vpop.f32.mrb[41].mxu0  ;;  %v3847_v14 = vpop.f32.mrb[41].mxu1 }
 0x50d   : > { %v3406_v38 = vmax.f32 %v3404_v53, %v3229_v52  ;;  %v4005_v13 = vmax.f32 %v4003_v58, %v3847_v14  ;;  %v3231_v41 = vpop.f32.mrb[42].mxu0  ;;  %v3849_v11 = vpop.f32.mrb[42].mxu1 }
 0x50e   : > { %v3338_v22 = vmax.f32 %v3336_v48, %v3231_v41  ;;  %v3938_v60 = vmax.f32 %v3936_v37, %v3849_v11  ;;  %v3233_v32 = vpop.f32.mrb[43].mxu0  ;;  %v3851_v54 = vpop.f32.mrb[43].mxu1 }
 0x50f   : > { %v3407_v10 = vmax.f32 %v3405_v47, %v3233_v32  ;;  %v4007_v18 = vmax.f32 %v4005_v13, %v3851_v54 }
 0x513   : > { %v3237_v12 = vpop.f32.mrb[44].mxu0  ;;  %v3855_v59 = vpop.f32.mrb[44].mxu1 }
 0x514   : > { %v3339_v40 = vmax.f32 %v3337_v4, %v3237_v12  ;;  %v3940_v33 = vmax.f32 %v3938_v60, %v3855_v59  ;;  %v3239_v62 = vpop.f32.mrb[45].mxu0  ;;  %v3857_v2 = vpop.f32.mrb[45].mxu1 }
 0x515   : > { %v3408_v51 = vmax.f32 %v3406_v38, %v3239_v62  ;;  %v4009_v57 = vmax.f32 %v4007_v18, %v3857_v2  ;;  %v3241_v36 = vpop.f32.mrb[46].mxu0  ;;  %v3859_v35 = vpop.f32.mrb[46].mxu1 }
 0x516   : > { %v3340_v3 = vmax.f32 %v3338_v22, %v3241_v36  ;;  %v3942_v25 = vmax.f32 %v3940_v33, %v3859_v35  ;;  %v3243_v21 = vpop.f32.mrb[47].mxu0  ;;  %v3861_v43 = vpop.f32.mrb[47].mxu1 }
 0x517   : > { %v3409_v30 = vmax.f32 %v3407_v10, %v3243_v21  ;;  %v4011_v45 = vmax.f32 %v4009_v57, %v3861_v43 }
 0x51b   : > { %v3247_v19 = vpop.f32.mrb[48].mxu0  ;;  %v3865_v31 = vpop.f32.mrb[48].mxu1 }
 0x51c   : > { %v3341_v50 = vmax.f32 %v3339_v40, %v3247_v19  ;;  %v3944_v39 = vmax.f32 %v3942_v25, %v3865_v31  ;;  %v3249_v26 = vpop.f32.mrb[49].mxu0  ;;  %v3867_v6 = vpop.f32.mrb[49].mxu1 }
 0x51d   : > { %v3410_v49 = vmax.f32 %v3408_v51, %v3249_v26  ;;  %v4013_v23 = vmax.f32 %v4011_v45, %v3867_v6  ;;  %v3251_v28 = vpop.f32.mrb[50].mxu0  ;;  %v3869_v46 = vpop.f32.mrb[50].mxu1 }
 0x51e   : > { %v3342_v56 = vmax.f32 %v3340_v3, %v3251_v28  ;;  %v3946_v17 = vmax.f32 %v3944_v39, %v3869_v46  ;;  %v3253_v24 = vpop.f32.mrb[51].mxu0  ;;  %v3871_v34 = vpop.f32.mrb[51].mxu1 }
 0x51f   : > { %v3411_v0 = vmax.f32 %v3409_v30, %v3253_v24  ;;  %v4015_v8 = vmax.f32 %v4013_v23, %v3871_v34 }
 0x523   : > { %v3257_v9 = vpop.f32.mrb[52].mxu0  ;;  %v3875_v29 = vpop.f32.mrb[52].mxu1 }
 0x524   : > { %v3343_v1 = vmax.f32 %v3341_v50, %v3257_v9  ;;  %v3948_v27 = vmax.f32 %v3946_v17, %v3875_v29  ;;  %v3259_v53 = vpop.f32.mrb[53].mxu0  ;;  %v3877_v5 = vpop.f32.mrb[53].mxu1 }
 0x525   : > { %v3412_v42 = vmax.f32 %v3410_v49, %v3259_v53  ;;  %v4017_v61 = vmax.f32 %v4015_v8, %v3877_v5  ;;  %v3261_v48 = vpop.f32.mrb[54].mxu0  ;;  %v3879_v44 = vpop.f32.mrb[54].mxu1 }
 0x526   : > { %v3344_v7 = vmax.f32 %v3342_v56, %v3261_v48  ;;  %v3950_v20 = vmax.f32 %v3948_v27, %v3879_v44  ;;  %v3263_v47 = vpop.f32.mrb[55].mxu0  ;;  %v3881_v58 = vpop.f32.mrb[55].mxu1 }
 0x527   : > { %v3413_v16 = vmax.f32 %v3411_v0, %v3263_v47  ;;  %v4019_v15 = vmax.f32 %v4017_v61, %v3881_v58  ;;  %v3286_v47 = vld [vmem:[#allocation2 + $0x4] sm:$0x3] }
 0x52b   : > { %v3267_v4 = vpop.f32.mrb[56].mxu0  ;;  %v3885_v37 = vpop.f32.mrb[56].mxu1 }
 0x52c   : > { %v3345_v52 = vmax.f32 %v3343_v1, %v3267_v4  ;;  %v3952_v14 = vmax.f32 %v3950_v20, %v3885_v37  ;;  %v3269_v38 = vpop.f32.mrb[57].mxu0  ;;  %v3887_v13 = vpop.f32.mrb[57].mxu1 }
 0x52d   : > { %v3414_v41 = vmax.f32 %v3412_v42, %v3269_v38  ;;  %v4021_v11 = vmax.f32 %v4019_v15, %v3887_v13  ;;  %v3271_v22 = vpop.f32.mrb[58].mxu0  ;;  %v3889_v60 = vpop.f32.mrb[58].mxu1 }
 0x52e   : > { %v3346_v32 = vmax.f32 %v3344_v7, %v3271_v22  ;;  %v3954_v54 = vmax.f32 %v3952_v14, %v3889_v60  ;;  %v3273_v10 = vpop.f32.mrb[59].mxu0  ;;  %v3891_v18 = vpop.f32.mrb[59].mxu1  ;;  %v3894_v14 = vld [vmem:[#allocation2 + $0x6] sm:$0x3] }
 0x52f   : > { %v3415_v12 = vmax.f32 %v3413_v16, %v3273_v10  ;;  %v4023_v59 = vmax.f32 %v4021_v11, %v3891_v18 }
 0x533   : > { %v3277_v40 = vpop.f32.mrb[60].mxu0 }
 0x534   : > { %v3347_v33 = vmax.f32 %v3345_v52, %v3277_v40  ;;  %v3279_v62 = vpop.f32.mrb[61].mxu0 }
 0x535   : > { %v3416_v2 = vmax.f32 %v3414_v41, %v3279_v62  ;;  %v3281_v51 = vpop.f32.mrb[62].mxu0  ;;  %v4057_v41 = vld [vmem:[#allocation11] sm:$0xff] }
 0x536   : > { %v3348_v57 = vmax.f32 %v3346_v32, %v3281_v51  ;;  %v3283_v36 = vpop.f32.mrb[63].mxu0 }
 0x537   : > { %v3417_v35 = vmax.f32 %v3415_v12, %v3283_v36 }
 0x538   : > { %v3349_v3 = vmax.f32 %v3347_v33, %v3348_v57 }
 0x539   : > { %v3418_v25 = vmax.f32 %v3416_v2, %v3417_v35 }
 0x53a   : > { %v3350_v21 = vrot.slane %v3349_v3, 4 }
 0x53b   : > { %v3419_v43 = vrot.slane %v3418_v25, 4  ;;  %v3575_v30 = vpop.f32.mrb[64].mxu0 }
 0x53c   : > { %v3351_v45 = vmax.f32 %v3349_v3, %v3350_v21  ;;  %v3956_v19 = vmax.f32 %v3954_v54, %v3575_v30  ;;  %v3577_v31 = vpop.f32.mrb[65].mxu0 }
 0x53d   : > { %v3420_v50 = vmax.f32 %v3418_v25, %v3419_v43  ;;  %v4025_v39 = vmax.f32 %v4023_v59, %v3577_v31  ;;  %v3579_v26 = vpop.f32.mrb[66].mxu0 }
 0x53e   : > { %v3352_v6 = vrot.slane %v3351_v45, 2  ;;  %v3957_v49 = vmax.f32 %v3579_v26, %v3956_v19  ;;  %v3581_v23 = vpop.f32.mrb[67].mxu0 }
 0x53f   : > { %v3421_v28 = vrot.slane %v3420_v50, 2  ;;  %v4026_v46 = vmax.f32 %v3581_v23, %v4025_v39 }
 0x540   : > { %v3353_v56 = vmax.f32 %v3351_v45, %v3352_v6  ;;  %v3958_v17 = vrot.slane %v3957_v49, 4 }
 0x541   : > { %v3422_v24 = vmax.f32 %v3420_v50, %v3421_v28  ;;  %v4027_v34 = vrot.slane %v4026_v46, 4 }
 0x542   : > { %v3354_v0 = vrot.slane %v3353_v56, 1  ;;  %v3959_v8 = vmax.f32 %v3957_v49, %v3958_v17 }
 0x543   : > { %v3423_v9 = vrot.slane %v3422_v24, 1  ;;  %v4028_v29 = vmax.f32 %v4026_v46, %v4027_v34 }
 0x544   : > { %v3355_v1 = vmax.f32 %v3353_v56, %v3354_v0  ;;  %v3960_v27 = vrot.slane %v3959_v8, 2 }
 0x545   : > { %v3424_v53 = vmax.f32 %v3422_v24, %v3423_v9  ;;  %v4029_v5 = vrot.slane %v4028_v29, 2 }
 0x546   : > { %v3961_v42 = vmax.f32 %v3959_v8, %v3960_v27 }
 0x547   : > { %v3427_v61 = vcombine.low %v3355_v1, %v3424_v53  ;;  %v4030_v48 = vmax.f32 %v4028_v29, %v4029_v5 }
 0x548   : > { %v3962_v44 = vrot.slane %v3961_v42, 1 }
 0x549   : > { %v3434_v7 = vrot.slane %v3427_v61, %v5876_v55  ;;  %v4031_v20 = vrot.slane %v4030_v48, 1 }
 0x54a   : > { %v3963_v58 = vmax.f32 %v3961_v42, %v3962_v44 }
 0x54b   : > { %v3441_v16 = vrot.slane %v3434_v7, %v5876_v55  ;;  %v4032_v15 = vmax.f32 %v4030_v48, %v4031_v20 }
 0x54d   : > { %v3443_v4 = vmax.f32 %v3286_v47, %v3441_v16  ;;  %v4035_v37 = vcombine.low %v3963_v58, %v4032_v15 }
 0x54f   : > { %3444 = vst.msk [vmem:[#allocation2 + $0x4] sm:$0x3] %vm5891_vm1, %v3443_v4  ;;  %v4042_v52 = vrot.slane %v4035_v37, %v5876_v55 }
 0x551   : > { %v4049_v38 = vrot.slane %v4042_v52, %v5876_v55 }
 0x553   : > { %v4051_v13 = vmax.f32 %v3894_v14, %v4049_v38 }
 0x555   : > { %4052 = vst.msk [vmem:[#allocation2 + $0x6] sm:$0x3] %vm5891_vm1, %v4051_v13 }
 0x55c   : > { %v4056_v11 = vld [vmem:[#allocation2] sm:$0xff] }
 0x55d   : > { %v4058_v22 = vadd.f32 %v4057_v41, %v4056_v11 }
 0x55f   : > { %v4059_v60 = vmax.f32 %v4058_v22, 0.0 }
 0x561   : > { %4060 = vst [vmem:[%s408_s28] sm:$0xff] %v4059_v60 }
 0x562 PF: > { %s21_s26 = sadd.s32 1, %s4974_s26   ;;  %s5983_s24 = smov %s4970_s25 }
 0x563   : > { %p18_p8 = scmp.ge.s32.totalorder %s21_s26, 4   ;;  %s5984_s25 = smov %s5986_s12 }
 0x565   :  { %20 = sbr.rel (!%p18_p8) target bundleno = 5 (0x5), region = 111 }
 0x56c   :  { %4088 = vsyncpa [#allocation4], 1 }
 0x56d   :  { %4090 = vsyncpa [#allocation4 + $0x1], 1 }
 0x56e   :  { %4091 = vsyncpa [#allocation6], 1 }
 0x56f   :  { %4092 = vsyncpa [#allocation9], 1 }
 0x570   :  { %4093 = vsyncpa [#allocation12], 1 }

// kernel: pointnet_encoder_forward.3
= control target key start
LH: loop header
LB: loop body
LE: loop exit
PB: predicated region body
PF: predicated region fallthrough
CT: control target
= control target key end

     0   :  { %s4646_s24 = smov 0   ;;  %s4648_s25 = smov 0   ;;  %s5608_s0 = inlined_call_operand.vmem [shape: f32[2,512,8], index: 0, kind: input, shape index: {}]   ;;  %s5609_s1 = inlined_call_operand.vmem [shape: f32[2,8,128], index: 1, kind: input, shape index: {}]   ;;  %s5610_s2 = inlined_call_operand.vmem [shape: f32[1,128], index: 2, kind: input, shape index: {}]   ;;  %s5611_s3 = inlined_call_operand.vmem [shape: bf16[128,128], index: 3, kind: input, shape index: {}]   ;;  %s5612_s4 = inlined_call_operand.vmem [shape: f32[1,128], index: 4, kind: input, shape index: {}]   ;;  %s5613_s5 = inlined_call_operand.vmem [shape: bf16[128,1024], index: 5, kind: input, shape index: {}]   ;;  %s5614_s6 = inlined_call_operand.vmem [shape: f32[1,1024], index: 6, kind: input, shape index: {}]   ;;  %s5615_s7 = inlined_call_operand.vmem [shape: f32[1,2,1,1024], index: 7, kind: output, shape index: {}]  }
   0x1   :  { %s4650_s26 = smov 0  }
   0x2 LB: > { %s32_s27 = sadd.s32 1, %s4597_s25  ;;  %p4099_p0 = scmp.ge.s32.totalorder %s4601_s26, 1  ;;  %s4601_s26 = sphi %s4650_s26, %s17_s26   ;;  %s4597_s25 = sphi %s4648_s25, %s5651_s25   ;;  %s4593_s24 = sphi %s4646_s24, %s5650_s24  }
   0x3   : > { %p34_p1 = scmp.ge.s32.totalorder %s32_s27, 2  ;;  %p278_p2 = scmp.lt.s32.totalorder %s4601_s26, 3 }
   0x5   : > { %s5653_s27 = smov (%p34_p1, %s32_s27), 0  ;;  %p279_p3 = pnand %p4099_p0, %p278_p2 }
   0x7   : > { %282 = sbr.rel (%p279_p3) target bundleno = 1226 (0x4ca), region = 48 }
   0xe   : > { %p324_p4 = scmp.lt.s32.totalorder %s4593_s24, 1  ;;  %v4571_v0 = vld [vmem:[%s5611_s3] sm:$0xff]   ;;  %v4572_v1 = vld [vmem:[%s5611_s3 + $0x8] sm:$0xff]   ;;  %vm424_vm0 = vcmask 64512   ;;  %v4573_v2 = vld [vmem:[%s5611_s3 + $0x10] sm:$0xff]  }
   0xf   : > { %4448 = vmatprep.subr.bf16.mxu1 %v4571_v0  ;;  %v4574_v7 = vld [vmem:[%s5611_s3 + $0x18] sm:$0xff]   ;;  %v4575_v10 = vld [vmem:[%s5611_s3 + $0x20] sm:$0xff]   ;;  %v4576_v50 = vld [vmem:[%s5611_s3 + $0x28] sm:$0xff]  }
  0x10   : > { %s5655_s24 = smov (!%p324_p4, %s4593_s24), 1  ;;  %4449 = vmatpush3.bf16.msra.mxu1 %v4571_v0  ;;  %v4577_v53 = vld [vmem:[%s5611_s3 + $0x30] sm:$0xff]   ;;  %v4578_v56 = vld [vmem:[%s5611_s3 + $0x38] sm:$0xff]  }
  0x11   : > { %s4244_s9 = sshll.u32 %s5655_s24, 9  ;;  %s4102_s10 = sshll.u32 %s5655_s24, 3  ;;  %4450 = vmatprep.subr.bf16.mxu1 %v4572_v1 }
  0x12   : > { %s4680_s15 = scalar_lea.vmem %s5608_s0, %s4244_s9  ;;  %s337_s18 = scalar_lea.vmem %s5609_s1, %s4102_s10 }
  0x13   : > { %v416_v3 = vld [vmem:[%s337_s18] sm:$0xff]  ;;  %v353_v5 = vld [vmem:[%s4680_s15 + $0x8] sm:$0xff]  ;;  %v354_v6 = vld [vmem:[%s4680_s15 + $0x10] sm:$0xff]  ;;  %s345_s21 = scalar_lea.vmem %s5615_s7, %s4102_s10 }
  0x14   : > { %v352_v4 = vld [vmem:[%s4680_s15] sm:$0xff]  ;;  %4350 = vmatprep.subr.mxu0 %v416_v3  ;;  %4451 = vmatpush3.bf16.msra.mxu1 %v4572_v1  ;;  %v355_v8 = vld [vmem:[%s4680_s15 + $0x18] sm:$0xff]  ;;  %v357_v11 = vld [vmem:[%s4680_s15 + $0x28] sm:$0xff] }
  0x15   : > { %4352 = vmatprep.mubr.msk.f32.mxu0 %vm424_vm0, %v352_v4  ;;  %4351 = vmatpush3.msra.mxu0 %v416_v3  ;;  %v356_v9 = vld [vmem:[%s4680_s15 + $0x20] sm:$0xff]  ;;  %v358_v12 = vld [vmem:[%s4680_s15 + $0x30] sm:$0xff]  ;;  %v359_v13 = vld [vmem:[%s4680_s15 + $0x38] sm:$0xff] }
  0x16   : > { %4353 = vmatmul.mubr.msk.f32.vlgmr.msra.gmra.mrb[0].mxu0 %vm424_vm0, %v353_v5  ;;  %4452 = vmatprep.subr.bf16.mxu1 %v4573_v2  ;;  %v360_v14 = vld [vmem:[%s4680_s15 + $0x40] sm:$0xff]  ;;  %v361_v15 = vld [vmem:[%s4680_s15 + $0x48] sm:$0xff]  ;;  %v362_v16 = vld [vmem:[%s4680_s15 + $0x50] sm:$0xff] }
  0x17   : > { %4355 = vmatprep.mubr.msk.f32.mxu0 %vm424_vm0, %v354_v6  ;;  %v363_v17 = vld [vmem:[%s4680_s15 + $0x58] sm:$0xff]  ;;  %v364_v18 = vld [vmem:[%s4680_s15 + $0x60] sm:$0xff]  ;;  %v365_v19 = vld [vmem:[%s4680_s15 + $0x68] sm:$0xff] }
  0x18   : > { %4453 = vmatpush3.bf16.msra.mxu1 %v4573_v2  ;;  %v366_v20 = vld [vmem:[%s4680_s15 + $0x70] sm:$0xff]  ;;  %v367_v21 = vld [vmem:[%s4680_s15 + $0x78] sm:$0xff]  ;;  %v368_v22 = vld [vmem:[%s4680_s15 + $0x80] sm:$0xff] }
  0x19   : > { %4454 = vmatprep.subr.bf16.mxu1 %v4574_v7  ;;  %v369_v23 = vld [vmem:[%s4680_s15 + $0x88] sm:$0xff]  ;;  %v370_v24 = vld [vmem:[%s4680_s15 + $0x90] sm:$0xff]  ;;  %v371_v25 = vld [vmem:[%s4680_s15 + $0x98] sm:$0xff] }
  0x1a   : > { %4356 = vmatmul.mubr.msk.f32.gmra.mrb[2].mxu0 %vm424_vm0, %v355_v8  ;;  %v372_v26 = vld [vmem:[%s4680_s15 + $0xa0] sm:$0xff]  ;;  %v373_v27 = vld [vmem:[%s4680_s15 + $0xa8] sm:$0xff]  ;;  %v374_v28 = vld [vmem:[%s4680_s15 + $0xb0] sm:$0xff] }
  0x1b   : > { %4358 = vmatprep.mubr.msk.f32.mxu0 %vm424_vm0, %v356_v9  ;;  %v375_v29 = vld [vmem:[%s4680_s15 + $0xb8] sm:$0xff]  ;;  %v376_v30 = vld [vmem:[%s4680_s15 + $0xc0] sm:$0xff]  ;;  %v377_v31 = vld [vmem:[%s4680_s15 + $0xc8] sm:$0xff] }
  0x1c   : > { %4455 = vmatpush3.bf16.msra.mxu1 %v4574_v7  ;;  %v378_v32 = vld [vmem:[%s4680_s15 + $0xd0] sm:$0xff]  ;;  %v379_v33 = vld [vmem:[%s4680_s15 + $0xd8] sm:$0xff]  ;;  %v380_v34 = vld [vmem:[%s4680_s15 + $0xe0] sm:$0xff] }
  0x1d   : > { %4456 = vmatprep.subr.bf16.mxu1 %v4575_v10  ;;  %v381_v35 = vld [vmem:[%s4680_s15 + $0xe8] sm:$0xff]  ;;  %v382_v36 = vld [vmem:[%s4680_s15 + $0xf0] sm:$0xff]  ;;  %v383_v37 = vld [vmem:[%s4680_s15 + $0xf8] sm:$0xff] }
  0x1e   : > { %4359 = vmatmul.mubr.msk.f32.gmra.mrb[4].mxu0 %vm424_vm0, %v357_v11  ;;  %v384_v38 = vld [vmem:[%s4680_s15 + $0x100] sm:$0xff]  ;;  %v385_v39 = vld [vmem:[%s4680_s15 + $0x108] sm:$0xff]  ;;  %v386_v40 = vld [vmem:[%s4680_s15 + $0x110] sm:$0xff] }
  0x1f   : > { %4361 = vmatprep.mubr.msk.f32.mxu0 %vm424_vm0, %v358_v12  ;;  %v387_v41 = vld [vmem:[%s4680_s15 + $0x118] sm:$0xff]  ;;  %v388_v42 = vld [vmem:[%s4680_s15 + $0x120] sm:$0xff]  ;;  %v389_v43 = vld [vmem:[%s4680_s15 + $0x128] sm:$0xff] }
  0x20   : > { %4457 = vmatpush3.bf16.msra.mxu1 %v4575_v10  ;;  %v390_v44 = vld [vmem:[%s4680_s15 + $0x130] sm:$0xff]  ;;  %v391_v45 = vld [vmem:[%s4680_s15 + $0x138] sm:$0xff]  ;;  %v392_v46 = vld [vmem:[%s4680_s15 + $0x140] sm:$0xff] }
  0x21   : > { %v393_v47 = vld [vmem:[%s4680_s15 + $0x148] sm:$0xff]  ;;  %v394_v48 = vld [vmem:[%s4680_s15 + $0x150] sm:$0xff]  ;;  %v395_v49 = vld [vmem:[%s4680_s15 + $0x158] sm:$0xff]  ;;  %4458 = vmatprep.subr.bf16.mxu1 %v4576_v50 }
  0x22   : > { %4362 = vmatmul.mubr.msk.f32.gmra.mrb[6].mxu0 %vm424_vm0, %v359_v13  ;;  %v396_v51 = vld [vmem:[%s4680_s15 + $0x160] sm:$0xff]  ;;  %v397_v52 = vld [vmem:[%s4680_s15 + $0x168] sm:$0xff]  ;;  %v398_v54 = vld [vmem:[%s4680_s15 + $0x170] sm:$0xff] }
  0x23   : > { %4364 = vmatprep.mubr.msk.f32.mxu0 %vm424_vm0, %v360_v14  ;;  %v399_v55 = vld [vmem:[%s4680_s15 + $0x178] sm:$0xff]  ;;  %v400_v57 = vld [vmem:[%s4680_s15 + $0x180] sm:$0xff]  ;;  %v401_v58 = vld [vmem:[%s4680_s15 + $0x188] sm:$0xff] }
  0x24   : > { %4459 = vmatpush3.bf16.msra.mxu1 %v4576_v50  ;;  %v402_v59 = vld [vmem:[%s4680_s15 + $0x190] sm:$0xff]  ;;  %v403_v60 = vld [vmem:[%s4680_s15 + $0x198] sm:$0xff]  ;;  %v404_v61 = vld [vmem:[%s4680_s15 + $0x1a0] sm:$0xff] }
  0x25   : > { %4460 = vmatprep.subr.bf16.mxu1 %v4577_v53  ;;  %v405_v62 = vld [vmem:[%s4680_s15 + $0x1a8] sm:$0xff]  ;;  %v406_v63 = vld [vmem:[%s4680_s15 + $0x1b0] sm:$0xff]  ;;  %v407_v0 = vld [vmem:[%s4680_s15 + $0x1b8] sm:$0xff] }
  0x26   : > { %4365 = vmatmul.mubr.msk.f32.gmra.mrb[8].mxu0 %vm424_vm0, %v361_v15  ;;  %v408_v1 = vld [vmem:[%s4680_s15 + $0x1c0] sm:$0xff]  ;;  %v409_v2 = vld [vmem:[%s4680_s15 + $0x1c8] sm:$0xff]  ;;  %v410_v3 = vld [vmem:[%s4680_s15 + $0x1d0] sm:$0xff] }
  0x27   : > { %4367 = vmatprep.mubr.msk.f32.mxu0 %vm424_vm0, %v362_v16  ;;  %v411_v4 = vld [vmem:[%s4680_s15 + $0x1d8] sm:$0xff]  ;;  %v412_v5 = vld [vmem:[%s4680_s15 + $0x1e0] sm:$0xff]  ;;  %v413_v6 = vld [vmem:[%s4680_s15 + $0x1e8] sm:$0xff] }
  0x28   : > { %4461 = vmatpush3.bf16.msra.mxu1 %v4577_v53  ;;  %v414_v7 = vld [vmem:[%s4680_s15 + $0x1f0] sm:$0xff]  ;;  %v415_v8 = vld [vmem:[%s4680_s15 + $0x1f8] sm:$0xff]  ;;  %v1554_v9 = vld [vmem:[%s5613_s5] sm:$0xff] }
  0x29   : > { %4462 = vmatprep.subr.bf16.mxu1 %v4578_v56  ;;  %v1555_v10 = vld [vmem:[%s5613_s5 + $0x20] sm:$0xff] }
  0x2a   : > { %4368 = vmatmul.mubr.msk.f32.gmra.mrb[10].mxu0 %vm424_vm0, %v363_v17  ;;  %v4178_v11 = vcombine.low %v1554_v9, %v1555_v10  ;;  %v4179_v12 = vcombine.high %v1554_v9, %v1555_v10  ;;  %v1556_v13 = vld [vmem:[%s5613_s5 + $0x40] sm:$0xff] }
  0x2b   : > { %4370 = vmatprep.mubr.msk.f32.mxu0 %vm424_vm0, %v364_v18  ;;  %v1557_v14 = vld [vmem:[%s5613_s5 + $0x60] sm:$0xff] }
  0x2c   : > { %4463 = vmatpush3.bf16.msra.mxu1 %v4578_v56  ;;  %1650 = vmatprep.subr.bf16.mxu0 %v4179_v12  ;;  %v4180_v15 = vcombine.low %v1556_v13, %v1557_v14  ;;  %v4181_v16 = vcombine.high %v1556_v13, %v1557_v14  ;;  %v1558_v17 = vld [vmem:[%s5613_s5 + $0x80] sm:$0xff] }
  0x2d   : > { %1651 = vmatpush1.bf16.msra.mxu0 %v4178_v11  ;;  %v1559_v18 = vld [vmem:[%s5613_s5 + $0xa0] sm:$0xff] }
  0x2e   : > { %4371 = vmatmul.mubr.msk.f32.gmra.mrb[12].mxu0 %vm424_vm0, %v365_v19  ;;  %1652 = vmatprep.subr.bf16.mxu0 %v4181_v16  ;;  %v4182_v19 = vcombine.low %v1558_v17, %v1559_v18  ;;  %v2173_v16 = vld [vmem:[%s5613_s5 + $0xe8] sm:$0xff] }
  0x2f   : > { %4373 = vmatprep.mubr.msk.f32.mxu0 %vm424_vm0, %v366_v20  ;;  %v4183_v20 = vcombine.high %v1558_v17, %v1559_v18 }
  0x31   : > { %1653 = vmatpush1.bf16.msra.mxu0 %v4180_v15  ;;  %v2172_v15 = vld [vmem:[%s5613_s5 + $0xc8] sm:$0xff] }
  0x32   : > { %4374 = vmatmul.mubr.msk.f32.gmra.mrb[14].mxu0 %vm424_vm0, %v367_v21  ;;  %1654 = vmatprep.subr.bf16.mxu0 %v4183_v20  ;;  %v1560_v21 = vld [vmem:[%s5613_s5 + $0xc0] sm:$0xff] }
  0x33   : > { %4376 = vmatprep.mubr.msk.f32.mxu0 %vm424_vm0, %v368_v22  ;;  %v1561_v22 = vld [vmem:[%s5613_s5 + $0xe0] sm:$0xff] }
  0x35   : > { %1655 = vmatpush1.bf16.msra.mxu0 %v4182_v19 }
  0x36   : > { %4377 = vmatmul.mubr.msk.f32.gmra.mrb[16].mxu0 %vm424_vm0, %v369_v23  ;;  %v4184_v23 = vcombine.low %v1560_v21, %v1561_v22 }
  0x37   : > { %4379 = vmatprep.mubr.msk.f32.mxu0 %vm424_vm0, %v370_v24  ;;  %v4185_v24 = vcombine.high %v1560_v21, %v1561_v22 }
  0x39   : > { %1656 = vmatprep.subr.bf16.mxu0 %v4185_v24  ;;  %v4201_v24 = vcombine.high %v2172_v15, %v2173_v16 }
  0x3a   : > { %4380 = vmatmul.mubr.msk.f32.gmra.mrb[18].mxu0 %vm424_vm0, %v371_v25  ;;  %v1562_v25 = vld [vmem:[%s5613_s5 + $0x100] sm:$0xff] }
  0x3b   : > { %4382 = vmatprep.mubr.msk.f32.mxu0 %vm424_vm0, %v372_v26  ;;  %1657 = vmatpush1.bf16.msra.mxu0 %v4184_v23  ;;  %v1563_v26 = vld [vmem:[%s5613_s5 + $0x120] sm:$0xff] }
  0x3e   : > { %4383 = vmatmul.mubr.msk.f32.gmra.mrb[20].mxu0 %vm424_vm0, %v373_v27  ;;  %v4186_v27 = vcombine.low %v1562_v25, %v1563_v26 }
  0x3f   : > { %4385 = vmatprep.mubr.msk.f32.mxu0 %vm424_vm0, %v374_v28  ;;  %v4187_v28 = vcombine.high %v1562_v25, %v1563_v26  ;;  %v2174_v26 = vld [vmem:[%s5613_s5 + $0x108] sm:$0xff] }
  0x41   : > { %1658 = vmatprep.subr.bf16.mxu0 %v4187_v28 }
  0x42   : > { %4386 = vmatmul.mubr.msk.f32.gmra.mrb[22].mxu0 %vm424_vm0, %v375_v29  ;;  %v2166_v29 = vld [vmem:[%s5613_s5 + $0x8] sm:$0xff] }
  0x43   : > { %4388 = vmatprep.mubr.msk.f32.mxu0 %vm424_vm0, %v376_v30  ;;  %1659 = vmatpush1.bf16.msra.mxu0 %v4186_v27  ;;  %v2167_v30 = vld [vmem:[%s5613_s5 + $0x28] sm:$0xff] }
  0x44   : > { %v2175_v27 = vld [vmem:[%s5613_s5 + $0x128] sm:$0xff] }
  0x46   : > { %4389 = vmatmul.mubr.msk.f32.gmra.mrb[24].mxu0 %vm424_vm0, %v377_v31  ;;  %v4195_v31 = vcombine.high %v2166_v29, %v2167_v30 }
  0x47   : > { %4391 = vmatprep.mubr.msk.f32.mxu0 %vm424_vm0, %v378_v32  ;;  %v1564_v32 = vld [vmem:[%s5613_s5 + $0x140] sm:$0xff] }
  0x48   : > { %2262 = vmatprep.subr.bf16.mxu1 %v4195_v31 }
  0x4a   : > { %4392 = vmatmul.mubr.msk.f32.gmra.mrb[26].mxu0 %vm424_vm0, %v379_v33  ;;  %v1565_v33 = vld [vmem:[%s5613_s5 + $0x160] sm:$0xff] }
  0x4b   : > { %4394 = vmatprep.mubr.msk.f32.mxu0 %vm424_vm0, %v380_v34  ;;  %v4188_v34 = vcombine.low %v1564_v32, %v1565_v33 }
  0x4e   : > { %4395 = vmatmul.mubr.msk.f32.gmra.mrb[28].mxu0 %vm424_vm0, %v381_v35  ;;  %v4189_v35 = vcombine.high %v1564_v32, %v1565_v33  ;;  %v4200_v32 = vcombine.low %v2172_v15, %v2173_v16 }
  0x4f   : > { %4397 = vmatprep.mubr.msk.f32.mxu0 %vm424_vm0, %v382_v36  ;;  %v1566_v36 = vld [vmem:[%s5613_s5 + $0x180] sm:$0xff] }
  0x50   : > { %1660 = vmatprep.subr.bf16.mxu0 %v4189_v35  ;;  %v4203_v35 = vcombine.high %v2174_v26, %v2175_v27 }
  0x51   : > { %1661 = vmatpush1.bf16.msra.mxu0 %v4188_v34 }
  0x52   : > { %4398 = vmatmul.mubr.msk.f32.gmra.mrb[30].mxu0 %vm424_vm0, %v383_v37  ;;  %v1567_v37 = vld [vmem:[%s5613_s5 + $0x1a0] sm:$0xff] }
  0x53   : > { %4400 = vmatprep.mubr.msk.f32.mxu0 %vm424_vm0, %v384_v38  ;;  %v4190_v38 = vcombine.low %v1566_v36, %v1567_v37 }
  0x56   : > { %4401 = vmatmul.mubr.msk.f32.gmra.mrb[32].mxu0 %vm424_vm0, %v385_v39  ;;  %v4191_v39 = vcombine.high %v1566_v36, %v1567_v37  ;;  %v2176_v37 = vld [vmem:[%s5613_s5 + $0x148] sm:$0xff] }
  0x57   : > { %4403 = vmatprep.mubr.msk.f32.mxu0 %vm424_vm0, %v386_v40  ;;  %v1568_v40 = vld [vmem:[%s5613_s5 + $0x1c0] sm:$0xff] }
  0x58   : > { %1662 = vmatprep.subr.bf16.mxu0 %v4191_v39 }
  0x59   : > { %1663 = vmatpush1.bf16.msra.mxu0 %v4190_v38  ;;  %v2177_v38 = vld [vmem:[%s5613_s5 + $0x168] sm:$0xff] }
  0x5a   : > { %4404 = vmatmul.mubr.msk.f32.gmra.mrb[34].mxu0 %vm424_vm0, %v387_v41  ;;  %v1569_v41 = vld [vmem:[%s5613_s5 + $0x1e0] sm:$0xff] }
  0x5b   : > { %4406 = vmatprep.mubr.msk.f32.mxu0 %vm424_vm0, %v388_v42  ;;  %v4192_v42 = vcombine.low %v1568_v40, %v1569_v41 }
  0x5e   : > { %4407 = vmatmul.mubr.msk.f32.gmra.mrb[36].mxu0 %vm424_vm0, %v389_v43  ;;  %v4193_v43 = vcombine.high %v1568_v40, %v1569_v41 }
  0x5f   : > { %4409 = vmatprep.mubr.msk.f32.mxu0 %vm424_vm0, %v390_v44  ;;  %v4887_v44 = vld [vmem:[%s5610_s2] ss:$0 sm:$0xff] }
  0x60   : > { %1664 = vmatprep.subr.bf16.mxu0 %v4193_v43  ;;  %v4202_v43 = vcombine.low %v2174_v26, %v2175_v27 }
  0x61   : > { %1665 = vmatpush1.bf16.msra.mxu0 %v4192_v42 }
  0x62   : > { %4410 = vmatmul.mubr.msk.f32.gmra.mrb[38].mxu0 %vm424_vm0, %v391_v45 }
  0x63   : > { %4412 = vmatprep.mubr.msk.f32.mxu0 %vm424_vm0, %v392_v46 }
  0x66   : > { %4413 = vmatmul.mubr.msk.f32.gmra.mrb[40].mxu0 %vm424_vm0, %v393_v47 }
  0x67   : > { %4415 = vmatprep.mubr.msk.f32.mxu0 %vm424_vm0, %v394_v48 }
  0x6a   : > { %4416 = vmatmul.mubr.msk.f32.gmra.mrb[42].mxu0 %vm424_vm0, %v395_v49 }
  0x6b   : > { %4418 = vmatprep.mubr.msk.f32.mxu0 %vm424_vm0, %v396_v51 }
  0x6e   : > { %4419 = vmatmul.mubr.msk.f32.gmra.mrb[44].mxu0 %vm424_vm0, %v397_v52 }
  0x6f   : > { %4421 = vmatprep.mubr.msk.f32.mxu0 %vm424_vm0, %v398_v54 }
  0x72   : > { %4422 = vmatmul.mubr.msk.f32.gmra.mrb[46].mxu0 %vm424_vm0, %v399_v55 }
  0x73   : > { %4424 = vmatprep.mubr.msk.f32.mxu0 %vm424_vm0, %v400_v57  ;;  %v2168_v57 = vld [vmem:[%s5613_s5 + $0x48] sm:$0xff] }
  0x76   : > { %4425 = vmatmul.mubr.msk.f32.gmra.mrb[48].mxu0 %vm424_vm0, %v401_v58  ;;  %v2169_v58 = vld [vmem:[%s5613_s5 + $0x68] sm:$0xff] }
  0x77   : > { %4427 = vmatprep.mubr.msk.f32.mxu0 %vm424_vm0, %v402_v59  ;;  %v4196_v10 = vcombine.low %v2168_v57, %v2169_v58 }
  0x7a   : > { %4428 = vmatmul.mubr.msk.f32.gmra.mrb[50].mxu0 %vm424_vm0, %v403_v60 }
  0x7b   : > { %4430 = vmatprep.mubr.msk.f32.mxu0 %vm424_vm0, %v404_v61 }
  0x7e   : > { %4431 = vmatmul.mubr.msk.f32.gmra.mrb[52].mxu0 %vm424_vm0, %v405_v62 }
  0x7f   : > { %4433 = vmatprep.mubr.msk.f32.mxu0 %vm424_vm0, %v406_v63  ;;  %v4194_v63 = vcombine.low %v2166_v29, %v2167_v30 }
  0x82   : > { %4434 = vmatmul.mubr.msk.f32.gmra.mrb[54].mxu0 %vm424_vm0, %v407_v0 }
  0x83   : > { %4436 = vmatprep.mubr.msk.f32.mxu0 %vm424_vm0, %v408_v1 }
  0x86   : > { %4437 = vmatmul.mubr.msk.f32.gmra.mrb[56].mxu0 %vm424_vm0, %v409_v2  ;;  %v4197_v2 = vcombine.high %v2168_v57, %v2169_v58 }
  0x87   : > { %4439 = vmatprep.mubr.msk.f32.mxu0 %vm424_vm0, %v410_v3 }
  0x8a   : > { %4440 = vmatmul.mubr.msk.f32.gmra.mrb[58].mxu0 %vm424_vm0, %v411_v4  ;;  %v2170_v4 = vld [vmem:[%s5613_s5 + $0x88] sm:$0xff] }
  0x8b   : > { %4442 = vmatprep.mubr.msk.f32.mxu0 %vm424_vm0, %v412_v5  ;;  %v2171_v5 = vld [vmem:[%s5613_s5 + $0xa8] sm:$0xff] }
  0x8c   : > { %v4199_v13 = vcombine.high %v2170_v4, %v2171_v5  ;;  %v4198_v21 = vcombine.low %v2170_v4, %v2171_v5 }
  0x8e   : > { %4443 = vmatmul.mubr.msk.f32.gmra.mrb[60].mxu0 %vm424_vm0, %v413_v6 }
  0x8f   : > { %4445 = vmatprep.mubr.msk.f32.mxu0 %vm424_vm0, %v414_v7 }
  0x92   : > { %4446 = vmatmul.mubr.msk.f32.gmra.mrb[62].mxu0 %vm424_vm0, %v415_v8 }
  0xe9   : > { %v4354_v45 = vpop.f32.mrb[0].mxu0 }
  0xea   : > { %v683_v46 = vpop.f32.mrb[1].mxu0  ;;  %v689_v47 = vadd.f32 %v4354_v45, %v4887_v44 }
  0xeb   : > { %v684_v48 = vadd.f32 %v4887_v44, %v683_v46 }
  0xec   : > { %v1003_v49 = vmax.f32 %v689_v47, 0.0  ;;  %v4205_v47 = vcombine.high %v2176_v37, %v2177_v38 }
  0xed   : > { %v4357_v50 = vpop.f32.mrb[2].mxu0  ;;  %v1002_v51 = vmax.f32 %v684_v48, 0.0 }
  0xee   : > { %v699_v52 = vadd.f32 %v4357_v50, %v4887_v44  ;;  %v693_v53 = vpop.f32.mrb[3].mxu0 }
  0xef   : > { %v694_v54 = vadd.f32 %v4887_v44, %v693_v53  ;;  %v1066_v55 = vpack.c.bf16 %v1003_v49, %v1002_v51  ;;  %v4204_v53 = vcombine.low %v2176_v37, %v2177_v38 }
  0xf0   : > { %v1005_v56 = vmax.f32 %v699_v52, 0.0 }
  0xf1   : > { %v1004_v59 = vmax.f32 %v694_v54, 0.0  ;;  %4464 = vmatprep.mubr.bf16.mxu1 %v1066_v55  ;;  %v4360_v60 = vpop.f32.mrb[4].mxu0 }
  0xf2   : > { %v709_v61 = vadd.f32 %v4360_v60, %v4887_v44  ;;  %v703_v62 = vpop.f32.mrb[5].mxu0 }
  0xf3   : > { %v1067_v0 = vpack.c.bf16 %v1005_v56, %v1004_v59  ;;  %v704_v1 = vadd.f32 %v4887_v44, %v703_v62 }
  0xf4   : > { %v1007_v3 = vmax.f32 %v709_v61, 0.0 }
  0xf5   : > { %4465 = vmatmul.mubr.bf16.vlgmr.msra.gmra.mrb[0].mxu1 %v1067_v0  ;;  %v1006_v6 = vmax.f32 %v704_v1, 0.0  ;;  %v4363_v7 = vpop.f32.mrb[6].mxu0 }
  0xf6   : > { %v719_v8 = vadd.f32 %v4363_v7, %v4887_v44  ;;  %v713_v9 = vpop.f32.mrb[7].mxu0  ;;  %2263 = vmatpush1.bf16.msra.mxu1 %v4194_v63 }
  0xf7   : > { %v714_v11 = vadd.f32 %v4887_v44, %v713_v9  ;;  %v1068_v12 = vpack.c.bf16 %v1007_v3, %v1006_v6  ;;  %2264 = vmatprep.subr.bf16.mxu1 %v4197_v2 }
  0xf8   : > { %v1009_v14 = vmax.f32 %v719_v8, 0.0 }
  0xf9   : > { %v1008_v17 = vmax.f32 %v714_v11, 0.0  ;;  %4468 = vmatprep.mubr.bf16.mxu1 %v1068_v12  ;;  %v4366_v18 = vpop.f32.mrb[8].mxu0 }
  0xfa   : > { %v729_v19 = vadd.f32 %v4366_v18, %v4887_v44  ;;  %v723_v20 = vpop.f32.mrb[9].mxu0  ;;  %2265 = vmatpush1.bf16.msra.mxu1 %v4196_v10 }
  0xfb   : > { %v1069_v22 = vpack.c.bf16 %v1009_v14, %v1008_v17  ;;  %v724_v23 = vadd.f32 %v4887_v44, %v723_v20  ;;  %2266 = vmatprep.subr.bf16.mxu1 %v4199_v13 }
  0xfc   : > { %v1011_v25 = vmax.f32 %v729_v19, 0.0 }
  0xfd   : > { %4469 = vmatmul.mubr.bf16.gmra.mrb[4].mxu1 %v1069_v22  ;;  %v1010_v28 = vmax.f32 %v724_v23, 0.0  ;;  %v4369_v29 = vpop.f32.mrb[10].mxu0 }
  0xfe   : > { %v739_v30 = vadd.f32 %v4369_v29, %v4887_v44  ;;  %v733_v31 = vpop.f32.mrb[11].mxu0  ;;  %2267 = vmatpush1.bf16.msra.mxu1 %v4198_v21 }
  0xff   : > { %v734_v33 = vadd.f32 %v4887_v44, %v733_v31  ;;  %v1070_v34 = vpack.c.bf16 %v1011_v25, %v1010_v28  ;;  %2268 = vmatprep.subr.bf16.mxu1 %v4201_v24 }
 0x100   : > { %v1013_v36 = vmax.f32 %v739_v30, 0.0 }
 0x101   : > { %v1012_v39 = vmax.f32 %v734_v33, 0.0  ;;  %4472 = vmatprep.mubr.bf16.mxu1 %v1070_v34  ;;  %v4372_v40 = vpop.f32.mrb[12].mxu0 }
 0x102   : > { %v749_v41 = vadd.f32 %v4372_v40, %v4887_v44  ;;  %v743_v42 = vpop.f32.mrb[13].mxu0  ;;  %2269 = vmatpush1.bf16.msra.mxu1 %v4200_v32 }
 0x103   : > { %v1071_v45 = vpack.c.bf16 %v1013_v36, %v1012_v39  ;;  %v744_v46 = vadd.f32 %v4887_v44, %v743_v42  ;;  %2270 = vmatprep.subr.bf16.mxu1 %v4203_v35 }
 0x104   : > { %v1015_v48 = vmax.f32 %v749_v41, 0.0 }
 0x105   : > { %4473 = vmatmul.mubr.bf16.gmra.mrb[8].mxu1 %v1071_v45  ;;  %v1014_v49 = vmax.f32 %v744_v46, 0.0  ;;  %v4375_v50 = vpop.f32.mrb[14].mxu0 }
 0x106   : > { %v759_v51 = vadd.f32 %v4375_v50, %v4887_v44  ;;  %v753_v52 = vpop.f32.mrb[15].mxu0  ;;  %2271 = vmatpush1.bf16.msra.mxu1 %v4202_v43 }
 0x107   : > { %v754_v54 = vadd.f32 %v4887_v44, %v753_v52  ;;  %v1072_v55 = vpack.c.bf16 %v1015_v48, %v1014_v49  ;;  %2272 = vmatprep.subr.bf16.mxu1 %v4205_v47 }
 0x108   : > { %v1017_v56 = vmax.f32 %v759_v51, 0.0 }
 0x109   : > { %v1016_v57 = vmax.f32 %v754_v54, 0.0  ;;  %4476 = vmatprep.mubr.bf16.mxu1 %v1072_v55  ;;  %v4378_v58 = vpop.f32.mrb[16].mxu0 }
 0x10a   : > { %v769_v59 = vadd.f32 %v4378_v58, %v4887_v44  ;;  %v763_v60 = vpop.f32.mrb[17].mxu0  ;;  %2273 = vmatpush1.bf16.msra.mxu1 %v4204_v53 }
 0x10b   : > { %v1073_v61 = vpack.c.bf16 %v1017_v56, %v1016_v57  ;;  %v764_v62 = vadd.f32 %v4887_v44, %v763_v60 }
 0x10c   : > { %v1019_v63 = vmax.f32 %v769_v59, 0.0 }
 0x10d   : > { %4477 = vmatmul.mubr.bf16.gmra.mrb[12].mxu1 %v1073_v61  ;;  %v1018_v0 = vmax.f32 %v764_v62, 0.0  ;;  %v4381_v1 = vpop.f32.mrb[18].mxu0 }
 0x10e   : > { %v779_v2 = vadd.f32 %v4381_v1, %v4887_v44  ;;  %v773_v3 = vpop.f32.mrb[19].mxu0 }
 0x10f   : > { %v774_v4 = vadd.f32 %v4887_v44, %v773_v3  ;;  %v1074_v5 = vpack.c.bf16 %v1019_v63, %v1018_v0 }
 0x110   : > { %v1021_v6 = vmax.f32 %v779_v2, 0.0 }
 0x111   : > { %v1020_v7 = vmax.f32 %v774_v4, 0.0  ;;  %4480 = vmatprep.mubr.bf16.mxu1 %v1074_v5  ;;  %v4384_v8 = vpop.f32.mrb[20].mxu0 }
 0x112   : > { %v789_v9 = vadd.f32 %v4384_v8, %v4887_v44  ;;  %v783_v10 = vpop.f32.mrb[21].mxu0 }
 0x113   : > { %v1075_v11 = vpack.c.bf16 %v1021_v6, %v1020_v7  ;;  %v784_v12 = vadd.f32 %v4887_v44, %v783_v10 }
 0x114   : > { %v1023_v13 = vmax.f32 %v789_v9, 0.0 }
 0x115   : > { %4481 = vmatmul.mubr.bf16.gmra.mrb[16].mxu1 %v1075_v11  ;;  %v1022_v14 = vmax.f32 %v784_v12, 0.0  ;;  %v4387_v15 = vpop.f32.mrb[22].mxu0 }
 0x116   : > { %v799_v16 = vadd.f32 %v4387_v15, %v4887_v44  ;;  %v793_v17 = vpop.f32.mrb[23].mxu0 }
 0x117   : > { %v794_v18 = vadd.f32 %v4887_v44, %v793_v17  ;;  %v1076_v19 = vpack.c.bf16 %v1023_v13, %v1022_v14 }
 0x118   : > { %v1025_v20 = vmax.f32 %v799_v16, 0.0 }
 0x119   : > { %v1024_v21 = vmax.f32 %v794_v18, 0.0  ;;  %4484 = vmatprep.mubr.bf16.mxu1 %v1076_v19  ;;  %v4390_v22 = vpop.f32.mrb[24].mxu0 }
 0x11a   : > { %v809_v23 = vadd.f32 %v4390_v22, %v4887_v44  ;;  %v803_v24 = vpop.f32.mrb[25].mxu0 }
 0x11b   : > { %v1077_v25 = vpack.c.bf16 %v1025_v20, %v1024_v21  ;;  %v804_v26 = vadd.f32 %v4887_v44, %v803_v24 }
 0x11c   : > { %v1027_v27 = vmax.f32 %v809_v23, 0.0 }
 0x11d   : > { %4485 = vmatmul.mubr.bf16.gmra.mrb[20].mxu1 %v1077_v25  ;;  %v1026_v28 = vmax.f32 %v804_v26, 0.0  ;;  %v4393_v29 = vpop.f32.mrb[26].mxu0 }
 0x11e   : > { %v819_v30 = vadd.f32 %v4393_v29, %v4887_v44  ;;  %v813_v31 = vpop.f32.mrb[27].mxu0 }
 0x11f   : > { %v814_v32 = vadd.f32 %v4887_v44, %v813_v31  ;;  %v1078_v33 = vpack.c.bf16 %v1027_v27, %v1026_v28 }
 0x120   : > { %v1029_v34 = vmax.f32 %v819_v30, 0.0 }
 0x121   : > { %v1028_v35 = vmax.f32 %v814_v32, 0.0  ;;  %4488 = vmatprep.mubr.bf16.mxu1 %v1078_v33  ;;  %v4396_v36 = vpop.f32.mrb[28].mxu0 }
 0x122   : > { %v829_v37 = vadd.f32 %v4396_v36, %v4887_v44  ;;  %v823_v38 = vpop.f32.mrb[29].mxu0 }
 0x123   : > { %v1079_v39 = vpack.c.bf16 %v1029_v34, %v1028_v35  ;;  %v824_v40 = vadd.f32 %v4887_v44, %v823_v38 }
 0x124   : > { %v1031_v41 = vmax.f32 %v829_v37, 0.0 }
 0x125   : > { %4489 = vmatmul.mubr.bf16.gmra.mrb[24].mxu1 %v1079_v39  ;;  %v1030_v42 = vmax.f32 %v824_v40, 0.0  ;;  %v4399_v43 = vpop.f32.mrb[30].mxu0 }
 0x126   : > { %v839_v45 = vadd.f32 %v4399_v43, %v4887_v44  ;;  %v833_v46 = vpop.f32.mrb[31].mxu0 }
 0x127   : > { %v834_v47 = vadd.f32 %v4887_v44, %v833_v46  ;;  %v1080_v48 = vpack.c.bf16 %v1031_v41, %v1030_v42  ;;  %v2178_v41 = vld [vmem:[%s5613_s5 + $0x188] sm:$0xff] }
 0x128   : > { %v1033_v49 = vmax.f32 %v839_v45, 0.0  ;;  %v2179_v42 = vld [vmem:[%s5613_s5 + $0x1a8] sm:$0xff] }
 0x129   : > { %v1032_v50 = vmax.f32 %v834_v47, 0.0  ;;  %4492 = vmatprep.mubr.bf16.mxu1 %v1080_v48  ;;  %v4402_v51 = vpop.f32.mrb[32].mxu0  ;;  %v4207_v45 = vcombine.high %v2178_v41, %v2179_v42  ;;  %v4206_v48 = vcombine.low %v2178_v41, %v2179_v42 }
 0x12a   : > { %v849_v52 = vadd.f32 %v4402_v51, %v4887_v44  ;;  %v843_v53 = vpop.f32.mrb[33].mxu0 }
 0x12b   : > { %v1081_v54 = vpack.c.bf16 %v1033_v49, %v1032_v50  ;;  %v844_v55 = vadd.f32 %v4887_v44, %v843_v53  ;;  %2274 = vmatprep.subr.bf16.mxu1 %v4207_v45  ;;  %v2180_v53 = vld [vmem:[%s5613_s5 + $0x1c8] sm:$0xff] }
 0x12c   : > { %v1035_v56 = vmax.f32 %v849_v52, 0.0  ;;  %2275 = vmatpush1.bf16.msra.mxu1 %v4206_v48 }
 0x12d   : > { %4493 = vmatmul.mubr.bf16.gmra.mrb[28].mxu1 %v1081_v54  ;;  %v1034_v57 = vmax.f32 %v844_v55, 0.0  ;;  %v4405_v58 = vpop.f32.mrb[34].mxu0  ;;  %v2181_v54 = vld [vmem:[%s5613_s5 + $0x1e8] sm:$0xff] }
 0x12e   : > { %v859_v59 = vadd.f32 %v4405_v58, %v4887_v44  ;;  %v853_v60 = vpop.f32.mrb[35].mxu0 }
 0x12f   : > { %v854_v61 = vadd.f32 %v4887_v44, %v853_v60  ;;  %v1082_v62 = vpack.c.bf16 %v1035_v56, %v1034_v57  ;;  %v4209_v56 = vcombine.high %v2180_v53, %v2181_v54 }
 0x130   : > { %v1037_v63 = vmax.f32 %v859_v59, 0.0  ;;  %v4208_v59 = vcombine.low %v2180_v53, %v2181_v54 }
 0x131   : > { %v1036_v0 = vmax.f32 %v854_v61, 0.0  ;;  %4496 = vmatprep.mubr.bf16.mxu1 %v1082_v62  ;;  %v4408_v1 = vpop.f32.mrb[36].mxu0  ;;  %2276 = vmatprep.subr.bf16.mxu1 %v4209_v56 }
 0x132   : > { %v869_v2 = vadd.f32 %v4408_v1, %v4887_v44  ;;  %v863_v3 = vpop.f32.mrb[37].mxu0  ;;  %2277 = vmatpush1.bf16.msra.mxu1 %v4208_v59  ;;  %v4986_v1 = vld [vmem:[%s5613_s5 + $0x10] sm:$0xff] }
 0x133   : > { %v1083_v4 = vpack.c.bf16 %v1037_v63, %v1036_v0  ;;  %v864_v5 = vadd.f32 %v4887_v44, %v863_v3 }
 0x134   : > { %v1039_v6 = vmax.f32 %v869_v2, 0.0  ;;  %v4991_v2 = vld [vmem:[%s5613_s5 + $0x30] sm:$0xff] }
 0x135   : > { %4497 = vmatmul.mubr.bf16.gmra.mrb[32].mxu1 %v1083_v4  ;;  %v1038_v7 = vmax.f32 %v864_v5, 0.0  ;;  %v4411_v8 = vpop.f32.mrb[38].mxu0  ;;  %v4603_v5 = vmov 0  }
 0x136   : > { %v879_v9 = vadd.f32 %v4411_v8, %v4887_v44  ;;  %v873_v10 = vpop.f32.mrb[39].mxu0  ;;  %1682 = vmatprep.mubr.bf16.mxu0 %v4603_v5 }
 0x137   : > { %v874_v11 = vadd.f32 %v4887_v44, %v873_v10  ;;  %v1084_v12 = vpack.c.bf16 %v1039_v6, %v1038_v7  ;;  %v4210_v6 = vcombine.low %v4986_v1, %v4991_v2  ;;  %v4211_v7 = vcombine.high %v4986_v1, %v4991_v2  ;;  %v2780_v2 = vld [vmem:[%s5613_s5 + $0xd0] sm:$0xff] }
 0x138   : > { %v1041_v13 = vmax.f32 %v879_v9, 0.0 }
 0x139   : > { %v1040_v14 = vmax.f32 %v874_v11, 0.0  ;;  %4500 = vmatprep.mubr.bf16.mxu1 %v1084_v12  ;;  %v4414_v15 = vpop.f32.mrb[40].mxu0  ;;  %2870 = vmatprep.subr.bf16.mxu0 %v4211_v7 }
 0x13a   : > { %v889_v16 = vadd.f32 %v4414_v15, %v4887_v44  ;;  %v883_v17 = vpop.f32.mrb[41].mxu0 }
 0x13b   : > { %v1085_v18 = vpack.c.bf16 %v1041_v13, %v1040_v14  ;;  %v884_v19 = vadd.f32 %v4887_v44, %v883_v17 }
 0x13c   : > { %v1043_v20 = vmax.f32 %v889_v16, 0.0 }
 0x13d   : > { %4501 = vmatmul.mubr.bf16.gmra.mrb[36].mxu1 %v1085_v18  ;;  %v1042_v21 = vmax.f32 %v884_v19, 0.0  ;;  %v4417_v22 = vpop.f32.mrb[42].mxu0 }
 0x13e   : > { %v899_v23 = vadd.f32 %v4417_v22, %v4887_v44  ;;  %v893_v24 = vpop.f32.mrb[43].mxu0 }
 0x13f   : > { %v894_v25 = vadd.f32 %v4887_v44, %v893_v24  ;;  %v1086_v26 = vpack.c.bf16 %v1043_v20, %v1042_v21 }
 0x140   : > { %v1045_v27 = vmax.f32 %v899_v23, 0.0 }
 0x141   : > { %v1044_v28 = vmax.f32 %v894_v25, 0.0  ;;  %4504 = vmatprep.mubr.bf16.mxu1 %v1086_v26  ;;  %v4420_v29 = vpop.f32.mrb[44].mxu0 }
 0x142   : > { %v909_v30 = vadd.f32 %v4420_v29, %v4887_v44  ;;  %v903_v31 = vpop.f32.mrb[45].mxu0 }
 0x143   : > { %v1087_v32 = vpack.c.bf16 %v1045_v27, %v1044_v28  ;;  %v904_v33 = vadd.f32 %v4887_v44, %v903_v31 }
 0x144   : > { %v1047_v34 = vmax.f32 %v909_v30, 0.0 }
 0x145   : > { %4505 = vmatmul.mubr.bf16.gmra.mrb[40].mxu1 %v1087_v32  ;;  %v1046_v35 = vmax.f32 %v904_v33, 0.0  ;;  %v4423_v36 = vpop.f32.mrb[46].mxu0 }
 0x146   : > { %v919_v37 = vadd.f32 %v4423_v36, %v4887_v44  ;;  %v913_v38 = vpop.f32.mrb[47].mxu0 }
 0x147   : > { %v914_v39 = vadd.f32 %v4887_v44, %v913_v38  ;;  %v1088_v40 = vpack.c.bf16 %v1047_v34, %v1046_v35 }
 0x148   : > { %v1049_v43 = vmax.f32 %v919_v37, 0.0 }
 0x149   : > { %v1048_v46 = vmax.f32 %v914_v39, 0.0  ;;  %4508 = vmatprep.mubr.bf16.mxu1 %v1088_v40  ;;  %v4426_v47 = vpop.f32.mrb[48].mxu0 }
 0x14a   : > { %v929_v49 = vadd.f32 %v4426_v47, %v4887_v44  ;;  %v923_v50 = vpop.f32.mrb[49].mxu0 }
 0x14b   : > { %v1089_v51 = vpack.c.bf16 %v1049_v43, %v1048_v46  ;;  %v924_v52 = vadd.f32 %v4887_v44, %v923_v50 }
 0x14c   : > { %v1051_v55 = vmax.f32 %v929_v49, 0.0 }
 0x14d   : > { %4509 = vmatmul.mubr.bf16.gmra.mrb[44].mxu1 %v1089_v51  ;;  %v1050_v57 = vmax.f32 %v924_v52, 0.0  ;;  %v4429_v58 = vpop.f32.mrb[50].mxu0  ;;  %v3382_v51 = vld [vmem:[%s5613_s5 + $0x18] sm:$0xff] }
 0x14e   : > { %v939_v60 = vadd.f32 %v4429_v58, %v4887_v44  ;;  %v933_v61 = vpop.f32.mrb[51].mxu0  ;;  %v3383_v52 = vld [vmem:[%s5613_s5 + $0x38] sm:$0xff] }
 0x14f   : > { %v934_v62 = vadd.f32 %v4887_v44, %v933_v61  ;;  %v1090_v63 = vpack.c.bf16 %v1051_v55, %v1050_v57  ;;  %v5017_v53 = vcombine.high %v3382_v51, %v3383_v52 }
 0x150   : > { %v1053_v0 = vmax.f32 %v939_v60, 0.0 }
 0x151   : > { %v1052_v3 = vmax.f32 %v934_v62, 0.0  ;;  %v4432_v4 = vpop.f32.mrb[52].mxu0  ;;  %4512 = vmatprep.mubr.bf16.mxu1 %v1090_v63  ;;  %4528 = vmatprep.subr.bf16.mxu1 %v5017_v53 }
 0x152   : > { %v949_v8 = vadd.f32 %v4432_v4, %v4887_v44  ;;  %v943_v9 = vpop.f32.mrb[53].mxu0 }
 0x153   : > { %v944_v10 = vadd.f32 %v4887_v44, %v943_v9  ;;  %v1091_v11 = vpack.c.bf16 %v1053_v0, %v1052_v3  ;;  %v2776_v0 = vld [vmem:[%s5613_s5 + $0x50] sm:$0xff]  ;;  %v3384_v9 = vld [vmem:[%s5613_s5 + $0x58] sm:$0xff] }
 0x154   : > { %v1055_v12 = vmax.f32 %v949_v8, 0.0  ;;  %v2777_v3 = vld [vmem:[%s5613_s5 + $0x70] sm:$0xff] }
 0x155   : > { %v1054_v13 = vmax.f32 %v944_v10, 0.0  ;;  %4513 = vmatmul.mubr.bf16.gmra.mrb[48].mxu1 %v1091_v11  ;;  %v4435_v14 = vpop.f32.mrb[54].mxu0  ;;  %v3385_v10 = vld [vmem:[%s5613_s5 + $0x78] sm:$0xff] }
 0x156   : > { %v959_v15 = vadd.f32 %v4435_v14, %v4887_v44  ;;  %v953_v16 = vpop.f32.mrb[55].mxu0 }
 0x157   : > { %v954_v17 = vadd.f32 %v4887_v44, %v953_v16  ;;  %v1092_v18 = vpack.c.bf16 %v1055_v12, %v1054_v13  ;;  %v4213_v13 = vcombine.high %v2776_v0, %v2777_v3  ;;  %v2778_v16 = vld [vmem:[%s5613_s5 + $0x90] sm:$0xff] }
 0x158   : > { %v1057_v19 = vmax.f32 %v959_v15, 0.0 }
 0x159   : > { %v1056_v20 = vmax.f32 %v954_v17, 0.0  ;;  %v4438_v21 = vpop.f32.mrb[56].mxu0  ;;  %4516 = vmatprep.mubr.bf16.mxu1 %v1092_v18  ;;  %v2779_v17 = vld [vmem:[%s5613_s5 + $0xb0] sm:$0xff]  ;;  %v5052_v18 = vcombine.low %v3382_v51, %v3383_v52 }
 0x15a   : > { %v969_v22 = vadd.f32 %v4438_v21, %v4887_v44  ;;  %v963_v23 = vpop.f32.mrb[57].mxu0  ;;  %v5057_v21 = vcombine.high %v3384_v9, %v3385_v10 }
 0x15b   : > { %v964_v24 = vadd.f32 %v4887_v44, %v963_v23  ;;  %v1093_v25 = vpack.c.bf16 %v1057_v19, %v1056_v20 }
 0x15c   : > { %v1059_v26 = vmax.f32 %v969_v22, 0.0 }
 0x15d   : > { %v1058_v27 = vmax.f32 %v964_v24, 0.0  ;;  %v4441_v28 = vpop.f32.mrb[58].mxu0  ;;  %4517 = vmatmul.mubr.bf16.gmra.mrb[52].mxu1 %v1093_v25  ;;  %v4212_v25 = vcombine.low %v2776_v0, %v2777_v3 }
 0x15e   : > { %v979_v29 = vadd.f32 %v4441_v28, %v4887_v44  ;;  %v973_v30 = vpop.f32.mrb[59].mxu0  ;;  %v4215_v28 = vcombine.high %v2778_v16, %v2779_v17 }
 0x15f   : > { %v974_v31 = vadd.f32 %v4887_v44, %v973_v30  ;;  %v1094_v32 = vpack.c.bf16 %v1059_v26, %v1058_v27  ;;  %v5067_v30 = vcombine.low %v3384_v9, %v3385_v10 }
 0x160   : > { %v1061_v33 = vmax.f32 %v979_v29, 0.0 }
 0x161   : > { %v1060_v34 = vmax.f32 %v974_v31, 0.0  ;;  %v4444_v35 = vpop.f32.mrb[60].mxu0  ;;  %4520 = vmatprep.mubr.bf16.mxu1 %v1094_v32 }
 0x162   : > { %v989_v36 = vadd.f32 %v4444_v35, %v4887_v44  ;;  %v983_v37 = vpop.f32.mrb[61].mxu0 }
 0x163   : > { %v984_v38 = vadd.f32 %v4887_v44, %v983_v37  ;;  %v1095_v39 = vpack.c.bf16 %v1061_v33, %v1060_v34  ;;  %v4214_v34 = vcombine.low %v2778_v16, %v2779_v17 }
 0x164   : > { %v1063_v40 = vmax.f32 %v989_v36, 0.0 }
 0x165   : > { %v1062_v41 = vmax.f32 %v984_v38, 0.0  ;;  %v4447_v42 = vpop.f32.mrb[62].mxu0  ;;  %4521 = vmatmul.mubr.bf16.gmra.mrb[56].mxu1 %v1095_v39  ;;  %v2782_v38 = vld [vmem:[%s5613_s5 + $0x110] sm:$0xff] }
 0x166   : > { %v999_v43 = vadd.f32 %v4447_v42, %v4887_v44  ;;  %v993_v45 = vpop.f32.mrb[63].mxu0  ;;  %v3386_v42 = vld [vmem:[%s5613_s5 + $0x98] sm:$0xff] }
 0x167   : > { %v994_v46 = vadd.f32 %v4887_v44, %v993_v45  ;;  %v1096_v47 = vpack.c.bf16 %v1063_v40, %v1062_v41  ;;  %v5023_v44 = vld [vmem:[%s5612_s4] ss:$0 sm:$0xff]  ;;  %v2783_v41 = vld [vmem:[%s5613_s5 + $0x130] sm:$0xff] }
 0x168   : > { %v1065_v48 = vmax.f32 %v999_v43, 0.0  ;;  %v3387_v43 = vld [vmem:[%s5613_s5 + $0xb8] sm:$0xff] }
 0x169   : > { %v1064_v49 = vmax.f32 %v994_v46, 0.0  ;;  %4524 = vmatprep.mubr.bf16.mxu1 %v1096_v47 }
 0x16b   : > { %v1097_v50 = vpack.c.bf16 %v1065_v48, %v1064_v49  ;;  %v5100_v48 = vcombine.low %v3386_v42, %v3387_v43  ;;  %v5102_v49 = vcombine.high %v3386_v42, %v3387_v43 }
 0x16d   : > { %4525 = vmatmul.mubr.bf16.gmra.mrb[60].mxu1 %v1097_v50 }
 0x16e   : > { %2294 = vmatprep.mubr.bf16.mxu1 %v4603_v5 }
 0x1c8   : > { %v4466_v54 = vpop.f32.mrb[0].mxu1 }
 0x1c9   : > { %v1212_v55 = vadd.f32 %v4466_v54, %v5023_v44  ;;  %v1203_v56 = vpop.f32.mrb[1].mxu1 }
 0x1ca   : > { %v1204_v57 = vadd.f32 %v5023_v44, %v1203_v56  ;;  %v4467_v58 = vpop.f32.mrb[2].mxu1 }
 0x1cb   : > { %v1215_v59 = vadd.f32 %v4467_v58, %v5023_v44  ;;  %v1206_v60 = vpop.f32.mrb[3].mxu1  ;;  %v1460_v62 = vmax.f32 %v1212_v55, 0.0  ;;  %v4219_v55 = vcombine.high %v2782_v38, %v2783_v41 }
 0x1cc   : > { %v1207_v61 = vadd.f32 %v5023_v44, %v1206_v60  ;;  %v1458_v4 = vmax.f32 %v1204_v57, 0.0  ;;  %v4218_v60 = vcombine.low %v2782_v38, %v2783_v41 }
 0x1cd   : > { %v1461_v63 = vmax.f32 %v1215_v59, 0.0 }
 0x1ce   : > { %v1459_v7 = vmax.f32 %v1207_v61, 0.0 }
 0x1cf   : > { %v5035_v8 = vpack.c.bf16 %v1461_v63, %v1460_v62 }
 0x1d0   : > { %v5043_v11 = vpack.c.bf16 %v1459_v7, %v1458_v4  ;;  %v4470_v12 = vpop.f32.mrb[4].mxu1 }
 0x1d1   : > { %v1228_v14 = vadd.f32 %v4470_v12, %v5023_v44  ;;  %v1219_v15 = vpop.f32.mrb[5].mxu1 }
 0x1d2   : > { %1683 = vmatmul.mubr.bf16.vlgmr.msra.gmra.mrb[64].mxu0 %v5043_v11  ;;  %2295 = vmatmul.mubr.bf16.vlgmr.msra.gmra.mrb[64].mxu1 %v5043_v11  ;;  %v1220_v19 = vadd.f32 %v5023_v44, %v1219_v15  ;;  %v4471_v20 = vpop.f32.mrb[6].mxu1 }
 0x1d3   : > { %2871 = vmatpush1.bf16.msra.mxu0 %v4210_v6  ;;  %v1464_v22 = vmax.f32 %v1228_v14, 0.0  ;;  %v1231_v23 = vadd.f32 %v4471_v20, %v5023_v44  ;;  %v1222_v24 = vpop.f32.mrb[7].mxu1  ;;  %1692 = vmatprep.mubr.bf16.mxu0 %v4603_v5  ;;  %v2781_v6 = vld [vmem:[%s5613_s5 + $0xf0] sm:$0xff] }
 0x1d4   : > { %v1462_v26 = vmax.f32 %v1220_v19, 0.0  ;;  %v1223_v27 = vadd.f32 %v5023_v44, %v1222_v24  ;;  %2304 = vmatprep.mubr.bf16.mxu1 %v4603_v5  ;;  %2872 = vmatprep.subr.bf16.mxu0 %v4213_v13  ;;  %v4217_v37 = vcombine.high %v2780_v2, %v2781_v6  ;;  %v4216_v52 = vcombine.low %v2780_v2, %v2781_v6 }
 0x1d5   : > { %v1465_v29 = vmax.f32 %v1231_v23, 0.0  ;;  %4536 = vmatpush1.bf16.msra.mxu1 %v5052_v18 }
 0x1d6   : > { %v1463_v1 = vmax.f32 %v1223_v27, 0.0  ;;  %4529 = vmatprep.subr.bf16.mxu1 %v5057_v21  ;;  %v2785_v27 = vld [vmem:[%s5613_s5 + $0x170] sm:$0xff] }
 0x1d7   : > { %v5076_v31 = vpack.c.bf16 %v1465_v29, %v1464_v22  ;;  %2873 = vmatpush1.bf16.msra.mxu0 %v4212_v25 }
 0x1d8   : > { %v5078_v32 = vpack.c.bf16 %v1463_v1, %v1462_v26  ;;  %v4474_v33 = vpop.f32.mrb[8].mxu1  ;;  %2874 = vmatprep.subr.bf16.mxu0 %v4215_v28  ;;  %v2784_v26 = vld [vmem:[%s5613_s5 + $0x150] sm:$0xff] }
 0x1d9   : > { %v1244_v35 = vadd.f32 %v4474_v33, %v5023_v44  ;;  %v1235_v36 = vpop.f32.mrb[9].mxu1  ;;  %4537 = vmatpush1.bf16.msra.mxu1 %v5067_v30  ;;  %v4220_v1 = vcombine.low %v2784_v26, %v2785_v27  ;;  %v4221_v2 = vcombine.high %v2784_v26, %v2785_v27 }
 0x1da   : > { %1693 = vmatmul.mubr.bf16.gmra.mrb[68].mxu0 %v5035_v8  ;;  %2305 = vmatmul.mubr.bf16.gmra.mrb[68].mxu1 %v5035_v8  ;;  %v1236_v39 = vadd.f32 %v5023_v44, %v1235_v36  ;;  %v4475_v40 = vpop.f32.mrb[10].mxu1 }
 0x1db   : > { %1702 = vmatprep.mubr.bf16.mxu0 %v4603_v5  ;;  %2314 = vmatprep.mubr.bf16.mxu1 %v4603_v5  ;;  %v1468_v45 = vmax.f32 %v1244_v35, 0.0  ;;  %v1247_v46 = vadd.f32 %v4475_v40, %v5023_v44  ;;  %v1238_v47 = vpop.f32.mrb[11].mxu1 }
 0x1dc   : > { %v1466_v50 = vmax.f32 %v1236_v39, 0.0  ;;  %v1239_v51 = vadd.f32 %v5023_v44, %v1238_v47  ;;  %2875 = vmatpush1.bf16.msra.mxu0 %v4214_v34  ;;  %4530 = vmatprep.subr.bf16.mxu1 %v5102_v49 }
 0x1dd   : > { %v1469_v54 = vmax.f32 %v1247_v46, 0.0  ;;  %2876 = vmatprep.subr.bf16.mxu0 %v4217_v37  ;;  %4538 = vmatpush1.bf16.msra.mxu1 %v5100_v48 }
 0x1de   : > { %v1467_v56 = vmax.f32 %v1239_v51, 0.0 }
 0x1df   : > { %v5107_v57 = vpack.c.bf16 %v1469_v54, %v1468_v45 }
 0x1e0   : > { %v5109_v58 = vpack.c.bf16 %v1467_v56, %v1466_v50  ;;  %v4478_v59 = vpop.f32.mrb[12].mxu1  ;;  %2877 = vmatpush1.bf16.msra.mxu0 %v4216_v52 }
 0x1e1   : > { %v1260_v61 = vadd.f32 %v4478_v59, %v5023_v44  ;;  %v1251_v62 = vpop.f32.mrb[13].mxu1  ;;  %2878 = vmatprep.subr.bf16.mxu0 %v4219_v55 }
 0x1e2   : > { %1703 = vmatmul.mubr.bf16.gmra.mrb[72].mxu0 %v5078_v32  ;;  %2315 = vmatmul.mubr.bf16.gmra.mrb[72].mxu1 %v5078_v32  ;;  %v1252_v63 = vadd.f32 %v5023_v44, %v1251_v62  ;;  %v4479_v0 = vpop.f32.mrb[14].mxu1  ;;  %v3389_v62 = vld [vmem:[%s5613_s5 + $0xf8] sm:$0xff] }
 0x1e3   : > { %1712 = vmatprep.mubr.bf16.mxu0 %v4603_v5  ;;  %2324 = vmatprep.mubr.bf16.mxu1 %v4603_v5  ;;  %v1472_v3 = vmax.f32 %v1260_v61, 0.0  ;;  %v1263_v4 = vadd.f32 %v4479_v0, %v5023_v44  ;;  %v1254_v7 = vpop.f32.mrb[15].mxu1  ;;  %v3388_v61 = vld [vmem:[%s5613_s5 + $0xd8] sm:$0xff] }
 0x1e4   : > { %v1470_v9 = vmax.f32 %v1252_v63, 0.0  ;;  %v1255_v10 = vadd.f32 %v5023_v44, %v1254_v7  ;;  %2879 = vmatpush1.bf16.msra.mxu0 %v4218_v60  ;;  %v5168_v7 = vcombine.high %v3388_v61, %v3389_v62 }
 0x1e5   : > { %v1473_v12 = vmax.f32 %v1263_v4, 0.0  ;;  %2880 = vmatprep.subr.bf16.mxu0 %v4221_v2  ;;  %v5166_v4 = vcombine.low %v3388_v61, %v3389_v62 }
 0x1e6   : > { %v1471_v13 = vmax.f32 %v1255_v10, 0.0  ;;  %4531 = vmatprep.subr.bf16.mxu1 %v5168_v7 }
 0x1e7   : > { %v5119_v14 = vpack.c.bf16 %v1473_v12, %v1472_v3  ;;  %4539 = vmatpush1.bf16.msra.mxu1 %v5166_v4 }
 0x1e8   : > { %v5121_v15 = vpack.c.bf16 %v1471_v13, %v1470_v9  ;;  %v4482_v16 = vpop.f32.mrb[16].mxu1  ;;  %2881 = vmatpush1.bf16.msra.mxu0 %v4220_v1 }
 0x1e9   : > { %v1276_v17 = vadd.f32 %v4482_v16, %v5023_v44  ;;  %v1267_v19 = vpop.f32.mrb[17].mxu1 }
 0x1ea   : > { %1713 = vmatmul.mubr.bf16.gmra.mrb[76].mxu0 %v5076_v31  ;;  %2325 = vmatmul.mubr.bf16.gmra.mrb[76].mxu1 %v5076_v31  ;;  %v1268_v20 = vadd.f32 %v5023_v44, %v1267_v19  ;;  %v4483_v22 = vpop.f32.mrb[18].mxu1 }
 0x1eb   : > { %1722 = vmatprep.mubr.bf16.mxu0 %v4603_v5  ;;  %2334 = vmatprep.mubr.bf16.mxu1 %v4603_v5  ;;  %v1476_v23 = vmax.f32 %v1276_v17, 0.0  ;;  %v1279_v24 = vadd.f32 %v4483_v22, %v5023_v44  ;;  %v1270_v25 = vpop.f32.mrb[19].mxu1 }
 0x1ec   : > { %v1474_v28 = vmax.f32 %v1268_v20, 0.0  ;;  %v1271_v29 = vadd.f32 %v5023_v44, %v1270_v25 }
 0x1ed   : > { %v1477_v6 = vmax.f32 %v1279_v24, 0.0 }
 0x1ee   : > { %v1475_v33 = vmax.f32 %v1271_v29, 0.0 }
 0x1ef   : > { %v5137_v34 = vpack.c.bf16 %v1477_v6, %v1476_v23 }
 0x1f0   : > { %v5139_v35 = vpack.c.bf16 %v1475_v33, %v1474_v28  ;;  %v4486_v36 = vpop.f32.mrb[20].mxu1 }
 0x1f1   : > { %v1292_v37 = vadd.f32 %v4486_v36, %v5023_v44  ;;  %v1283_v38 = vpop.f32.mrb[21].mxu1 }
 0x1f2   : > { %1723 = vmatmul.mubr.bf16.gmra.mrb[80].mxu0 %v5109_v58  ;;  %2335 = vmatmul.mubr.bf16.gmra.mrb[80].mxu1 %v5109_v58  ;;  %v1284_v39 = vadd.f32 %v5023_v44, %v1283_v38  ;;  %v4487_v40 = vpop.f32.mrb[22].mxu1 }
 0x1f3   : > { %1732 = vmatprep.mubr.bf16.mxu0 %v4603_v5  ;;  %2344 = vmatprep.mubr.bf16.mxu1 %v4603_v5  ;;  %v1480_v41 = vmax.f32 %v1292_v37, 0.0  ;;  %v1295_v42 = vadd.f32 %v4487_v40, %v5023_v44  ;;  %v1286_v43 = vpop.f32.mrb[23].mxu1 }
 0x1f4   : > { %v1478_v45 = vmax.f32 %v1284_v39, 0.0  ;;  %v1287_v46 = vadd.f32 %v5023_v44, %v1286_v43 }
 0x1f5   : > { %v1481_v47 = vmax.f32 %v1295_v42, 0.0 }
 0x1f6   : > { %v1479_v50 = vmax.f32 %v1287_v46, 0.0  ;;  %v2787_v46 = vld [vmem:[%s5613_s5 + $0x1b0] sm:$0xff] }
 0x1f7   : > { %v5149_v51 = vpack.c.bf16 %v1481_v47, %v1480_v41 }
 0x1f8   : > { %v5151_v52 = vpack.c.bf16 %v1479_v50, %v1478_v45  ;;  %v4490_v54 = vpop.f32.mrb[24].mxu1  ;;  %v2786_v45 = vld [vmem:[%s5613_s5 + $0x190] sm:$0xff] }
 0x1f9   : > { %v1308_v55 = vadd.f32 %v4490_v54, %v5023_v44  ;;  %v1299_v56 = vpop.f32.mrb[25].mxu1  ;;  %v4222_v54 = vcombine.low %v2786_v45, %v2787_v46 }
 0x1fa   : > { %1733 = vmatmul.mubr.bf16.gmra.mrb[84].mxu0 %v5107_v57  ;;  %2345 = vmatmul.mubr.bf16.gmra.mrb[84].mxu1 %v5107_v57  ;;  %v1300_v59 = vadd.f32 %v5023_v44, %v1299_v56  ;;  %v4491_v60 = vpop.f32.mrb[26].mxu1 }
 0x1fb   : > { %1742 = vmatprep.mubr.bf16.mxu0 %v4603_v5  ;;  %2354 = vmatprep.mubr.bf16.mxu1 %v4603_v5  ;;  %v1484_v63 = vmax.f32 %v1308_v55, 0.0  ;;  %v1311_v0 = vadd.f32 %v4491_v60, %v5023_v44  ;;  %v1302_v3 = vpop.f32.mrb[27].mxu1  ;;  %v4223_v55 = vcombine.high %v2786_v45, %v2787_v46 }
 0x1fc   : > { %v1482_v9 = vmax.f32 %v1300_v59, 0.0  ;;  %v1303_v10 = vadd.f32 %v5023_v44, %v1302_v3 }
 0x1fd   : > { %v1485_v12 = vmax.f32 %v1311_v0, 0.0  ;;  %2882 = vmatprep.subr.bf16.mxu0 %v4223_v55 }
 0x1fe   : > { %v1483_v13 = vmax.f32 %v1303_v10, 0.0  ;;  %2883 = vmatpush1.bf16.msra.mxu0 %v4222_v54 }
 0x1ff   : > { %v5173_v16 = vpack.c.bf16 %v1485_v12, %v1484_v63 }
 0x200   : > { %v5175_v17 = vpack.c.bf16 %v1483_v13, %v1482_v9  ;;  %v4494_v19 = vpop.f32.mrb[28].mxu1 }
 0x201   : > { %v1324_v20 = vadd.f32 %v4494_v19, %v5023_v44  ;;  %v1315_v22 = vpop.f32.mrb[29].mxu1 }
 0x202   : > { %1743 = vmatmul.mubr.bf16.gmra.mrb[88].mxu0 %v5121_v15  ;;  %2355 = vmatmul.mubr.bf16.gmra.mrb[88].mxu1 %v5121_v15  ;;  %v1316_v23 = vadd.f32 %v5023_v44, %v1315_v22  ;;  %v4495_v24 = vpop.f32.mrb[30].mxu1 }
 0x203   : > { %1752 = vmatprep.mubr.bf16.mxu0 %v4603_v5  ;;  %2364 = vmatprep.mubr.bf16.mxu1 %v4603_v5  ;;  %v1488_v25 = vmax.f32 %v1324_v20, 0.0  ;;  %v1327_v26 = vadd.f32 %v4495_v24, %v5023_v44  ;;  %v1318_v27 = vpop.f32.mrb[31].mxu1 }
 0x204   : > { %v1486_v28 = vmax.f32 %v1316_v23, 0.0  ;;  %v1319_v29 = vadd.f32 %v5023_v44, %v1318_v27 }
 0x205   : > { %v1489_v1 = vmax.f32 %v1327_v26, 0.0 }
 0x206   : > { %v1487_v2 = vmax.f32 %v1319_v29, 0.0 }
 0x207   : > { %v5185_v6 = vpack.c.bf16 %v1489_v1, %v1488_v25 }
 0x208   : > { %v5187_v33 = vpack.c.bf16 %v1487_v2, %v1486_v28  ;;  %v4498_v36 = vpop.f32.mrb[32].mxu1  ;;  %v3390_v2 = vld [vmem:[%s5613_s5 + $0x118] sm:$0xff] }
 0x209   : > { %v1340_v37 = vadd.f32 %v4498_v36, %v5023_v44  ;;  %v1331_v38 = vpop.f32.mrb[33].mxu1  ;;  %v3391_v36 = vld [vmem:[%s5613_s5 + $0x138] sm:$0xff] }
 0x20a   : > { %1753 = vmatmul.mubr.bf16.gmra.mrb[92].mxu0 %v5119_v14  ;;  %2365 = vmatmul.mubr.bf16.gmra.mrb[92].mxu1 %v5119_v14  ;;  %v1332_v39 = vadd.f32 %v5023_v44, %v1331_v38  ;;  %v4499_v40 = vpop.f32.mrb[34].mxu1 }
 0x20b   : > { %1762 = vmatprep.mubr.bf16.mxu0 %v4603_v5  ;;  %2374 = vmatprep.mubr.bf16.mxu1 %v4603_v5  ;;  %v1492_v41 = vmax.f32 %v1340_v37, 0.0  ;;  %v1343_v42 = vadd.f32 %v4499_v40, %v5023_v44  ;;  %v1334_v43 = vpop.f32.mrb[35].mxu1  ;;  %v5232_v40 = vcombine.low %v3390_v2, %v3391_v36 }
 0x20c   : > { %v1490_v47 = vmax.f32 %v1332_v39, 0.0  ;;  %v1335_v50 = vadd.f32 %v5023_v44, %v1334_v43 }
 0x20d   : > { %v1493_v56 = vmax.f32 %v1343_v42, 0.0 }
 0x20e   : > { %v1491_v59 = vmax.f32 %v1335_v50, 0.0 }
 0x20f   : > { %v5203_v60 = vpack.c.bf16 %v1493_v56, %v1492_v41  ;;  %v5234_v41 = vcombine.high %v3390_v2, %v3391_v36 }
 0x210   : > { %v5205_v61 = vpack.c.bf16 %v1491_v59, %v1490_v47  ;;  %v4502_v62 = vpop.f32.mrb[36].mxu1 }
 0x211   : > { %v1356_v63 = vadd.f32 %v4502_v62, %v5023_v44  ;;  %v1347_v0 = vpop.f32.mrb[37].mxu1  ;;  %4532 = vmatprep.subr.bf16.mxu1 %v5234_v41 }
 0x212   : > { %1763 = vmatmul.mubr.bf16.gmra.mrb[96].mxu0 %v5139_v35  ;;  %2375 = vmatmul.mubr.bf16.gmra.mrb[96].mxu1 %v5139_v35  ;;  %v1348_v3 = vadd.f32 %v5023_v44, %v1347_v0  ;;  %v4503_v9 = vpop.f32.mrb[38].mxu1 }
 0x213   : > { %1772 = vmatprep.mubr.bf16.mxu0 %v4603_v5  ;;  %2384 = vmatprep.mubr.bf16.mxu1 %v4603_v5  ;;  %v1496_v10 = vmax.f32 %v1356_v63, 0.0  ;;  %v1359_v12 = vadd.f32 %v4503_v9, %v5023_v44  ;;  %v1350_v13 = vpop.f32.mrb[39].mxu1 }
 0x214   : > { %v1494_v19 = vmax.f32 %v1348_v3, 0.0  ;;  %v1351_v20 = vadd.f32 %v5023_v44, %v1350_v13  ;;  %4540 = vmatpush1.bf16.msra.mxu1 %v5232_v40 }
 0x215   : > { %v1497_v22 = vmax.f32 %v1359_v12, 0.0 }
 0x216   : > { %v1495_v23 = vmax.f32 %v1351_v20, 0.0 }
 0x217   : > { %v5215_v24 = vpack.c.bf16 %v1497_v22, %v1496_v10 }
 0x218   : > { %v5217_v25 = vpack.c.bf16 %v1495_v23, %v1494_v19  ;;  %v4506_v26 = vpop.f32.mrb[40].mxu1 }
 0x219   : > { %v1372_v27 = vadd.f32 %v4506_v26, %v5023_v44  ;;  %v1363_v28 = vpop.f32.mrb[41].mxu1 }
 0x21a   : > { %1773 = vmatmul.mubr.bf16.gmra.mrb[100].mxu0 %v5137_v34  ;;  %2385 = vmatmul.mubr.bf16.gmra.mrb[100].mxu1 %v5137_v34  ;;  %v1364_v29 = vadd.f32 %v5023_v44, %v1363_v28  ;;  %v4507_v1 = vpop.f32.mrb[42].mxu1 }
 0x21b   : > { %1782 = vmatprep.mubr.bf16.mxu0 %v4603_v5  ;;  %2394 = vmatprep.mubr.bf16.mxu1 %v4603_v5  ;;  %v1500_v37 = vmax.f32 %v1372_v27, 0.0  ;;  %v1375_v38 = vadd.f32 %v4507_v1, %v5023_v44  ;;  %v1366_v39 = vpop.f32.mrb[43].mxu1 }
 0x21c   : > { %v1498_v42 = vmax.f32 %v1364_v29, 0.0  ;;  %v1367_v43 = vadd.f32 %v5023_v44, %v1366_v39 }
 0x21d   : > { %v1501_v45 = vmax.f32 %v1375_v38, 0.0 }
 0x21e   : > { %v1499_v46 = vmax.f32 %v1367_v43, 0.0 }
 0x21f   : > { %v5239_v47 = vpack.c.bf16 %v1501_v45, %v1500_v37 }
 0x220   : > { %v5241_v50 = vpack.c.bf16 %v1499_v46, %v1498_v42  ;;  %v4510_v54 = vpop.f32.mrb[44].mxu1 }
 0x221   : > { %5632 = vst [vmem:[#allocation3_spill] sm:$0xff] %v5239_v47  ;;  %v1388_v55 = vadd.f32 %v4510_v54, %v5023_v44  ;;  %v1379_v56 = vpop.f32.mrb[45].mxu1 }
 0x222   : > { %5633 = vst [vmem:[#allocation4_spill] sm:$0xff] %v5241_v50  ;;  %1783 = vmatmul.mubr.bf16.gmra.mrb[104].mxu0 %v5151_v52  ;;  %2395 = vmatmul.mubr.bf16.gmra.mrb[104].mxu1 %v5151_v52  ;;  %v1380_v59 = vadd.f32 %v5023_v44, %v1379_v56  ;;  %v4511_v62 = vpop.f32.mrb[46].mxu1  ;;  %v2789_v56 = vld [vmem:[%s5613_s5 + $0x1f0] sm:$0xff] }
 0x223   : > { %1792 = vmatprep.mubr.bf16.mxu0 %v4603_v5  ;;  %2404 = vmatprep.mubr.bf16.mxu1 %v4603_v5  ;;  %v1504_v63 = vmax.f32 %v1388_v55, 0.0  ;;  %v1391_v0 = vadd.f32 %v4511_v62, %v5023_v44  ;;  %v1382_v3 = vpop.f32.mrb[47].mxu1  ;;  %v2788_v55 = vld [vmem:[%s5613_s5 + $0x1d0] sm:$0xff] }
 0x224   : > { %v1502_v9 = vmax.f32 %v1380_v59, 0.0  ;;  %v1383_v10 = vadd.f32 %v5023_v44, %v1382_v3 }
 0x225   : > { %v1505_v12 = vmax.f32 %v1391_v0, 0.0  ;;  %v4225_v0 = vcombine.high %v2788_v55, %v2789_v56 }
 0x226   : > { %v1503_v13 = vmax.f32 %v1383_v10, 0.0 }
 0x227   : > { %v5251_v19 = vpack.c.bf16 %v1505_v12, %v1504_v63  ;;  %v4224_v63 = vcombine.low %v2788_v55, %v2789_v56  ;;  %2884 = vmatprep.subr.bf16.mxu0 %v4225_v0  ;;  %v3392_v55 = vld [vmem:[%s5613_s5 + $0x158] sm:$0xff] }
 0x228   : > { %v5253_v20 = vpack.c.bf16 %v1503_v13, %v1502_v9  ;;  %v4514_v22 = vpop.f32.mrb[48].mxu1  ;;  %v3393_v56 = vld [vmem:[%s5613_s5 + $0x178] sm:$0xff] }
 0x229   : > { %5634 = vst [vmem:[#allocation5_spill] sm:$0xff] %v5251_v19  ;;  %v1404_v23 = vadd.f32 %v4514_v22, %v5023_v44  ;;  %v1395_v26 = vpop.f32.mrb[49].mxu1  ;;  %2885 = vmatpush1.bf16.msra.mxu0 %v4224_v63 }
 0x22a   : > { %5635 = vst [vmem:[#allocation6_spill] sm:$0xff] %v5253_v20  ;;  %1793 = vmatmul.mubr.bf16.gmra.mrb[108].mxu0 %v5149_v51  ;;  %2405 = vmatmul.mubr.bf16.gmra.mrb[108].mxu1 %v5149_v51  ;;  %v1396_v27 = vadd.f32 %v5023_v44, %v1395_v26  ;;  %v4515_v28 = vpop.f32.mrb[50].mxu1 }
 0x22b   : > { %1802 = vmatprep.mubr.bf16.mxu0 %v4603_v5  ;;  %2414 = vmatprep.mubr.bf16.mxu1 %v4603_v5  ;;  %v1508_v29 = vmax.f32 %v1404_v23, 0.0  ;;  %v1407_v1 = vadd.f32 %v4515_v28, %v5023_v44  ;;  %v1398_v2 = vpop.f32.mrb[51].mxu1 }
 0x22c   : > { %v1506_v36 = vmax.f32 %v1396_v27, 0.0  ;;  %v1399_v37 = vadd.f32 %v5023_v44, %v1398_v2  ;;  %3478 = vmatprep.subr.bf16.mxu0 %v5017_v53 }
 0x22d   : > { %v1509_v38 = vmax.f32 %v1407_v1, 0.0 }
 0x22e   : > { %v1507_v39 = vmax.f32 %v1399_v37, 0.0 }
 0x22f   : > { %v5263_v42 = vpack.c.bf16 %v1509_v38, %v1508_v29 }
 0x230   : > { %v5265_v43 = vpack.c.bf16 %v1507_v39, %v1506_v36  ;;  %v4518_v45 = vpop.f32.mrb[52].mxu1 }
 0x231   : > { %5636 = vst [vmem:[#allocation7_spill] sm:$0xff] %v5263_v42  ;;  %v1420_v46 = vadd.f32 %v4518_v45, %v5023_v44  ;;  %v1411_v54 = vpop.f32.mrb[53].mxu1 }
 0x232   : > { %5637 = vst [vmem:[#allocation8_spill] sm:$0xff] %v5265_v43  ;;  %1803 = vmatmul.mubr.bf16.gmra.mrb[112].mxu0 %v5175_v17  ;;  %2415 = vmatmul.mubr.bf16.gmra.mrb[112].mxu1 %v5175_v17  ;;  %v1412_v59 = vadd.f32 %v5023_v44, %v1411_v54  ;;  %v4519_v62 = vpop.f32.mrb[54].mxu1 }
 0x233   : > { %1812 = vmatprep.mubr.bf16.mxu0 %v4603_v5  ;;  %2424 = vmatprep.mubr.bf16.mxu1 %v4603_v5  ;;  %v1512_v3 = vmax.f32 %v1420_v46, 0.0  ;;  %v1423_v9 = vadd.f32 %v4519_v62, %v5023_v44  ;;  %v1414_v10 = vpop.f32.mrb[55].mxu1  ;;  %v5302_v62 = vcombine.high %v3392_v55, %v3393_v56 }
 0x234   : > { %v1510_v12 = vmax.f32 %v1412_v59, 0.0  ;;  %v1415_v13 = vadd.f32 %v5023_v44, %v1414_v10 }
 0x235   : > { %v1513_v22 = vmax.f32 %v1423_v9, 0.0  ;;  %4533 = vmatprep.subr.bf16.mxu1 %v5302_v62 }
 0x236   : > { %v1511_v23 = vmax.f32 %v1415_v13, 0.0 }
 0x237   : > { %v5282_v26 = vpack.c.bf16 %v1513_v22, %v1512_v3  ;;  %v5306_v3 = vcombine.low %v3392_v55, %v3393_v56 }
 0x238   : > { %v5284_v27 = vpack.c.bf16 %v1511_v23, %v1510_v12  ;;  %v4522_v28 = vpop.f32.mrb[56].mxu1 }
 0x239   : > { %5638 = vst [vmem:[#allocation9_spill] sm:$0xff] %v5282_v26  ;;  %v1436_v29 = vadd.f32 %v4522_v28, %v5023_v44  ;;  %v1427_v1 = vpop.f32.mrb[57].mxu1  ;;  %4541 = vmatpush1.bf16.msra.mxu1 %v5306_v3 }
 0x23a   : > { %5639 = vst [vmem:[#allocation10_spill] sm:$0xff] %v5284_v27  ;;  %1813 = vmatmul.mubr.bf16.gmra.mrb[116].mxu0 %v5173_v16  ;;  %2425 = vmatmul.mubr.bf16.gmra.mrb[116].mxu1 %v5173_v16  ;;  %v1428_v2 = vadd.f32 %v5023_v44, %v1427_v1  ;;  %v4523_v36 = vpop.f32.mrb[58].mxu1 }
 0x23b   : > { %1822 = vmatprep.mubr.bf16.mxu0 %v4603_v5  ;;  %2434 = vmatprep.mubr.bf16.mxu1 %v4603_v5  ;;  %v1516_v53 = vmax.f32 %v1436_v29, 0.0  ;;  %v1439_v37 = vadd.f32 %v4523_v36, %v5023_v44  ;;  %v1430_v38 = vpop.f32.mrb[59].mxu1 }
 0x23c   : > { %v1514_v39 = vmax.f32 %v1428_v2, 0.0  ;;  %v1431_v45 = vadd.f32 %v5023_v44, %v1430_v38  ;;  %v3395_v38 = vld [vmem:[%s5613_s5 + $0x1b8] sm:$0xff] }
 0x23d   : > { %v1517_v46 = vmax.f32 %v1439_v37, 0.0  ;;  %v3394_v37 = vld [vmem:[%s5613_s5 + $0x198] sm:$0xff] }
 0x23e   : > { %v1515_v54 = vmax.f32 %v1431_v45, 0.0  ;;  %v5328_v45 = vcombine.high %v3394_v37, %v3395_v38 }
 0x23f   : > { %v5300_v59 = vpack.c.bf16 %v1517_v46, %v1516_v53  ;;  %v5330_v46 = vcombine.low %v3394_v37, %v3395_v38 }
 0x240   : > { %v5304_v63 = vpack.c.bf16 %v1515_v54, %v1514_v39  ;;  %v4526_v0 = vpop.f32.mrb[60].mxu1  ;;  %v3397_v54 = vld [vmem:[%s5613_s5 + $0x1f8] sm:$0xff]  ;;  %4534 = vmatprep.subr.bf16.mxu1 %v5328_v45 }
 0x241   : > { %v1452_v9 = vadd.f32 %v4526_v0, %v5023_v44  ;;  %v1443_v10 = vpop.f32.mrb[61].mxu1  ;;  %4542 = vmatpush1.bf16.msra.mxu1 %v5330_v46 }
 0x242   : > { %1823 = vmatmul.mubr.bf16.gmra.mrb[120].mxu0 %v5187_v33  ;;  %2435 = vmatmul.mubr.bf16.gmra.mrb[120].mxu1 %v5187_v33  ;;  %v1444_v12 = vadd.f32 %v5023_v44, %v1443_v10  ;;  %v4527_v13 = vpop.f32.mrb[62].mxu1 }
 0x243   : > { %1832 = vmatprep.mubr.bf16.mxu0 %v4603_v5  ;;  %2444 = vmatprep.mubr.bf16.mxu1 %v4603_v5  ;;  %v1520_v22 = vmax.f32 %v1452_v9, 0.0  ;;  %v1455_v23 = vadd.f32 %v4527_v13, %v5023_v44  ;;  %v1446_v28 = vpop.f32.mrb[63].mxu1 }
 0x244   : > { %v1518_v29 = vmax.f32 %v1444_v12, 0.0  ;;  %v1447_v1 = vadd.f32 %v5023_v44, %v1446_v28  ;;  %v3396_v44 = vld [vmem:[%s5613_s5 + $0x1d8] sm:$0xff] }
 0x245   : > { %v1521_v2 = vmax.f32 %v1455_v23, 0.0  ;;  %v5343_v55 = vcombine.high %v3396_v44, %v3397_v54  ;;  %v5346_v56 = vcombine.low %v3396_v44, %v3397_v54 }
 0x246   : > { %v1519_v36 = vmax.f32 %v1447_v1, 0.0 }
 0x247   : > { %v5318_v53 = vpack.c.bf16 %v1521_v2, %v1520_v22  ;;  %4535 = vmatprep.subr.bf16.mxu1 %v5343_v55 }
 0x248   : > { %v5326_v39 = vpack.c.bf16 %v1519_v36, %v1518_v29  ;;  %4543 = vmatpush1.bf16.msra.mxu1 %v5346_v56 }
 0x24a   : > { %1833 = vmatmul.mubr.bf16.gmra.mrb[124].mxu0 %v5185_v6  ;;  %2445 = vmatmul.mubr.bf16.gmra.mrb[124].mxu1 %v5185_v6 }
 0x24b   : > { %1842 = vmatprep.mubr.bf16.mxu0 %v4603_v5  ;;  %2454 = vmatprep.mubr.bf16.mxu1 %v4603_v5 }
 0x252   : > { %1843 = vmatmul.mubr.bf16.gmra.mrb[128].mxu0 %v5205_v61  ;;  %2455 = vmatmul.mubr.bf16.gmra.mrb[128].mxu1 %v5205_v61 }
 0x253   : > { %1852 = vmatprep.mubr.bf16.mxu0 %v4603_v5  ;;  %2464 = vmatprep.mubr.bf16.mxu1 %v4603_v5 }
 0x25a   : > { %1853 = vmatmul.mubr.bf16.gmra.mrb[132].mxu0 %v5203_v60  ;;  %2465 = vmatmul.mubr.bf16.gmra.mrb[132].mxu1 %v5203_v60 }
 0x25b   : > { %1862 = vmatprep.mubr.bf16.mxu0 %v4603_v5  ;;  %2474 = vmatprep.mubr.bf16.mxu1 %v4603_v5 }
 0x262   : > { %1863 = vmatmul.mubr.bf16.gmra.mrb[136].mxu0 %v5217_v25  ;;  %2475 = vmatmul.mubr.bf16.gmra.mrb[136].mxu1 %v5217_v25 }
 0x263   : > { %1872 = vmatprep.mubr.bf16.mxu0 %v4603_v5  ;;  %2484 = vmatprep.mubr.bf16.mxu1 %v4603_v5 }
 0x26a   : > { %1873 = vmatmul.mubr.bf16.gmra.mrb[140].mxu0 %v5215_v24  ;;  %2485 = vmatmul.mubr.bf16.gmra.mrb[140].mxu1 %v5215_v24 }
 0x26b   : > { %1882 = vmatprep.mubr.bf16.mxu0 %v4603_v5  ;;  %2494 = vmatprep.mubr.bf16.mxu1 %v4603_v5 }
 0x272   : > { %1883 = vmatmul.mubr.bf16.gmra.mrb[144].mxu0 %v5241_v50  ;;  %2495 = vmatmul.mubr.bf16.gmra.mrb[144].mxu1 %v5241_v50 }
 0x273   : > { %1892 = vmatprep.mubr.bf16.mxu0 %v4603_v5  ;;  %2504 = vmatprep.mubr.bf16.mxu1 %v4603_v5 }
 0x27a   : > { %1893 = vmatmul.mubr.bf16.gmra.mrb[148].mxu0 %v5239_v47  ;;  %2505 = vmatmul.mubr.bf16.gmra.mrb[148].mxu1 %v5239_v47 }
 0x27b   : > { %1902 = vmatprep.mubr.bf16.mxu0 %v4603_v5  ;;  %2514 = vmatprep.mubr.bf16.mxu1 %v4603_v5 }
 0x282   : > { %1903 = vmatmul.mubr.bf16.gmra.mrb[152].mxu0 %v5253_v20  ;;  %2515 = vmatmul.mubr.bf16.gmra.mrb[152].mxu1 %v5253_v20 }
 0x283   : > { %1912 = vmatprep.mubr.bf16.mxu0 %v4603_v5  ;;  %2524 = vmatprep.mubr.bf16.mxu1 %v4603_v5 }
 0x28a   : > { %1913 = vmatmul.mubr.bf16.gmra.mrb[156].mxu0 %v5251_v19  ;;  %2525 = vmatmul.mubr.bf16.gmra.mrb[156].mxu1 %v5251_v19 }
 0x28b   : > { %1922 = vmatprep.mubr.bf16.mxu0 %v4603_v5  ;;  %2534 = vmatprep.mubr.bf16.mxu1 %v4603_v5 }
 0x292   : > { %1923 = vmatmul.mubr.bf16.gmra.mrb[160].mxu0 %v5265_v43  ;;  %2535 = vmatmul.mubr.bf16.gmra.mrb[160].mxu1 %v5265_v43 }
 0x293   : > { %1932 = vmatprep.mubr.bf16.mxu0 %v4603_v5  ;;  %2544 = vmatprep.mubr.bf16.mxu1 %v4603_v5 }
 0x29a   : > { %1933 = vmatmul.mubr.bf16.gmra.mrb[164].mxu0 %v5263_v42  ;;  %2545 = vmatmul.mubr.bf16.gmra.mrb[164].mxu1 %v5263_v42 }
 0x29b   : > { %1942 = vmatprep.mubr.bf16.mxu0 %v4603_v5  ;;  %2554 = vmatprep.mubr.bf16.mxu1 %v4603_v5 }
 0x2a2   : > { %1943 = vmatmul.mubr.bf16.gmra.mrb[168].mxu0 %v5284_v27  ;;  %2555 = vmatmul.mubr.bf16.gmra.mrb[168].mxu1 %v5284_v27 }
 0x2a3   : > { %1952 = vmatprep.mubr.bf16.mxu0 %v4603_v5  ;;  %2564 = vmatprep.mubr.bf16.mxu1 %v4603_v5 }
 0x2a5   : > { %v1684_v0 = vpop.f32.mrb[64].mxu0  ;;  %v2296_v9 = vpop.f32.mrb[64].mxu1 }
 0x2a6   : > { %v1686_v10 = vpop.f32.mrb[65].mxu0  ;;  %v2298_v12 = vpop.f32.mrb[65].mxu1 }
 0x2a7   : > { %v1688_v13 = vpop.f32.mrb[66].mxu0  ;;  %v2300_v22 = vpop.f32.mrb[66].mxu1 }
 0x2a8   : > { %v1690_v23 = vpop.f32.mrb[67].mxu0  ;;  %v2302_v28 = vpop.f32.mrb[67].mxu1 }
 0x2aa   : > { %1953 = vmatmul.mubr.bf16.gmra.mrb[172].mxu0 %v5282_v26  ;;  %2565 = vmatmul.mubr.bf16.gmra.mrb[172].mxu1 %v5282_v26 }
 0x2ab   : > { %1962 = vmatprep.mubr.bf16.mxu0 %v4603_v5  ;;  %2574 = vmatprep.mubr.bf16.mxu1 %v4603_v5 }
 0x2ad   : > { %v1694_v29 = vpop.f32.mrb[68].mxu0  ;;  %v2306_v1 = vpop.f32.mrb[68].mxu1 }
 0x2ae   : > { %v2004_v2 = vmax.f32 %v1684_v0, %v1694_v29  ;;  %v2616_v36 = vmax.f32 %v2296_v9, %v2306_v1  ;;  %v1696_v37 = vpop.f32.mrb[69].mxu0  ;;  %v2308_v38 = vpop.f32.mrb[69].mxu1 }
 0x2af   : > { %v2073_v44 = vmax.f32 %v1686_v10, %v1696_v37  ;;  %v2685_v54 = vmax.f32 %v2298_v12, %v2308_v38  ;;  %v1698_v27 = vpop.f32.mrb[70].mxu0  ;;  %v2310_v42 = vpop.f32.mrb[70].mxu1 }
 0x2b0   : > { %v2005_v43 = vmax.f32 %v1688_v13, %v1698_v27  ;;  %v2617_v19 = vmax.f32 %v2300_v22, %v2310_v42  ;;  %v1700_v20 = vpop.f32.mrb[71].mxu0  ;;  %v2312_v47 = vpop.f32.mrb[71].mxu1 }
 0x2b1   : > { %v2074_v50 = vmax.f32 %v1690_v23, %v1700_v20  ;;  %v2686_v26 = vmax.f32 %v2302_v28, %v2312_v47 }
 0x2b2   : > { %1963 = vmatmul.mubr.bf16.gmra.mrb[176].mxu0 %v5304_v63  ;;  %2575 = vmatmul.mubr.bf16.gmra.mrb[176].mxu1 %v5304_v63 }
 0x2b3   : > { %1972 = vmatprep.mubr.bf16.mxu0 %v4603_v5  ;;  %2584 = vmatprep.mubr.bf16.mxu1 %v4603_v5 }
 0x2b5   : > { %v1704_v0 = vpop.f32.mrb[72].mxu0  ;;  %v2316_v9 = vpop.f32.mrb[72].mxu1 }
 0x2b6   : > { %v2006_v10 = vmax.f32 %v2004_v2, %v1704_v0  ;;  %v2618_v12 = vmax.f32 %v2616_v36, %v2316_v9  ;;  %v1706_v29 = vpop.f32.mrb[73].mxu0  ;;  %v2318_v1 = vpop.f32.mrb[73].mxu1 }
 0x2b7   : > { %v2075_v27 = vmax.f32 %v2073_v44, %v1706_v29  ;;  %v2687_v42 = vmax.f32 %v2685_v54, %v2318_v1  ;;  %v1708_v13 = vpop.f32.mrb[74].mxu0  ;;  %v2320_v22 = vpop.f32.mrb[74].mxu1 }
 0x2b8   : > { %v2007_v20 = vmax.f32 %v2005_v43, %v1708_v13  ;;  %v2619_v47 = vmax.f32 %v2617_v19, %v2320_v22  ;;  %v1710_v23 = vpop.f32.mrb[75].mxu0  ;;  %v2322_v28 = vpop.f32.mrb[75].mxu1 }
 0x2b9   : > { %v2076_v37 = vmax.f32 %v2074_v50, %v1710_v23  ;;  %v2688_v38 = vmax.f32 %v2686_v26, %v2322_v28 }
 0x2ba   : > { %1973 = vmatmul.mubr.bf16.gmra.mrb[180].mxu0 %v5300_v59  ;;  %2585 = vmatmul.mubr.bf16.gmra.mrb[180].mxu1 %v5300_v59 }
 0x2bb   : > { %1982 = vmatprep.mubr.bf16.mxu0 %v4603_v5  ;;  %2594 = vmatprep.mubr.bf16.mxu1 %v4603_v5 }
 0x2bd   : > { %v1714_v2 = vpop.f32.mrb[76].mxu0  ;;  %v2326_v36 = vpop.f32.mrb[76].mxu1 }
 0x2be   : > { %v2008_v44 = vmax.f32 %v2006_v10, %v1714_v2  ;;  %v2620_v54 = vmax.f32 %v2618_v12, %v2326_v36  ;;  %v1716_v0 = vpop.f32.mrb[77].mxu0  ;;  %v2328_v9 = vpop.f32.mrb[77].mxu1 }
 0x2bf   : > { %v2077_v43 = vmax.f32 %v2075_v27, %v1716_v0  ;;  %v2689_v19 = vmax.f32 %v2687_v42, %v2328_v9  ;;  %v1718_v29 = vpop.f32.mrb[78].mxu0  ;;  %v2330_v1 = vpop.f32.mrb[78].mxu1 }
 0x2c0   : > { %v2009_v50 = vmax.f32 %v2007_v20, %v1718_v29  ;;  %v2621_v26 = vmax.f32 %v2619_v47, %v2330_v1  ;;  %v1720_v13 = vpop.f32.mrb[79].mxu0  ;;  %v2332_v22 = vpop.f32.mrb[79].mxu1 }
 0x2c1   : > { %v2078_v23 = vmax.f32 %v2076_v37, %v1720_v13  ;;  %v2690_v28 = vmax.f32 %v2688_v38, %v2332_v22 }
 0x2c2   : > { %1983 = vmatmul.mubr.bf16.gmra.mrb[184].mxu0 %v5326_v39  ;;  %2595 = vmatmul.mubr.bf16.gmra.mrb[184].mxu1 %v5326_v39 }
 0x2c3   : > { %1992 = vmatprep.mubr.bf16.mxu0 %v4603_v5  ;;  %2604 = vmatprep.mubr.bf16.mxu1 %v4603_v5 }
 0x2c5   : > { %v1724_v10 = vpop.f32.mrb[80].mxu0  ;;  %v2336_v12 = vpop.f32.mrb[80].mxu1 }
 0x2c6   : > { %v2010_v27 = vmax.f32 %v2008_v44, %v1724_v10  ;;  %v2622_v42 = vmax.f32 %v2620_v54, %v2336_v12  ;;  %v1726_v2 = vpop.f32.mrb[81].mxu0  ;;  %v2338_v36 = vpop.f32.mrb[81].mxu1 }
 0x2c7   : > { %v2079_v20 = vmax.f32 %v2077_v43, %v1726_v2  ;;  %v2691_v47 = vmax.f32 %v2689_v19, %v2338_v36  ;;  %v1728_v0 = vpop.f32.mrb[82].mxu0  ;;  %v2340_v9 = vpop.f32.mrb[82].mxu1 }
 0x2c8   : > { %v2011_v37 = vmax.f32 %v2009_v50, %v1728_v0  ;;  %v2623_v38 = vmax.f32 %v2621_v26, %v2340_v9  ;;  %v1730_v29 = vpop.f32.mrb[83].mxu0  ;;  %v2342_v1 = vpop.f32.mrb[83].mxu1 }
 0x2c9   : > { %v2080_v13 = vmax.f32 %v2078_v23, %v1730_v29  ;;  %v2692_v22 = vmax.f32 %v2690_v28, %v2342_v1 }
 0x2ca   : > { %1993 = vmatmul.mubr.bf16.gmra.mrb[188].mxu0 %v5318_v53  ;;  %2605 = vmatmul.mubr.bf16.gmra.mrb[188].mxu1 %v5318_v53 }
 0x2cb   : > { %2902 = vmatprep.mubr.bf16.mxu0 %v4603_v5  ;;  %3520 = vmatprep.mubr.bf16.mxu1 %v4603_v5 }
 0x2cd   : > { %v1734_v44 = vpop.f32.mrb[84].mxu0  ;;  %v2346_v54 = vpop.f32.mrb[84].mxu1 }
 0x2ce   : > { %v2012_v43 = vmax.f32 %v2010_v27, %v1734_v44  ;;  %v2624_v19 = vmax.f32 %v2622_v42, %v2346_v54  ;;  %v1736_v10 = vpop.f32.mrb[85].mxu0  ;;  %v2348_v12 = vpop.f32.mrb[85].mxu1 }
 0x2cf   : > { %v2081_v50 = vmax.f32 %v2079_v20, %v1736_v10  ;;  %v2693_v26 = vmax.f32 %v2691_v47, %v2348_v12  ;;  %v1738_v2 = vpop.f32.mrb[86].mxu0  ;;  %v2350_v36 = vpop.f32.mrb[86].mxu1 }
 0x2d0   : > { %v2013_v23 = vmax.f32 %v2011_v37, %v1738_v2  ;;  %v2625_v28 = vmax.f32 %v2623_v38, %v2350_v36  ;;  %v1740_v0 = vpop.f32.mrb[87].mxu0  ;;  %v2352_v9 = vpop.f32.mrb[87].mxu1 }
 0x2d1   : > { %v2082_v29 = vmax.f32 %v2080_v13, %v1740_v0  ;;  %v2694_v1 = vmax.f32 %v2692_v22, %v2352_v9 }
 0x2d2   : > { %2903 = vmatmul.mubr.bf16.vlgmr.msra.gmra.mrb[192].mxu0 %v5043_v11  ;;  %3521 = vmatmul.mubr.bf16.vlgmr.msra.gmra.mrb[192].mxu1 %v5035_v8 }
 0x2d3   : > { %3479 = vmatpush1.bf16.msra.mxu0 %v5052_v18  ;;  %2912 = vmatprep.mubr.bf16.mxu0 %v4603_v5 }
 0x2d4   : > { %3530 = vmatprep.mubr.bf16.mxu1 %v4603_v5  ;;  %3480 = vmatprep.subr.bf16.mxu0 %v5057_v21 }
 0x2d5   : > { %v1744_v27 = vpop.f32.mrb[88].mxu0  ;;  %v2356_v42 = vpop.f32.mrb[88].mxu1 }
 0x2d6   : > { %v2014_v20 = vmax.f32 %v2012_v43, %v1744_v27  ;;  %v2626_v47 = vmax.f32 %v2624_v19, %v2356_v42  ;;  %v1746_v37 = vpop.f32.mrb[89].mxu0  ;;  %v2358_v38 = vpop.f32.mrb[89].mxu1 }
 0x2d7   : > { %v2083_v13 = vmax.f32 %v2081_v50, %v1746_v37  ;;  %v2695_v22 = vmax.f32 %v2693_v26, %v2358_v38  ;;  %v1748_v44 = vpop.f32.mrb[90].mxu0  ;;  %v2360_v54 = vpop.f32.mrb[90].mxu1  ;;  %3481 = vmatpush1.bf16.msra.mxu0 %v5067_v30 }
 0x2d8   : > { %v2015_v10 = vmax.f32 %v2013_v23, %v1748_v44  ;;  %v2627_v18 = vmax.f32 %v2625_v28, %v2360_v54  ;;  %v1750_v12 = vpop.f32.mrb[91].mxu0  ;;  %v2362_v2 = vpop.f32.mrb[91].mxu1  ;;  %3482 = vmatprep.subr.bf16.mxu0 %v5102_v49 }
 0x2d9   : > { %v2084_v36 = vmax.f32 %v2082_v29, %v1750_v12  ;;  %v2696_v21 = vmax.f32 %v2694_v1, %v2362_v2 }
 0x2da   : > { %2913 = vmatmul.mubr.bf16.gmra.mrb[196].mxu0 %v5035_v8  ;;  %3531 = vmatmul.mubr.bf16.gmra.mrb[196].mxu1 %v5078_v32 }
 0x2db   : > { %2922 = vmatprep.mubr.bf16.mxu0 %v4603_v5  ;;  %3540 = vmatprep.mubr.bf16.mxu1 %v4603_v5 }
 0x2dc   : > { %3483 = vmatpush1.bf16.msra.mxu0 %v5100_v48 }
 0x2dd   : > { %v1754_v43 = vpop.f32.mrb[92].mxu0  ;;  %v2366_v30 = vpop.f32.mrb[92].mxu1  ;;  %3484 = vmatprep.subr.bf16.mxu0 %v5168_v7 }
 0x2de   : > { %v2016_v19 = vmax.f32 %v2014_v20, %v1754_v43  ;;  %v2628_v50 = vmax.f32 %v2626_v47, %v2366_v30  ;;  %v1756_v26 = vpop.f32.mrb[93].mxu0  ;;  %v2368_v49 = vpop.f32.mrb[93].mxu1 }
 0x2df   : > { %v2085_v23 = vmax.f32 %v2083_v13, %v1756_v26  ;;  %v2697_v28 = vmax.f32 %v2695_v22, %v2368_v49  ;;  %v1758_v0 = vpop.f32.mrb[94].mxu0  ;;  %v2370_v8 = vpop.f32.mrb[94].mxu1 }
 0x2e0   : > { %v2017_v9 = vmax.f32 %v2015_v10, %v1758_v0  ;;  %v2629_v29 = vmax.f32 %v2627_v18, %v2370_v8  ;;  %v1760_v1 = vpop.f32.mrb[95].mxu0  ;;  %v2372_v27 = vpop.f32.mrb[95].mxu1  ;;  %3485 = vmatpush1.bf16.msra.mxu0 %v5166_v4 }
 0x2e1   : > { %v2086_v42 = vmax.f32 %v2084_v36, %v1760_v1  ;;  %v2698_v48 = vmax.f32 %v2696_v21, %v2372_v27  ;;  %3486 = vmatprep.subr.bf16.mxu0 %v5234_v41 }
 0x2e2   : > { %2923 = vmatmul.mubr.bf16.gmra.mrb[200].mxu0 %v5078_v32  ;;  %3541 = vmatmul.mubr.bf16.gmra.mrb[200].mxu1 %v5076_v31 }
 0x2e3   : > { %2932 = vmatprep.mubr.bf16.mxu0 %v4603_v5  ;;  %3550 = vmatprep.mubr.bf16.mxu1 %v4603_v5 }
 0x2e4   : > { %3487 = vmatpush1.bf16.msra.mxu0 %v5232_v40 }
 0x2e5   : > { %v1764_v7 = vpop.f32.mrb[96].mxu0  ;;  %v2376_v20 = vpop.f32.mrb[96].mxu1  ;;  %3488 = vmatprep.subr.bf16.mxu0 %v5302_v62 }
 0x2e6   : > { %v2018_v47 = vmax.f32 %v2016_v19, %v1764_v7  ;;  %v2630_v4 = vmax.f32 %v2628_v50, %v2376_v20  ;;  %v1766_v37 = vpop.f32.mrb[97].mxu0  ;;  %v2378_v38 = vpop.f32.mrb[97].mxu1 }
 0x2e7   : > { %v2087_v13 = vmax.f32 %v2085_v23, %v1766_v37  ;;  %v2699_v41 = vmax.f32 %v2697_v28, %v2378_v38  ;;  %v1768_v22 = vpop.f32.mrb[98].mxu0  ;;  %v2380_v32 = vpop.f32.mrb[98].mxu1 }
 0x2e8   : > { %v2019_v44 = vmax.f32 %v2017_v9, %v1768_v22  ;;  %v2631_v54 = vmax.f32 %v2629_v29, %v2380_v32  ;;  %v1770_v10 = vpop.f32.mrb[99].mxu0  ;;  %v2382_v18 = vpop.f32.mrb[99].mxu1  ;;  %3489 = vmatpush1.bf16.msra.mxu0 %v5306_v3 }
 0x2e9   : > { %v2088_v12 = vmax.f32 %v2086_v42, %v1770_v10  ;;  %v2700_v40 = vmax.f32 %v2698_v48, %v2382_v18  ;;  %3490 = vmatprep.subr.bf16.mxu0 %v5328_v45 }
 0x2ea   : > { %2933 = vmatmul.mubr.bf16.gmra.mrb[204].mxu0 %v5076_v31  ;;  %3551 = vmatmul.mubr.bf16.gmra.mrb[204].mxu1 %v5109_v58 }
 0x2eb   : > { %2942 = vmatprep.mubr.bf16.mxu0 %v4603_v5  ;;  %3560 = vmatprep.mubr.bf16.mxu1 %v4603_v5 }
 0x2ec   : > { %3491 = vmatpush1.bf16.msra.mxu0 %v5330_v46 }
 0x2ed   : > { %v1774_v62 = vpop.f32.mrb[100].mxu0  ;;  %v2386_v2 = vpop.f32.mrb[100].mxu1  ;;  %3492 = vmatprep.subr.bf16.mxu0 %v5343_v55 }
 0x2ee   : > { %v2020_v36 = vmax.f32 %v2018_v47, %v1774_v62  ;;  %v2632_v3 = vmax.f32 %v2630_v4, %v2386_v2  ;;  %v1776_v21 = vpop.f32.mrb[101].mxu0  ;;  %v2388_v43 = vpop.f32.mrb[101].mxu1 }
 0x2ef   : > { %v2089_v30 = vmax.f32 %v2087_v13, %v1776_v21  ;;  %v2701_v45 = vmax.f32 %v2699_v41, %v2388_v43  ;;  %v1778_v19 = vpop.f32.mrb[102].mxu0  ;;  %v2390_v31 = vpop.f32.mrb[102].mxu1 }
 0x2f0   : > { %v2021_v50 = vmax.f32 %v2019_v44, %v1778_v19  ;;  %v2633_v26 = vmax.f32 %v2631_v54, %v2390_v31  ;;  %v1780_v49 = vpop.f32.mrb[103].mxu0  ;;  %v2392_v23 = vpop.f32.mrb[103].mxu1  ;;  %3493 = vmatpush1.bf16.msra.mxu0 %v5346_v56 }
 0x2f1   : > { %v2090_v28 = vmax.f32 %v2088_v12, %v1780_v49  ;;  %v2702_v46 = vmax.f32 %v2700_v40, %v2392_v23 }
 0x2f2   : > { %2943 = vmatmul.mubr.bf16.gmra.mrb[208].mxu0 %v5109_v58  ;;  %3561 = vmatmul.mubr.bf16.gmra.mrb[208].mxu1 %v5107_v57 }
 0x2f3   : > { %2952 = vmatprep.mubr.bf16.mxu0 %v4603_v5  ;;  %3570 = vmatprep.mubr.bf16.mxu1 %v4603_v5 }
 0x2f5   : > { %v1784_v55 = vpop.f32.mrb[104].mxu0  ;;  %v2396_v0 = vpop.f32.mrb[104].mxu1 }
 0x2f6   : > { %v2022_v8 = vmax.f32 %v2020_v36, %v1784_v55  ;;  %v2634_v9 = vmax.f32 %v2632_v3, %v2396_v0  ;;  %v1786_v29 = vpop.f32.mrb[105].mxu0  ;;  %v2398_v1 = vpop.f32.mrb[105].mxu1 }
 0x2f7   : > { %v2091_v27 = vmax.f32 %v2089_v30, %v1786_v29  ;;  %v2703_v42 = vmax.f32 %v2701_v45, %v2398_v1  ;;  %v1788_v48 = vpop.f32.mrb[106].mxu0  ;;  %v2400_v56 = vpop.f32.mrb[106].mxu1 }
 0x2f8   : > { %v2023_v7 = vmax.f32 %v2021_v50, %v1788_v48  ;;  %v2635_v20 = vmax.f32 %v2633_v26, %v2400_v56  ;;  %v1790_v47 = vpop.f32.mrb[107].mxu0  ;;  %v2402_v58 = vpop.f32.mrb[107].mxu1 }
 0x2f9   : > { %v2092_v4 = vmax.f32 %v2090_v28, %v1790_v47  ;;  %v2704_v37 = vmax.f32 %v2702_v46, %v2402_v58 }
 0x2fa   : > { %2953 = vmatmul.mubr.bf16.gmra.mrb[212].mxu0 %v5107_v57  ;;  %3571 = vmatmul.mubr.bf16.gmra.mrb[212].mxu1 %v5121_v15 }
 0x2fb   : > { %2962 = vmatprep.mubr.bf16.mxu0 %v4603_v5  ;;  %3580 = vmatprep.mubr.bf16.mxu1 %v4603_v5 }
 0x2fd   : > { %v1794_v38 = vpop.f32.mrb[108].mxu0  ;;  %v2406_v13 = vpop.f32.mrb[108].mxu1 }
 0x2fe   : > { %v2024_v41 = vmax.f32 %v2022_v8, %v1794_v38  ;;  %v2636_v22 = vmax.f32 %v2634_v9, %v2406_v13  ;;  %v1796_v32 = vpop.f32.mrb[109].mxu0  ;;  %v2408_v44 = vpop.f32.mrb[109].mxu1 }
 0x2ff   : > { %v2093_v54 = vmax.f32 %v2091_v27, %v1796_v32  ;;  %v2705_v10 = vmax.f32 %v2703_v42, %v2408_v44  ;;  %v1798_v18 = vpop.f32.mrb[110].mxu0  ;;  %v2410_v12 = vpop.f32.mrb[110].mxu1 }
 0x300   : > { %v2025_v40 = vmax.f32 %v2023_v7, %v1798_v18  ;;  %v2637_v62 = vmax.f32 %v2635_v20, %v2410_v12  ;;  %v1800_v2 = vpop.f32.mrb[111].mxu0  ;;  %v2412_v57 = vpop.f32.mrb[111].mxu1 }
 0x301   : > { %v2094_v36 = vmax.f32 %v2092_v4, %v1800_v2  ;;  %v2706_v3 = vmax.f32 %v2704_v37, %v2412_v57 }
 0x302   : > { %2963 = vmatmul.mubr.bf16.gmra.mrb[216].mxu0 %v5121_v15  ;;  %3581 = vmatmul.mubr.bf16.gmra.mrb[216].mxu1 %v5119_v14 }
 0x303   : > { %2972 = vmatprep.mubr.bf16.mxu0 %v4603_v5  ;;  %3590 = vmatprep.mubr.bf16.mxu1 %v4603_v5 }
 0x305   : > { %v1804_v21 = vpop.f32.mrb[112].mxu0  ;;  %v2416_v43 = vpop.f32.mrb[112].mxu1 }
 0x306   : > { %v2026_v30 = vmax.f32 %v2024_v41, %v1804_v21  ;;  %v2638_v45 = vmax.f32 %v2636_v22, %v2416_v43  ;;  %v1806_v19 = vpop.f32.mrb[113].mxu0  ;;  %v2418_v31 = vpop.f32.mrb[113].mxu1 }
 0x307   : > { %v2095_v50 = vmax.f32 %v2093_v54, %v1806_v19  ;;  %v2707_v26 = vmax.f32 %v2705_v10, %v2418_v31  ;;  %v1808_v49 = vpop.f32.mrb[114].mxu0  ;;  %v2420_v23 = vpop.f32.mrb[114].mxu1 }
 0x308   : > { %v2027_v28 = vmax.f32 %v2025_v40, %v1808_v49  ;;  %v2639_v46 = vmax.f32 %v2637_v62, %v2420_v23  ;;  %v1810_v55 = vpop.f32.mrb[115].mxu0  ;;  %v2422_v15 = vpop.f32.mrb[115].mxu1 }
 0x309   : > { %v2096_v0 = vmax.f32 %v2094_v36, %v1810_v55  ;;  %v2708_v8 = vmax.f32 %v2706_v3, %v2422_v15 }
 0x30a   : > { %2973 = vmatmul.mubr.bf16.gmra.mrb[220].mxu0 %v5119_v14  ;;  %3591 = vmatmul.mubr.bf16.gmra.mrb[220].mxu1 %v5139_v35 }
 0x30b   : > { %2982 = vmatprep.mubr.bf16.mxu0 %v4603_v5  ;;  %3600 = vmatprep.mubr.bf16.mxu1 %v4603_v5 }
 0x30d   : > { %v1814_v9 = vpop.f32.mrb[116].mxu0  ;;  %v2426_v29 = vpop.f32.mrb[116].mxu1 }
 0x30e   : > { %v2028_v1 = vmax.f32 %v2026_v30, %v1814_v9  ;;  %v2640_v27 = vmax.f32 %v2638_v45, %v2426_v29  ;;  %v1816_v42 = vpop.f32.mrb[117].mxu0  ;;  %v2428_v48 = vpop.f32.mrb[117].mxu1 }
 0x30f   : > { %v2097_v56 = vmax.f32 %v2095_v50, %v1816_v42  ;;  %v2709_v7 = vmax.f32 %v2707_v26, %v2428_v48  ;;  %v1818_v20 = vpop.f32.mrb[118].mxu0  ;;  %v2430_v47 = vpop.f32.mrb[118].mxu1 }
 0x310   : > { %v2029_v58 = vmax.f32 %v2027_v28, %v1818_v20  ;;  %v2641_v4 = vmax.f32 %v2639_v46, %v2430_v47  ;;  %v1820_v37 = vpop.f32.mrb[119].mxu0  ;;  %v2432_v14 = vpop.f32.mrb[119].mxu1 }
 0x311   : > { %v2098_v38 = vmax.f32 %v2096_v0, %v1820_v37  ;;  %v2710_v13 = vmax.f32 %v2708_v8, %v2432_v14 }
 0x312   : > { %2983 = vmatmul.mubr.bf16.gmra.mrb[224].mxu0 %v5139_v35  ;;  %3601 = vmatmul.mubr.bf16.gmra.mrb[224].mxu1 %v5137_v34 }
 0x313   : > { %2992 = vmatprep.mubr.bf16.mxu0 %v4603_v5  ;;  %3610 = vmatprep.mubr.bf16.mxu1 %v4603_v5 }
 0x315   : > { %v1824_v41 = vpop.f32.mrb[120].mxu0  ;;  %v2436_v22 = vpop.f32.mrb[120].mxu1 }
 0x316   : > { %v2030_v32 = vmax.f32 %v2028_v1, %v1824_v41  ;;  %v2642_v44 = vmax.f32 %v2640_v27, %v2436_v22  ;;  %v1826_v54 = vpop.f32.mrb[121].mxu0  ;;  %v2438_v10 = vpop.f32.mrb[121].mxu1 }
 0x317   : > { %v2099_v18 = vmax.f32 %v2097_v56, %v1826_v54  ;;  %v2711_v12 = vmax.f32 %v2709_v7, %v2438_v10  ;;  %v1828_v40 = vpop.f32.mrb[122].mxu0  ;;  %v2440_v62 = vpop.f32.mrb[122].mxu1 }
 0x318   : > { %v2031_v2 = vmax.f32 %v2029_v58, %v1828_v40  ;;  %v2643_v57 = vmax.f32 %v2641_v4, %v2440_v62  ;;  %v1830_v36 = vpop.f32.mrb[123].mxu0  ;;  %v2442_v35 = vpop.f32.mrb[123].mxu1  ;;  %v4604_v62 = vmov -inf  }
 0x319   : > { %v2100_v3 = vmax.f32 %v2098_v38, %v1830_v36  ;;  %v2712_v21 = vmax.f32 %v2710_v13, %v2442_v35  ;;  %351 = vst [vmem:[#allocation2] sm:$0xff] %v4604_v62 }
 0x31a   : > { %2993 = vmatmul.mubr.bf16.gmra.mrb[228].mxu0 %v5137_v34  ;;  %3611 = vmatmul.mubr.bf16.gmra.mrb[228].mxu1 %v5151_v52 }
 0x31b   : > { %3002 = vmatprep.mubr.bf16.mxu0 %v4603_v5  ;;  %3620 = vmatprep.mubr.bf16.mxu1 %v4603_v5 }
 0x31d   : > { %v1834_v43 = vpop.f32.mrb[124].mxu0  ;;  %v2446_v30 = vpop.f32.mrb[124].mxu1 }
 0x31e   : > { %v2032_v45 = vmax.f32 %v2030_v32, %v1834_v43  ;;  %v2644_v19 = vmax.f32 %v2642_v44, %v2446_v30  ;;  %v1836_v31 = vpop.f32.mrb[125].mxu0  ;;  %v2448_v50 = vpop.f32.mrb[125].mxu1 }
 0x31f   : > { %v2101_v26 = vmax.f32 %v2099_v18, %v1836_v31  ;;  %v2713_v49 = vmax.f32 %v2711_v12, %v2448_v50  ;;  %v1838_v23 = vpop.f32.mrb[126].mxu0  ;;  %v2450_v28 = vpop.f32.mrb[126].mxu1 }
 0x320   : > { %v2033_v46 = vmax.f32 %v2031_v2, %v1838_v23  ;;  %v2645_v55 = vmax.f32 %v2643_v57, %v2450_v28  ;;  %v1840_v15 = vpop.f32.mrb[127].mxu0  ;;  %v2452_v34 = vpop.f32.mrb[127].mxu1 }
 0x321   : > { %v2102_v0 = vmax.f32 %v2100_v3, %v1840_v15  ;;  %v2714_v8 = vmax.f32 %v2712_v21, %v2452_v34 }
 0x322   : > { %3003 = vmatmul.mubr.bf16.gmra.mrb[232].mxu0 %v5151_v52  ;;  %3621 = vmatmul.mubr.bf16.gmra.mrb[232].mxu1 %v5149_v51 }
 0x323   : > { %3012 = vmatprep.mubr.bf16.mxu0 %v4603_v5  ;;  %3630 = vmatprep.mubr.bf16.mxu1 %v4603_v5 }
 0x325   : > { %v1844_v9 = vpop.f32.mrb[128].mxu0  ;;  %v2456_v29 = vpop.f32.mrb[128].mxu1 }
 0x326   : > { %v2034_v1 = vmax.f32 %v2032_v45, %v1844_v9  ;;  %v2646_v27 = vmax.f32 %v2644_v19, %v2456_v29  ;;  %v1846_v42 = vpop.f32.mrb[129].mxu0  ;;  %v2458_v48 = vpop.f32.mrb[129].mxu1 }
 0x327   : > { %v2103_v56 = vmax.f32 %v2101_v26, %v1846_v42  ;;  %v2715_v7 = vmax.f32 %v2713_v49, %v2458_v48  ;;  %v1848_v20 = vpop.f32.mrb[130].mxu0  ;;  %v2460_v47 = vpop.f32.mrb[130].mxu1 }
 0x328   : > { %v2035_v58 = vmax.f32 %v2033_v46, %v1848_v20  ;;  %v2647_v4 = vmax.f32 %v2645_v55, %v2460_v47  ;;  %v1850_v37 = vpop.f32.mrb[131].mxu0  ;;  %v2462_v52 = vpop.f32.mrb[131].mxu1 }
 0x329   : > { %v2104_v14 = vmax.f32 %v2102_v0, %v1850_v37  ;;  %v2716_v38 = vmax.f32 %v2714_v8, %v2462_v52 }
 0x32a   : > { %3013 = vmatmul.mubr.bf16.gmra.mrb[236].mxu0 %v5149_v51  ;;  %3631 = vmatmul.mubr.bf16.gmra.mrb[236].mxu1 %v5175_v17 }
 0x32b   : > { %3022 = vmatprep.mubr.bf16.mxu0 %v4603_v5  ;;  %3640 = vmatprep.mubr.bf16.mxu1 %v4603_v5 }
 0x32d   : > { %v1854_v13 = vpop.f32.mrb[132].mxu0  ;;  %v2466_v41 = vpop.f32.mrb[132].mxu1 }
 0x32e   : > { %v2036_v22 = vmax.f32 %v2034_v1, %v1854_v13  ;;  %v2648_v32 = vmax.f32 %v2646_v27, %v2466_v41  ;;  %v1856_v44 = vpop.f32.mrb[133].mxu0  ;;  %v2468_v54 = vpop.f32.mrb[133].mxu1 }
 0x32f   : > { %v2105_v10 = vmax.f32 %v2103_v56, %v1856_v44  ;;  %v2717_v18 = vmax.f32 %v2715_v7, %v2468_v54  ;;  %v1858_v12 = vpop.f32.mrb[134].mxu0  ;;  %v2470_v40 = vpop.f32.mrb[134].mxu1 }
 0x330   : > { %v2037_v2 = vmax.f32 %v2035_v58, %v1858_v12  ;;  %v2649_v51 = vmax.f32 %v2647_v4, %v2470_v40  ;;  %v1860_v57 = vpop.f32.mrb[135].mxu0  ;;  %v2472_v36 = vpop.f32.mrb[135].mxu1 }
 0x331   : > { %v2106_v35 = vmax.f32 %v2104_v14, %v1860_v57  ;;  %v2718_v3 = vmax.f32 %v2716_v38, %v2472_v36 }
 0x332   : > { %3023 = vmatmul.mubr.bf16.gmra.mrb[240].mxu0 %v5175_v17  ;;  %3641 = vmatmul.mubr.bf16.gmra.mrb[240].mxu1 %v5173_v16 }
 0x333   : > { %3032 = vmatprep.mubr.bf16.mxu0 %v4603_v5  ;;  %3650 = vmatprep.mubr.bf16.mxu1 %v4603_v5 }
 0x335   : > { %v1864_v21 = vpop.f32.mrb[136].mxu0  ;;  %v2476_v43 = vpop.f32.mrb[136].mxu1 }
 0x336   : > { %v2038_v30 = vmax.f32 %v2036_v22, %v1864_v21  ;;  %v2650_v45 = vmax.f32 %v2648_v32, %v2476_v43  ;;  %v1866_v19 = vpop.f32.mrb[137].mxu0  ;;  %v2478_v31 = vpop.f32.mrb[137].mxu1 }
 0x337   : > { %v2107_v50 = vmax.f32 %v2105_v10, %v1866_v19  ;;  %v2719_v26 = vmax.f32 %v2717_v18, %v2478_v31  ;;  %v1868_v49 = vpop.f32.mrb[138].mxu0  ;;  %v2480_v23 = vpop.f32.mrb[138].mxu1 }
 0x338   : > { %v2039_v28 = vmax.f32 %v2037_v2, %v1868_v49  ;;  %v2651_v46 = vmax.f32 %v2649_v51, %v2480_v23  ;;  %v1870_v55 = vpop.f32.mrb[139].mxu0  ;;  %v2482_v17 = vpop.f32.mrb[139].mxu1 }
 0x339   : > { %v2108_v15 = vmax.f32 %v2106_v35, %v1870_v55  ;;  %v2720_v34 = vmax.f32 %v2718_v3, %v2482_v17 }
 0x33a   : > { %3033 = vmatmul.mubr.bf16.gmra.mrb[244].mxu0 %v5173_v16  ;;  %3651 = vmatmul.mubr.bf16.gmra.mrb[244].mxu1 %v5187_v33 }
 0x33b   : > { %3042 = vmatprep.mubr.bf16.mxu0 %v4603_v5  ;;  %3660 = vmatprep.mubr.bf16.mxu1 %v4603_v5 }
 0x33d   : > { %v1874_v0 = vpop.f32.mrb[140].mxu0  ;;  %v2486_v8 = vpop.f32.mrb[140].mxu1 }
 0x33e   : > { %v2040_v9 = vmax.f32 %v2038_v30, %v1874_v0  ;;  %v2652_v29 = vmax.f32 %v2650_v45, %v2486_v8  ;;  %v1876_v1 = vpop.f32.mrb[141].mxu0  ;;  %v2488_v27 = vpop.f32.mrb[141].mxu1 }
 0x33f   : > { %v2109_v42 = vmax.f32 %v2107_v50, %v1876_v1  ;;  %v2721_v48 = vmax.f32 %v2719_v26, %v2488_v27  ;;  %v1878_v56 = vpop.f32.mrb[142].mxu0  ;;  %v2490_v7 = vpop.f32.mrb[142].mxu1 }
 0x340   : > { %v2041_v20 = vmax.f32 %v2039_v28, %v1878_v56  ;;  %v2653_v47 = vmax.f32 %v2651_v46, %v2490_v7  ;;  %v1880_v58 = vpop.f32.mrb[143].mxu0  ;;  %v2492_v16 = vpop.f32.mrb[143].mxu1 }
 0x341   : > { %v2110_v4 = vmax.f32 %v2108_v15, %v1880_v58  ;;  %v2722_v37 = vmax.f32 %v2720_v34, %v2492_v16 }
 0x342   : > { %3043 = vmatmul.mubr.bf16.gmra.mrb[248].mxu0 %v5187_v33  ;;  %3661 = vmatmul.mubr.bf16.gmra.mrb[248].mxu1 %v5185_v6 }
 0x343   : > { %3052 = vmatprep.mubr.bf16.mxu0 %v4603_v5  ;;  %3670 = vmatprep.mubr.bf16.mxu1 %v4603_v5 }
 0x345   : > { %v1884_v52 = vpop.f32.mrb[144].mxu0  ;;  %v2496_v14 = vpop.f32.mrb[144].mxu1 }
 0x346   : > { %v2042_v38 = vmax.f32 %v2040_v9, %v1884_v52  ;;  %v2654_v13 = vmax.f32 %v2652_v29, %v2496_v14  ;;  %v1886_v41 = vpop.f32.mrb[145].mxu0  ;;  %v2498_v22 = vpop.f32.mrb[145].mxu1 }
 0x347   : > { %v2111_v32 = vmax.f32 %v2109_v42, %v1886_v41  ;;  %v2723_v44 = vmax.f32 %v2721_v48, %v2498_v22  ;;  %v1888_v54 = vpop.f32.mrb[146].mxu0  ;;  %v2500_v10 = vpop.f32.mrb[146].mxu1 }
 0x348   : > { %v2043_v18 = vmax.f32 %v2041_v20, %v1888_v54  ;;  %v2655_v12 = vmax.f32 %v2653_v47, %v2500_v10  ;;  %v1890_v40 = vpop.f32.mrb[147].mxu0  ;;  %v2502_v33 = vpop.f32.mrb[147].mxu1 }
 0x349   : > { %v2112_v62 = vmax.f32 %v2110_v4, %v1890_v40  ;;  %v2724_v2 = vmax.f32 %v2722_v37, %v2502_v33 }
 0x34a   : > { %3053 = vmatmul.mubr.bf16.gmra.mrb[252].mxu0 %v5185_v6  ;;  %3671 = vmatmul.mubr.bf16.gmra.mrb[252].mxu1 %v5205_v61 }
 0x34b   : > { %3062 = vmatprep.mubr.bf16.mxu0 %v4603_v5  ;;  %3680 = vmatprep.mubr.bf16.mxu1 %v4603_v5 }
 0x34d   : > { %v1894_v51 = vpop.f32.mrb[148].mxu0  ;;  %v2506_v57 = vpop.f32.mrb[148].mxu1 }
 0x34e   : > { %v2044_v36 = vmax.f32 %v2042_v38, %v1894_v51  ;;  %v2656_v35 = vmax.f32 %v2654_v13, %v2506_v57  ;;  %v1896_v3 = vpop.f32.mrb[149].mxu0  ;;  %v2508_v21 = vpop.f32.mrb[149].mxu1 }
 0x34f   : > { %v2113_v43 = vmax.f32 %v2111_v32, %v1896_v3  ;;  %v2725_v30 = vmax.f32 %v2723_v44, %v2508_v21  ;;  %v1898_v45 = vpop.f32.mrb[150].mxu0  ;;  %v2510_v19 = vpop.f32.mrb[150].mxu1 }
 0x350   : > { %v2045_v31 = vmax.f32 %v2043_v18, %v1898_v45  ;;  %v2657_v50 = vmax.f32 %v2655_v12, %v2510_v19  ;;  %v1900_v26 = vpop.f32.mrb[151].mxu0  ;;  %v2512_v6 = vpop.f32.mrb[151].mxu1 }
 0x351   : > { %v2114_v49 = vmax.f32 %v2112_v62, %v1900_v26  ;;  %v2726_v23 = vmax.f32 %v2724_v2, %v2512_v6 }
 0x352   : > { %3063 = vmatmul.mubr.bf16.gmra.mrb[0].mxu0 %v5205_v61  ;;  %3681 = vmatmul.mubr.bf16.gmra.mrb[0].mxu1 %v5203_v60 }
 0x353   : > { %3072 = vmatprep.mubr.bf16.mxu0 %v4603_v5  ;;  %3690 = vmatprep.mubr.bf16.mxu1 %v4603_v5 }
 0x355   : > { %v1904_v28 = vpop.f32.mrb[152].mxu0  ;;  %v2516_v46 = vpop.f32.mrb[152].mxu1 }
 0x356   : > { %v2046_v55 = vmax.f32 %v2044_v36, %v1904_v28  ;;  %v2658_v17 = vmax.f32 %v2656_v35, %v2516_v46  ;;  %v1906_v15 = vpop.f32.mrb[153].mxu0  ;;  %v2518_v34 = vpop.f32.mrb[153].mxu1 }
 0x357   : > { %v2115_v0 = vmax.f32 %v2113_v43, %v1906_v15  ;;  %v2727_v8 = vmax.f32 %v2725_v30, %v2518_v34  ;;  %v1908_v9 = vpop.f32.mrb[154].mxu0  ;;  %v2520_v29 = vpop.f32.mrb[154].mxu1  ;;  %v5640_v30 = vld [vmem:[#allocation4_spill] sm:$0xff] }
 0x358   : > { %v2047_v1 = vmax.f32 %v2045_v31, %v1908_v9  ;;  %v2659_v27 = vmax.f32 %v2657_v50, %v2520_v29  ;;  %v1910_v42 = vpop.f32.mrb[155].mxu0  ;;  %v2522_v61 = vpop.f32.mrb[155].mxu1 }
 0x359   : > { %v2116_v48 = vmax.f32 %v2114_v49, %v1910_v42  ;;  %v2728_v56 = vmax.f32 %v2726_v23, %v2522_v61 }
 0x35a   : > { %3073 = vmatmul.mubr.bf16.gmra.mrb[4].mxu0 %v5203_v60  ;;  %3691 = vmatmul.mubr.bf16.gmra.mrb[4].mxu1 %v5217_v25 }
 0x35b   : > { %3082 = vmatprep.mubr.bf16.mxu0 %v4603_v5  ;;  %3700 = vmatprep.mubr.bf16.mxu1 %v4603_v5 }
 0x35d   : > { %v1914_v7 = vpop.f32.mrb[156].mxu0  ;;  %v2526_v20 = vpop.f32.mrb[156].mxu1 }
 0x35e   : > { %v2048_v47 = vmax.f32 %v2046_v55, %v1914_v7  ;;  %v2660_v58 = vmax.f32 %v2658_v17, %v2526_v20  ;;  %v1916_v16 = vpop.f32.mrb[157].mxu0  ;;  %v2528_v4 = vpop.f32.mrb[157].mxu1 }
 0x35f   : > { %v2117_v37 = vmax.f32 %v2115_v0, %v1916_v16  ;;  %v2729_v52 = vmax.f32 %v2727_v8, %v2528_v4  ;;  %v1918_v14 = vpop.f32.mrb[158].mxu0  ;;  %v2530_v38 = vpop.f32.mrb[158].mxu1  ;;  %v5641_v8 = vld [vmem:[#allocation3_spill] sm:$0xff] }
 0x360   : > { %v2049_v13 = vmax.f32 %v2047_v1, %v1918_v14  ;;  %v2661_v41 = vmax.f32 %v2659_v27, %v2530_v38  ;;  %v1920_v22 = vpop.f32.mrb[159].mxu0  ;;  %v2532_v60 = vpop.f32.mrb[159].mxu1  ;;  %v5642_v14 = vld [vmem:[#allocation6_spill] sm:$0xff] }
 0x361   : > { %v2118_v32 = vmax.f32 %v2116_v48, %v1920_v22  ;;  %v2730_v44 = vmax.f32 %v2728_v56, %v2532_v60 }
 0x362   : > { %3083 = vmatmul.mubr.bf16.gmra.mrb[8].mxu0 %v5217_v25  ;;  %3701 = vmatmul.mubr.bf16.gmra.mrb[8].mxu1 %v5215_v24 }
 0x363   : > { %3092 = vmatprep.mubr.bf16.mxu0 %v4603_v5  ;;  %3710 = vmatprep.mubr.bf16.mxu1 %v4603_v5 }
 0x365   : > { %v1924_v54 = vpop.f32.mrb[160].mxu0  ;;  %v2536_v10 = vpop.f32.mrb[160].mxu1 }
 0x366   : > { %v2050_v18 = vmax.f32 %v2048_v47, %v1924_v54  ;;  %v2662_v12 = vmax.f32 %v2660_v58, %v2536_v10  ;;  %v1926_v40 = vpop.f32.mrb[161].mxu0  ;;  %v2538_v33 = vpop.f32.mrb[161].mxu1 }
 0x367   : > { %v2119_v62 = vmax.f32 %v2117_v37, %v1926_v40  ;;  %v2731_v2 = vmax.f32 %v2729_v52, %v2538_v33  ;;  %v1928_v51 = vpop.f32.mrb[162].mxu0  ;;  %v2540_v57 = vpop.f32.mrb[162].mxu1 }
 0x368   : > { %v2051_v36 = vmax.f32 %v2049_v13, %v1928_v51  ;;  %v2663_v35 = vmax.f32 %v2661_v41, %v2540_v57  ;;  %v1930_v3 = vpop.f32.mrb[163].mxu0  ;;  %v2542_v25 = vpop.f32.mrb[163].mxu1  ;;  %v5643_v57 = vld [vmem:[#allocation5_spill] sm:$0xff] }
 0x369   : > { %v2120_v21 = vmax.f32 %v2118_v32, %v1930_v3  ;;  %v2732_v43 = vmax.f32 %v2730_v44, %v2542_v25 }
 0x36a   : > { %3093 = vmatmul.mubr.bf16.gmra.mrb[12].mxu0 %v5215_v24  ;;  %3711 = vmatmul.mubr.bf16.gmra.mrb[12].mxu1 %v5640_v30 }
 0x36b   : > { %3102 = vmatprep.mubr.bf16.mxu0 %v4603_v5  ;;  %3720 = vmatprep.mubr.bf16.mxu1 %v4603_v5 }
 0x36d   : > { %v1934_v45 = vpop.f32.mrb[164].mxu0  ;;  %v2546_v19 = vpop.f32.mrb[164].mxu1 }
 0x36e   : > { %v2052_v31 = vmax.f32 %v2050_v18, %v1934_v45  ;;  %v2664_v50 = vmax.f32 %v2662_v12, %v2546_v19  ;;  %v1936_v26 = vpop.f32.mrb[165].mxu0  ;;  %v2548_v6 = vpop.f32.mrb[165].mxu1 }
 0x36f   : > { %v2121_v49 = vmax.f32 %v2119_v62, %v1936_v26  ;;  %v2733_v23 = vmax.f32 %v2731_v2, %v2548_v6  ;;  %v1938_v28 = vpop.f32.mrb[166].mxu0  ;;  %v2550_v46 = vpop.f32.mrb[166].mxu1 }
 0x370   : > { %v2053_v55 = vmax.f32 %v2051_v36, %v1938_v28  ;;  %v2665_v17 = vmax.f32 %v2663_v35, %v2550_v46  ;;  %v1940_v15 = vpop.f32.mrb[167].mxu0  ;;  %v2552_v24 = vpop.f32.mrb[167].mxu1  ;;  %v5644_v46 = vld [vmem:[#allocation8_spill] sm:$0xff] }
 0x371   : > { %v2122_v34 = vmax.f32 %v2120_v21, %v1940_v15  ;;  %v2734_v0 = vmax.f32 %v2732_v43, %v2552_v24 }
 0x372   : > { %3103 = vmatmul.mubr.bf16.gmra.mrb[16].mxu0 %v5640_v30  ;;  %3721 = vmatmul.mubr.bf16.gmra.mrb[16].mxu1 %v5641_v8 }
 0x373   : > { %3112 = vmatprep.mubr.bf16.mxu0 %v4603_v5  ;;  %3730 = vmatprep.mubr.bf16.mxu1 %v4603_v5 }
 0x375   : > { %v1944_v9 = vpop.f32.mrb[168].mxu0  ;;  %v2556_v29 = vpop.f32.mrb[168].mxu1 }
 0x376   : > { %v2054_v1 = vmax.f32 %v2052_v31, %v1944_v9  ;;  %v2666_v27 = vmax.f32 %v2664_v50, %v2556_v29  ;;  %v1946_v42 = vpop.f32.mrb[169].mxu0  ;;  %v2558_v61 = vpop.f32.mrb[169].mxu1 }
 0x377   : > { %v2123_v48 = vmax.f32 %v2121_v49, %v1946_v42  ;;  %v2735_v56 = vmax.f32 %v2733_v23, %v2558_v61  ;;  %v1948_v7 = vpop.f32.mrb[170].mxu0  ;;  %v2560_v20 = vpop.f32.mrb[170].mxu1 }
 0x378   : > { %v2055_v47 = vmax.f32 %v2053_v55, %v1948_v7  ;;  %v2667_v58 = vmax.f32 %v2665_v17, %v2560_v20  ;;  %v1950_v16 = vpop.f32.mrb[171].mxu0  ;;  %v2562_v4 = vpop.f32.mrb[171].mxu1  ;;  %v5645_v20 = vld [vmem:[#allocation7_spill] sm:$0xff] }
 0x379   : > { %v2124_v37 = vmax.f32 %v2122_v34, %v1950_v16  ;;  %v2736_v52 = vmax.f32 %v2734_v0, %v2562_v4 }
 0x37a   : > { %3113 = vmatmul.mubr.bf16.gmra.mrb[20].mxu0 %v5641_v8  ;;  %3731 = vmatmul.mubr.bf16.gmra.mrb[20].mxu1 %v5642_v14 }
 0x37b   : > { %3122 = vmatprep.mubr.bf16.mxu0 %v4603_v5  ;;  %3740 = vmatprep.mubr.bf16.mxu1 %v4603_v5 }
 0x37d   : > { %v1954_v38 = vpop.f32.mrb[172].mxu0  ;;  %v2566_v13 = vpop.f32.mrb[172].mxu1 }
 0x37e   : > { %v2056_v41 = vmax.f32 %v2054_v1, %v1954_v38  ;;  %v2668_v22 = vmax.f32 %v2666_v27, %v2566_v13  ;;  %v1956_v60 = vpop.f32.mrb[173].mxu0  ;;  %v2568_v32 = vpop.f32.mrb[173].mxu1 }
 0x37f   : > { %v2125_v44 = vmax.f32 %v2123_v48, %v1956_v60  ;;  %v2737_v54 = vmax.f32 %v2735_v56, %v2568_v32  ;;  %v1958_v10 = vpop.f32.mrb[174].mxu0  ;;  %v2570_v18 = vpop.f32.mrb[174].mxu1 }
 0x380   : > { %v2057_v12 = vmax.f32 %v2055_v47, %v1958_v10  ;;  %v2669_v40 = vmax.f32 %v2667_v58, %v2570_v18  ;;  %v1960_v33 = vpop.f32.mrb[175].mxu0  ;;  %v2572_v62 = vpop.f32.mrb[175].mxu1  ;;  %v5646_v18 = vld [vmem:[#allocation10_spill] sm:$0xff] }
 0x381   : > { %v2126_v2 = vmax.f32 %v2124_v37, %v1960_v33  ;;  %v2738_v51 = vmax.f32 %v2736_v52, %v2572_v62 }
 0x382   : > { %3123 = vmatmul.mubr.bf16.gmra.mrb[24].mxu0 %v5642_v14  ;;  %3741 = vmatmul.mubr.bf16.gmra.mrb[24].mxu1 %v5643_v57 }
 0x383   : > { %3132 = vmatprep.mubr.bf16.mxu0 %v4603_v5  ;;  %3750 = vmatprep.mubr.bf16.mxu1 %v4603_v5 }
 0x385   : > { %v1964_v36 = vpop.f32.mrb[176].mxu0  ;;  %v2576_v35 = vpop.f32.mrb[176].mxu1 }
 0x386   : > { %v2058_v3 = vmax.f32 %v2056_v41, %v1964_v36  ;;  %v2670_v25 = vmax.f32 %v2668_v22, %v2576_v35  ;;  %v1966_v21 = vpop.f32.mrb[177].mxu0  ;;  %v2578_v43 = vpop.f32.mrb[177].mxu1 }
 0x387   : > { %v2127_v30 = vmax.f32 %v2125_v44, %v1966_v21  ;;  %v2739_v45 = vmax.f32 %v2737_v54, %v2578_v43  ;;  %v1968_v19 = vpop.f32.mrb[178].mxu0  ;;  %v2580_v31 = vpop.f32.mrb[178].mxu1 }
 0x388   : > { %v2059_v50 = vmax.f32 %v2057_v12, %v1968_v19  ;;  %v2671_v26 = vmax.f32 %v2669_v40, %v2580_v31  ;;  %v1970_v6 = vpop.f32.mrb[179].mxu0  ;;  %v2582_v49 = vpop.f32.mrb[179].mxu1 }
 0x389   : > { %v2128_v23 = vmax.f32 %v2126_v2, %v1970_v6  ;;  %v2740_v28 = vmax.f32 %v2738_v51, %v2582_v49 }
 0x38a   : > { %3133 = vmatmul.mubr.bf16.gmra.mrb[28].mxu0 %v5643_v57  ;;  %3751 = vmatmul.mubr.bf16.gmra.mrb[28].mxu1 %v5644_v46 }
 0x38b   : > { %3142 = vmatprep.mubr.bf16.mxu0 %v4603_v5  ;;  %3760 = vmatprep.mubr.bf16.mxu1 %v4603_v5 }
 0x38d   : > { %v1974_v55 = vpop.f32.mrb[180].mxu0  ;;  %v2586_v17 = vpop.f32.mrb[180].mxu1 }
 0x38e   : > { %v2060_v15 = vmax.f32 %v2058_v3, %v1974_v55  ;;  %v2672_v24 = vmax.f32 %v2670_v25, %v2586_v17  ;;  %v1976_v34 = vpop.f32.mrb[181].mxu0  ;;  %v2588_v0 = vpop.f32.mrb[181].mxu1 }
 0x38f   : > { %v2129_v8 = vmax.f32 %v2127_v30, %v1976_v34  ;;  %v2741_v9 = vmax.f32 %v2739_v45, %v2588_v0  ;;  %v1978_v29 = vpop.f32.mrb[182].mxu0  ;;  %v2590_v1 = vpop.f32.mrb[182].mxu1 }
 0x390   : > { %v2061_v27 = vmax.f32 %v2059_v50, %v1978_v29  ;;  %v2673_v42 = vmax.f32 %v2671_v26, %v2590_v1  ;;  %v1980_v61 = vpop.f32.mrb[183].mxu0  ;;  %v2592_v48 = vpop.f32.mrb[183].mxu1  ;;  %v5647_v26 = vld [vmem:[#allocation9_spill] sm:$0xff] }
 0x391   : > { %v2130_v56 = vmax.f32 %v2128_v23, %v1980_v61  ;;  %v2742_v7 = vmax.f32 %v2740_v28, %v2592_v48 }
 0x392   : > { %3143 = vmatmul.mubr.bf16.gmra.mrb[32].mxu0 %v5644_v46  ;;  %3761 = vmatmul.mubr.bf16.gmra.mrb[32].mxu1 %v5645_v20  ;;  %v4605_v46 = vmov 1966171168  }
 0x393   : > { %3152 = vmatprep.mubr.bf16.mxu0 %v4603_v5  ;;  %3770 = vmatprep.mubr.bf16.mxu1 %v4603_v5  ;;  %v2146_v55 = vunpack.c.l.s4 %v4605_v46  ;;  %v2003_v46 = vld [vmem:[#allocation2] sm:$0x3] }
 0x395   : > { %v1984_v47 = vpop.f32.mrb[184].mxu0  ;;  %v2596_v58 = vpop.f32.mrb[184].mxu1 }
 0x396   : > { %v2062_v16 = vmax.f32 %v2060_v15, %v1984_v47  ;;  %v2674_v4 = vmax.f32 %v2672_v24, %v2596_v58  ;;  %v1986_v37 = vpop.f32.mrb[185].mxu0  ;;  %v2598_v52 = vpop.f32.mrb[185].mxu1  ;;  %v2148_v15 = vlaneseq }
 0x397   : > { %v2131_v14 = vmax.f32 %v2129_v8, %v1986_v37  ;;  %v2743_v38 = vmax.f32 %v2741_v9, %v2598_v52  ;;  %v1988_v13 = vpop.f32.mrb[186].mxu0  ;;  %v2600_v41 = vpop.f32.mrb[186].mxu1 }
 0x398   : > { %v2063_v22 = vmax.f32 %v2061_v27, %v1988_v13  ;;  %v2675_v60 = vmax.f32 %v2673_v42, %v2600_v41  ;;  %v1990_v32 = vpop.f32.mrb[187].mxu0  ;;  %v2602_v44 = vpop.f32.mrb[187].mxu1  ;;  %v2149_v37 = vshrl.u32 %v2148_v15, 7  ;;  %vm5565_vm1 = vcmp.lt.s32.totalorder %v2148_v15, 256 }
 0x399   : > { %v2132_v54 = vmax.f32 %v2130_v56, %v1990_v32  ;;  %v2744_v10 = vmax.f32 %v2742_v7, %v2602_v44 }
 0x39a   : > { %3153 = vmatmul.mubr.bf16.gmra.mrb[36].mxu0 %v5645_v20  ;;  %3771 = vmatmul.mubr.bf16.gmra.mrb[36].mxu1 %v5646_v18  ;;  %v2147_v20 = vunpack.c.0.s8 %v2146_v55  ;;  %v2615_v55 = vld [vmem:[#allocation2 + $0x2] sm:$0x3] }
 0x39b   : > { %3162 = vmatprep.mubr.bf16.mxu0 %v4603_v5  ;;  %3780 = vmatprep.mubr.bf16.mxu1 %v4603_v5 }
 0x39d   : > { %v1994_v12 = vpop.f32.mrb[188].mxu0  ;;  %v2606_v40 = vpop.f32.mrb[188].mxu1 }
 0x39e   : > { %v2064_v33 = vmax.f32 %v2062_v16, %v1994_v12  ;;  %v2676_v62 = vmax.f32 %v2674_v4, %v2606_v40  ;;  %v1996_v2 = vpop.f32.mrb[189].mxu0  ;;  %v2608_v51 = vpop.f32.mrb[189].mxu1 }
 0x39f   : > { %v2133_v57 = vmax.f32 %v2131_v14, %v1996_v2  ;;  %v2745_v36 = vmax.f32 %v2743_v38, %v2608_v51  ;;  %v1998_v35 = vpop.f32.mrb[190].mxu0  ;;  %v2610_v3 = vpop.f32.mrb[190].mxu1 }
 0x3a0   : > { %v2065_v25 = vmax.f32 %v2063_v22, %v1998_v35  ;;  %v2677_v21 = vmax.f32 %v2675_v60, %v2610_v3  ;;  %v2000_v43 = vpop.f32.mrb[191].mxu0  ;;  %v2612_v30 = vpop.f32.mrb[191].mxu1 }
 0x3a1   : > { %v2134_v45 = vmax.f32 %v2132_v54, %v2000_v43  ;;  %v2746_v19 = vmax.f32 %v2744_v10, %v2612_v30  ;;  %v5550_v54 = vsub.s32 %v2147_v20, %v2149_v37 }
 0x3a2   : > { %v2066_v31 = vmax.f32 %v2064_v33, %v2065_v25  ;;  %v2678_v50 = vmax.f32 %v2676_v62, %v2677_v21  ;;  %3163 = vmatmul.mubr.bf16.gmra.mrb[40].mxu0 %v5646_v18  ;;  %3781 = vmatmul.mubr.bf16.gmra.mrb[40].mxu1 %v5647_v26 }
 0x3a3   : > { %v2135_v6 = vmax.f32 %v2133_v57, %v2134_v45  ;;  %v2747_v49 = vmax.f32 %v2745_v36, %v2746_v19  ;;  %3172 = vmatprep.mubr.bf16.mxu0 %v4603_v5  ;;  %3790 = vmatprep.mubr.bf16.mxu1 %v4603_v5 }
 0x3a4   : > { %v2067_v23 = vrot.slane %v2066_v31, 4  ;;  %v2679_v28 = vrot.slane %v2678_v50, 4 }
 0x3a5   : > { %v2136_v17 = vrot.slane %v2135_v6, 4  ;;  %v2748_v24 = vrot.slane %v2747_v49, 4  ;;  %v5537_v34 = vpop.f32.mrb[192].mxu0  ;;  %v3522_v0 = vpop.f32.mrb[192].mxu1 }
 0x3a6   : > { %v2068_v8 = vmax.f32 %v2066_v31, %v2067_v23  ;;  %v2680_v9 = vmax.f32 %v2678_v50, %v2679_v28  ;;  %v5539_v29 = vpop.f32.mrb[193].mxu0  ;;  %v3524_v1 = vpop.f32.mrb[193].mxu1 }
 0x3a7   : > { %v2137_v27 = vmax.f32 %v2135_v6, %v2136_v17  ;;  %v2749_v42 = vmax.f32 %v2747_v49, %v2748_v24  ;;  %v5541_v61 = vpop.f32.mrb[194].mxu0  ;;  %v3526_v48 = vpop.f32.mrb[194].mxu1 }
 0x3a8   : > { %v2069_v56 = vrot.slane %v2068_v8, 2  ;;  %v2681_v7 = vrot.slane %v2680_v9, 2  ;;  %v3832_v47 = vmax.f32 %v3526_v48, %v3522_v0  ;;  %v5543_v58 = vpop.f32.mrb[195].mxu0  ;;  %v3528_v16 = vpop.f32.mrb[195].mxu1 }
 0x3a9   : > { %v2138_v4 = vrot.slane %v2137_v27, 2  ;;  %v2750_v52 = vrot.slane %v2749_v42, 2  ;;  %v3901_v14 = vmax.f32 %v3528_v16, %v3524_v1 }
 0x3aa   : > { %v2070_v38 = vmax.f32 %v2068_v8, %v2069_v56  ;;  %v2682_v13 = vmax.f32 %v2680_v9, %v2681_v7  ;;  %3173 = vmatmul.mubr.bf16.gmra.mrb[44].mxu0 %v5647_v26  ;;  %3791 = vmatmul.mubr.bf16.gmra.mrb[44].mxu1 %v5304_v63 }
 0x3ab   : > { %v2139_v41 = vmax.f32 %v2137_v27, %v2138_v4  ;;  %v2751_v22 = vmax.f32 %v2749_v42, %v2750_v52  ;;  %3182 = vmatprep.mubr.bf16.mxu0 %v4603_v5  ;;  %3800 = vmatprep.mubr.bf16.mxu1 %v4603_v5 }
 0x3ac   : > { %v2071_v60 = vrot.slane %v2070_v38, 1  ;;  %v2683_v32 = vrot.slane %v2682_v13, 1 }
 0x3ad   : > { %v2140_v44 = vrot.slane %v2139_v41, 1  ;;  %v2752_v10 = vrot.slane %v2751_v22, 1  ;;  %v2914_v18 = vpop.f32.mrb[196].mxu0  ;;  %v3532_v12 = vpop.f32.mrb[196].mxu1 }
 0x3ae   : > { %v2072_v40 = vmax.f32 %v2070_v38, %v2071_v60  ;;  %v2684_v33 = vmax.f32 %v2682_v13, %v2683_v32  ;;  %v3224_v62 = vmax.f32 %v5537_v34, %v2914_v18  ;;  %v3834_v2 = vmax.f32 %v3832_v47, %v3532_v12  ;;  %v2916_v51 = vpop.f32.mrb[197].mxu0  ;;  %v3534_v57 = vpop.f32.mrb[197].mxu1 }
 0x3af   : > { %v2141_v36 = vmax.f32 %v2139_v41, %v2140_v44  ;;  %v2753_v35 = vmax.f32 %v2751_v22, %v2752_v10  ;;  %v3293_v3 = vmax.f32 %v5539_v29, %v2916_v51  ;;  %v3903_v25 = vmax.f32 %v3901_v14, %v3534_v57  ;;  %v2918_v21 = vpop.f32.mrb[198].mxu0  ;;  %v3536_v43 = vpop.f32.mrb[198].mxu1 }
 0x3b0   : > { %v3225_v30 = vmax.f32 %v5541_v61, %v2918_v21  ;;  %v3836_v45 = vmax.f32 %v3834_v2, %v3536_v43  ;;  %v2920_v19 = vpop.f32.mrb[199].mxu0  ;;  %v3538_v31 = vpop.f32.mrb[199].mxu1 }
 0x3b1   : > { %v2144_v50 = vcombine.low %v2072_v40, %v2141_v36  ;;  %v2756_v26 = vcombine.low %v2684_v33, %v2753_v35  ;;  %v3294_v6 = vmax.f32 %v5543_v58, %v2920_v19  ;;  %v3905_v49 = vmax.f32 %v3903_v25, %v3538_v31 }
 0x3b2   : > { %3183 = vmatmul.mubr.bf16.gmra.mrb[48].mxu0 %v5304_v63  ;;  %3801 = vmatmul.mubr.bf16.gmra.mrb[48].mxu1 %v5300_v59 }
 0x3b3   : > { %v2151_v23 = vrot.slane %v2144_v50, %v5550_v54  ;;  %v2763_v28 = vrot.slane %v2756_v26, %v5550_v54  ;;  %3192 = vmatprep.mubr.bf16.mxu0 %v4603_v5  ;;  %3810 = vmatprep.mubr.bf16.mxu1 %v4603_v5 }
 0x3b5   : > { %v2158_v17 = vrot.slane %v2151_v23, %v5550_v54  ;;  %v2770_v24 = vrot.slane %v2763_v28, %v5550_v54  ;;  %v2924_v34 = vpop.f32.mrb[200].mxu0  ;;  %v3542_v0 = vpop.f32.mrb[200].mxu1 }
 0x3b6   : > { %v3226_v8 = vmax.f32 %v3224_v62, %v2924_v34  ;;  %v3838_v9 = vmax.f32 %v3836_v45, %v3542_v0  ;;  %v2926_v29 = vpop.f32.mrb[201].mxu0  ;;  %v3544_v1 = vpop.f32.mrb[201].mxu1 }
 0x3b7   : > { %v2160_v27 = vmax.f32 %v2003_v46, %v2158_v17  ;;  %v2772_v42 = vmax.f32 %v2615_v55, %v2770_v24  ;;  %v3295_v61 = vmax.f32 %v3293_v3, %v2926_v29  ;;  %v3907_v48 = vmax.f32 %v3905_v49, %v3544_v1  ;;  %v2928_v56 = vpop.f32.mrb[202].mxu0  ;;  %v3546_v7 = vpop.f32.mrb[202].mxu1 }
 0x3b8   : > { %v3227_v20 = vmax.f32 %v3225_v30, %v2928_v56  ;;  %v3840_v47 = vmax.f32 %v3838_v9, %v3546_v7  ;;  %v2930_v58 = vpop.f32.mrb[203].mxu0  ;;  %v3548_v16 = vpop.f32.mrb[203].mxu1 }
 0x3b9   : > { %2165 = vst.msk [vmem:[#allocation2] sm:$0x3] %vm5565_vm1, %v2160_v27  ;;  %2773 = vst.msk [vmem:[#allocation2 + $0x2] sm:$0x3] %vm5565_vm1, %v2772_v42  ;;  %v3296_v15 = vmax.f32 %v3294_v6, %v2930_v58  ;;  %v3909_v4 = vmax.f32 %v3907_v48, %v3548_v16 }
 0x3ba   : > { %3193 = vmatmul.mubr.bf16.gmra.mrb[52].mxu0 %v5300_v59  ;;  %3811 = vmatmul.mubr.bf16.gmra.mrb[52].mxu1 %v5326_v39 }
 0x3bb   : > { %3202 = vmatprep.mubr.bf16.mxu0 %v4603_v5  ;;  %3820 = vmatprep.mubr.bf16.mxu1 %v4603_v5 }
 0x3bd   : > { %v2934_v37 = vpop.f32.mrb[204].mxu0  ;;  %v3552_v52 = vpop.f32.mrb[204].mxu1 }
 0x3be   : > { %v3228_v14 = vmax.f32 %v3226_v8, %v2934_v37  ;;  %v3842_v38 = vmax.f32 %v3840_v47, %v3552_v52  ;;  %v2936_v13 = vpop.f32.mrb[205].mxu0  ;;  %v3554_v41 = vpop.f32.mrb[205].mxu1 }
 0x3bf   : > { %v3297_v22 = vmax.f32 %v3295_v61, %v2936_v13  ;;  %v3911_v60 = vmax.f32 %v3909_v4, %v3554_v41  ;;  %v2938_v32 = vpop.f32.mrb[206].mxu0  ;;  %v3556_v44 = vpop.f32.mrb[206].mxu1 }
 0x3c0   : > { %v3229_v10 = vmax.f32 %v3227_v20, %v2938_v32  ;;  %v3844_v18 = vmax.f32 %v3842_v38, %v3556_v44  ;;  %v2940_v12 = vpop.f32.mrb[207].mxu0  ;;  %v3558_v59 = vpop.f32.mrb[207].mxu1 }
 0x3c1   : > { %v3298_v40 = vmax.f32 %v3296_v15, %v2940_v12  ;;  %v3913_v33 = vmax.f32 %v3911_v60, %v3558_v59 }
 0x3c2   : > { %3203 = vmatmul.mubr.bf16.gmra.mrb[56].mxu0 %v5326_v39  ;;  %3821 = vmatmul.mubr.bf16.gmra.mrb[56].mxu1 %v5318_v53 }
 0x3c3   : > { %3212 = vmatprep.mubr.bf16.mxu0 %v4603_v5 }
 0x3c5   : > { %v2944_v62 = vpop.f32.mrb[208].mxu0  ;;  %v3562_v2 = vpop.f32.mrb[208].mxu1 }
 0x3c6   : > { %v3230_v51 = vmax.f32 %v3228_v14, %v2944_v62  ;;  %v3846_v57 = vmax.f32 %v3844_v18, %v3562_v2  ;;  %v2946_v36 = vpop.f32.mrb[209].mxu0  ;;  %v3564_v35 = vpop.f32.mrb[209].mxu1 }
 0x3c7   : > { %v3299_v3 = vmax.f32 %v3297_v22, %v2946_v36  ;;  %v3915_v25 = vmax.f32 %v3913_v33, %v3564_v35  ;;  %v2948_v21 = vpop.f32.mrb[210].mxu0  ;;  %v3566_v43 = vpop.f32.mrb[210].mxu1 }
 0x3c8   : > { %v3231_v30 = vmax.f32 %v3229_v10, %v2948_v21  ;;  %v3848_v45 = vmax.f32 %v3846_v57, %v3566_v43  ;;  %v2950_v19 = vpop.f32.mrb[211].mxu0  ;;  %v3568_v31 = vpop.f32.mrb[211].mxu1 }
 0x3c9   : > { %v3300_v50 = vmax.f32 %v3298_v40, %v2950_v19  ;;  %v3917_v39 = vmax.f32 %v3915_v25, %v3568_v31 }
 0x3ca   : > { %3213 = vmatmul.mubr.bf16.gmra.mrb[60].mxu0 %v5318_v53 }
 0x3cb   : > { %3510 = vmatprep.mubr.bf16.mxu0 %v4603_v5 }
 0x3cd   : > { %v2954_v26 = vpop.f32.mrb[212].mxu0  ;;  %v3572_v6 = vpop.f32.mrb[212].mxu1 }
 0x3ce   : > { %v3232_v49 = vmax.f32 %v3230_v51, %v2954_v26  ;;  %v3850_v23 = vmax.f32 %v3848_v45, %v3572_v6  ;;  %v2956_v28 = vpop.f32.mrb[213].mxu0  ;;  %v3574_v46 = vpop.f32.mrb[213].mxu1 }
 0x3cf   : > { %v3301_v55 = vmax.f32 %v3299_v3, %v2956_v28  ;;  %v3919_v17 = vmax.f32 %v3917_v39, %v3574_v46  ;;  %v2958_v24 = vpop.f32.mrb[214].mxu0  ;;  %v3576_v34 = vpop.f32.mrb[214].mxu1 }
 0x3d0   : > { %v3233_v0 = vmax.f32 %v3231_v30, %v2958_v24  ;;  %v3852_v8 = vmax.f32 %v3850_v23, %v3576_v34  ;;  %v2960_v9 = vpop.f32.mrb[215].mxu0  ;;  %v3578_v29 = vpop.f32.mrb[215].mxu1 }
 0x3d1   : > { %v3302_v1 = vmax.f32 %v3300_v50, %v2960_v9  ;;  %v3921_v27 = vmax.f32 %v3919_v17, %v3578_v29 }
 0x3d2   : > { %3511 = vmatmul.mubr.bf16.vlgmr.msra.gmra.mrb[64].mxu0 %v5043_v11 }
 0x3d5   : > { %v2964_v53 = vpop.f32.mrb[216].mxu0  ;;  %v3582_v5 = vpop.f32.mrb[216].mxu1 }
 0x3d6   : > { %v3234_v42 = vmax.f32 %v3232_v49, %v2964_v53  ;;  %v3854_v61 = vmax.f32 %v3852_v8, %v3582_v5  ;;  %v2966_v48 = vpop.f32.mrb[217].mxu0  ;;  %v3584_v56 = vpop.f32.mrb[217].mxu1 }
 0x3d7   : > { %v3303_v7 = vmax.f32 %v3301_v55, %v2966_v48  ;;  %v3923_v20 = vmax.f32 %v3921_v27, %v3584_v56  ;;  %v2968_v47 = vpop.f32.mrb[218].mxu0  ;;  %v3586_v58 = vpop.f32.mrb[218].mxu1 }
 0x3d8   : > { %v3235_v16 = vmax.f32 %v3233_v0, %v2968_v47  ;;  %v3856_v15 = vmax.f32 %v3854_v61, %v3586_v58  ;;  %v2970_v4 = vpop.f32.mrb[219].mxu0  ;;  %v3588_v37 = vpop.f32.mrb[219].mxu1 }
 0x3d9   : > { %v3304_v52 = vmax.f32 %v3302_v1, %v2970_v4  ;;  %v3925_v14 = vmax.f32 %v3923_v20, %v3588_v37 }
 0x3dd   : > { %v2974_v38 = vpop.f32.mrb[220].mxu0  ;;  %v3592_v13 = vpop.f32.mrb[220].mxu1 }
 0x3de   : > { %v3236_v41 = vmax.f32 %v3234_v42, %v2974_v38  ;;  %v3858_v11 = vmax.f32 %v3856_v15, %v3592_v13  ;;  %v2976_v22 = vpop.f32.mrb[221].mxu0  ;;  %v3594_v60 = vpop.f32.mrb[221].mxu1 }
 0x3df   : > { %v3305_v32 = vmax.f32 %v3303_v7, %v2976_v22  ;;  %v3927_v44 = vmax.f32 %v3925_v14, %v3594_v60  ;;  %v2978_v10 = vpop.f32.mrb[222].mxu0  ;;  %v3596_v18 = vpop.f32.mrb[222].mxu1 }
 0x3e0   : > { %v3237_v12 = vmax.f32 %v3235_v16, %v2978_v10  ;;  %v3860_v59 = vmax.f32 %v3858_v11, %v3596_v18  ;;  %v2980_v40 = vpop.f32.mrb[223].mxu0  ;;  %v3598_v33 = vpop.f32.mrb[223].mxu1 }
 0x3e1   : > { %v3306_v62 = vmax.f32 %v3304_v52, %v2980_v40  ;;  %v3929_v2 = vmax.f32 %v3927_v44, %v3598_v33 }
 0x3e5   : > { %v2984_v51 = vpop.f32.mrb[224].mxu0  ;;  %v3602_v57 = vpop.f32.mrb[224].mxu1 }
 0x3e6   : > { %v3238_v36 = vmax.f32 %v3236_v41, %v2984_v51  ;;  %v3862_v35 = vmax.f32 %v3860_v59, %v3602_v57  ;;  %v2986_v3 = vpop.f32.mrb[225].mxu0  ;;  %v3604_v25 = vpop.f32.mrb[225].mxu1 }
 0x3e7   : > { %v3307_v21 = vmax.f32 %v3305_v32, %v2986_v3  ;;  %v3931_v43 = vmax.f32 %v3929_v2, %v3604_v25  ;;  %v2988_v30 = vpop.f32.mrb[226].mxu0  ;;  %v3606_v45 = vpop.f32.mrb[226].mxu1 }
 0x3e8   : > { %v3239_v19 = vmax.f32 %v3237_v12, %v2988_v30  ;;  %v3864_v31 = vmax.f32 %v3862_v35, %v3606_v45  ;;  %v2990_v50 = vpop.f32.mrb[227].mxu0  ;;  %v3608_v39 = vpop.f32.mrb[227].mxu1 }
 0x3e9   : > { %v3308_v26 = vmax.f32 %v3306_v62, %v2990_v50  ;;  %v3933_v6 = vmax.f32 %v3931_v43, %v3608_v39 }
 0x3ed   : > { %v2994_v49 = vpop.f32.mrb[228].mxu0  ;;  %v3612_v23 = vpop.f32.mrb[228].mxu1 }
 0x3ee   : > { %v3240_v28 = vmax.f32 %v3238_v36, %v2994_v49  ;;  %v3866_v46 = vmax.f32 %v3864_v31, %v3612_v23  ;;  %v2996_v55 = vpop.f32.mrb[229].mxu0  ;;  %v3614_v17 = vpop.f32.mrb[229].mxu1 }
 0x3ef   : > { %v3309_v24 = vmax.f32 %v3307_v21, %v2996_v55  ;;  %v3935_v34 = vmax.f32 %v3933_v6, %v3614_v17  ;;  %v2998_v0 = vpop.f32.mrb[230].mxu0  ;;  %v3616_v8 = vpop.f32.mrb[230].mxu1 }
 0x3f0   : > { %v3241_v9 = vmax.f32 %v3239_v19, %v2998_v0  ;;  %v3868_v29 = vmax.f32 %v3866_v46, %v3616_v8  ;;  %v3000_v1 = vpop.f32.mrb[231].mxu0  ;;  %v3618_v27 = vpop.f32.mrb[231].mxu1 }
 0x3f1   : > { %v3310_v53 = vmax.f32 %v3308_v26, %v3000_v1  ;;  %v3937_v5 = vmax.f32 %v3935_v34, %v3618_v27 }
 0x3f5   : > { %v3004_v42 = vpop.f32.mrb[232].mxu0  ;;  %v3622_v61 = vpop.f32.mrb[232].mxu1 }
 0x3f6   : > { %v3242_v48 = vmax.f32 %v3240_v28, %v3004_v42  ;;  %v3870_v56 = vmax.f32 %v3868_v29, %v3622_v61  ;;  %v3006_v7 = vpop.f32.mrb[233].mxu0  ;;  %v3624_v20 = vpop.f32.mrb[233].mxu1 }
 0x3f7   : > { %v3311_v47 = vmax.f32 %v3309_v24, %v3006_v7  ;;  %v3939_v58 = vmax.f32 %v3937_v5, %v3624_v20  ;;  %v3008_v16 = vpop.f32.mrb[234].mxu0  ;;  %v3626_v15 = vpop.f32.mrb[234].mxu1 }
 0x3f8   : > { %v3243_v4 = vmax.f32 %v3241_v9, %v3008_v16  ;;  %v3872_v37 = vmax.f32 %v3870_v56, %v3626_v15  ;;  %v3010_v52 = vpop.f32.mrb[235].mxu0  ;;  %v3628_v14 = vpop.f32.mrb[235].mxu1 }
 0x3f9   : > { %v3312_v38 = vmax.f32 %v3310_v53, %v3010_v52  ;;  %v3941_v13 = vmax.f32 %v3939_v58, %v3628_v14 }
 0x3fd   : > { %v3014_v41 = vpop.f32.mrb[236].mxu0  ;;  %v3632_v11 = vpop.f32.mrb[236].mxu1 }
 0x3fe   : > { %v3244_v22 = vmax.f32 %v3242_v48, %v3014_v41  ;;  %v3874_v60 = vmax.f32 %v3872_v37, %v3632_v11  ;;  %v3016_v32 = vpop.f32.mrb[237].mxu0  ;;  %v3634_v44 = vpop.f32.mrb[237].mxu1 }
 0x3ff   : > { %v3313_v10 = vmax.f32 %v3311_v47, %v3016_v32  ;;  %v3943_v18 = vmax.f32 %v3941_v13, %v3634_v44  ;;  %v3018_v12 = vpop.f32.mrb[238].mxu0  ;;  %v3636_v59 = vpop.f32.mrb[238].mxu1 }
 0x400   : > { %v3245_v40 = vmax.f32 %v3243_v4, %v3018_v12  ;;  %v3876_v33 = vmax.f32 %v3874_v60, %v3636_v59  ;;  %v3020_v62 = vpop.f32.mrb[239].mxu0  ;;  %v3638_v2 = vpop.f32.mrb[239].mxu1 }
 0x401   : > { %v3314_v51 = vmax.f32 %v3312_v38, %v3020_v62  ;;  %v3945_v57 = vmax.f32 %v3943_v18, %v3638_v2 }
 0x405   : > { %v3024_v36 = vpop.f32.mrb[240].mxu0  ;;  %v3642_v35 = vpop.f32.mrb[240].mxu1 }
 0x406   : > { %v3246_v3 = vmax.f32 %v3244_v22, %v3024_v36  ;;  %v3878_v25 = vmax.f32 %v3876_v33, %v3642_v35  ;;  %v3026_v21 = vpop.f32.mrb[241].mxu0  ;;  %v3644_v43 = vpop.f32.mrb[241].mxu1 }
 0x407   : > { %v3315_v30 = vmax.f32 %v3313_v10, %v3026_v21  ;;  %v3947_v45 = vmax.f32 %v3945_v57, %v3644_v43  ;;  %v3028_v19 = vpop.f32.mrb[242].mxu0  ;;  %v3646_v31 = vpop.f32.mrb[242].mxu1 }
 0x408   : > { %v3247_v50 = vmax.f32 %v3245_v40, %v3028_v19  ;;  %v3880_v39 = vmax.f32 %v3878_v25, %v3646_v31  ;;  %v3030_v26 = vpop.f32.mrb[243].mxu0  ;;  %v3648_v6 = vpop.f32.mrb[243].mxu1 }
 0x409   : > { %v3316_v49 = vmax.f32 %v3314_v51, %v3030_v26  ;;  %v3949_v23 = vmax.f32 %v3947_v45, %v3648_v6 }
 0x40d   : > { %v3034_v28 = vpop.f32.mrb[244].mxu0  ;;  %v3652_v46 = vpop.f32.mrb[244].mxu1 }
 0x40e   : > { %v3248_v55 = vmax.f32 %v3246_v3, %v3034_v28  ;;  %v3882_v17 = vmax.f32 %v3880_v39, %v3652_v46  ;;  %v3036_v24 = vpop.f32.mrb[245].mxu0  ;;  %v3654_v34 = vpop.f32.mrb[245].mxu1 }
 0x40f   : > { %v3317_v0 = vmax.f32 %v3315_v30, %v3036_v24  ;;  %v3951_v8 = vmax.f32 %v3949_v23, %v3654_v34  ;;  %v3038_v9 = vpop.f32.mrb[246].mxu0  ;;  %v3656_v29 = vpop.f32.mrb[246].mxu1 }
 0x410   : > { %v3249_v1 = vmax.f32 %v3247_v50, %v3038_v9  ;;  %v3884_v27 = vmax.f32 %v3882_v17, %v3656_v29  ;;  %v3040_v53 = vpop.f32.mrb[247].mxu0  ;;  %v3658_v5 = vpop.f32.mrb[247].mxu1 }
 0x411   : > { %v3318_v42 = vmax.f32 %v3316_v49, %v3040_v53  ;;  %v3953_v61 = vmax.f32 %v3951_v8, %v3658_v5 }
 0x415   : > { %v3044_v48 = vpop.f32.mrb[248].mxu0  ;;  %v3662_v56 = vpop.f32.mrb[248].mxu1 }
 0x416   : > { %v3250_v7 = vmax.f32 %v3248_v55, %v3044_v48  ;;  %v3886_v20 = vmax.f32 %v3884_v27, %v3662_v56  ;;  %v3046_v47 = vpop.f32.mrb[249].mxu0  ;;  %v3664_v58 = vpop.f32.mrb[249].mxu1 }
 0x417   : > { %v3319_v16 = vmax.f32 %v3317_v0, %v3046_v47  ;;  %v3955_v15 = vmax.f32 %v3953_v61, %v3664_v58  ;;  %v3048_v4 = vpop.f32.mrb[250].mxu0  ;;  %v3666_v37 = vpop.f32.mrb[250].mxu1 }
 0x418   : > { %v3251_v52 = vmax.f32 %v3249_v1, %v3048_v4  ;;  %v3888_v14 = vmax.f32 %v3886_v20, %v3666_v37  ;;  %v3050_v38 = vpop.f32.mrb[251].mxu0  ;;  %v3668_v13 = vpop.f32.mrb[251].mxu1 }
 0x419   : > { %v3320_v41 = vmax.f32 %v3318_v42, %v3050_v38  ;;  %v3957_v11 = vmax.f32 %v3955_v15, %v3668_v13 }
 0x41d   : > { %v3054_v22 = vpop.f32.mrb[252].mxu0  ;;  %v3672_v60 = vpop.f32.mrb[252].mxu1 }
 0x41e   : > { %v3252_v32 = vmax.f32 %v3250_v7, %v3054_v22  ;;  %v3890_v44 = vmax.f32 %v3888_v14, %v3672_v60  ;;  %v3056_v10 = vpop.f32.mrb[253].mxu0  ;;  %v3674_v18 = vpop.f32.mrb[253].mxu1 }
 0x41f   : > { %v3321_v12 = vmax.f32 %v3319_v16, %v3056_v10  ;;  %v3959_v59 = vmax.f32 %v3957_v11, %v3674_v18  ;;  %v3058_v40 = vpop.f32.mrb[254].mxu0  ;;  %v3676_v33 = vpop.f32.mrb[254].mxu1 }
 0x420   : > { %v3253_v62 = vmax.f32 %v3251_v52, %v3058_v40  ;;  %v3892_v2 = vmax.f32 %v3890_v44, %v3676_v33  ;;  %v3060_v51 = vpop.f32.mrb[255].mxu0  ;;  %v3678_v57 = vpop.f32.mrb[255].mxu1 }
 0x421   : > { %v3322_v36 = vmax.f32 %v3320_v41, %v3060_v51  ;;  %v3961_v35 = vmax.f32 %v3959_v59, %v3678_v57 }
 0x425   : > { %v3064_v3 = vpop.f32.mrb[0].mxu0  ;;  %v3682_v25 = vpop.f32.mrb[0].mxu1 }
 0x426   : > { %v3254_v21 = vmax.f32 %v3252_v32, %v3064_v3  ;;  %v3833_v43 = vmax.f32 %v3682_v25, %v3892_v2  ;;  %v3066_v30 = vpop.f32.mrb[1].mxu0  ;;  %v3684_v45 = vpop.f32.mrb[1].mxu1 }
 0x427   : > { %v3323_v19 = vmax.f32 %v3321_v12, %v3066_v30  ;;  %v3902_v31 = vmax.f32 %v3684_v45, %v3961_v35  ;;  %v3068_v50 = vpop.f32.mrb[2].mxu0  ;;  %v3686_v39 = vpop.f32.mrb[2].mxu1 }
 0x428   : > { %v3255_v26 = vmax.f32 %v3253_v62, %v3068_v50  ;;  %v3835_v6 = vmax.f32 %v3833_v43, %v3686_v39  ;;  %v3070_v49 = vpop.f32.mrb[3].mxu0  ;;  %v3688_v23 = vpop.f32.mrb[3].mxu1 }
 0x429   : > { %v3324_v28 = vmax.f32 %v3322_v36, %v3070_v49  ;;  %v3904_v46 = vmax.f32 %v3902_v31, %v3688_v23 }
 0x42d   : > { %v3074_v55 = vpop.f32.mrb[4].mxu0  ;;  %v3692_v17 = vpop.f32.mrb[4].mxu1 }
 0x42e   : > { %v3256_v24 = vmax.f32 %v3254_v21, %v3074_v55  ;;  %v3837_v34 = vmax.f32 %v3835_v6, %v3692_v17  ;;  %v3076_v0 = vpop.f32.mrb[5].mxu0  ;;  %v3694_v8 = vpop.f32.mrb[5].mxu1 }
 0x42f   : > { %v3325_v9 = vmax.f32 %v3323_v19, %v3076_v0  ;;  %v3906_v29 = vmax.f32 %v3904_v46, %v3694_v8  ;;  %v3078_v1 = vpop.f32.mrb[6].mxu0  ;;  %v3696_v27 = vpop.f32.mrb[6].mxu1 }
 0x430   : > { %v3257_v53 = vmax.f32 %v3255_v26, %v3078_v1  ;;  %v3839_v5 = vmax.f32 %v3837_v34, %v3696_v27  ;;  %v3080_v42 = vpop.f32.mrb[7].mxu0  ;;  %v3698_v61 = vpop.f32.mrb[7].mxu1 }
 0x431   : > { %v3326_v48 = vmax.f32 %v3324_v28, %v3080_v42  ;;  %v3908_v56 = vmax.f32 %v3906_v29, %v3698_v61 }
 0x435   : > { %v3084_v7 = vpop.f32.mrb[8].mxu0  ;;  %v3702_v20 = vpop.f32.mrb[8].mxu1 }
 0x436   : > { %v3258_v47 = vmax.f32 %v3256_v24, %v3084_v7  ;;  %v3841_v58 = vmax.f32 %v3839_v5, %v3702_v20  ;;  %v3086_v16 = vpop.f32.mrb[9].mxu0  ;;  %v3704_v15 = vpop.f32.mrb[9].mxu1 }
 0x437   : > { %v3327_v4 = vmax.f32 %v3325_v9, %v3086_v16  ;;  %v3910_v37 = vmax.f32 %v3908_v56, %v3704_v15  ;;  %v3088_v52 = vpop.f32.mrb[10].mxu0  ;;  %v3706_v14 = vpop.f32.mrb[10].mxu1 }
 0x438   : > { %v3259_v38 = vmax.f32 %v3257_v53, %v3088_v52  ;;  %v3843_v13 = vmax.f32 %v3841_v58, %v3706_v14  ;;  %v3090_v41 = vpop.f32.mrb[11].mxu0  ;;  %v3708_v11 = vpop.f32.mrb[11].mxu1 }
 0x439   : > { %v3328_v22 = vmax.f32 %v3326_v48, %v3090_v41  ;;  %v3912_v60 = vmax.f32 %v3910_v37, %v3708_v11 }
 0x43d   : > { %v3094_v32 = vpop.f32.mrb[12].mxu0  ;;  %v3712_v44 = vpop.f32.mrb[12].mxu1 }
 0x43e   : > { %v3260_v10 = vmax.f32 %v3258_v47, %v3094_v32  ;;  %v3845_v18 = vmax.f32 %v3843_v13, %v3712_v44  ;;  %v3096_v12 = vpop.f32.mrb[13].mxu0  ;;  %v3714_v59 = vpop.f32.mrb[13].mxu1 }
 0x43f   : > { %v3329_v40 = vmax.f32 %v3327_v4, %v3096_v12  ;;  %v3914_v33 = vmax.f32 %v3912_v60, %v3714_v59  ;;  %v3098_v62 = vpop.f32.mrb[14].mxu0  ;;  %v3716_v2 = vpop.f32.mrb[14].mxu1 }
 0x440   : > { %v3261_v51 = vmax.f32 %v3259_v38, %v3098_v62  ;;  %v3847_v57 = vmax.f32 %v3845_v18, %v3716_v2  ;;  %v3100_v36 = vpop.f32.mrb[15].mxu0  ;;  %v3718_v35 = vpop.f32.mrb[15].mxu1 }
 0x441   : > { %v3330_v3 = vmax.f32 %v3328_v22, %v3100_v36  ;;  %v3916_v25 = vmax.f32 %v3914_v33, %v3718_v35 }
 0x445   : > { %v3104_v21 = vpop.f32.mrb[16].mxu0  ;;  %v3722_v43 = vpop.f32.mrb[16].mxu1 }
 0x446   : > { %v3262_v30 = vmax.f32 %v3260_v10, %v3104_v21  ;;  %v3849_v45 = vmax.f32 %v3847_v57, %v3722_v43  ;;  %v3106_v19 = vpop.f32.mrb[17].mxu0  ;;  %v3724_v31 = vpop.f32.mrb[17].mxu1 }
 0x447   : > { %v3331_v50 = vmax.f32 %v3329_v40, %v3106_v19  ;;  %v3918_v39 = vmax.f32 %v3916_v25, %v3724_v31  ;;  %v3108_v26 = vpop.f32.mrb[18].mxu0  ;;  %v3726_v6 = vpop.f32.mrb[18].mxu1 }
 0x448   : > { %v3263_v49 = vmax.f32 %v3261_v51, %v3108_v26  ;;  %v3851_v23 = vmax.f32 %v3849_v45, %v3726_v6  ;;  %v3110_v28 = vpop.f32.mrb[19].mxu0  ;;  %v3728_v46 = vpop.f32.mrb[19].mxu1 }
 0x449   : > { %v3332_v55 = vmax.f32 %v3330_v3, %v3110_v28  ;;  %v3920_v17 = vmax.f32 %v3918_v39, %v3728_v46 }
 0x44d   : > { %v3114_v24 = vpop.f32.mrb[20].mxu0  ;;  %v3732_v34 = vpop.f32.mrb[20].mxu1 }
 0x44e   : > { %v3264_v0 = vmax.f32 %v3262_v30, %v3114_v24  ;;  %v3853_v8 = vmax.f32 %v3851_v23, %v3732_v34  ;;  %v3116_v9 = vpop.f32.mrb[21].mxu0  ;;  %v3734_v29 = vpop.f32.mrb[21].mxu1 }
 0x44f   : > { %v3333_v1 = vmax.f32 %v3331_v50, %v3116_v9  ;;  %v3922_v27 = vmax.f32 %v3920_v17, %v3734_v29  ;;  %v3118_v53 = vpop.f32.mrb[22].mxu0  ;;  %v3736_v5 = vpop.f32.mrb[22].mxu1 }
 0x450   : > { %v3265_v42 = vmax.f32 %v3263_v49, %v3118_v53  ;;  %v3855_v61 = vmax.f32 %v3853_v8, %v3736_v5  ;;  %v3120_v48 = vpop.f32.mrb[23].mxu0  ;;  %v3738_v56 = vpop.f32.mrb[23].mxu1 }
 0x451   : > { %v3334_v7 = vmax.f32 %v3332_v55, %v3120_v48  ;;  %v3924_v20 = vmax.f32 %v3922_v27, %v3738_v56 }
 0x455   : > { %v3124_v47 = vpop.f32.mrb[24].mxu0  ;;  %v3742_v58 = vpop.f32.mrb[24].mxu1 }
 0x456   : > { %v3266_v16 = vmax.f32 %v3264_v0, %v3124_v47  ;;  %v3857_v15 = vmax.f32 %v3855_v61, %v3742_v58  ;;  %v3126_v4 = vpop.f32.mrb[25].mxu0  ;;  %v3744_v37 = vpop.f32.mrb[25].mxu1 }
 0x457   : > { %v3335_v52 = vmax.f32 %v3333_v1, %v3126_v4  ;;  %v3926_v14 = vmax.f32 %v3924_v20, %v3744_v37  ;;  %v3128_v38 = vpop.f32.mrb[26].mxu0  ;;  %v3746_v13 = vpop.f32.mrb[26].mxu1 }
 0x458   : > { %v3267_v41 = vmax.f32 %v3265_v42, %v3128_v38  ;;  %v3859_v11 = vmax.f32 %v3857_v15, %v3746_v13  ;;  %v3130_v22 = vpop.f32.mrb[27].mxu0  ;;  %v3748_v60 = vpop.f32.mrb[27].mxu1 }
 0x459   : > { %v3336_v32 = vmax.f32 %v3334_v7, %v3130_v22  ;;  %v3928_v44 = vmax.f32 %v3926_v14, %v3748_v60 }
 0x45d   : > { %v3134_v10 = vpop.f32.mrb[28].mxu0  ;;  %v3752_v18 = vpop.f32.mrb[28].mxu1 }
 0x45e   : > { %v3268_v12 = vmax.f32 %v3266_v16, %v3134_v10  ;;  %v3861_v59 = vmax.f32 %v3859_v11, %v3752_v18  ;;  %v3136_v40 = vpop.f32.mrb[29].mxu0  ;;  %v3754_v33 = vpop.f32.mrb[29].mxu1 }
 0x45f   : > { %v3337_v62 = vmax.f32 %v3335_v52, %v3136_v40  ;;  %v3930_v2 = vmax.f32 %v3928_v44, %v3754_v33  ;;  %v3138_v51 = vpop.f32.mrb[30].mxu0  ;;  %v3756_v57 = vpop.f32.mrb[30].mxu1 }
 0x460   : > { %v3269_v36 = vmax.f32 %v3267_v41, %v3138_v51  ;;  %v3863_v35 = vmax.f32 %v3861_v59, %v3756_v57  ;;  %v3140_v3 = vpop.f32.mrb[31].mxu0  ;;  %v3758_v25 = vpop.f32.mrb[31].mxu1 }
 0x461   : > { %v3338_v21 = vmax.f32 %v3336_v32, %v3140_v3  ;;  %v3932_v43 = vmax.f32 %v3930_v2, %v3758_v25 }
 0x465   : > { %v3144_v30 = vpop.f32.mrb[32].mxu0  ;;  %v3762_v45 = vpop.f32.mrb[32].mxu1 }
 0x466   : > { %v3270_v19 = vmax.f32 %v3268_v12, %v3144_v30  ;;  %v3865_v31 = vmax.f32 %v3863_v35, %v3762_v45  ;;  %v3146_v50 = vpop.f32.mrb[33].mxu0  ;;  %v3764_v39 = vpop.f32.mrb[33].mxu1 }
 0x467   : > { %v3339_v26 = vmax.f32 %v3337_v62, %v3146_v50  ;;  %v3934_v6 = vmax.f32 %v3932_v43, %v3764_v39  ;;  %v3148_v49 = vpop.f32.mrb[34].mxu0  ;;  %v3766_v23 = vpop.f32.mrb[34].mxu1 }
 0x468   : > { %v3271_v28 = vmax.f32 %v3269_v36, %v3148_v49  ;;  %v3867_v46 = vmax.f32 %v3865_v31, %v3766_v23  ;;  %v3150_v55 = vpop.f32.mrb[35].mxu0  ;;  %v3768_v17 = vpop.f32.mrb[35].mxu1 }
 0x469   : > { %v3340_v24 = vmax.f32 %v3338_v21, %v3150_v55  ;;  %v3936_v34 = vmax.f32 %v3934_v6, %v3768_v17 }
 0x46d   : > { %v3154_v0 = vpop.f32.mrb[36].mxu0  ;;  %v3772_v8 = vpop.f32.mrb[36].mxu1 }
 0x46e   : > { %v3272_v9 = vmax.f32 %v3270_v19, %v3154_v0  ;;  %v3869_v29 = vmax.f32 %v3867_v46, %v3772_v8  ;;  %v3156_v1 = vpop.f32.mrb[37].mxu0  ;;  %v3774_v27 = vpop.f32.mrb[37].mxu1 }
 0x46f   : > { %v3341_v53 = vmax.f32 %v3339_v26, %v3156_v1  ;;  %v3938_v5 = vmax.f32 %v3936_v34, %v3774_v27  ;;  %v3158_v42 = vpop.f32.mrb[38].mxu0  ;;  %v3776_v61 = vpop.f32.mrb[38].mxu1 }
 0x470   : > { %v3273_v48 = vmax.f32 %v3271_v28, %v3158_v42  ;;  %v3871_v56 = vmax.f32 %v3869_v29, %v3776_v61  ;;  %v3160_v7 = vpop.f32.mrb[39].mxu0  ;;  %v3778_v20 = vpop.f32.mrb[39].mxu1 }
 0x471   : > { %v3342_v47 = vmax.f32 %v3340_v24, %v3160_v7  ;;  %v3940_v58 = vmax.f32 %v3938_v5, %v3778_v20 }
 0x475   : > { %v3164_v16 = vpop.f32.mrb[40].mxu0  ;;  %v3782_v15 = vpop.f32.mrb[40].mxu1 }
 0x476   : > { %v3274_v4 = vmax.f32 %v3272_v9, %v3164_v16  ;;  %v3873_v37 = vmax.f32 %v3871_v56, %v3782_v15  ;;  %v3166_v52 = vpop.f32.mrb[41].mxu0  ;;  %v3784_v14 = vpop.f32.mrb[41].mxu1 }
 0x477   : > { %v3343_v38 = vmax.f32 %v3341_v53, %v3166_v52  ;;  %v3942_v13 = vmax.f32 %v3940_v58, %v3784_v14  ;;  %v3168_v41 = vpop.f32.mrb[42].mxu0  ;;  %v3786_v11 = vpop.f32.mrb[42].mxu1 }
 0x478   : > { %v3275_v22 = vmax.f32 %v3273_v48, %v3168_v41  ;;  %v3875_v60 = vmax.f32 %v3873_v37, %v3786_v11  ;;  %v3170_v32 = vpop.f32.mrb[43].mxu0  ;;  %v3788_v44 = vpop.f32.mrb[43].mxu1 }
 0x479   : > { %v3344_v10 = vmax.f32 %v3342_v47, %v3170_v32  ;;  %v3944_v18 = vmax.f32 %v3942_v13, %v3788_v44 }
 0x47d   : > { %v3174_v12 = vpop.f32.mrb[44].mxu0  ;;  %v3792_v59 = vpop.f32.mrb[44].mxu1 }
 0x47e   : > { %v3276_v40 = vmax.f32 %v3274_v4, %v3174_v12  ;;  %v3877_v33 = vmax.f32 %v3875_v60, %v3792_v59  ;;  %v3176_v62 = vpop.f32.mrb[45].mxu0  ;;  %v3794_v2 = vpop.f32.mrb[45].mxu1 }
 0x47f   : > { %v3345_v51 = vmax.f32 %v3343_v38, %v3176_v62  ;;  %v3946_v57 = vmax.f32 %v3944_v18, %v3794_v2  ;;  %v3178_v36 = vpop.f32.mrb[46].mxu0  ;;  %v3796_v35 = vpop.f32.mrb[46].mxu1 }
 0x480   : > { %v3277_v3 = vmax.f32 %v3275_v22, %v3178_v36  ;;  %v3879_v25 = vmax.f32 %v3877_v33, %v3796_v35  ;;  %v3180_v21 = vpop.f32.mrb[47].mxu0  ;;  %v3798_v43 = vpop.f32.mrb[47].mxu1 }
 0x481   : > { %v3346_v30 = vmax.f32 %v3344_v10, %v3180_v21  ;;  %v3948_v45 = vmax.f32 %v3946_v57, %v3798_v43 }
 0x485   : > { %v3184_v19 = vpop.f32.mrb[48].mxu0  ;;  %v3802_v31 = vpop.f32.mrb[48].mxu1 }
 0x486   : > { %v3278_v50 = vmax.f32 %v3276_v40, %v3184_v19  ;;  %v3881_v39 = vmax.f32 %v3879_v25, %v3802_v31  ;;  %v3186_v26 = vpop.f32.mrb[49].mxu0  ;;  %v3804_v6 = vpop.f32.mrb[49].mxu1 }
 0x487   : > { %v3347_v49 = vmax.f32 %v3345_v51, %v3186_v26  ;;  %v3950_v23 = vmax.f32 %v3948_v45, %v3804_v6  ;;  %v3188_v28 = vpop.f32.mrb[50].mxu0  ;;  %v3806_v46 = vpop.f32.mrb[50].mxu1 }
 0x488   : > { %v3279_v55 = vmax.f32 %v3277_v3, %v3188_v28  ;;  %v3883_v17 = vmax.f32 %v3881_v39, %v3806_v46  ;;  %v3190_v24 = vpop.f32.mrb[51].mxu0  ;;  %v3808_v34 = vpop.f32.mrb[51].mxu1 }
 0x489   : > { %v3348_v0 = vmax.f32 %v3346_v30, %v3190_v24  ;;  %v3952_v8 = vmax.f32 %v3950_v23, %v3808_v34 }
 0x48d   : > { %v3194_v9 = vpop.f32.mrb[52].mxu0  ;;  %v3812_v29 = vpop.f32.mrb[52].mxu1 }
 0x48e   : > { %v3280_v1 = vmax.f32 %v3278_v50, %v3194_v9  ;;  %v3885_v27 = vmax.f32 %v3883_v17, %v3812_v29  ;;  %v3196_v53 = vpop.f32.mrb[53].mxu0  ;;  %v3814_v5 = vpop.f32.mrb[53].mxu1 }
 0x48f   : > { %v3349_v42 = vmax.f32 %v3347_v49, %v3196_v53  ;;  %v3954_v61 = vmax.f32 %v3952_v8, %v3814_v5  ;;  %v3198_v48 = vpop.f32.mrb[54].mxu0  ;;  %v3816_v56 = vpop.f32.mrb[54].mxu1 }
 0x490   : > { %v3281_v7 = vmax.f32 %v3279_v55, %v3198_v48  ;;  %v3887_v20 = vmax.f32 %v3885_v27, %v3816_v56  ;;  %v3200_v47 = vpop.f32.mrb[55].mxu0  ;;  %v3818_v58 = vpop.f32.mrb[55].mxu1 }
 0x491   : > { %v3350_v16 = vmax.f32 %v3348_v0, %v3200_v47  ;;  %v3956_v15 = vmax.f32 %v3954_v61, %v3818_v58  ;;  %v3223_v47 = vld [vmem:[#allocation2 + $0x4] sm:$0x3] }
 0x495   : > { %v3204_v4 = vpop.f32.mrb[56].mxu0  ;;  %v3822_v37 = vpop.f32.mrb[56].mxu1 }
 0x496   : > { %v3282_v52 = vmax.f32 %v3280_v1, %v3204_v4  ;;  %v3889_v14 = vmax.f32 %v3887_v20, %v3822_v37  ;;  %v3206_v38 = vpop.f32.mrb[57].mxu0  ;;  %v3824_v13 = vpop.f32.mrb[57].mxu1 }
 0x497   : > { %v3351_v41 = vmax.f32 %v3349_v42, %v3206_v38  ;;  %v3958_v11 = vmax.f32 %v3956_v15, %v3824_v13  ;;  %v3208_v22 = vpop.f32.mrb[58].mxu0  ;;  %v3826_v60 = vpop.f32.mrb[58].mxu1 }
 0x498   : > { %v3283_v32 = vmax.f32 %v3281_v7, %v3208_v22  ;;  %v3891_v44 = vmax.f32 %v3889_v14, %v3826_v60  ;;  %v3210_v10 = vpop.f32.mrb[59].mxu0  ;;  %v3828_v18 = vpop.f32.mrb[59].mxu1  ;;  %v3831_v14 = vld [vmem:[#allocation2 + $0x6] sm:$0x3] }
 0x499   : > { %v3352_v12 = vmax.f32 %v3350_v16, %v3210_v10  ;;  %v3960_v59 = vmax.f32 %v3958_v11, %v3828_v18 }
 0x49d   : > { %v3214_v40 = vpop.f32.mrb[60].mxu0 }
 0x49e   : > { %v3284_v33 = vmax.f32 %v3282_v52, %v3214_v40  ;;  %v3216_v62 = vpop.f32.mrb[61].mxu0 }
 0x49f   : > { %v3353_v2 = vmax.f32 %v3351_v41, %v3216_v62  ;;  %v3218_v51 = vpop.f32.mrb[62].mxu0  ;;  %v3994_v41 = vld [vmem:[%s5614_s6] sm:$0xff] }
 0x4a0   : > { %v3285_v57 = vmax.f32 %v3283_v32, %v3218_v51  ;;  %v3220_v36 = vpop.f32.mrb[63].mxu0 }
 0x4a1   : > { %v3354_v35 = vmax.f32 %v3352_v12, %v3220_v36 }
 0x4a2   : > { %v3286_v3 = vmax.f32 %v3284_v33, %v3285_v57 }
 0x4a3   : > { %v3355_v25 = vmax.f32 %v3353_v2, %v3354_v35 }
 0x4a4   : > { %v3287_v21 = vrot.slane %v3286_v3, 4 }
 0x4a5   : > { %v3356_v43 = vrot.slane %v3355_v25, 4  ;;  %v3512_v30 = vpop.f32.mrb[64].mxu0 }
 0x4a6   : > { %v3288_v45 = vmax.f32 %v3286_v3, %v3287_v21  ;;  %v3893_v19 = vmax.f32 %v3891_v44, %v3512_v30  ;;  %v3514_v31 = vpop.f32.mrb[65].mxu0 }
 0x4a7   : > { %v3357_v50 = vmax.f32 %v3355_v25, %v3356_v43  ;;  %v3962_v39 = vmax.f32 %v3960_v59, %v3514_v31  ;;  %v3516_v26 = vpop.f32.mrb[66].mxu0 }
 0x4a8   : > { %v3289_v6 = vrot.slane %v3288_v45, 2  ;;  %v3894_v49 = vmax.f32 %v3516_v26, %v3893_v19  ;;  %v3518_v23 = vpop.f32.mrb[67].mxu0 }
 0x4a9   : > { %v3358_v28 = vrot.slane %v3357_v50, 2  ;;  %v3963_v46 = vmax.f32 %v3518_v23, %v3962_v39 }
 0x4aa   : > { %v3290_v55 = vmax.f32 %v3288_v45, %v3289_v6  ;;  %v3895_v17 = vrot.slane %v3894_v49, 4 }
 0x4ab   : > { %v3359_v24 = vmax.f32 %v3357_v50, %v3358_v28  ;;  %v3964_v34 = vrot.slane %v3963_v46, 4 }
 0x4ac   : > { %v3291_v0 = vrot.slane %v3290_v55, 1  ;;  %v3896_v8 = vmax.f32 %v3894_v49, %v3895_v17 }
 0x4ad   : > { %v3360_v9 = vrot.slane %v3359_v24, 1  ;;  %v3965_v29 = vmax.f32 %v3963_v46, %v3964_v34 }
 0x4ae   : > { %v3292_v1 = vmax.f32 %v3290_v55, %v3291_v0  ;;  %v3897_v27 = vrot.slane %v3896_v8, 2 }
 0x4af   : > { %v3361_v53 = vmax.f32 %v3359_v24, %v3360_v9  ;;  %v3966_v5 = vrot.slane %v3965_v29, 2 }
 0x4b0   : > { %v3898_v42 = vmax.f32 %v3896_v8, %v3897_v27 }
 0x4b1   : > { %v3364_v61 = vcombine.low %v3292_v1, %v3361_v53  ;;  %v3967_v48 = vmax.f32 %v3965_v29, %v3966_v5 }
 0x4b2   : > { %v3899_v56 = vrot.slane %v3898_v42, 1 }
 0x4b3   : > { %v3371_v7 = vrot.slane %v3364_v61, %v5550_v54  ;;  %v3968_v20 = vrot.slane %v3967_v48, 1 }
 0x4b4   : > { %v3900_v58 = vmax.f32 %v3898_v42, %v3899_v56 }
 0x4b5   : > { %v3378_v16 = vrot.slane %v3371_v7, %v5550_v54  ;;  %v3969_v15 = vmax.f32 %v3967_v48, %v3968_v20 }
 0x4b7   : > { %v3380_v4 = vmax.f32 %v3223_v47, %v3378_v16  ;;  %v3972_v37 = vcombine.low %v3900_v58, %v3969_v15 }
 0x4b9   : > { %3381 = vst.msk [vmem:[#allocation2 + $0x4] sm:$0x3] %vm5565_vm1, %v3380_v4  ;;  %v3979_v52 = vrot.slane %v3972_v37, %v5550_v54 }
 0x4bb   : > { %v3986_v38 = vrot.slane %v3979_v52, %v5550_v54 }
 0x4bd   : > { %v3988_v13 = vmax.f32 %v3831_v14, %v3986_v38 }
 0x4bf   : > { %3989 = vst.msk [vmem:[#allocation2 + $0x6] sm:$0x3] %vm5565_vm1, %v3988_v13 }
 0x4c6   : > { %v3993_v11 = vld [vmem:[#allocation2] sm:$0xff] }
 0x4c7   : > { %v3995_v22 = vadd.f32 %v3994_v41, %v3993_v11 }
 0x4c9   : > { %3996 = vst [vmem:[%s345_s21] sm:$0xff] %v3995_v22 }
 0x4ca PF: > { %s17_s26 = sadd.s32 1, %s4601_s26   ;;  %s5650_s24 = smov %s4597_s25 }
 0x4cb   : > { %p14_p5 = scmp.ge.s32.totalorder %s17_s26, 4   ;;  %s5651_s25 = smov %s5653_s27 }
 0x4cd   :  { %16 = sbr.rel (!%p14_p5) target bundleno = 2 (0x2), region = 89 }

</bundles_post_ra>
